<compile_context>
chip_gen: v7x
topology: tpu7x:2x2x1
jax: 0.10.0
libtpu: 0.0.40
codegen_flags: <defaults>
</compile_context>

<pallas_src>
from functools import partial

import jax
import jax.numpy as jnp
from jax.experimental import pallas as pl
from jax.experimental.pallas import tpu as pltpu

CNN_OUTPUT_DIM = 120
FCN_HIDDEN_DIM = 128
OUTPUT_DIM = 2
LANE = 128
FEAT_CHUNK = 16            # x1 features contracted per MXU matmul (K = FEAT_CHUNK*128)


def _round_up(x, m):
    return (x + m - 1) // m * m


def _mio_kernel(x1_ref, x2_ref, wf_ref, bf_ref, w2_ref, b2_ref, out_ref, acc_ref):
    x1 = x1_ref[...]                       # (TB, DP) f32
    x2 = x2_ref[...]                       # (TB, DP) f32
    nc, ck, hp = wf_ref.shape
    dp = x2.shape[1]
    cpf = ck // dp                         # features per chunk (= FEAT_CHUNK)

    # init accumulator with the fused (bilinear + fc1) bias
    acc_ref[...] = jnp.broadcast_to(bf_ref[...], acc_ref.shape)

    # bilinear (+fc1) contraction: chunked outer product -> big bf16 MXU matmuls
    for c in range(nc):
        base = c * cpf
        pieces = [
            (x1[:, base + f: base + f + 1] * x2).astype(jnp.bfloat16)   # (TB, DP)
            for f in range(cpf)
        ]
        z_c = jnp.concatenate(pieces, axis=1)                           # (TB, cpf*DP)
        acc_ref[...] += jnp.dot(z_c, wf_ref[c],
                                preferred_element_type=jnp.float32)

    # fused ReLU
    hidden = jnp.maximum(acc_ref[...], 0.0)                             # (TB, HP) f32

    # fc2 (padded, lane-dense 128-wide output)
    logits = jnp.dot(hidden.astype(jnp.bfloat16), w2_ref[...],
                     preferred_element_type=jnp.float32) + b2_ref[...]

    # softmax over the padded class dimension; pad logits carry bias -1e30 so
    # their contribution is exactly 0.
    m = jnp.max(logits, axis=-1, keepdims=True)
    e = jnp.exp(logits - m)
    out_ref[...] = e / jnp.sum(e, axis=-1, keepdims=True)


def preprocess_params(params):
    """One-time fold of fc1 into the bilinear weight + padding + bf16 cast."""
    K, D, D2 = params["w_bil"].shape
    H = params["w_fc1"].shape[0]
    O = params["w_fc2"].shape[0]
    DP = _round_up(max(D, D2), LANE)
    HP = _round_up(H, LANE)
    OP = _round_up(O, LANE)

    # Wf[i, j, h] = sum_k W_bil[k, i, j] * W_fc1[h, k]
    wf = jnp.einsum("kij,hk->ijh", params["w_bil"], params["w_fc1"])
    wf = jnp.pad(wf, ((0, DP - D), (0, DP - D2), (0, HP - H)))
    wf = wf.reshape(DP // FEAT_CHUNK, FEAT_CHUNK * DP, HP).astype(jnp.bfloat16)

    bf = params["b_bil"] @ params["w_fc1"].T + params["b_fc1"]
    bf = jnp.pad(bf, (0, HP - H)).reshape(1, HP).astype(jnp.float32)

    w2 = jnp.pad(params["w_fc2"].T, ((0, HP - H), (0, OP - O))).astype(jnp.bfloat16)
    b2 = jnp.pad(params["b_fc2"], (0, OP - O),
                 constant_values=-1e30).reshape(1, OP).astype(jnp.float32)

    return {"wf": wf, "bf": bf, "w2": w2, "b2": b2, "out_dim": int(O)}


@partial(jax.jit, static_argnames=("out_dim",))
def _mio_forward_impl(x1, x2, wf, bf, w2, b2, out_dim):
    B, D = x1.shape
    NC, CK, HP = wf.shape
    DP = CK // FEAT_CHUNK
    OP = w2.shape[1]

    # batch tiling: multiple of 8; 256 only for large batches so medium batches
    # keep >= 2 grid steps (v7x has 2 TensorCores sharing the parallel axis)
    if B >= 512:
        TB = 256
    elif B >= 128:
        TB = 128
    else:
        TB = _round_up(B, 8)
    BP = _round_up(B, TB)

    x1p = jnp.pad(x1, ((0, BP - B), (0, DP - D))).astype(jnp.float32)
    x2p = jnp.pad(x2, ((0, BP - B), (0, DP - D))).astype(jnp.float32)

    cost = pl.CostEstimate(
        flops=2 * BP * DP * DP * HP + 2 * BP * HP * OP,
        transcendentals=BP * OP,
        bytes_accessed=(4 * (x1p.size + x2p.size + bf.size + b2.size + BP * OP)
                        + 2 * (wf.size + w2.size)),
    )

    out = pl.pallas_call(
        _mio_kernel,
        out_shape=jax.ShapeDtypeStruct((BP, OP), jnp.float32),
        grid=(BP // TB,),
        in_specs=[
            pl.BlockSpec((TB, DP), lambda i: (i, 0)),            # x1 batch tile
            pl.BlockSpec((TB, DP), lambda i: (i, 0)),            # x2 batch tile
            pl.BlockSpec((NC, CK, HP), lambda i: (0, 0, 0)),     # fused weight (resident, bf16)
            pl.BlockSpec((1, HP), lambda i: (0, 0)),             # fused bias (f32)
            pl.BlockSpec((HP, OP), lambda i: (0, 0)),            # fc2 weight (bf16)
            pl.BlockSpec((1, OP), lambda i: (0, 0)),             # fc2 bias (f32, pads=-1e30)
        ],
        out_specs=pl.BlockSpec((TB, OP), lambda i: (i, 0)),
        scratch_shapes=[pltpu.VMEM((TB, HP), jnp.float32)],      # f32 accumulator
        compiler_params=pltpu.CompilerParams(
            dimension_semantics=("parallel",),
            vmem_limit_bytes=40 * 1024 * 1024,
        ),
        cost_estimate=cost,
    )(x1p, x2p, wf, bf, w2, b2)

    return out[:B, :out_dim]


def mio_forward(x1, x2, prep):
    """Pallas implementation of MiOModel.forward(x1, x2) (return_embedding=False)."""
    return _mio_forward_impl(x1, x2, prep["wf"], prep["bf"], prep["w2"], prep["b2"],
                             out_dim=prep["out_dim"])


def init_params(key, d=CNN_OUTPUT_DIM, h=FCN_HIDDEN_DIM, o=OUTPUT_DIM):
    ks = jax.random.split(key, 6)

    def unif(k, shape, fan_in):
        bound = 1.0 / jnp.sqrt(fan_in)
        return jax.random.uniform(k, shape, jnp.float32, -bound, bound)

    return {
        "w_bil": unif(ks[0], (d, d, d), d),   # nn.Bilinear(d, d, d).weight : (out, in1, in2)
        "b_bil": unif(ks[1], (d,), d),
        "w_fc1": unif(ks[2], (h, d), d),      # nn.Linear(d, h).weight
        "b_fc1": unif(ks[3], (h,), d),
        "w_fc2": unif(ks[4], (o, h), h),      # nn.Linear(h, o).weight
        "b_fc2": unif(ks[5], (o,), h),
    }


def mio_reference(x1, x2, params):
    """Pure-JAX reference matching the PyTorch forward (full f32)."""
    y = jnp.einsum("bi,kij,bj->bk", x1, params["w_bil"], x2) + params["b_bil"]
    h = jnp.maximum(y @ params["w_fc1"].T + params["b_fc1"], 0.0)
    logits = h @ params["w_fc2"].T + params["b_fc2"]
    return jax.nn.softmax(logits, axis=1)


if __name__ == "__main__":
    key = jax.random.PRNGKey(0)
    kp, k1, k2 = jax.random.split(key, 3)

    B = 4
    params = init_params(kp)
    prep = preprocess_params(params)        # one-time weight fold / pad / cast

    cnn_features_whisper = jax.random.normal(k1, (B, CNN_OUTPUT_DIM), jnp.float32)
    cnn_features_xlsr = jax.random.normal(k2, (B, CNN_OUTPUT_DIM), jnp.float32)

    out = mio_forward(cnn_features_whisper, cnn_features_xlsr, prep)
    out = jax.block_until_ready(out)

    ref = mio_reference(cnn_features_whisper, cnn_features_xlsr, params)
    assert out.shape == (B, OUTPUT_DIM)
    assert jnp.allclose(jnp.sum(out, axis=1), 1.0, atol=1e-5)
    # bf16 MXU operands with f32 accumulation: tolerance relaxed vs the full-f32 reference.
    assert jnp.allclose(out, ref, rtol=1e-2, atol=5e-3), (out, ref)

    print("KERNEL_OK")
</pallas_src>

<mosaic_0001>
module attributes {stable_mosaic.version = 11 : i64} {
  func.func @_mio_kernel(%arg0: i32, %arg1: memref<8x128xf32, #tpu.memory_space<vmem>>, %arg2: memref<8x128xf32, #tpu.memory_space<vmem>>, %arg3: memref<8x2048x128xbf16, #tpu.memory_space<vmem>>, %arg4: memref<1x128xf32, #tpu.memory_space<vmem>>, %arg5: memref<128x128xbf16, #tpu.memory_space<vmem>>, %arg6: memref<1x128xf32, #tpu.memory_space<vmem>>, %arg7: memref<8x128xf32, #tpu.memory_space<vmem>>, %arg8: memref<8x128xf32, #tpu.memory_space<vmem>>) attributes {dimension_semantics = [#tpu.dimension_semantics<parallel>], iteration_bounds = array<i64: 1>, scalar_prefetch = 0 : i64, scratch_operands = 1 : i64, tpu.core_type = #tpu.core_type<tc>, window_params = [{transform_indices = @transform_0, window_bounds = array<i64: 8, 128>}, {transform_indices = @transform_1, window_bounds = array<i64: 8, 128>}, {pipeline_mode = #tpu.pipeline_mode<synchronous>, transform_indices = @transform_2, window_bounds = array<i64: 8, 2048, 128>}, {pipeline_mode = #tpu.pipeline_mode<synchronous>, transform_indices = @transform_3, window_bounds = array<i64: 1, 128>}, {pipeline_mode = #tpu.pipeline_mode<synchronous>, transform_indices = @transform_4, window_bounds = array<i64: 128, 128>}, {pipeline_mode = #tpu.pipeline_mode<synchronous>, transform_indices = @transform_5, window_bounds = array<i64: 1, 128>}, {transform_indices = @transform_6, window_bounds = array<i64: 8, 128>}]} {
    %c0 = arith.constant 0 : index
    %c0_0 = arith.constant 0 : index
    %0 = vector.load %arg1[%c0, %c0_0] : memref<8x128xf32, #tpu.memory_space<vmem>>, vector<8x128xf32>
    %c0_1 = arith.constant 0 : index
    %c0_2 = arith.constant 0 : index
    %1 = vector.load %arg2[%c0_1, %c0_2] : memref<8x128xf32, #tpu.memory_space<vmem>>, vector<8x128xf32>
    %c0_3 = arith.constant 0 : index
    %c0_4 = arith.constant 0 : index
    %2 = vector.load %arg4[%c0_3, %c0_4] : memref<1x128xf32, #tpu.memory_space<vmem>>, vector<1x128xf32>
    %3 = vector.shape_cast %2 : vector<1x128xf32> to vector<1x128xf32>
    %4 = vector.broadcast %3 : vector<1x128xf32> to vector<8x128xf32>
    %c0_5 = arith.constant 0 : index
    %c0_6 = arith.constant 0 : index
    %5 = vector.load %arg8[%c0_5, %c0_6] : memref<8x128xf32, #tpu.memory_space<vmem>>, vector<8x128xf32>
    tpu.vector_store %arg8[%c0_5, %c0_6], %4 {strides = array<i32>} : memref<8x128xf32, #tpu.memory_space<vmem>>, vector<8x128xf32>,
    %6 = vector.extract_strided_slice %0 {offsets = [0, 0], sizes = [8, 1], strides = [1, 1]} : vector<8x128xf32> to vector<8x1xf32>
    %7 = vector.broadcast %6 : vector<8x1xf32> to vector<8x128xf32>
    %8 = arith.mulf %7, %1 : vector<8x128xf32>
    %9 = arith.truncf %8 : vector<8x128xf32> to vector<8x128xbf16>
    %10 = vector.extract_strided_slice %0 {offsets = [0, 1], sizes = [8, 1], strides = [1, 1]} : vector<8x128xf32> to vector<8x1xf32>
    %11 = vector.broadcast %10 : vector<8x1xf32> to vector<8x128xf32>
    %12 = arith.mulf %11, %1 : vector<8x128xf32>
    %13 = arith.truncf %12 : vector<8x128xf32> to vector<8x128xbf16>
    %14 = vector.extract_strided_slice %0 {offsets = [0, 2], sizes = [8, 1], strides = [1, 1]} : vector<8x128xf32> to vector<8x1xf32>
    %15 = vector.broadcast %14 : vector<8x1xf32> to vector<8x128xf32>
    %16 = arith.mulf %15, %1 : vector<8x128xf32>
    %17 = arith.truncf %16 : vector<8x128xf32> to vector<8x128xbf16>
    %18 = vector.extract_strided_slice %0 {offsets = [0, 3], sizes = [8, 1], strides = [1, 1]} : vector<8x128xf32> to vector<8x1xf32>
    %19 = vector.broadcast %18 : vector<8x1xf32> to vector<8x128xf32>
    %20 = arith.mulf %19, %1 : vector<8x128xf32>
    %21 = arith.truncf %20 : vector<8x128xf32> to vector<8x128xbf16>
    %22 = vector.extract_strided_slice %0 {offsets = [0, 4], sizes = [8, 1], strides = [1, 1]} : vector<8x128xf32> to vector<8x1xf32>
    %23 = vector.broadcast %22 : vector<8x1xf32> to vector<8x128xf32>
    %24 = arith.mulf %23, %1 : vector<8x128xf32>
    %25 = arith.truncf %24 : vector<8x128xf32> to vector<8x128xbf16>
    %26 = vector.extract_strided_slice %0 {offsets = [0, 5], sizes = [8, 1], strides = [1, 1]} : vector<8x128xf32> to vector<8x1xf32>
    %27 = vector.broadcast %26 : vector<8x1xf32> to vector<8x128xf32>
    %28 = arith.mulf %27, %1 : vector<8x128xf32>
    %29 = arith.truncf %28 : vector<8x128xf32> to vector<8x128xbf16>
    %30 = vector.extract_strided_slice %0 {offsets = [0, 6], sizes = [8, 1], strides = [1, 1]} : vector<8x128xf32> to vector<8x1xf32>
    %31 = vector.broadcast %30 : vector<8x1xf32> to vector<8x128xf32>
    %32 = arith.mulf %31, %1 : vector<8x128xf32>
    %33 = arith.truncf %32 : vector<8x128xf32> to vector<8x128xbf16>
    %34 = vector.extract_strided_slice %0 {offsets = [0, 7], sizes = [8, 1], strides = [1, 1]} : vector<8x128xf32> to vector<8x1xf32>
    %35 = vector.broadcast %34 : vector<8x1xf32> to vector<8x128xf32>
    %36 = arith.mulf %35, %1 : vector<8x128xf32>
    %37 = arith.truncf %36 : vector<8x128xf32> to vector<8x128xbf16>
    %38 = vector.extract_strided_slice %0 {offsets = [0, 8], sizes = [8, 1], strides = [1, 1]} : vector<8x128xf32> to vector<8x1xf32>
    %39 = vector.broadcast %38 : vector<8x1xf32> to vector<8x128xf32>
    %40 = arith.mulf %39, %1 : vector<8x128xf32>
    %41 = arith.truncf %40 : vector<8x128xf32> to vector<8x128xbf16>
    %42 = vector.extract_strided_slice %0 {offsets = [0, 9], sizes = [8, 1], strides = [1, 1]} : vector<8x128xf32> to vector<8x1xf32>
    %43 = vector.broadcast %42 : vector<8x1xf32> to vector<8x128xf32>
    %44 = arith.mulf %43, %1 : vector<8x128xf32>
    %45 = arith.truncf %44 : vector<8x128xf32> to vector<8x128xbf16>
    %46 = vector.extract_strided_slice %0 {offsets = [0, 10], sizes = [8, 1], strides = [1, 1]} : vector<8x128xf32> to vector<8x1xf32>
    %47 = vector.broadcast %46 : vector<8x1xf32> to vector<8x128xf32>
    %48 = arith.mulf %47, %1 : vector<8x128xf32>
    %49 = arith.truncf %48 : vector<8x128xf32> to vector<8x128xbf16>
    %50 = vector.extract_strided_slice %0 {offsets = [0, 11], sizes = [8, 1], strides = [1, 1]} : vector<8x128xf32> to vector<8x1xf32>
    %51 = vector.broadcast %50 : vector<8x1xf32> to vector<8x128xf32>
    %52 = arith.mulf %51, %1 : vector<8x128xf32>
    %53 = arith.truncf %52 : vector<8x128xf32> to vector<8x128xbf16>
    %54 = vector.extract_strided_slice %0 {offsets = [0, 12], sizes = [8, 1], strides = [1, 1]} : vector<8x128xf32> to vector<8x1xf32>
    %55 = vector.broadcast %54 : vector<8x1xf32> to vector<8x128xf32>
    %56 = arith.mulf %55, %1 : vector<8x128xf32>
    %57 = arith.truncf %56 : vector<8x128xf32> to vector<8x128xbf16>
    %58 = vector.extract_strided_slice %0 {offsets = [0, 13], sizes = [8, 1], strides = [1, 1]} : vector<8x128xf32> to vector<8x1xf32>
    %59 = vector.broadcast %58 : vector<8x1xf32> to vector<8x128xf32>
    %60 = arith.mulf %59, %1 : vector<8x128xf32>
    %61 = arith.truncf %60 : vector<8x128xf32> to vector<8x128xbf16>
    %62 = vector.extract_strided_slice %0 {offsets = [0, 14], sizes = [8, 1], strides = [1, 1]} : vector<8x128xf32> to vector<8x1xf32>
    %63 = vector.broadcast %62 : vector<8x1xf32> to vector<8x128xf32>
    %64 = arith.mulf %63, %1 : vector<8x128xf32>
    %65 = arith.truncf %64 : vector<8x128xf32> to vector<8x128xbf16>
    %66 = vector.extract_strided_slice %0 {offsets = [0, 15], sizes = [8, 1], strides = [1, 1]} : vector<8x128xf32> to vector<8x1xf32>
    %67 = vector.broadcast %66 : vector<8x1xf32> to vector<8x128xf32>
    %68 = arith.mulf %67, %1 : vector<8x128xf32>
    %69 = arith.truncf %68 : vector<8x128xf32> to vector<8x128xbf16>
    %70 = tpu.concatenate %9, %13, %17, %21, %25, %29, %33, %37, %41, %45, %49, %53, %57, %61, %65, %69 in 1 : vector<8x128xbf16>, vector<8x128xbf16>, vector<8x128xbf16>, vector<8x128xbf16>, vector<8x128xbf16>, vector<8x128xbf16>, vector<8x128xbf16>, vector<8x128xbf16>, vector<8x128xbf16>, vector<8x128xbf16>, vector<8x128xbf16>, vector<8x128xbf16>, vector<8x128xbf16>, vector<8x128xbf16>, vector<8x128xbf16>, vector<8x128xbf16> -> vector<8x2048xbf16>
    %c0_7 = arith.constant 0 : index
    %c0_8 = arith.constant 0 : index
    %71 = vector.load %arg8[%c0_7, %c0_8] : memref<8x128xf32, #tpu.memory_space<vmem>>, vector<8x128xf32>
    %c0_9 = arith.constant 0 : index
    %c0_10 = arith.constant 0 : index
    %c0_11 = arith.constant 0 : index
    %72 = vector.load %arg3[%c0_9, %c0_10, %c0_11] : memref<8x2048x128xbf16, #tpu.memory_space<vmem>>, vector<1x2048x128xbf16>
    %73 = vector.shape_cast %72 : vector<1x2048x128xbf16> to vector<2048x128xbf16>
    %cst = arith.constant dense<0.000000e+00> : vector<8x128xf32>
    %74 = tpu.matmul %70, %73, %cst {dimension_numbers = #tpu.dot_dimension_numbers<[1], [0], [0], [1], [0, 0, 1, 1], [], []>} : vector<8x2048xbf16>, vector<2048x128xbf16>, vector<8x128xf32> -> vector<8x128xf32>
    %75 = arith.addf %71, %74 : vector<8x128xf32>
    %c0_12 = arith.constant 0 : index
    %c0_13 = arith.constant 0 : index
    %76 = vector.load %arg8[%c0_12, %c0_13] : memref<8x128xf32, #tpu.memory_space<vmem>>, vector<8x128xf32>
    tpu.vector_store %arg8[%c0_12, %c0_13], %75 {strides = array<i32>} : memref<8x128xf32, #tpu.memory_space<vmem>>, vector<8x128xf32>,
    %77 = vector.extract_strided_slice %0 {offsets = [0, 16], sizes = [8, 1], strides = [1, 1]} : vector<8x128xf32> to vector<8x1xf32>
    %78 = vector.broadcast %77 : vector<8x1xf32> to vector<8x128xf32>
    %79 = arith.mulf %78, %1 : vector<8x128xf32>
    %80 = arith.truncf %79 : vector<8x128xf32> to vector<8x128xbf16>
    %81 = vector.extract_strided_slice %0 {offsets = [0, 17], sizes = [8, 1], strides = [1, 1]} : vector<8x128xf32> to vector<8x1xf32>
    %82 = vector.broadcast %81 : vector<8x1xf32> to vector<8x128xf32>
    %83 = arith.mulf %82, %1 : vector<8x128xf32>
    %84 = arith.truncf %83 : vector<8x128xf32> to vector<8x128xbf16>
    %85 = vector.extract_strided_slice %0 {offsets = [0, 18], sizes = [8, 1], strides = [1, 1]} : vector<8x128xf32> to vector<8x1xf32>
    %86 = vector.broadcast %85 : vector<8x1xf32> to vector<8x128xf32>
    %87 = arith.mulf %86, %1 : vector<8x128xf32>
    %88 = arith.truncf %87 : vector<8x128xf32> to vector<8x128xbf16>
    %89 = vector.extract_strided_slice %0 {offsets = [0, 19], sizes = [8, 1], strides = [1, 1]} : vector<8x128xf32> to vector<8x1xf32>
    %90 = vector.broadcast %89 : vector<8x1xf32> to vector<8x128xf32>
    %91 = arith.mulf %90, %1 : vector<8x128xf32>
    %92 = arith.truncf %91 : vector<8x128xf32> to vector<8x128xbf16>
    %93 = vector.extract_strided_slice %0 {offsets = [0, 20], sizes = [8, 1], strides = [1, 1]} : vector<8x128xf32> to vector<8x1xf32>
    %94 = vector.broadcast %93 : vector<8x1xf32> to vector<8x128xf32>
    %95 = arith.mulf %94, %1 : vector<8x128xf32>
    %96 = arith.truncf %95 : vector<8x128xf32> to vector<8x128xbf16>
    %97 = vector.extract_strided_slice %0 {offsets = [0, 21], sizes = [8, 1], strides = [1, 1]} : vector<8x128xf32> to vector<8x1xf32>
    %98 = vector.broadcast %97 : vector<8x1xf32> to vector<8x128xf32>
    %99 = arith.mulf %98, %1 : vector<8x128xf32>
    %100 = arith.truncf %99 : vector<8x128xf32> to vector<8x128xbf16>
    %101 = vector.extract_strided_slice %0 {offsets = [0, 22], sizes = [8, 1], strides = [1, 1]} : vector<8x128xf32> to vector<8x1xf32>
    %102 = vector.broadcast %101 : vector<8x1xf32> to vector<8x128xf32>
    %103 = arith.mulf %102, %1 : vector<8x128xf32>
    %104 = arith.truncf %103 : vector<8x128xf32> to vector<8x128xbf16>
    %105 = vector.extract_strided_slice %0 {offsets = [0, 23], sizes = [8, 1], strides = [1, 1]} : vector<8x128xf32> to vector<8x1xf32>
    %106 = vector.broadcast %105 : vector<8x1xf32> to vector<8x128xf32>
    %107 = arith.mulf %106, %1 : vector<8x128xf32>
    %108 = arith.truncf %107 : vector<8x128xf32> to vector<8x128xbf16>
    %109 = vector.extract_strided_slice %0 {offsets = [0, 24], sizes = [8, 1], strides = [1, 1]} : vector<8x128xf32> to vector<8x1xf32>
    %110 = vector.broadcast %109 : vector<8x1xf32> to vector<8x128xf32>
    %111 = arith.mulf %110, %1 : vector<8x128xf32>
    %112 = arith.truncf %111 : vector<8x128xf32> to vector<8x128xbf16>
    %113 = vector.extract_strided_slice %0 {offsets = [0, 25], sizes = [8, 1], strides = [1, 1]} : vector<8x128xf32> to vector<8x1xf32>
    %114 = vector.broadcast %113 : vector<8x1xf32> to vector<8x128xf32>
    %115 = arith.mulf %114, %1 : vector<8x128xf32>
    %116 = arith.truncf %115 : vector<8x128xf32> to vector<8x128xbf16>
    %117 = vector.extract_strided_slice %0 {offsets = [0, 26], sizes = [8, 1], strides = [1, 1]} : vector<8x128xf32> to vector<8x1xf32>
    %118 = vector.broadcast %117 : vector<8x1xf32> to vector<8x128xf32>
    %119 = arith.mulf %118, %1 : vector<8x128xf32>
    %120 = arith.truncf %119 : vector<8x128xf32> to vector<8x128xbf16>
    %121 = vector.extract_strided_slice %0 {offsets = [0, 27], sizes = [8, 1], strides = [1, 1]} : vector<8x128xf32> to vector<8x1xf32>
    %122 = vector.broadcast %121 : vector<8x1xf32> to vector<8x128xf32>
    %123 = arith.mulf %122, %1 : vector<8x128xf32>
    %124 = arith.truncf %123 : vector<8x128xf32> to vector<8x128xbf16>
    %125 = vector.extract_strided_slice %0 {offsets = [0, 28], sizes = [8, 1], strides = [1, 1]} : vector<8x128xf32> to vector<8x1xf32>
    %126 = vector.broadcast %125 : vector<8x1xf32> to vector<8x128xf32>
    %127 = arith.mulf %126, %1 : vector<8x128xf32>
    %128 = arith.truncf %127 : vector<8x128xf32> to vector<8x128xbf16>
    %129 = vector.extract_strided_slice %0 {offsets = [0, 29], sizes = [8, 1], strides = [1, 1]} : vector<8x128xf32> to vector<8x1xf32>
    %130 = vector.broadcast %129 : vector<8x1xf32> to vector<8x128xf32>
    %131 = arith.mulf %130, %1 : vector<8x128xf32>
    %132 = arith.truncf %131 : vector<8x128xf32> to vector<8x128xbf16>
    %133 = vector.extract_strided_slice %0 {offsets = [0, 30], sizes = [8, 1], strides = [1, 1]} : vector<8x128xf32> to vector<8x1xf32>
    %134 = vector.broadcast %133 : vector<8x1xf32> to vector<8x128xf32>
    %135 = arith.mulf %134, %1 : vector<8x128xf32>
    %136 = arith.truncf %135 : vector<8x128xf32> to vector<8x128xbf16>
    %137 = vector.extract_strided_slice %0 {offsets = [0, 31], sizes = [8, 1], strides = [1, 1]} : vector<8x128xf32> to vector<8x1xf32>
    %138 = vector.broadcast %137 : vector<8x1xf32> to vector<8x128xf32>
    %139 = arith.mulf %138, %1 : vector<8x128xf32>
    %140 = arith.truncf %139 : vector<8x128xf32> to vector<8x128xbf16>
    %141 = tpu.concatenate %80, %84, %88, %92, %96, %100, %104, %108, %112, %116, %120, %124, %128, %132, %136, %140 in 1 : vector<8x128xbf16>, vector<8x128xbf16>, vector<8x128xbf16>, vector<8x128xbf16>, vector<8x128xbf16>, vector<8x128xbf16>, vector<8x128xbf16>, vector<8x128xbf16>, vector<8x128xbf16>, vector<8x128xbf16>, vector<8x128xbf16>, vector<8x128xbf16>, vector<8x128xbf16>, vector<8x128xbf16>, vector<8x128xbf16>, vector<8x128xbf16> -> vector<8x2048xbf16>
    %c0_14 = arith.constant 0 : index
    %c0_15 = arith.constant 0 : index
    %142 = vector.load %arg8[%c0_14, %c0_15] : memref<8x128xf32, #tpu.memory_space<vmem>>, vector<8x128xf32>
    %c1 = arith.constant 1 : index
    %c0_16 = arith.constant 0 : index
    %c0_17 = arith.constant 0 : index
    %143 = vector.load %arg3[%c1, %c0_16, %c0_17] : memref<8x2048x128xbf16, #tpu.memory_space<vmem>>, vector<1x2048x128xbf16>
    %144 = vector.shape_cast %143 : vector<1x2048x128xbf16> to vector<2048x128xbf16>
    %cst_18 = arith.constant dense<0.000000e+00> : vector<8x128xf32>
    %145 = tpu.matmul %141, %144, %cst_18 {dimension_numbers = #tpu.dot_dimension_numbers<[1], [0], [0], [1], [0, 0, 1, 1], [], []>} : vector<8x2048xbf16>, vector<2048x128xbf16>, vector<8x128xf32> -> vector<8x128xf32>
    %146 = arith.addf %142, %145 : vector<8x128xf32>
    %c0_19 = arith.constant 0 : index
    %c0_20 = arith.constant 0 : index
    %147 = vector.load %arg8[%c0_19, %c0_20] : memref<8x128xf32, #tpu.memory_space<vmem>>, vector<8x128xf32>
    tpu.vector_store %arg8[%c0_19, %c0_20], %146 {strides = array<i32>} : memref<8x128xf32, #tpu.memory_space<vmem>>, vector<8x128xf32>,
    %148 = vector.extract_strided_slice %0 {offsets = [0, 32], sizes = [8, 1], strides = [1, 1]} : vector<8x128xf32> to vector<8x1xf32>
    %149 = vector.broadcast %148 : vector<8x1xf32> to vector<8x128xf32>
    %150 = arith.mulf %149, %1 : vector<8x128xf32>
    %151 = arith.truncf %150 : vector<8x128xf32> to vector<8x128xbf16>
    %152 = vector.extract_strided_slice %0 {offsets = [0, 33], sizes = [8, 1], strides = [1, 1]} : vector<8x128xf32> to vector<8x1xf32>
    %153 = vector.broadcast %152 : vector<8x1xf32> to vector<8x128xf32>
    %154 = arith.mulf %153, %1 : vector<8x128xf32>
    %155 = arith.truncf %154 : vector<8x128xf32> to vector<8x128xbf16>
    %156 = vector.extract_strided_slice %0 {offsets = [0, 34], sizes = [8, 1], strides = [1, 1]} : vector<8x128xf32> to vector<8x1xf32>
    %157 = vector.broadcast %156 : vector<8x1xf32> to vector<8x128xf32>
    %158 = arith.mulf %157, %1 : vector<8x128xf32>
    %159 = arith.truncf %158 : vector<8x128xf32> to vector<8x128xbf16>
    %160 = vector.extract_strided_slice %0 {offsets = [0, 35], sizes = [8, 1], strides = [1, 1]} : vector<8x128xf32> to vector<8x1xf32>
    %161 = vector.broadcast %160 : vector<8x1xf32> to vector<8x128xf32>
    %162 = arith.mulf %161, %1 : vector<8x128xf32>
    %163 = arith.truncf %162 : vector<8x128xf32> to vector<8x128xbf16>
    %164 = vector.extract_strided_slice %0 {offsets = [0, 36], sizes = [8, 1], strides = [1, 1]} : vector<8x128xf32> to vector<8x1xf32>
    %165 = vector.broadcast %164 : vector<8x1xf32> to vector<8x128xf32>
    %166 = arith.mulf %165, %1 : vector<8x128xf32>
    %167 = arith.truncf %166 : vector<8x128xf32> to vector<8x128xbf16>
    %168 = vector.extract_strided_slice %0 {offsets = [0, 37], sizes = [8, 1], strides = [1, 1]} : vector<8x128xf32> to vector<8x1xf32>
    %169 = vector.broadcast %168 : vector<8x1xf32> to vector<8x128xf32>
    %170 = arith.mulf %169, %1 : vector<8x128xf32>
    %171 = arith.truncf %170 : vector<8x128xf32> to vector<8x128xbf16>
    %172 = vector.extract_strided_slice %0 {offsets = [0, 38], sizes = [8, 1], strides = [1, 1]} : vector<8x128xf32> to vector<8x1xf32>
    %173 = vector.broadcast %172 : vector<8x1xf32> to vector<8x128xf32>
    %174 = arith.mulf %173, %1 : vector<8x128xf32>
    %175 = arith.truncf %174 : vector<8x128xf32> to vector<8x128xbf16>
    %176 = vector.extract_strided_slice %0 {offsets = [0, 39], sizes = [8, 1], strides = [1, 1]} : vector<8x128xf32> to vector<8x1xf32>
    %177 = vector.broadcast %176 : vector<8x1xf32> to vector<8x128xf32>
    %178 = arith.mulf %177, %1 : vector<8x128xf32>
    %179 = arith.truncf %178 : vector<8x128xf32> to vector<8x128xbf16>
    %180 = vector.extract_strided_slice %0 {offsets = [0, 40], sizes = [8, 1], strides = [1, 1]} : vector<8x128xf32> to vector<8x1xf32>
    %181 = vector.broadcast %180 : vector<8x1xf32> to vector<8x128xf32>
    %182 = arith.mulf %181, %1 : vector<8x128xf32>
    %183 = arith.truncf %182 : vector<8x128xf32> to vector<8x128xbf16>
    %184 = vector.extract_strided_slice %0 {offsets = [0, 41], sizes = [8, 1], strides = [1, 1]} : vector<8x128xf32> to vector<8x1xf32>
    %185 = vector.broadcast %184 : vector<8x1xf32> to vector<8x128xf32>
    %186 = arith.mulf %185, %1 : vector<8x128xf32>
    %187 = arith.truncf %186 : vector<8x128xf32> to vector<8x128xbf16>
    %188 = vector.extract_strided_slice %0 {offsets = [0, 42], sizes = [8, 1], strides = [1, 1]} : vector<8x128xf32> to vector<8x1xf32>
    %189 = vector.broadcast %188 : vector<8x1xf32> to vector<8x128xf32>
    %190 = arith.mulf %189, %1 : vector<8x128xf32>
    %191 = arith.truncf %190 : vector<8x128xf32> to vector<8x128xbf16>
    %192 = vector.extract_strided_slice %0 {offsets = [0, 43], sizes = [8, 1], strides = [1, 1]} : vector<8x128xf32> to vector<8x1xf32>
    %193 = vector.broadcast %192 : vector<8x1xf32> to vector<8x128xf32>
    %194 = arith.mulf %193, %1 : vector<8x128xf32>
    %195 = arith.truncf %194 : vector<8x128xf32> to vector<8x128xbf16>
    %196 = vector.extract_strided_slice %0 {offsets = [0, 44], sizes = [8, 1], strides = [1, 1]} : vector<8x128xf32> to vector<8x1xf32>
    %197 = vector.broadcast %196 : vector<8x1xf32> to vector<8x128xf32>
    %198 = arith.mulf %197, %1 : vector<8x128xf32>
    %199 = arith.truncf %198 : vector<8x128xf32> to vector<8x128xbf16>
    %200 = vector.extract_strided_slice %0 {offsets = [0, 45], sizes = [8, 1], strides = [1, 1]} : vector<8x128xf32> to vector<8x1xf32>
    %201 = vector.broadcast %200 : vector<8x1xf32> to vector<8x128xf32>
    %202 = arith.mulf %201, %1 : vector<8x128xf32>
    %203 = arith.truncf %202 : vector<8x128xf32> to vector<8x128xbf16>
    %204 = vector.extract_strided_slice %0 {offsets = [0, 46], sizes = [8, 1], strides = [1, 1]} : vector<8x128xf32> to vector<8x1xf32>
    %205 = vector.broadcast %204 : vector<8x1xf32> to vector<8x128xf32>
    %206 = arith.mulf %205, %1 : vector<8x128xf32>
    %207 = arith.truncf %206 : vector<8x128xf32> to vector<8x128xbf16>
    %208 = vector.extract_strided_slice %0 {offsets = [0, 47], sizes = [8, 1], strides = [1, 1]} : vector<8x128xf32> to vector<8x1xf32>
    %209 = vector.broadcast %208 : vector<8x1xf32> to vector<8x128xf32>
    %210 = arith.mulf %209, %1 : vector<8x128xf32>
    %211 = arith.truncf %210 : vector<8x128xf32> to vector<8x128xbf16>
    %212 = tpu.concatenate %151, %155, %159, %163, %167, %171, %175, %179, %183, %187, %191, %195, %199, %203, %207, %211 in 1 : vector<8x128xbf16>, vector<8x128xbf16>, vector<8x128xbf16>, vector<8x128xbf16>, vector<8x128xbf16>, vector<8x128xbf16>, vector<8x128xbf16>, vector<8x128xbf16>, vector<8x128xbf16>, vector<8x128xbf16>, vector<8x128xbf16>, vector<8x128xbf16>, vector<8x128xbf16>, vector<8x128xbf16>, vector<8x128xbf16>, vector<8x128xbf16> -> vector<8x2048xbf16>
    %c0_21 = arith.constant 0 : index
    %c0_22 = arith.constant 0 : index
    %213 = vector.load %arg8[%c0_21, %c0_22] : memref<8x128xf32, #tpu.memory_space<vmem>>, vector<8x128xf32>
    %c2 = arith.constant 2 : index
    %c0_23 = arith.constant 0 : index
    %c0_24 = arith.constant 0 : index
    %214 = vector.load %arg3[%c2, %c0_23, %c0_24] : memref<8x2048x128xbf16, #tpu.memory_space<vmem>>, vector<1x2048x128xbf16>
    %215 = vector.shape_cast %214 : vector<1x2048x128xbf16> to vector<2048x128xbf16>
    %cst_25 = arith.constant dense<0.000000e+00> : vector<8x128xf32>
    %216 = tpu.matmul %212, %215, %cst_25 {dimension_numbers = #tpu.dot_dimension_numbers<[1], [0], [0], [1], [0, 0, 1, 1], [], []>} : vector<8x2048xbf16>, vector<2048x128xbf16>, vector<8x128xf32> -> vector<8x128xf32>
    %217 = arith.addf %213, %216 : vector<8x128xf32>
    %c0_26 = arith.constant 0 : index
    %c0_27 = arith.constant 0 : index
    %218 = vector.load %arg8[%c0_26, %c0_27] : memref<8x128xf32, #tpu.memory_space<vmem>>, vector<8x128xf32>
    tpu.vector_store %arg8[%c0_26, %c0_27], %217 {strides = array<i32>} : memref<8x128xf32, #tpu.memory_space<vmem>>, vector<8x128xf32>,
    %219 = vector.extract_strided_slice %0 {offsets = [0, 48], sizes = [8, 1], strides = [1, 1]} : vector<8x128xf32> to vector<8x1xf32>
    %220 = vector.broadcast %219 : vector<8x1xf32> to vector<8x128xf32>
    %221 = arith.mulf %220, %1 : vector<8x128xf32>
    %222 = arith.truncf %221 : vector<8x128xf32> to vector<8x128xbf16>
    %223 = vector.extract_strided_slice %0 {offsets = [0, 49], sizes = [8, 1], strides = [1, 1]} : vector<8x128xf32> to vector<8x1xf32>
    %224 = vector.broadcast %223 : vector<8x1xf32> to vector<8x128xf32>
    %225 = arith.mulf %224, %1 : vector<8x128xf32>
    %226 = arith.truncf %225 : vector<8x128xf32> to vector<8x128xbf16>
    %227 = vector.extract_strided_slice %0 {offsets = [0, 50], sizes = [8, 1], strides = [1, 1]} : vector<8x128xf32> to vector<8x1xf32>
    %228 = vector.broadcast %227 : vector<8x1xf32> to vector<8x128xf32>
    %229 = arith.mulf %228, %1 : vector<8x128xf32>
    %230 = arith.truncf %229 : vector<8x128xf32> to vector<8x128xbf16>
    %231 = vector.extract_strided_slice %0 {offsets = [0, 51], sizes = [8, 1], strides = [1, 1]} : vector<8x128xf32> to vector<8x1xf32>
    %232 = vector.broadcast %231 : vector<8x1xf32> to vector<8x128xf32>
    %233 = arith.mulf %232, %1 : vector<8x128xf32>
    %234 = arith.truncf %233 : vector<8x128xf32> to vector<8x128xbf16>
    %235 = vector.extract_strided_slice %0 {offsets = [0, 52], sizes = [8, 1], strides = [1, 1]} : vector<8x128xf32> to vector<8x1xf32>
    %236 = vector.broadcast %235 : vector<8x1xf32> to vector<8x128xf32>
    %237 = arith.mulf %236, %1 : vector<8x128xf32>
    %238 = arith.truncf %237 : vector<8x128xf32> to vector<8x128xbf16>
    %239 = vector.extract_strided_slice %0 {offsets = [0, 53], sizes = [8, 1], strides = [1, 1]} : vector<8x128xf32> to vector<8x1xf32>
    %240 = vector.broadcast %239 : vector<8x1xf32> to vector<8x128xf32>
    %241 = arith.mulf %240, %1 : vector<8x128xf32>
    %242 = arith.truncf %241 : vector<8x128xf32> to vector<8x128xbf16>
    %243 = vector.extract_strided_slice %0 {offsets = [0, 54], sizes = [8, 1], strides = [1, 1]} : vector<8x128xf32> to vector<8x1xf32>
    %244 = vector.broadcast %243 : vector<8x1xf32> to vector<8x128xf32>
    %245 = arith.mulf %244, %1 : vector<8x128xf32>
    %246 = arith.truncf %245 : vector<8x128xf32> to vector<8x128xbf16>
    %247 = vector.extract_strided_slice %0 {offsets = [0, 55], sizes = [8, 1], strides = [1, 1]} : vector<8x128xf32> to vector<8x1xf32>
    %248 = vector.broadcast %247 : vector<8x1xf32> to vector<8x128xf32>
    %249 = arith.mulf %248, %1 : vector<8x128xf32>
    %250 = arith.truncf %249 : vector<8x128xf32> to vector<8x128xbf16>
    %251 = vector.extract_strided_slice %0 {offsets = [0, 56], sizes = [8, 1], strides = [1, 1]} : vector<8x128xf32> to vector<8x1xf32>
    %252 = vector.broadcast %251 : vector<8x1xf32> to vector<8x128xf32>
    %253 = arith.mulf %252, %1 : vector<8x128xf32>
    %254 = arith.truncf %253 : vector<8x128xf32> to vector<8x128xbf16>
    %255 = vector.extract_strided_slice %0 {offsets = [0, 57], sizes = [8, 1], strides = [1, 1]} : vector<8x128xf32> to vector<8x1xf32>
    %256 = vector.broadcast %255 : vector<8x1xf32> to vector<8x128xf32>
    %257 = arith.mulf %256, %1 : vector<8x128xf32>
    %258 = arith.truncf %257 : vector<8x128xf32> to vector<8x128xbf16>
    %259 = vector.extract_strided_slice %0 {offsets = [0, 58], sizes = [8, 1], strides = [1, 1]} : vector<8x128xf32> to vector<8x1xf32>
    %260 = vector.broadcast %259 : vector<8x1xf32> to vector<8x128xf32>
    %261 = arith.mulf %260, %1 : vector<8x128xf32>
    %262 = arith.truncf %261 : vector<8x128xf32> to vector<8x128xbf16>
    %263 = vector.extract_strided_slice %0 {offsets = [0, 59], sizes = [8, 1], strides = [1, 1]} : vector<8x128xf32> to vector<8x1xf32>
    %264 = vector.broadcast %263 : vector<8x1xf32> to vector<8x128xf32>
    %265 = arith.mulf %264, %1 : vector<8x128xf32>
    %266 = arith.truncf %265 : vector<8x128xf32> to vector<8x128xbf16>
    %267 = vector.extract_strided_slice %0 {offsets = [0, 60], sizes = [8, 1], strides = [1, 1]} : vector<8x128xf32> to vector<8x1xf32>
    %268 = vector.broadcast %267 : vector<8x1xf32> to vector<8x128xf32>
    %269 = arith.mulf %268, %1 : vector<8x128xf32>
    %270 = arith.truncf %269 : vector<8x128xf32> to vector<8x128xbf16>
    %271 = vector.extract_strided_slice %0 {offsets = [0, 61], sizes = [8, 1], strides = [1, 1]} : vector<8x128xf32> to vector<8x1xf32>
    %272 = vector.broadcast %271 : vector<8x1xf32> to vector<8x128xf32>
    %273 = arith.mulf %272, %1 : vector<8x128xf32>
    %274 = arith.truncf %273 : vector<8x128xf32> to vector<8x128xbf16>
    %275 = vector.extract_strided_slice %0 {offsets = [0, 62], sizes = [8, 1], strides = [1, 1]} : vector<8x128xf32> to vector<8x1xf32>
    %276 = vector.broadcast %275 : vector<8x1xf32> to vector<8x128xf32>
    %277 = arith.mulf %276, %1 : vector<8x128xf32>
    %278 = arith.truncf %277 : vector<8x128xf32> to vector<8x128xbf16>
    %279 = vector.extract_strided_slice %0 {offsets = [0, 63], sizes = [8, 1], strides = [1, 1]} : vector<8x128xf32> to vector<8x1xf32>
    %280 = vector.broadcast %279 : vector<8x1xf32> to vector<8x128xf32>
    %281 = arith.mulf %280, %1 : vector<8x128xf32>
    %282 = arith.truncf %281 : vector<8x128xf32> to vector<8x128xbf16>
    %283 = tpu.concatenate %222, %226, %230, %234, %238, %242, %246, %250, %254, %258, %262, %266, %270, %274, %278, %282 in 1 : vector<8x128xbf16>, vector<8x128xbf16>, vector<8x128xbf16>, vector<8x128xbf16>, vector<8x128xbf16>, vector<8x128xbf16>, vector<8x128xbf16>, vector<8x128xbf16>, vector<8x128xbf16>, vector<8x128xbf16>, vector<8x128xbf16>, vector<8x128xbf16>, vector<8x128xbf16>, vector<8x128xbf16>, vector<8x128xbf16>, vector<8x128xbf16> -> vector<8x2048xbf16>
    %c0_28 = arith.constant 0 : index
    %c0_29 = arith.constant 0 : index
    %284 = vector.load %arg8[%c0_28, %c0_29] : memref<8x128xf32, #tpu.memory_space<vmem>>, vector<8x128xf32>
    %c3 = arith.constant 3 : index
    %c0_30 = arith.constant 0 : index
    %c0_31 = arith.constant 0 : index
    %285 = vector.load %arg3[%c3, %c0_30, %c0_31] : memref<8x2048x128xbf16, #tpu.memory_space<vmem>>, vector<1x2048x128xbf16>
    %286 = vector.shape_cast %285 : vector<1x2048x128xbf16> to vector<2048x128xbf16>
    %cst_32 = arith.constant dense<0.000000e+00> : vector<8x128xf32>
    %287 = tpu.matmul %283, %286, %cst_32 {dimension_numbers = #tpu.dot_dimension_numbers<[1], [0], [0], [1], [0, 0, 1, 1], [], []>} : vector<8x2048xbf16>, vector<2048x128xbf16>, vector<8x128xf32> -> vector<8x128xf32>
    %288 = arith.addf %284, %287 : vector<8x128xf32>
    %c0_33 = arith.constant 0 : index
    %c0_34 = arith.constant 0 : index
    %289 = vector.load %arg8[%c0_33, %c0_34] : memref<8x128xf32, #tpu.memory_space<vmem>>, vector<8x128xf32>
    tpu.vector_store %arg8[%c0_33, %c0_34], %288 {strides = array<i32>} : memref<8x128xf32, #tpu.memory_space<vmem>>, vector<8x128xf32>,
    %290 = vector.extract_strided_slice %0 {offsets = [0, 64], sizes = [8, 1], strides = [1, 1]} : vector<8x128xf32> to vector<8x1xf32>
    %291 = vector.broadcast %290 : vector<8x1xf32> to vector<8x128xf32>
    %292 = arith.mulf %291, %1 : vector<8x128xf32>
    %293 = arith.truncf %292 : vector<8x128xf32> to vector<8x128xbf16>
    %294 = vector.extract_strided_slice %0 {offsets = [0, 65], sizes = [8, 1], strides = [1, 1]} : vector<8x128xf32> to vector<8x1xf32>
    %295 = vector.broadcast %294 : vector<8x1xf32> to vector<8x128xf32>
    %296 = arith.mulf %295, %1 : vector<8x128xf32>
    %297 = arith.truncf %296 : vector<8x128xf32> to vector<8x128xbf16>
    %298 = vector.extract_strided_slice %0 {offsets = [0, 66], sizes = [8, 1], strides = [1, 1]} : vector<8x128xf32> to vector<8x1xf32>
    %299 = vector.broadcast %298 : vector<8x1xf32> to vector<8x128xf32>
    %300 = arith.mulf %299, %1 : vector<8x128xf32>
    %301 = arith.truncf %300 : vector<8x128xf32> to vector<8x128xbf16>
    %302 = vector.extract_strided_slice %0 {offsets = [0, 67], sizes = [8, 1], strides = [1, 1]} : vector<8x128xf32> to vector<8x1xf32>
    %303 = vector.broadcast %302 : vector<8x1xf32> to vector<8x128xf32>
    %304 = arith.mulf %303, %1 : vector<8x128xf32>
    %305 = arith.truncf %304 : vector<8x128xf32> to vector<8x128xbf16>
    %306 = vector.extract_strided_slice %0 {offsets = [0, 68], sizes = [8, 1], strides = [1, 1]} : vector<8x128xf32> to vector<8x1xf32>
    %307 = vector.broadcast %306 : vector<8x1xf32> to vector<8x128xf32>
    %308 = arith.mulf %307, %1 : vector<8x128xf32>
    %309 = arith.truncf %308 : vector<8x128xf32> to vector<8x128xbf16>
    %310 = vector.extract_strided_slice %0 {offsets = [0, 69], sizes = [8, 1], strides = [1, 1]} : vector<8x128xf32> to vector<8x1xf32>
    %311 = vector.broadcast %310 : vector<8x1xf32> to vector<8x128xf32>
    %312 = arith.mulf %311, %1 : vector<8x128xf32>
    %313 = arith.truncf %312 : vector<8x128xf32> to vector<8x128xbf16>
    %314 = vector.extract_strided_slice %0 {offsets = [0, 70], sizes = [8, 1], strides = [1, 1]} : vector<8x128xf32> to vector<8x1xf32>
    %315 = vector.broadcast %314 : vector<8x1xf32> to vector<8x128xf32>
    %316 = arith.mulf %315, %1 : vector<8x128xf32>
    %317 = arith.truncf %316 : vector<8x128xf32> to vector<8x128xbf16>
    %318 = vector.extract_strided_slice %0 {offsets = [0, 71], sizes = [8, 1], strides = [1, 1]} : vector<8x128xf32> to vector<8x1xf32>
    %319 = vector.broadcast %318 : vector<8x1xf32> to vector<8x128xf32>
    %320 = arith.mulf %319, %1 : vector<8x128xf32>
    %321 = arith.truncf %320 : vector<8x128xf32> to vector<8x128xbf16>
    %322 = vector.extract_strided_slice %0 {offsets = [0, 72], sizes = [8, 1], strides = [1, 1]} : vector<8x128xf32> to vector<8x1xf32>
    %323 = vector.broadcast %322 : vector<8x1xf32> to vector<8x128xf32>
    %324 = arith.mulf %323, %1 : vector<8x128xf32>
    %325 = arith.truncf %324 : vector<8x128xf32> to vector<8x128xbf16>
    %326 = vector.extract_strided_slice %0 {offsets = [0, 73], sizes = [8, 1], strides = [1, 1]} : vector<8x128xf32> to vector<8x1xf32>
    %327 = vector.broadcast %326 : vector<8x1xf32> to vector<8x128xf32>
    %328 = arith.mulf %327, %1 : vector<8x128xf32>
    %329 = arith.truncf %328 : vector<8x128xf32> to vector<8x128xbf16>
    %330 = vector.extract_strided_slice %0 {offsets = [0, 74], sizes = [8, 1], strides = [1, 1]} : vector<8x128xf32> to vector<8x1xf32>
    %331 = vector.broadcast %330 : vector<8x1xf32> to vector<8x128xf32>
    %332 = arith.mulf %331, %1 : vector<8x128xf32>
    %333 = arith.truncf %332 : vector<8x128xf32> to vector<8x128xbf16>
    %334 = vector.extract_strided_slice %0 {offsets = [0, 75], sizes = [8, 1], strides = [1, 1]} : vector<8x128xf32> to vector<8x1xf32>
    %335 = vector.broadcast %334 : vector<8x1xf32> to vector<8x128xf32>
    %336 = arith.mulf %335, %1 : vector<8x128xf32>
    %337 = arith.truncf %336 : vector<8x128xf32> to vector<8x128xbf16>
    %338 = vector.extract_strided_slice %0 {offsets = [0, 76], sizes = [8, 1], strides = [1, 1]} : vector<8x128xf32> to vector<8x1xf32>
    %339 = vector.broadcast %338 : vector<8x1xf32> to vector<8x128xf32>
    %340 = arith.mulf %339, %1 : vector<8x128xf32>
    %341 = arith.truncf %340 : vector<8x128xf32> to vector<8x128xbf16>
    %342 = vector.extract_strided_slice %0 {offsets = [0, 77], sizes = [8, 1], strides = [1, 1]} : vector<8x128xf32> to vector<8x1xf32>
    %343 = vector.broadcast %342 : vector<8x1xf32> to vector<8x128xf32>
    %344 = arith.mulf %343, %1 : vector<8x128xf32>
    %345 = arith.truncf %344 : vector<8x128xf32> to vector<8x128xbf16>
    %346 = vector.extract_strided_slice %0 {offsets = [0, 78], sizes = [8, 1], strides = [1, 1]} : vector<8x128xf32> to vector<8x1xf32>
    %347 = vector.broadcast %346 : vector<8x1xf32> to vector<8x128xf32>
    %348 = arith.mulf %347, %1 : vector<8x128xf32>
    %349 = arith.truncf %348 : vector<8x128xf32> to vector<8x128xbf16>
    %350 = vector.extract_strided_slice %0 {offsets = [0, 79], sizes = [8, 1], strides = [1, 1]} : vector<8x128xf32> to vector<8x1xf32>
    %351 = vector.broadcast %350 : vector<8x1xf32> to vector<8x128xf32>
    %352 = arith.mulf %351, %1 : vector<8x128xf32>
    %353 = arith.truncf %352 : vector<8x128xf32> to vector<8x128xbf16>
    %354 = tpu.concatenate %293, %297, %301, %305, %309, %313, %317, %321, %325, %329, %333, %337, %341, %345, %349, %353 in 1 : vector<8x128xbf16>, vector<8x128xbf16>, vector<8x128xbf16>, vector<8x128xbf16>, vector<8x128xbf16>, vector<8x128xbf16>, vector<8x128xbf16>, vector<8x128xbf16>, vector<8x128xbf16>, vector<8x128xbf16>, vector<8x128xbf16>, vector<8x128xbf16>, vector<8x128xbf16>, vector<8x128xbf16>, vector<8x128xbf16>, vector<8x128xbf16> -> vector<8x2048xbf16>
    %c0_35 = arith.constant 0 : index
    %c0_36 = arith.constant 0 : index
    %355 = vector.load %arg8[%c0_35, %c0_36] : memref<8x128xf32, #tpu.memory_space<vmem>>, vector<8x128xf32>
    %c4 = arith.constant 4 : index
    %c0_37 = arith.constant 0 : index
    %c0_38 = arith.constant 0 : index
    %356 = vector.load %arg3[%c4, %c0_37, %c0_38] : memref<8x2048x128xbf16, #tpu.memory_space<vmem>>, vector<1x2048x128xbf16>
    %357 = vector.shape_cast %356 : vector<1x2048x128xbf16> to vector<2048x128xbf16>
    %cst_39 = arith.constant dense<0.000000e+00> : vector<8x128xf32>
    %358 = tpu.matmul %354, %357, %cst_39 {dimension_numbers = #tpu.dot_dimension_numbers<[1], [0], [0], [1], [0, 0, 1, 1], [], []>} : vector<8x2048xbf16>, vector<2048x128xbf16>, vector<8x128xf32> -> vector<8x128xf32>
    %359 = arith.addf %355, %358 : vector<8x128xf32>
    %c0_40 = arith.constant 0 : index
    %c0_41 = arith.constant 0 : index
    %360 = vector.load %arg8[%c0_40, %c0_41] : memref<8x128xf32, #tpu.memory_space<vmem>>, vector<8x128xf32>
    tpu.vector_store %arg8[%c0_40, %c0_41], %359 {strides = array<i32>} : memref<8x128xf32, #tpu.memory_space<vmem>>, vector<8x128xf32>,
    %361 = vector.extract_strided_slice %0 {offsets = [0, 80], sizes = [8, 1], strides = [1, 1]} : vector<8x128xf32> to vector<8x1xf32>
    %362 = vector.broadcast %361 : vector<8x1xf32> to vector<8x128xf32>
    %363 = arith.mulf %362, %1 : vector<8x128xf32>
    %364 = arith.truncf %363 : vector<8x128xf32> to vector<8x128xbf16>
    %365 = vector.extract_strided_slice %0 {offsets = [0, 81], sizes = [8, 1], strides = [1, 1]} : vector<8x128xf32> to vector<8x1xf32>
    %366 = vector.broadcast %365 : vector<8x1xf32> to vector<8x128xf32>
    %367 = arith.mulf %366, %1 : vector<8x128xf32>
    %368 = arith.truncf %367 : vector<8x128xf32> to vector<8x128xbf16>
    %369 = vector.extract_strided_slice %0 {offsets = [0, 82], sizes = [8, 1], strides = [1, 1]} : vector<8x128xf32> to vector<8x1xf32>
    %370 = vector.broadcast %369 : vector<8x1xf32> to vector<8x128xf32>
    %371 = arith.mulf %370, %1 : vector<8x128xf32>
    %372 = arith.truncf %371 : vector<8x128xf32> to vector<8x128xbf16>
    %373 = vector.extract_strided_slice %0 {offsets = [0, 83], sizes = [8, 1], strides = [1, 1]} : vector<8x128xf32> to vector<8x1xf32>
    %374 = vector.broadcast %373 : vector<8x1xf32> to vector<8x128xf32>
    %375 = arith.mulf %374, %1 : vector<8x128xf32>
    %376 = arith.truncf %375 : vector<8x128xf32> to vector<8x128xbf16>
    %377 = vector.extract_strided_slice %0 {offsets = [0, 84], sizes = [8, 1], strides = [1, 1]} : vector<8x128xf32> to vector<8x1xf32>
    %378 = vector.broadcast %377 : vector<8x1xf32> to vector<8x128xf32>
    %379 = arith.mulf %378, %1 : vector<8x128xf32>
    %380 = arith.truncf %379 : vector<8x128xf32> to vector<8x128xbf16>
    %381 = vector.extract_strided_slice %0 {offsets = [0, 85], sizes = [8, 1], strides = [1, 1]} : vector<8x128xf32> to vector<8x1xf32>
    %382 = vector.broadcast %381 : vector<8x1xf32> to vector<8x128xf32>
    %383 = arith.mulf %382, %1 : vector<8x128xf32>
    %384 = arith.truncf %383 : vector<8x128xf32> to vector<8x128xbf16>
    %385 = vector.extract_strided_slice %0 {offsets = [0, 86], sizes = [8, 1], strides = [1, 1]} : vector<8x128xf32> to vector<8x1xf32>
    %386 = vector.broadcast %385 : vector<8x1xf32> to vector<8x128xf32>
    %387 = arith.mulf %386, %1 : vector<8x128xf32>
    %388 = arith.truncf %387 : vector<8x128xf32> to vector<8x128xbf16>
    %389 = vector.extract_strided_slice %0 {offsets = [0, 87], sizes = [8, 1], strides = [1, 1]} : vector<8x128xf32> to vector<8x1xf32>
    %390 = vector.broadcast %389 : vector<8x1xf32> to vector<8x128xf32>
    %391 = arith.mulf %390, %1 : vector<8x128xf32>
    %392 = arith.truncf %391 : vector<8x128xf32> to vector<8x128xbf16>
    %393 = vector.extract_strided_slice %0 {offsets = [0, 88], sizes = [8, 1], strides = [1, 1]} : vector<8x128xf32> to vector<8x1xf32>
    %394 = vector.broadcast %393 : vector<8x1xf32> to vector<8x128xf32>
    %395 = arith.mulf %394, %1 : vector<8x128xf32>
    %396 = arith.truncf %395 : vector<8x128xf32> to vector<8x128xbf16>
    %397 = vector.extract_strided_slice %0 {offsets = [0, 89], sizes = [8, 1], strides = [1, 1]} : vector<8x128xf32> to vector<8x1xf32>
    %398 = vector.broadcast %397 : vector<8x1xf32> to vector<8x128xf32>
    %399 = arith.mulf %398, %1 : vector<8x128xf32>
    %400 = arith.truncf %399 : vector<8x128xf32> to vector<8x128xbf16>
    %401 = vector.extract_strided_slice %0 {offsets = [0, 90], sizes = [8, 1], strides = [1, 1]} : vector<8x128xf32> to vector<8x1xf32>
    %402 = vector.broadcast %401 : vector<8x1xf32> to vector<8x128xf32>
    %403 = arith.mulf %402, %1 : vector<8x128xf32>
    %404 = arith.truncf %403 : vector<8x128xf32> to vector<8x128xbf16>
    %405 = vector.extract_strided_slice %0 {offsets = [0, 91], sizes = [8, 1], strides = [1, 1]} : vector<8x128xf32> to vector<8x1xf32>
    %406 = vector.broadcast %405 : vector<8x1xf32> to vector<8x128xf32>
    %407 = arith.mulf %406, %1 : vector<8x128xf32>
    %408 = arith.truncf %407 : vector<8x128xf32> to vector<8x128xbf16>
    %409 = vector.extract_strided_slice %0 {offsets = [0, 92], sizes = [8, 1], strides = [1, 1]} : vector<8x128xf32> to vector<8x1xf32>
    %410 = vector.broadcast %409 : vector<8x1xf32> to vector<8x128xf32>
    %411 = arith.mulf %410, %1 : vector<8x128xf32>
    %412 = arith.truncf %411 : vector<8x128xf32> to vector<8x128xbf16>
    %413 = vector.extract_strided_slice %0 {offsets = [0, 93], sizes = [8, 1], strides = [1, 1]} : vector<8x128xf32> to vector<8x1xf32>
    %414 = vector.broadcast %413 : vector<8x1xf32> to vector<8x128xf32>
    %415 = arith.mulf %414, %1 : vector<8x128xf32>
    %416 = arith.truncf %415 : vector<8x128xf32> to vector<8x128xbf16>
    %417 = vector.extract_strided_slice %0 {offsets = [0, 94], sizes = [8, 1], strides = [1, 1]} : vector<8x128xf32> to vector<8x1xf32>
    %418 = vector.broadcast %417 : vector<8x1xf32> to vector<8x128xf32>
    %419 = arith.mulf %418, %1 : vector<8x128xf32>
    %420 = arith.truncf %419 : vector<8x128xf32> to vector<8x128xbf16>
    %421 = vector.extract_strided_slice %0 {offsets = [0, 95], sizes = [8, 1], strides = [1, 1]} : vector<8x128xf32> to vector<8x1xf32>
    %422 = vector.broadcast %421 : vector<8x1xf32> to vector<8x128xf32>
    %423 = arith.mulf %422, %1 : vector<8x128xf32>
    %424 = arith.truncf %423 : vector<8x128xf32> to vector<8x128xbf16>
    %425 = tpu.concatenate %364, %368, %372, %376, %380, %384, %388, %392, %396, %400, %404, %408, %412, %416, %420, %424 in 1 : vector<8x128xbf16>, vector<8x128xbf16>, vector<8x128xbf16>, vector<8x128xbf16>, vector<8x128xbf16>, vector<8x128xbf16>, vector<8x128xbf16>, vector<8x128xbf16>, vector<8x128xbf16>, vector<8x128xbf16>, vector<8x128xbf16>, vector<8x128xbf16>, vector<8x128xbf16>, vector<8x128xbf16>, vector<8x128xbf16>, vector<8x128xbf16> -> vector<8x2048xbf16>
    %c0_42 = arith.constant 0 : index
    %c0_43 = arith.constant 0 : index
    %426 = vector.load %arg8[%c0_42, %c0_43] : memref<8x128xf32, #tpu.memory_space<vmem>>, vector<8x128xf32>
    %c5 = arith.constant 5 : index
    %c0_44 = arith.constant 0 : index
    %c0_45 = arith.constant 0 : index
    %427 = vector.load %arg3[%c5, %c0_44, %c0_45] : memref<8x2048x128xbf16, #tpu.memory_space<vmem>>, vector<1x2048x128xbf16>
    %428 = vector.shape_cast %427 : vector<1x2048x128xbf16> to vector<2048x128xbf16>
    %cst_46 = arith.constant dense<0.000000e+00> : vector<8x128xf32>
    %429 = tpu.matmul %425, %428, %cst_46 {dimension_numbers = #tpu.dot_dimension_numbers<[1], [0], [0], [1], [0, 0, 1, 1], [], []>} : vector<8x2048xbf16>, vector<2048x128xbf16>, vector<8x128xf32> -> vector<8x128xf32>
    %430 = arith.addf %426, %429 : vector<8x128xf32>
    %c0_47 = arith.constant 0 : index
    %c0_48 = arith.constant 0 : index
    %431 = vector.load %arg8[%c0_47, %c0_48] : memref<8x128xf32, #tpu.memory_space<vmem>>, vector<8x128xf32>
    tpu.vector_store %arg8[%c0_47, %c0_48], %430 {strides = array<i32>} : memref<8x128xf32, #tpu.memory_space<vmem>>, vector<8x128xf32>,
    %432 = vector.extract_strided_slice %0 {offsets = [0, 96], sizes = [8, 1], strides = [1, 1]} : vector<8x128xf32> to vector<8x1xf32>
    %433 = vector.broadcast %432 : vector<8x1xf32> to vector<8x128xf32>
    %434 = arith.mulf %433, %1 : vector<8x128xf32>
    %435 = arith.truncf %434 : vector<8x128xf32> to vector<8x128xbf16>
    %436 = vector.extract_strided_slice %0 {offsets = [0, 97], sizes = [8, 1], strides = [1, 1]} : vector<8x128xf32> to vector<8x1xf32>
    %437 = vector.broadcast %436 : vector<8x1xf32> to vector<8x128xf32>
    %438 = arith.mulf %437, %1 : vector<8x128xf32>
    %439 = arith.truncf %438 : vector<8x128xf32> to vector<8x128xbf16>
    %440 = vector.extract_strided_slice %0 {offsets = [0, 98], sizes = [8, 1], strides = [1, 1]} : vector<8x128xf32> to vector<8x1xf32>
    %441 = vector.broadcast %440 : vector<8x1xf32> to vector<8x128xf32>
    %442 = arith.mulf %441, %1 : vector<8x128xf32>
    %443 = arith.truncf %442 : vector<8x128xf32> to vector<8x128xbf16>
    %444 = vector.extract_strided_slice %0 {offsets = [0, 99], sizes = [8, 1], strides = [1, 1]} : vector<8x128xf32> to vector<8x1xf32>
    %445 = vector.broadcast %444 : vector<8x1xf32> to vector<8x128xf32>
    %446 = arith.mulf %445, %1 : vector<8x128xf32>
    %447 = arith.truncf %446 : vector<8x128xf32> to vector<8x128xbf16>
    %448 = vector.extract_strided_slice %0 {offsets = [0, 100], sizes = [8, 1], strides = [1, 1]} : vector<8x128xf32> to vector<8x1xf32>
    %449 = vector.broadcast %448 : vector<8x1xf32> to vector<8x128xf32>
    %450 = arith.mulf %449, %1 : vector<8x128xf32>
    %451 = arith.truncf %450 : vector<8x128xf32> to vector<8x128xbf16>
    %452 = vector.extract_strided_slice %0 {offsets = [0, 101], sizes = [8, 1], strides = [1, 1]} : vector<8x128xf32> to vector<8x1xf32>
    %453 = vector.broadcast %452 : vector<8x1xf32> to vector<8x128xf32>
    %454 = arith.mulf %453, %1 : vector<8x128xf32>
    %455 = arith.truncf %454 : vector<8x128xf32> to vector<8x128xbf16>
    %456 = vector.extract_strided_slice %0 {offsets = [0, 102], sizes = [8, 1], strides = [1, 1]} : vector<8x128xf32> to vector<8x1xf32>
    %457 = vector.broadcast %456 : vector<8x1xf32> to vector<8x128xf32>
    %458 = arith.mulf %457, %1 : vector<8x128xf32>
    %459 = arith.truncf %458 : vector<8x128xf32> to vector<8x128xbf16>
    %460 = vector.extract_strided_slice %0 {offsets = [0, 103], sizes = [8, 1], strides = [1, 1]} : vector<8x128xf32> to vector<8x1xf32>
    %461 = vector.broadcast %460 : vector<8x1xf32> to vector<8x128xf32>
    %462 = arith.mulf %461, %1 : vector<8x128xf32>
    %463 = arith.truncf %462 : vector<8x128xf32> to vector<8x128xbf16>
    %464 = vector.extract_strided_slice %0 {offsets = [0, 104], sizes = [8, 1], strides = [1, 1]} : vector<8x128xf32> to vector<8x1xf32>
    %465 = vector.broadcast %464 : vector<8x1xf32> to vector<8x128xf32>
    %466 = arith.mulf %465, %1 : vector<8x128xf32>
    %467 = arith.truncf %466 : vector<8x128xf32> to vector<8x128xbf16>
    %468 = vector.extract_strided_slice %0 {offsets = [0, 105], sizes = [8, 1], strides = [1, 1]} : vector<8x128xf32> to vector<8x1xf32>
    %469 = vector.broadcast %468 : vector<8x1xf32> to vector<8x128xf32>
    %470 = arith.mulf %469, %1 : vector<8x128xf32>
    %471 = arith.truncf %470 : vector<8x128xf32> to vector<8x128xbf16>
    %472 = vector.extract_strided_slice %0 {offsets = [0, 106], sizes = [8, 1], strides = [1, 1]} : vector<8x128xf32> to vector<8x1xf32>
    %473 = vector.broadcast %472 : vector<8x1xf32> to vector<8x128xf32>
    %474 = arith.mulf %473, %1 : vector<8x128xf32>
    %475 = arith.truncf %474 : vector<8x128xf32> to vector<8x128xbf16>
    %476 = vector.extract_strided_slice %0 {offsets = [0, 107], sizes = [8, 1], strides = [1, 1]} : vector<8x128xf32> to vector<8x1xf32>
    %477 = vector.broadcast %476 : vector<8x1xf32> to vector<8x128xf32>
    %478 = arith.mulf %477, %1 : vector<8x128xf32>
    %479 = arith.truncf %478 : vector<8x128xf32> to vector<8x128xbf16>
    %480 = vector.extract_strided_slice %0 {offsets = [0, 108], sizes = [8, 1], strides = [1, 1]} : vector<8x128xf32> to vector<8x1xf32>
    %481 = vector.broadcast %480 : vector<8x1xf32> to vector<8x128xf32>
    %482 = arith.mulf %481, %1 : vector<8x128xf32>
    %483 = arith.truncf %482 : vector<8x128xf32> to vector<8x128xbf16>
    %484 = vector.extract_strided_slice %0 {offsets = [0, 109], sizes = [8, 1], strides = [1, 1]} : vector<8x128xf32> to vector<8x1xf32>
    %485 = vector.broadcast %484 : vector<8x1xf32> to vector<8x128xf32>
    %486 = arith.mulf %485, %1 : vector<8x128xf32>
    %487 = arith.truncf %486 : vector<8x128xf32> to vector<8x128xbf16>
    %488 = vector.extract_strided_slice %0 {offsets = [0, 110], sizes = [8, 1], strides = [1, 1]} : vector<8x128xf32> to vector<8x1xf32>
    %489 = vector.broadcast %488 : vector<8x1xf32> to vector<8x128xf32>
    %490 = arith.mulf %489, %1 : vector<8x128xf32>
    %491 = arith.truncf %490 : vector<8x128xf32> to vector<8x128xbf16>
    %492 = vector.extract_strided_slice %0 {offsets = [0, 111], sizes = [8, 1], strides = [1, 1]} : vector<8x128xf32> to vector<8x1xf32>
    %493 = vector.broadcast %492 : vector<8x1xf32> to vector<8x128xf32>
    %494 = arith.mulf %493, %1 : vector<8x128xf32>
    %495 = arith.truncf %494 : vector<8x128xf32> to vector<8x128xbf16>
    %496 = tpu.concatenate %435, %439, %443, %447, %451, %455, %459, %463, %467, %471, %475, %479, %483, %487, %491, %495 in 1 : vector<8x128xbf16>, vector<8x128xbf16>, vector<8x128xbf16>, vector<8x128xbf16>, vector<8x128xbf16>, vector<8x128xbf16>, vector<8x128xbf16>, vector<8x128xbf16>, vector<8x128xbf16>, vector<8x128xbf16>, vector<8x128xbf16>, vector<8x128xbf16>, vector<8x128xbf16>, vector<8x128xbf16>, vector<8x128xbf16>, vector<8x128xbf16> -> vector<8x2048xbf16>
    %c0_49 = arith.constant 0 : index
    %c0_50 = arith.constant 0 : index
    %497 = vector.load %arg8[%c0_49, %c0_50] : memref<8x128xf32, #tpu.memory_space<vmem>>, vector<8x128xf32>
    %c6 = arith.constant 6 : index
    %c0_51 = arith.constant 0 : index
    %c0_52 = arith.constant 0 : index
    %498 = vector.load %arg3[%c6, %c0_51, %c0_52] : memref<8x2048x128xbf16, #tpu.memory_space<vmem>>, vector<1x2048x128xbf16>
    %499 = vector.shape_cast %498 : vector<1x2048x128xbf16> to vector<2048x128xbf16>
    %cst_53 = arith.constant dense<0.000000e+00> : vector<8x128xf32>
    %500 = tpu.matmul %496, %499, %cst_53 {dimension_numbers = #tpu.dot_dimension_numbers<[1], [0], [0], [1], [0, 0, 1, 1], [], []>} : vector<8x2048xbf16>, vector<2048x128xbf16>, vector<8x128xf32> -> vector<8x128xf32>
    %501 = arith.addf %497, %500 : vector<8x128xf32>
    %c0_54 = arith.constant 0 : index
    %c0_55 = arith.constant 0 : index
    %502 = vector.load %arg8[%c0_54, %c0_55] : memref<8x128xf32, #tpu.memory_space<vmem>>, vector<8x128xf32>
    tpu.vector_store %arg8[%c0_54, %c0_55], %501 {strides = array<i32>} : memref<8x128xf32, #tpu.memory_space<vmem>>, vector<8x128xf32>,
    %503 = vector.extract_strided_slice %0 {offsets = [0, 112], sizes = [8, 1], strides = [1, 1]} : vector<8x128xf32> to vector<8x1xf32>
    %504 = vector.broadcast %503 : vector<8x1xf32> to vector<8x128xf32>
    %505 = arith.mulf %504, %1 : vector<8x128xf32>
    %506 = arith.truncf %505 : vector<8x128xf32> to vector<8x128xbf16>
    %507 = vector.extract_strided_slice %0 {offsets = [0, 113], sizes = [8, 1], strides = [1, 1]} : vector<8x128xf32> to vector<8x1xf32>
    %508 = vector.broadcast %507 : vector<8x1xf32> to vector<8x128xf32>
    %509 = arith.mulf %508, %1 : vector<8x128xf32>
    %510 = arith.truncf %509 : vector<8x128xf32> to vector<8x128xbf16>
    %511 = vector.extract_strided_slice %0 {offsets = [0, 114], sizes = [8, 1], strides = [1, 1]} : vector<8x128xf32> to vector<8x1xf32>
    %512 = vector.broadcast %511 : vector<8x1xf32> to vector<8x128xf32>
    %513 = arith.mulf %512, %1 : vector<8x128xf32>
    %514 = arith.truncf %513 : vector<8x128xf32> to vector<8x128xbf16>
    %515 = vector.extract_strided_slice %0 {offsets = [0, 115], sizes = [8, 1], strides = [1, 1]} : vector<8x128xf32> to vector<8x1xf32>
    %516 = vector.broadcast %515 : vector<8x1xf32> to vector<8x128xf32>
    %517 = arith.mulf %516, %1 : vector<8x128xf32>
    %518 = arith.truncf %517 : vector<8x128xf32> to vector<8x128xbf16>
    %519 = vector.extract_strided_slice %0 {offsets = [0, 116], sizes = [8, 1], strides = [1, 1]} : vector<8x128xf32> to vector<8x1xf32>
    %520 = vector.broadcast %519 : vector<8x1xf32> to vector<8x128xf32>
    %521 = arith.mulf %520, %1 : vector<8x128xf32>
    %522 = arith.truncf %521 : vector<8x128xf32> to vector<8x128xbf16>
    %523 = vector.extract_strided_slice %0 {offsets = [0, 117], sizes = [8, 1], strides = [1, 1]} : vector<8x128xf32> to vector<8x1xf32>
    %524 = vector.broadcast %523 : vector<8x1xf32> to vector<8x128xf32>
    %525 = arith.mulf %524, %1 : vector<8x128xf32>
    %526 = arith.truncf %525 : vector<8x128xf32> to vector<8x128xbf16>
    %527 = vector.extract_strided_slice %0 {offsets = [0, 118], sizes = [8, 1], strides = [1, 1]} : vector<8x128xf32> to vector<8x1xf32>
    %528 = vector.broadcast %527 : vector<8x1xf32> to vector<8x128xf32>
    %529 = arith.mulf %528, %1 : vector<8x128xf32>
    %530 = arith.truncf %529 : vector<8x128xf32> to vector<8x128xbf16>
    %531 = vector.extract_strided_slice %0 {offsets = [0, 119], sizes = [8, 1], strides = [1, 1]} : vector<8x128xf32> to vector<8x1xf32>
    %532 = vector.broadcast %531 : vector<8x1xf32> to vector<8x128xf32>
    %533 = arith.mulf %532, %1 : vector<8x128xf32>
    %534 = arith.truncf %533 : vector<8x128xf32> to vector<8x128xbf16>
    %535 = vector.extract_strided_slice %0 {offsets = [0, 120], sizes = [8, 1], strides = [1, 1]} : vector<8x128xf32> to vector<8x1xf32>
    %536 = vector.broadcast %535 : vector<8x1xf32> to vector<8x128xf32>
    %537 = arith.mulf %536, %1 : vector<8x128xf32>
    %538 = arith.truncf %537 : vector<8x128xf32> to vector<8x128xbf16>
    %539 = vector.extract_strided_slice %0 {offsets = [0, 121], sizes = [8, 1], strides = [1, 1]} : vector<8x128xf32> to vector<8x1xf32>
    %540 = vector.broadcast %539 : vector<8x1xf32> to vector<8x128xf32>
    %541 = arith.mulf %540, %1 : vector<8x128xf32>
    %542 = arith.truncf %541 : vector<8x128xf32> to vector<8x128xbf16>
    %543 = vector.extract_strided_slice %0 {offsets = [0, 122], sizes = [8, 1], strides = [1, 1]} : vector<8x128xf32> to vector<8x1xf32>
    %544 = vector.broadcast %543 : vector<8x1xf32> to vector<8x128xf32>
    %545 = arith.mulf %544, %1 : vector<8x128xf32>
    %546 = arith.truncf %545 : vector<8x128xf32> to vector<8x128xbf16>
    %547 = vector.extract_strided_slice %0 {offsets = [0, 123], sizes = [8, 1], strides = [1, 1]} : vector<8x128xf32> to vector<8x1xf32>
    %548 = vector.broadcast %547 : vector<8x1xf32> to vector<8x128xf32>
    %549 = arith.mulf %548, %1 : vector<8x128xf32>
    %550 = arith.truncf %549 : vector<8x128xf32> to vector<8x128xbf16>
    %551 = vector.extract_strided_slice %0 {offsets = [0, 124], sizes = [8, 1], strides = [1, 1]} : vector<8x128xf32> to vector<8x1xf32>
    %552 = vector.broadcast %551 : vector<8x1xf32> to vector<8x128xf32>
    %553 = arith.mulf %552, %1 : vector<8x128xf32>
    %554 = arith.truncf %553 : vector<8x128xf32> to vector<8x128xbf16>
    %555 = vector.extract_strided_slice %0 {offsets = [0, 125], sizes = [8, 1], strides = [1, 1]} : vector<8x128xf32> to vector<8x1xf32>
    %556 = vector.broadcast %555 : vector<8x1xf32> to vector<8x128xf32>
    %557 = arith.mulf %556, %1 : vector<8x128xf32>
    %558 = arith.truncf %557 : vector<8x128xf32> to vector<8x128xbf16>
    %559 = vector.extract_strided_slice %0 {offsets = [0, 126], sizes = [8, 1], strides = [1, 1]} : vector<8x128xf32> to vector<8x1xf32>
    %560 = vector.broadcast %559 : vector<8x1xf32> to vector<8x128xf32>
    %561 = arith.mulf %560, %1 : vector<8x128xf32>
    %562 = arith.truncf %561 : vector<8x128xf32> to vector<8x128xbf16>
    %563 = vector.extract_strided_slice %0 {offsets = [0, 127], sizes = [8, 1], strides = [1, 1]} : vector<8x128xf32> to vector<8x1xf32>
    %564 = vector.broadcast %563 : vector<8x1xf32> to vector<8x128xf32>
    %565 = arith.mulf %564, %1 : vector<8x128xf32>
    %566 = arith.truncf %565 : vector<8x128xf32> to vector<8x128xbf16>
    %567 = tpu.concatenate %506, %510, %514, %518, %522, %526, %530, %534, %538, %542, %546, %550, %554, %558, %562, %566 in 1 : vector<8x128xbf16>, vector<8x128xbf16>, vector<8x128xbf16>, vector<8x128xbf16>, vector<8x128xbf16>, vector<8x128xbf16>, vector<8x128xbf16>, vector<8x128xbf16>, vector<8x128xbf16>, vector<8x128xbf16>, vector<8x128xbf16>, vector<8x128xbf16>, vector<8x128xbf16>, vector<8x128xbf16>, vector<8x128xbf16>, vector<8x128xbf16> -> vector<8x2048xbf16>
    %c0_56 = arith.constant 0 : index
    %c0_57 = arith.constant 0 : index
    %568 = vector.load %arg8[%c0_56, %c0_57] : memref<8x128xf32, #tpu.memory_space<vmem>>, vector<8x128xf32>
    %c7 = arith.constant 7 : index
    %c0_58 = arith.constant 0 : index
    %c0_59 = arith.constant 0 : index
    %569 = vector.load %arg3[%c7, %c0_58, %c0_59] : memref<8x2048x128xbf16, #tpu.memory_space<vmem>>, vector<1x2048x128xbf16>
    %570 = vector.shape_cast %569 : vector<1x2048x128xbf16> to vector<2048x128xbf16>
    %cst_60 = arith.constant dense<0.000000e+00> : vector<8x128xf32>
    %571 = tpu.matmul %567, %570, %cst_60 {dimension_numbers = #tpu.dot_dimension_numbers<[1], [0], [0], [1], [0, 0, 1, 1], [], []>} : vector<8x2048xbf16>, vector<2048x128xbf16>, vector<8x128xf32> -> vector<8x128xf32>
    %572 = arith.addf %568, %571 : vector<8x128xf32>
    %c0_61 = arith.constant 0 : index
    %c0_62 = arith.constant 0 : index
    %573 = vector.load %arg8[%c0_61, %c0_62] : memref<8x128xf32, #tpu.memory_space<vmem>>, vector<8x128xf32>
    tpu.vector_store %arg8[%c0_61, %c0_62], %572 {strides = array<i32>} : memref<8x128xf32, #tpu.memory_space<vmem>>, vector<8x128xf32>,
    %c0_63 = arith.constant 0 : index
    %c0_64 = arith.constant 0 : index
    %574 = vector.load %arg8[%c0_63, %c0_64] : memref<8x128xf32, #tpu.memory_space<vmem>>, vector<8x128xf32>
    %cst_65 = arith.constant 0.000000e+00 : f32
    %575 = vector.broadcast %cst_65 : f32 to vector<8x128xf32>
    %576 = arith.maximumf %574, %575 : vector<8x128xf32>
    %577 = arith.truncf %576 : vector<8x128xf32> to vector<8x128xbf16>
    %c0_66 = arith.constant 0 : index
    %c0_67 = arith.constant 0 : index
    %578 = vector.load %arg5[%c0_66, %c0_67] : memref<128x128xbf16, #tpu.memory_space<vmem>>, vector<128x128xbf16>
    %cst_68 = arith.constant dense<0.000000e+00> : vector<8x128xf32>
    %579 = tpu.matmul %577, %578, %cst_68 {dimension_numbers = #tpu.dot_dimension_numbers<[1], [0], [0], [1], [0, 0, 1, 1], [], []>} : vector<8x128xbf16>, vector<128x128xbf16>, vector<8x128xf32> -> vector<8x128xf32>
    %c0_69 = arith.constant 0 : index
    %c0_70 = arith.constant 0 : index
    %580 = vector.load %arg6[%c0_69, %c0_70] : memref<1x128xf32, #tpu.memory_space<vmem>>, vector<1x128xf32>
    %581 = vector.broadcast %580 : vector<1x128xf32> to vector<8x128xf32>
    %582 = arith.addf %579, %581 : vector<8x128xf32>
    %cst_71 = arith.constant dense<0xFF800000> : vector<8xf32>
    %583 = vector.multi_reduction <maximumf>, %582, %cst_71 [1] : vector<8x128xf32> to vector<8xf32>
    %584 = vector.shape_cast %583 : vector<8xf32> to vector<8x1xf32>
    %585 = vector.broadcast %584 : vector<8x1xf32> to vector<8x128xf32>
    %586 = arith.subf %582, %585 : vector<8x128xf32>
    %587 = math.exp %586 : vector<8x128xf32>
    %cst_72 = arith.constant dense<0.000000e+00> : vector<8xf32>
    %588 = vector.multi_reduction <add>, %587, %cst_72 [1] : vector<8x128xf32> to vector<8xf32>
    %589 = vector.shape_cast %588 : vector<8xf32> to vector<8x1xf32>
    %590 = vector.broadcast %589 : vector<8x1xf32> to vector<8x128xf32>
    %591 = arith.divf %587, %590 : vector<8x128xf32>
    %c0_73 = arith.constant 0 : index
    %c0_74 = arith.constant 0 : index
    %592 = vector.load %arg7[%c0_73, %c0_74] : memref<8x128xf32, #tpu.memory_space<vmem>>, vector<8x128xf32>
    tpu.vector_store %arg7[%c0_73, %c0_74], %591 {strides = array<i32>} : memref<8x128xf32, #tpu.memory_space<vmem>>, vector<8x128xf32>,
    return
  }
  func.func @transform_0(%arg0: i32) -> (i32, i32) {
    %c0_i32 = arith.constant 0 : i32
    %c0_i32_0 = arith.constant 0 : i32
    return %arg0, %c0_i32 : i32, i32
  }
  func.func @transform_1(%arg0: i32) -> (i32, i32) {
    %c0_i32 = arith.constant 0 : i32
    %c0_i32_0 = arith.constant 0 : i32
    return %arg0, %c0_i32 : i32, i32
  }
  func.func @transform_2(%arg0: i32) -> (i32, i32, i32) {
    %c0_i32 = arith.constant 0 : i32
    %c0_i32_0 = arith.constant 0 : i32
    %c0_i32_1 = arith.constant 0 : i32
    %c0_i32_2 = arith.constant 0 : i32
    return %c0_i32, %c0_i32_0, %c0_i32_1 : i32, i32, i32
  }
  func.func @transform_3(%arg0: i32) -> (i32, i32) {
    %c0_i32 = arith.constant 0 : i32
    %c0_i32_0 = arith.constant 0 : i32
    %c0_i32_1 = arith.constant 0 : i32
    return %c0_i32, %c0_i32_0 : i32, i32
  }
  func.func @transform_4(%arg0: i32) -> (i32, i32) {
    %c0_i32 = arith.constant 0 : i32
    %c0_i32_0 = arith.constant 0 : i32
    %c0_i32_1 = arith.constant 0 : i32
    return %c0_i32, %c0_i32_0 : i32, i32
  }
  func.func @transform_5(%arg0: i32) -> (i32, i32) {
    %c0_i32 = arith.constant 0 : i32
    %c0_i32_0 = arith.constant 0 : i32
    %c0_i32_1 = arith.constant 0 : i32
    return %c0_i32, %c0_i32_0 : i32, i32
  }
  func.func @transform_6(%arg0: i32) -> (i32, i32) {
    %c0_i32 = arith.constant 0 : i32
    %c0_i32_0 = arith.constant 0 : i32
    return %arg0, %c0_i32 : i32, i32
  }
}

</mosaic_0001>

<bundles_post_ra>
// kernel: _mio_forward_impl.1
= control target key start
LH: loop header
LB: loop body
LE: loop exit
PB: predicated region body
PF: predicated region fallthrough
CT: control target
= control target key end

     0   :  { %11 = vsyncpa [#allocation4], 0  ;;  %s16321_s0 = inlined_call_operand.vmem [shape: f32[8,128], index: 0, kind: input, shape index: {}]   ;;  %s16322_s1 = inlined_call_operand.vmem [shape: f32[8,128], index: 1, kind: input, shape index: {}]   ;;  %s16323_s2 = inlined_call_operand.hbm [shape: bf16[8,2048,128], index: 2, kind: input, shape index: {}]   ;;  %s16324_s3 = inlined_call_operand.hbm [shape: f32[1,128], index: 3, kind: input, shape index: {}]   ;;  %s16325_s4 = inlined_call_operand.hbm [shape: bf16[128,128], index: 4, kind: input, shape index: {}]   ;;  %s16326_s5 = inlined_call_operand.hbm [shape: f32[1,128], index: 5, kind: input, shape index: {}]   ;;  %s16327_s6 = inlined_call_operand.vmem [shape: f32[8,128], index: 6, kind: output, shape index: {}]  }
   0x1   :  { %12 = vsyncpa [#allocation6], 0 }
   0x2   :  { %13 = vsyncpa [#allocation9], 0  ;;  %s15649_s21 = smov [#allocation5]   ;;  %s15650_s23 = smov [#allocation3]  }
   0x3   :  { %s36_s22 = sshll.u32 %s15649_s21, 4  ;;  %s23_s24 = sshll.u32 %s15650_s23, 4  ;;  %s37_s22 = int_to_ptr.vmem [resolvable:$true] %s36_s22  ;;  %s15820_s24 = int_to_ptr.vmem [resolvable:$true] %s23_s24 }
   0x4   :  { %s15555_s27 = scalar_lea.hbm %s16324_s3, 16 }
   0x5   :  { %p15556_p0 = scmp.ne.s32.totalorder %s16324_s3, %s15555_s27  ;;  %p15559_p1 = scmp.lt.u32.totalorder %s15555_s27, %s16324_s3 }
   0x7   :  { %p15561_p2 = pnand %p15559_p1, %p15556_p0 }
   0x9   :  { %15564 = shalt.err (!%p15561_p2)
}
   0xa   :  { %s15565_s8 = scalar_lea.vmem %s37_s22, 16  ;;  %s15569_s9 = scalar_lea.vmem %s37_s22, 32 }
   0xb   :  { %p15566_p3 = scmp.ne.s32.totalorder %s37_s22, %s15565_s8  ;;  %p15570_p4 = scmp.lt.s32.totalorder %s37_s22, %s37_s22 }
   0xc   :  { %p15571_p5 = scmp.lt.s32.totalorder %s15569_s9, %s15565_s8 }
   0xe   :  { %p15572_p6 = por %p15571_p5, %p15570_p4 }
  0x10   :  { %p15573_p7 = pnand %p15572_p6, %p15566_p3 }
  0x12   :  { %15576 = shalt.err (!%p15573_p7)
}
  0x13   :  { %39 = dma.hbm_to_vmem [thread:$0]  %s16324_s3, 16, %s37_s22, [#allocation6]  }
  0x14   :  { %s15577_s14 = scalar_lea.hbm %s16323_s2, 131072 }
  0x15   :  { %p15578_p8 = scmp.ne.s32.totalorder %s16323_s2, %s15577_s14  ;;  %p15581_p9 = scmp.lt.u32.totalorder %s15577_s14, %s16323_s2 }
  0x17   :  { %p15583_p10 = pnand %p15581_p9, %p15578_p8 }
  0x19   :  { %15586 = shalt.err (!%p15583_p10)
}
  0x1a   :  { %s15587_s19 = scalar_lea.vmem %s15820_s24, 131072  ;;  %p15592_p12 = scmp.lt.s32.totalorder %s15820_s24, %s15820_s24 }
  0x1b   :  { %p15588_p11 = scmp.ne.s32.totalorder %s15820_s24, %s15587_s19  ;;  %p15593_p13 = scmp.lt.s32.totalorder %s15587_s19, %s15587_s19 }
  0x1d   :  { %p15594_p0 = por %p15593_p13, %p15592_p12 }
  0x1f   :  { %p15595_p1 = pnand %p15594_p0, %p15588_p11 }
  0x21   :  { %15598 = shalt.err (!%p15595_p1)
}
  0x22   :  { %s15651_s3 = smov 64   ;;  %s15652_s20 = smov 4  }
  0x23   :  { %29 = dma.hbm_to_vmem [thread:$0]  %s16323_s2, 131072, %s15820_s24, [#allocation4], %s15651_s3, %s15651_s3, %s15652_s20  }
  0x24   :  { %s15653_s23 = smov [#allocation7]   ;;  %s15654_s26 = smov [#allocation8]  }
  0x25   :  { %s45_s25 = sshll.u32 %s15653_s23, 4  ;;  %s58_s27 = sshll.u32 %s15654_s26, 4  ;;  %s46_s25 = int_to_ptr.vmem [resolvable:$true] %s45_s25  ;;  %s59_s27 = int_to_ptr.vmem [resolvable:$true] %s58_s27 }
  0x26   :  { %s15599_s30 = scalar_lea.hbm %s16325_s4, 1024 }
  0x27   :  { %p15600_p2 = scmp.ne.s32.totalorder %s16325_s4, %s15599_s30  ;;  %p15603_p3 = scmp.lt.u32.totalorder %s15599_s30, %s16325_s4 }
  0x29   :  { %p15605_p4 = pnand %p15603_p3, %p15600_p2 }
  0x2b   :  { %15608 = shalt.err (!%p15605_p4)
}
  0x2c   :  { %s15609_s2 = scalar_lea.vmem %s46_s25, 1024  ;;  %p15614_p6 = scmp.lt.s32.totalorder %s46_s25, %s46_s25 }
  0x2d   :  { %p15610_p5 = scmp.ne.s32.totalorder %s46_s25, %s15609_s2  ;;  %p15615_p7 = scmp.lt.s32.totalorder %s15609_s2, %s15609_s2 }
  0x2f   :  { %p15616_p8 = por %p15615_p7, %p15614_p6 }
  0x31   :  { %p15617_p9 = pnand %p15616_p8, %p15610_p5 }
  0x33   :  { %15620 = shalt.err (!%p15617_p9)
}
  0x34   :  { %51 = dma.hbm_to_vmem [thread:$0]  %s16325_s4, 1024, %s46_s25, [#allocation6], %s15651_s3, %s15651_s3, %s15652_s20  }
  0x35   :  { %s15621_s14 = scalar_lea.hbm %s16326_s5, 16 }
  0x36   :  { %p15622_p10 = scmp.ne.s32.totalorder %s16326_s5, %s15621_s14  ;;  %p15625_p11 = scmp.lt.u32.totalorder %s15621_s14, %s16326_s5 }
  0x38   :  { %p15627_p12 = pnand %p15625_p11, %p15622_p10 }
  0x3a   :  { %15630 = shalt.err (!%p15627_p12)
}
  0x3b   :  { %s15631_s19 = scalar_lea.vmem %s59_s27, 16  ;;  %s15635_s21 = scalar_lea.vmem %s59_s27, 32 }
  0x3c   :  { %p15632_p13 = scmp.ne.s32.totalorder %s59_s27, %s15631_s19  ;;  %p15636_p0 = scmp.lt.s32.totalorder %s59_s27, %s59_s27 }
  0x3d   :  { %p15637_p1 = scmp.lt.s32.totalorder %s15635_s21, %s15631_s19 }
  0x3f   :  { %p15638_p2 = por %p15637_p1, %p15636_p0 }
  0x41   :  { %p15639_p3 = pnand %p15638_p2, %p15632_p13 }
  0x43   :  { %15642 = shalt.err (!%p15639_p3)
}
  0x44   :  { %61 = dma.hbm_to_vmem [thread:$0]  %s16326_s5, 16, %s59_s27, [#allocation9]  }
  0x45   :  { %15643 = dma.done.wait [#allocation4], 131072  }
  0x46   :  { %15644 = vsyncadd [#allocation4], 4294836224 }
  0x47   :  { %15645 = dma.done.wait [#allocation6], 1040  }
  0x48   :  { %15646 = vsyncadd [#allocation6], 4294966256 }
  0x49   :  { %15647 = dma.done.wait [#allocation9], 16  }
  0x4a   :  { %15648 = vsyncadd [#allocation9], 4294967280  ;;  %v15655_v0 = vmov 3   ;;  %v15656_v1 = vmov 1   ;;  %v15878_v2 = vld [vmem:[%s16321_s0] sm:$0xff]  ;;  %v15657_v7 = vmov 2  }
  0x4b   :  { %14377 = vset.pattern.permute.xlu1 %v15655_v0  ;;  %14375 = vset.pattern.permute.xlu0 %v15656_v1  ;;  %v14504_v3 = vld [vmem:[#allocation3 + $0x40] sm:$0xff]   ;;  %v15658_v8 = vmov 0   ;;  %v14508_v9 = vld [vmem:[#allocation3 + $0x48] sm:$0xff]   ;;  %v14512_v13 = vld [vmem:[#allocation3 + $0x50] sm:$0xff]   ;;  %v15659_v14 = vmov 5   ;;  %v15660_v15 = vmov 4  }
  0x4c   :  { %105 = vperm.xlu1 %14377, %v15878_v2   ;;  %93 = vperm.xlu0 %14375, %v15878_v2   ;;  %v14505_v4 = vld [vmem:[#allocation3 + $0xc0] sm:$0xff]   ;;  %v14509_v10 = vld [vmem:[#allocation3 + $0xc8] sm:$0xff]   ;;  %v14513_v16 = vld [vmem:[#allocation3 + $0xd0] sm:$0xff]   ;;  %v15661_v21 = vmov 7   ;;  %v15662_v22 = vmov 9   ;;  %v15663_v27 = vmov 6  }
  0x4d   :  { %12802 = vmatprep.subr.bf16.mxu0 %v14504_v3  ;;  %v14506_v5 = vld [vmem:[#allocation3] sm:$0xff]   ;;  %12824 = vmatprep.subr.bf16.mxu1 %v14505_v4  ;;  %v14510_v11 = vld [vmem:[#allocation3 + $0x8] sm:$0xff]   ;;  %v14514_v17 = vld [vmem:[#allocation3 + $0x10] sm:$0xff]   ;;  %v15664_v28 = vmov 10   ;;  %v15665_v33 = vmov 8   ;;  %v15666_v34 = vmov 15  }
  0x4e   :  { %v14507_v6 = vld [vmem:[#allocation3 + $0x80] sm:$0xff]   ;;  %12803 = vmatpush3.bf16.msra.mxu0 %v14506_v5  ;;  %v14511_v12 = vld [vmem:[#allocation3 + $0x88] sm:$0xff]   ;;  %v14515_v18 = vld [vmem:[#allocation3 + $0x90] sm:$0xff]   ;;  %v15667_v39 = vmov 11   ;;  %v15668_v41 = vmov 16   ;;  %v15669_v45 = vmov 13  }
  0x4f   :  { %12825 = vmatpush3.bf16.msra.mxu1 %v14507_v6  ;;  %12804 = vmatprep.subr.bf16.mxu0 %v14508_v9  ;;  %v14516_v19 = vld [vmem:[#allocation3 + $0x58] sm:$0xff]   ;;  %v14520_v25 = vld [vmem:[#allocation3 + $0x60] sm:$0xff]   ;;  %v14524_v31 = vld [vmem:[#allocation3 + $0x68] sm:$0xff]   ;;  %v15670_v50 = vmov 21   ;;  %v15671_v51 = vmov 12   ;;  %v15672_v52 = vmov 22  }
  0x50   :  { %14378 = vset.pattern.permute.xlu1 %v15657_v7  ;;  %14376 = vset.pattern.permute.xlu0 %v15658_v8  ;;  %v14517_v20 = vld [vmem:[#allocation3 + $0xd8] sm:$0xff]   ;;  %v14521_v26 = vld [vmem:[#allocation3 + $0xe0] sm:$0xff]   ;;  %v14525_v32 = vld [vmem:[#allocation3 + $0xe8] sm:$0xff]   ;;  %v15673_v53 = vmov 14   ;;  %v15674_v54 = vmov 17   ;;  %v15675_v55 = vmov 19  }
  0x51   :  { %99 = vperm.xlu1 %14378, %v15878_v2   ;;  %87 = vperm.xlu0 %14376, %v15878_v2   ;;  %v14518_v23 = vld [vmem:[#allocation3 + $0x18] sm:$0xff]   ;;  %v14522_v29 = vld [vmem:[#allocation3 + $0x20] sm:$0xff]   ;;  %v14526_v35 = vld [vmem:[#allocation3 + $0x28] sm:$0xff]   ;;  %v15676_v56 = vmov 18   ;;  %v15677_v57 = vmov 20   ;;  %v15678_v58 = vmov 27  }
  0x52   :  { %12826 = vmatprep.subr.bf16.mxu1 %v14509_v10  ;;  %12805 = vmatpush3.bf16.msra.mxu0 %v14510_v11  ;;  %v14519_v24 = vld [vmem:[#allocation3 + $0x98] sm:$0xff]   ;;  %v14523_v30 = vld [vmem:[#allocation3 + $0xa0] sm:$0xff]   ;;  %v14527_v36 = vld [vmem:[#allocation3 + $0xa8] sm:$0xff]   ;;  %v15679_v59 = vmov 23   ;;  %v15680_v60 = vmov 25   ;;  %v15681_v61 = vmov 24  }
  0x53   :  { %12827 = vmatpush3.bf16.msra.mxu1 %v14511_v12  ;;  %12806 = vmatprep.subr.bf16.mxu0 %v14512_v13  ;;  %v14528_v37 = vld [vmem:[#allocation3 + $0x70] sm:$0xff]   ;;  %v14532_v43 = vld [vmem:[#allocation3 + $0x78] sm:$0xff]   ;;  %v14536_v48 = vld [vmem:[#allocation3 + $0x140] sm:$0xff]   ;;  %v15682_v62 = vmov 26   ;;  %v15683_v63 = vmov 29   ;;  %v15684_v0 = vmov 31  }
  0x54   :  { %12828 = vmatprep.subr.bf16.mxu1 %v14513_v16  ;;  %v14529_v38 = vld [vmem:[#allocation3 + $0xf0] sm:$0xff]   ;;  %v14533_v44 = vld [vmem:[#allocation3 + $0xf8] sm:$0xff]   ;;  %v14537_v49 = vld [vmem:[#allocation3 + $0x1c0] sm:$0xff]   ;;  %v15685_v1 = vmov 30   ;;  %v15686_v3 = vmov 28   ;;  %v15687_v4 = vmov 32  }
  0x55   :  { %14379 = vset.pattern.permute.xlu1 %v15659_v14  ;;  %14380 = vset.pattern.permute.xlu0 %v15660_v15  ;;  %v14530_v40 = vld [vmem:[#allocation3 + $0x30] sm:$0xff]   ;;  %v14534_v46 = vld [vmem:[#allocation3 + $0x38] sm:$0xff]   ;;  %v15915_v5 = vld [vmem:[%s16322_s1] sm:$0xff]  ;;  %v15688_v8 = vmov 33   ;;  %v15689_v13 = vmov 35   ;;  %vm15784_vm0 = vmmov 0  }
  0x56   :  { %117 = vperm.xlu1 %14379, %v15878_v2   ;;  %111 = vperm.xlu0 %14380, %v15878_v2   ;;  %v14531_v42 = vld [vmem:[#allocation3 + $0xb0] sm:$0xff]   ;;  %v14535_v47 = vld [vmem:[#allocation3 + $0xb8] sm:$0xff]   ;;  %v14538_v16 = vld [vmem:[#allocation3 + $0x100] sm:$0xff]  }
  0x57   :  { %12807 = vmatpush3.bf16.msra.mxu0 %v14514_v17  ;;  %12829 = vmatpush3.bf16.msra.mxu1 %v14515_v18 }
  0x58   :  { %12808 = vmatprep.subr.bf16.mxu0 %v14516_v19  ;;  %12830 = vmatprep.subr.bf16.mxu1 %v14517_v20  ;;  %v14539_v19 = vld [vmem:[#allocation3 + $0x180] sm:$0xff]   ;;  %v15690_v20 = vmov 34  }
  0x5a   :  { %14381 = vset.pattern.permute.xlu1 %v15661_v21  ;;  %14383 = vset.pattern.permute.xlu0 %v15662_v22  ;;  %v14540_v21 = vld [vmem:[#allocation3 + $0x148] sm:$0xff]  }
  0x5b   :  { %129 = vperm.xlu1 %14381, %v15878_v2   ;;  %141 = vperm.xlu0 %14383, %v15878_v2  }
  0x5c   :  { %12809 = vmatpush3.bf16.msra.mxu0 %v14518_v23  ;;  %12831 = vmatpush3.bf16.msra.mxu1 %v14519_v24  ;;  %v14541_v24 = vld [vmem:[#allocation3 + $0x1c8] sm:$0xff]  }
  0x5d   :  { %12810 = vmatprep.subr.bf16.mxu0 %v14520_v25  ;;  %12832 = vmatprep.subr.bf16.mxu1 %v14521_v26  ;;  %v14542_v25 = vld [vmem:[#allocation3 + $0x108] sm:$0xff]  }
  0x5e   :  { %v14543_v26 = vld [vmem:[#allocation3 + $0x188] sm:$0xff]  }
  0x5f   :  { %14382 = vset.pattern.permute.xlu1 %v15663_v27  ;;  %14386 = vset.pattern.permute.xlu0 %v15664_v28  ;;  %v14544_v28 = vld [vmem:[#allocation3 + $0x150] sm:$0xff]  }
  0x60   :  { %123 = vperm.xlu1 %14382, %v15878_v2   ;;  %147 = vperm.xlu0 %14386, %v15878_v2  }
  0x61   :  { %12811 = vmatpush3.bf16.msra.mxu0 %v14522_v29  ;;  %12833 = vmatpush3.bf16.msra.mxu1 %v14523_v30  ;;  %v14545_v30 = vld [vmem:[#allocation3 + $0x1d0] sm:$0xff]  }
  0x62   :  { %12812 = vmatprep.subr.bf16.mxu0 %v14524_v31  ;;  %12834 = vmatprep.subr.bf16.mxu1 %v14525_v32  ;;  %v14546_v31 = vld [vmem:[#allocation3 + $0x110] sm:$0xff]  }
  0x64   :  { %14384 = vset.pattern.permute.xlu1 %v15665_v33  ;;  %14389 = vset.pattern.permute.xlu0 %v15666_v34  ;;  %v14547_v33 = vld [vmem:[#allocation3 + $0x190] sm:$0xff]  }
  0x65   :  { %135 = vperm.xlu1 %14384, %v15878_v2   ;;  %177 = vperm.xlu0 %14389, %v15878_v2  }
  0x66   :  { %12813 = vmatpush3.bf16.msra.mxu0 %v14526_v35  ;;  %12835 = vmatpush3.bf16.msra.mxu1 %v14527_v36  ;;  %v14549_v35 = vld [vmem:[#allocation3 + $0x1d8] sm:$0xff]  }
  0x67   :  { %12814 = vmatprep.subr.bf16.mxu0 %v14528_v37  ;;  %12836 = vmatprep.subr.bf16.mxu1 %v14529_v38  ;;  %v14550_v37 = vld [vmem:[#allocation3 + $0x118] sm:$0xff]  }
  0x68   :  { %v14551_v38 = vld [vmem:[#allocation3 + $0x198] sm:$0xff]  }
  0x69   :  { %14385 = vset.pattern.permute.xlu1 %v15667_v39  ;;  %14392 = vset.pattern.permute.xlu0 %v15668_v41  ;;  %v14553_v41 = vld [vmem:[#allocation3 + $0x1e0] sm:$0xff]  }
  0x6a   :  { %153 = vperm.xlu1 %14385, %v15878_v2   ;;  %1530 = vperm.xlu0 %14392, %v15878_v2  }
  0x6b   :  { %12815 = vmatpush3.bf16.msra.mxu0 %v14530_v40  ;;  %12837 = vmatpush3.bf16.msra.mxu1 %v14531_v42  ;;  %v14552_v40 = vld [vmem:[#allocation3 + $0x160] sm:$0xff]  }
  0x6c   :  { %12816 = vmatprep.subr.bf16.mxu0 %v14532_v43  ;;  %12838 = vmatprep.subr.bf16.mxu1 %v14533_v44  ;;  %v14554_v42 = vld [vmem:[#allocation3 + $0x120] sm:$0xff]   ;;  %v14556_v44 = vld [vmem:[#allocation3 + $0x168] sm:$0xff]  }
  0x6d   :  { %v14555_v43 = vld [vmem:[#allocation3 + $0x1a0] sm:$0xff]  }
  0x6e   :  { %14387 = vset.pattern.permute.xlu1 %v15669_v45  ;;  %14395 = vset.pattern.permute.xlu0 %v15670_v50  ;;  %v14557_v45 = vld [vmem:[#allocation3 + $0x1e8] sm:$0xff]   ;;  %v15930_v50 = vld [vmem:[%s16321_s0] sm:$0xff] }
  0x6f   :  { %165 = vperm.xlu1 %14387, %v15878_v2   ;;  %12817 = vmatpush3.bf16.msra.mxu0 %v14534_v46 }
  0x70   :  { %1560 = vperm.xlu0 %14395, %v15878_v2   ;;  %12839 = vmatpush3.bf16.msra.mxu1 %v14535_v47  ;;  %v14558_v47 = vld [vmem:[#allocation3 + $0x128] sm:$0xff]  }
  0x71   :  { %12846 = vmatprep.subr.bf16.mxu0 %v14536_v48  ;;  %12868 = vmatprep.subr.bf16.mxu1 %v14537_v49  ;;  %v15691_v48 = vmov 37   ;;  %v14559_v49 = vld [vmem:[#allocation3 + $0x1a8] sm:$0xff]  }
  0x73   :  { %14388 = vset.pattern.permute.xlu1 %v15671_v51  ;;  %v14560_v51 = vld [vmem:[#allocation3 + $0x170] sm:$0xff]  }
  0x74   :  { %159 = vperm.xlu1 %14388, %v15878_v2   ;;  %14398 = vset.pattern.permute.xlu0 %v15672_v52  ;;  %v14561_v52 = vld [vmem:[#allocation3 + $0x1f0] sm:$0xff]  }
  0x75   :  { %1566 = vperm.xlu0 %14398, %v15878_v2  }
  0x78   :  { %14390 = vset.pattern.permute.xlu1 %v15673_v53 }
  0x79   :  { %171 = vperm.xlu1 %14390, %v15878_v2   ;;  %14401 = vset.pattern.permute.xlu0 %v15678_v58  ;;  %v14565_v58 = vld [vmem:[#allocation3 + $0x178] sm:$0xff]  }
  0x7a   :  { %1596 = vperm.xlu0 %14401, %v15878_v2  }
  0x7d   :  { %14391 = vset.pattern.permute.xlu1 %v15674_v54  ;;  %v14562_v54 = vld [vmem:[#allocation3 + $0x130] sm:$0xff]  }
  0x7e   :  { %1536 = vperm.xlu1 %14391, %v15878_v2   ;;  %14404 = vset.pattern.permute.xlu0 %v15686_v3  ;;  %v14569_v3 = vld [vmem:[#allocation3 + $0x2c0] sm:$0xff]  }
  0x7f   :  { %1602 = vperm.xlu0 %14404, %v15878_v2  }
  0x82   :  { %14393 = vset.pattern.permute.xlu1 %v15675_v55  ;;  %v14563_v55 = vld [vmem:[#allocation3 + $0x1b0] sm:$0xff]  }
  0x83   :  { %1548 = vperm.xlu1 %14393, %v15878_v2   ;;  %14407 = vset.pattern.permute.xlu0 %v15688_v8 }
  0x84   :  { %2980 = vperm.xlu0 %14407, %v15878_v2  }
  0x87   :  { %14394 = vset.pattern.permute.xlu1 %v15676_v56 }
  0x88   :  { %1542 = vperm.xlu1 %14394, %v15878_v2   ;;  %14410 = vset.pattern.permute.xlu0 %v15690_v20  ;;  %v14576_v20 = vld [vmem:[#allocation3 + $0x250] sm:$0xff]  }
  0x89   :  { %2986 = vperm.xlu0 %14410, %v15878_v2  }
  0x8c   :  { %14396 = vset.pattern.permute.xlu1 %v15677_v57  ;;  %v14564_v57 = vld [vmem:[#allocation3 + $0x1f8] sm:$0xff]  }
  0x8d   :  { %1554 = vperm.xlu1 %14396, %v15878_v2  }
  0x91   :  { %14397 = vset.pattern.permute.xlu1 %v15679_v59  ;;  %v14566_v59 = vld [vmem:[#allocation3 + $0x138] sm:$0xff]  }
  0x92   :  { %1572 = vperm.xlu1 %14397, %v15878_v2  }
  0x96   :  { %14399 = vset.pattern.permute.xlu1 %v15680_v60  ;;  %v15692_v60 = vmov 36  }
  0x97   :  { %1584 = vperm.xlu1 %14399, %v15878_v2  }
  0x9b   :  { %14400 = vset.pattern.permute.xlu1 %v15681_v61 }
  0x9c   :  { %1578 = vperm.xlu1 %14400, %v15878_v2  }
  0xa0   :  { %14402 = vset.pattern.permute.xlu1 %v15682_v62 }
  0xa1   :  { %1590 = vperm.xlu1 %14402, %v15878_v2  }
  0xa5   :  { %14403 = vset.pattern.permute.xlu1 %v15683_v63  ;;  %v14567_v63 = vld [vmem:[#allocation3 + $0x1b8] sm:$0xff]  }
  0xa6   :  { %1608 = vperm.xlu1 %14403, %v15878_v2  }
  0xaa   :  { %14405 = vset.pattern.permute.xlu1 %v15684_v0 }
  0xab   :  { %1620 = vperm.xlu1 %14405, %v15878_v2  }
  0xaf   :  { %14406 = vset.pattern.permute.xlu1 %v15685_v1  ;;  %v14568_v1 = vld [vmem:[#allocation3 + $0x240] sm:$0xff]  }
  0xb0   :  { %1614 = vperm.xlu1 %14406, %v15878_v2  }
  0xb4   :  { %14408 = vset.pattern.permute.xlu1 %v15687_v4 }
  0xb5   :  { %2974 = vperm.xlu1 %14408, %v15878_v2  }
  0xb9   :  { %14409 = vset.pattern.permute.xlu1 %v15689_v13  ;;  %v15694_v13 = vmov 38  }
  0xba   :  { %2992 = vperm.xlu1 %14409, %v15878_v2   ;;  %v14548_v2 = vld [vmem:[#allocation3 + $0x158] sm:$0xff]  }
  0xbe   :  { %14411 = vset.pattern.permute.xlu1 %v15691_v48 }
  0xbf   :  { %3004 = vperm.xlu1 %14411, %v15930_v50  }
  0xc3   :  { %14412 = vset.pattern.permute.xlu1 %v15692_v60  ;;  %v15698_v60 = vmov 42  }
  0xc4   :  { %2998 = vperm.xlu1 %14412, %v15930_v50  }
  0xc8   :  { %14414 = vset.pattern.permute.xlu1 %v15694_v13  ;;  %v14616_v13 = vld [vmem:[#allocation3 + $0x360] sm:$0xff]  }
  0xc9   :  { %3010 = vperm.xlu1 %14414, %v15930_v50  }
  0xcb   :  { %v94_v6 = vpop.permute.xlu0 %93  ;;  %v106_v7 = vpop.permute.xlu1 %105 }
  0xcc   :  { %v96_v9 = vmul.f32 %v94_v6, %v15915_v5  ;;  %v108_v10 = vmul.f32 %v106_v7, %v15915_v5  ;;  %v14570_v6 = vld [vmem:[#allocation3 + $0x200] sm:$0xff]  }
  0xce   :  { %v97_v11 = vpack.c.bf16 %v96_v9, %v96_v9  ;;  %v109_v12 = vpack.c.bf16 %v108_v10, %v108_v10  ;;  %v15693_v9 = vmov 39  }
  0xcf   :  { %14413 = vset.pattern.permute.xlu0 %v15693_v9  ;;  %v14612_v9 = vld [vmem:[#allocation3 + $0x358] sm:$0xff]  }
  0xd0   :  { %v100_v14 = vpop.permute.xlu1 %99  ;;  %1239 = vmatprep.mubr.bf16.mxu0 %v97_v11  ;;  %v88_v15 = vpop.permute.xlu0 %87  ;;  %1279 = vmatprep.mubr.bf16.mxu1 %v109_v12  ;;  %v14571_v12 = vld [vmem:[#allocation3 + $0x280] sm:$0xff]  }
  0xd1   :  { %v102_v17 = vmul.f32 %v100_v14, %v15915_v5  ;;  %v90_v18 = vmul.f32 %v88_v15, %v15915_v5  ;;  %3016 = vperm.xlu0 %14413, %v15930_v50   ;;  %v14572_v14 = vld [vmem:[#allocation3 + $0x248] sm:$0xff]  }
  0xd2   :  { %v14573_v15 = vld [vmem:[#allocation3 + $0x2c8] sm:$0xff]  }
  0xd3   :  { %v103_v22 = vpack.c.bf16 %v102_v17, %v102_v17  ;;  %v91_v23 = vpack.c.bf16 %v90_v18, %v90_v18 }
  0xd5   :  { %1240 = vmatmul.mubr.bf16.vlgmr.msra.gmra.mrb[0].mxu0 %v91_v23  ;;  %1280 = vmatmul.mubr.bf16.vlgmr.msra.gmra.mrb[0].mxu1 %v103_v22  ;;  %v118_v27 = vpop.permute.xlu1 %117  ;;  %v112_v56 = vpop.permute.xlu0 %111  ;;  %v14578_v22 = vld [vmem:[#allocation3 + $0x210] sm:$0xff]  }
  0xd6   :  { %12847 = vmatpush3.bf16.msra.mxu0 %v14538_v16  ;;  %12869 = vmatpush3.bf16.msra.mxu1 %v14539_v19  ;;  %v120_v29 = vmul.f32 %v118_v27, %v15915_v5  ;;  %v114_v62 = vmul.f32 %v112_v56, %v15915_v5  ;;  %v14574_v16 = vld [vmem:[#allocation3 + $0x208] sm:$0xff]   ;;  %v14579_v23 = vld [vmem:[#allocation3 + $0x290] sm:$0xff]   ;;  %v14583_v27 = vld [vmem:[#allocation3 + $0x298] sm:$0xff]  }
  0xd7   :  { %12848 = vmatprep.subr.bf16.mxu0 %v14540_v21  ;;  %12870 = vmatprep.subr.bf16.mxu1 %v14541_v24  ;;  %v14575_v19 = vld [vmem:[#allocation3 + $0x288] sm:$0xff]   ;;  %v14577_v21 = vld [vmem:[#allocation3 + $0x2d0] sm:$0xff]   ;;  %v14580_v24 = vld [vmem:[#allocation3 + $0x258] sm:$0xff]  }
  0xd8   :  { %v121_v32 = vpack.c.bf16 %v120_v29, %v120_v29  ;;  %v115_v11 = vpack.c.bf16 %v114_v62, %v114_v62  ;;  %v14585_v29 = vld [vmem:[#allocation3 + $0x2e0] sm:$0xff]   ;;  %v14605_v62 = vld [vmem:[#allocation3 + $0x3c8] sm:$0xff]  }
  0xda   :  { %12849 = vmatpush3.bf16.msra.mxu0 %v14542_v25  ;;  %12871 = vmatpush3.bf16.msra.mxu1 %v14543_v26  ;;  %v130_v34 = vpop.permute.xlu1 %129  ;;  %v142_v4 = vpop.permute.xlu0 %141  ;;  %v14581_v25 = vld [vmem:[#allocation3 + $0x2d8] sm:$0xff]  }
  0xdb   :  { %12850 = vmatprep.subr.bf16.mxu0 %v14544_v28  ;;  %12872 = vmatprep.subr.bf16.mxu1 %v14545_v30  ;;  %v132_v36 = vmul.f32 %v130_v34, %v15915_v5  ;;  %v144_v7 = vmul.f32 %v142_v4, %v15915_v5  ;;  %v14582_v26 = vld [vmem:[#allocation3 + $0x218] sm:$0xff]   ;;  %v14584_v28 = vld [vmem:[#allocation3 + $0x260] sm:$0xff]   ;;  %v15695_v34 = vmov 41   ;;  %v14608_v4 = vld [vmem:[#allocation3 + $0x350] sm:$0xff]  }
  0xdc   :  { %1319 = vmatprep.mubr.bf16.mxu0 %v121_v32  ;;  %v14586_v30 = vld [vmem:[#allocation3 + $0x220] sm:$0xff]   ;;  %v14588_v32 = vld [vmem:[#allocation3 + $0x268] sm:$0xff]   ;;  %14415 = vset.pattern.permute.xlu1 %v15695_v34 }
  0xdd   :  { %v133_v39 = vpack.c.bf16 %v132_v36, %v132_v36  ;;  %v145_v17 = vpack.c.bf16 %v144_v7, %v144_v7  ;;  %3028 = vperm.xlu1 %14415, %v15930_v50   ;;  %v14592_v36 = vld [vmem:[#allocation3 + $0x270] sm:$0xff]   ;;  %v14632_v34 = vld [vmem:[#allocation3 + $0x440] sm:$0xff]  }
  0xde   :  { %12851 = vmatpush3.bf16.msra.mxu0 %v14546_v31  ;;  %12873 = vmatpush3.bf16.msra.mxu1 %v14547_v33  ;;  %v14587_v31 = vld [vmem:[#allocation3 + $0x2a0] sm:$0xff]   ;;  %v14589_v33 = vld [vmem:[#allocation3 + $0x2e8] sm:$0xff]   ;;  %v14610_v7 = vld [vmem:[#allocation3 + $0x310] sm:$0xff]  }
  0xdf   :  { %12852 = vmatprep.subr.bf16.mxu0 %v14548_v2  ;;  %12874 = vmatprep.subr.bf16.mxu1 %v14549_v35  ;;  %v124_v46 = vpop.permute.xlu1 %123  ;;  %v14590_v2 = vld [vmem:[#allocation3 + $0x228] sm:$0xff]  }
  0xe0   :  { %1359 = vmatprep.mubr.bf16.mxu1 %v133_v39  ;;  %v126_v61 = vmul.f32 %v124_v46, %v15915_v5  ;;  %v14591_v35 = vld [vmem:[#allocation3 + $0x2a8] sm:$0xff]   ;;  %v14595_v39 = vld [vmem:[#allocation3 + $0x2b0] sm:$0xff]   ;;  %v14599_v46 = vld [vmem:[#allocation3 + $0x2b8] sm:$0xff]  }
  0xe2   :  { %12853 = vmatpush3.bf16.msra.mxu0 %v14550_v37  ;;  %12875 = vmatpush3.bf16.msra.mxu1 %v14551_v38  ;;  %v127_v10 = vpack.c.bf16 %v126_v61, %v126_v61  ;;  %v14593_v37 = vld [vmem:[#allocation3 + $0x2f0] sm:$0xff]   ;;  %v14604_v61 = vld [vmem:[#allocation3 + $0x348] sm:$0xff]  }
  0xe3   :  { %12854 = vmatprep.subr.bf16.mxu0 %v14552_v40  ;;  %12876 = vmatprep.subr.bf16.mxu1 %v14553_v41  ;;  %v14594_v38 = vld [vmem:[#allocation3 + $0x230] sm:$0xff]   ;;  %v148_v40 = vpop.permute.xlu0 %147  ;;  %v14596_v41 = vld [vmem:[#allocation3 + $0x278] sm:$0xff]  }
  0xe4   :  { %v15933_v53 = vpop.permute.xlu1 %135 }
  0xe6   :  { %12855 = vmatpush3.bf16.msra.mxu0 %v14554_v42  ;;  %12877 = vmatpush3.bf16.msra.mxu1 %v14555_v43  ;;  %v14597_v42 = vld [vmem:[#allocation3 + $0x2f8] sm:$0xff]  }
  0xe7   :  { %12856 = vmatprep.subr.bf16.mxu0 %v14556_v44  ;;  %12878 = vmatprep.subr.bf16.mxu1 %v14557_v45  ;;  %v14598_v43 = vld [vmem:[#allocation3 + $0x238] sm:$0xff]   ;;  %v15696_v44 = vmov 43   ;;  %v150_v45 = vmul.f32 %v148_v40, %v15915_v5  ;;  %v178_v48 = vpop.permute.xlu0 %177 }
  0xe8   :  { %14417 = vset.pattern.permute.xlu1 %v15696_v44  ;;  %v180_v56 = vmul.f32 %v178_v48, %v15915_v5  ;;  %v15702_v44 = vmov 46   ;;  %v14638_v48 = vld [vmem:[#allocation3 + $0x408] sm:$0xff]  }
  0xe9   :  { %v154_v0 = vpop.permute.xlu1 %153  ;;  %3040 = vperm.xlu1 %14417, %v15930_v50  }
  0xea   :  { %12857 = vmatpush3.bf16.msra.mxu0 %v14558_v47  ;;  %12879 = vmatpush3.bf16.msra.mxu1 %v14559_v49  ;;  %v156_v8 = vmul.f32 %v154_v0, %v15915_v5  ;;  %v14600_v49 = vld [vmem:[#allocation3 + $0x340] sm:$0xff]  }
  0xeb   :  { %12858 = vmatprep.subr.bf16.mxu0 %v14560_v51  ;;  %12880 = vmatprep.subr.bf16.mxu1 %v14561_v52  ;;  %v138_v51 = vmul.f32 %v15933_v53, %v15915_v5  ;;  %v14601_v52 = vld [vmem:[#allocation3 + $0x3c0] sm:$0xff]  }
  0xec   :  { %v157_v18 = vpack.c.bf16 %v156_v8, %v156_v8  ;;  %v14611_v8 = vld [vmem:[#allocation3 + $0x390] sm:$0xff]  }
  0xed   :  { %14418 = vset.pattern.permute.xlu1 %v15698_v60  ;;  %v139_v53 = vpack.c.bf16 %v138_v51, %v138_v51  ;;  %v14647_v60 = vld [vmem:[#allocation3 + $0x498] sm:$0xff]  }
  0xee   :  { %12859 = vmatpush3.bf16.msra.mxu0 %v14562_v54  ;;  %12881 = vmatpush3.bf16.msra.mxu1 %v14563_v55  ;;  %v166_v47 = vpop.permute.xlu1 %165  ;;  %v14602_v54 = vld [vmem:[#allocation3 + $0x300] sm:$0xff]  }
  0xef   :  { %12882 = vmatprep.subr.bf16.mxu1 %v14564_v57  ;;  %12860 = vmatprep.subr.bf16.mxu0 %v14565_v58  ;;  %v168_v55 = vmul.f32 %v166_v47, %v15915_v5  ;;  %v15697_v57 = vmov 40   ;;  %v151_v58 = vpack.c.bf16 %v150_v45, %v150_v45  ;;  %v14636_v45 = vld [vmem:[#allocation3 + $0x448] sm:$0xff]  }
  0xf0   :  { %14416 = vset.pattern.permute.xlu0 %v15697_v57  ;;  %3034 = vperm.xlu1 %14418, %v15930_v50   ;;  %v14637_v47 = vld [vmem:[#allocation3 + $0x4c8] sm:$0xff]   ;;  %v14644_v57 = vld [vmem:[#allocation3 + $0x458] sm:$0xff]  }
  0xf1   :  { %3022 = vperm.xlu0 %14416, %v15930_v50   ;;  %v169_v0 = vpack.c.bf16 %v168_v55, %v168_v55  ;;  %v14642_v55 = vld [vmem:[#allocation3 + $0x410] sm:$0xff]  }
  0xf2   :  { %12861 = vmatpush3.bf16.msra.mxu0 %v14566_v59  ;;  %12883 = vmatpush3.bf16.msra.mxu1 %v14567_v63  ;;  %v14603_v59 = vld [vmem:[#allocation3 + $0x380] sm:$0xff]   ;;  %v14606_v63 = vld [vmem:[#allocation3 + $0x308] sm:$0xff]  }
  0xf3   :  { %12890 = vmatprep.subr.bf16.mxu0 %v14568_v1  ;;  %12912 = vmatprep.subr.bf16.mxu1 %v14569_v3  ;;  %v181_v1 = vpack.c.bf16 %v180_v56, %v180_v56  ;;  %v14607_v3 = vld [vmem:[#allocation3 + $0x388] sm:$0xff]   ;;  %v14643_v56 = vld [vmem:[#allocation3 + $0x490] sm:$0xff]  }
  0xf5   :  { %1320 = vmatmul.mubr.bf16.vlgmr.msra.gmra.mrb[4].mxu0 %v115_v11  ;;  %1360 = vmatmul.mubr.bf16.vlgmr.msra.gmra.mrb[4].mxu1 %v127_v10  ;;  %v14613_v10 = vld [vmem:[#allocation3 + $0x3d8] sm:$0xff]  }
  0xf6   :  { %12891 = vmatpush3.bf16.msra.mxu0 %v14570_v6  ;;  %12913 = vmatpush3.bf16.msra.mxu1 %v14571_v12  ;;  %v14609_v6 = vld [vmem:[#allocation3 + $0x3d0] sm:$0xff]   ;;  %v14614_v11 = vld [vmem:[#allocation3 + $0x318] sm:$0xff]  }
  0xf7   :  { %12892 = vmatprep.subr.bf16.mxu0 %v14572_v14  ;;  %12914 = vmatprep.subr.bf16.mxu1 %v14573_v15  ;;  %v14615_v12 = vld [vmem:[#allocation3 + $0x398] sm:$0xff]   ;;  %v14617_v14 = vld [vmem:[#allocation3 + $0x3e0] sm:$0xff]   ;;  %v160_v15 = vpop.permute.xlu1 %159 }
  0xf8   :  { %1399 = vmatprep.mubr.bf16.mxu0 %v145_v17  ;;  %1439 = vmatprep.mubr.bf16.mxu1 %v157_v18  ;;  %v14619_v17 = vld [vmem:[#allocation3 + $0x3a0] sm:$0xff]   ;;  %v14620_v18 = vld [vmem:[#allocation3 + $0x368] sm:$0xff]  }
  0xfa   :  { %12893 = vmatpush3.bf16.msra.mxu0 %v14574_v16  ;;  %12915 = vmatpush3.bf16.msra.mxu1 %v14575_v19  ;;  %v14618_v16 = vld [vmem:[#allocation3 + $0x320] sm:$0xff]   ;;  %v14621_v19 = vld [vmem:[#allocation3 + $0x3e8] sm:$0xff]  }
  0xfb   :  { %12894 = vmatprep.subr.bf16.mxu0 %v14576_v20  ;;  %12916 = vmatprep.subr.bf16.mxu1 %v14577_v21  ;;  %v14622_v20 = vld [vmem:[#allocation3 + $0x328] sm:$0xff]  }
  0xfc   :  { %v14623_v21 = vld [vmem:[#allocation3 + $0x3a8] sm:$0xff]  }
  0xfe   :  { %12895 = vmatpush3.bf16.msra.mxu0 %v14578_v22  ;;  %12917 = vmatpush3.bf16.msra.mxu1 %v14579_v23  ;;  %v172_v22 = vpop.permute.xlu1 %171  ;;  %v14624_v23 = vld [vmem:[#allocation3 + $0x370] sm:$0xff]  }
  0xff   :  { %12896 = vmatprep.subr.bf16.mxu0 %v14580_v24  ;;  %12918 = vmatprep.subr.bf16.mxu1 %v14581_v25  ;;  %v14625_v24 = vld [vmem:[#allocation3 + $0x3f0] sm:$0xff]  }
 0x100   :  { %v14626_v25 = vld [vmem:[#allocation3 + $0x330] sm:$0xff]  }
 0x102   :  { %12897 = vmatpush3.bf16.msra.mxu0 %v14582_v26  ;;  %12919 = vmatpush3.bf16.msra.mxu1 %v14583_v27  ;;  %v14627_v26 = vld [vmem:[#allocation3 + $0x3b0] sm:$0xff]   ;;  %v1537_v27 = vpop.permute.xlu1 %1536 }
 0x103   :  { %12898 = vmatprep.subr.bf16.mxu0 %v14584_v28  ;;  %12920 = vmatprep.subr.bf16.mxu1 %v14585_v29  ;;  %v15699_v28 = vmov 44   ;;  %v14628_v29 = vld [vmem:[#allocation3 + $0x378] sm:$0xff]  }
 0x104   :  { %14420 = vset.pattern.permute.xlu1 %v15699_v28 }
 0x105   :  { %3046 = vperm.xlu1 %14420, %v15930_v50  }
 0x106   :  { %12899 = vmatpush3.bf16.msra.mxu0 %v14586_v30  ;;  %12921 = vmatpush3.bf16.msra.mxu1 %v14587_v31  ;;  %v14629_v30 = vld [vmem:[#allocation3 + $0x3f8] sm:$0xff]  }
 0x107   :  { %12900 = vmatprep.subr.bf16.mxu0 %v14588_v32  ;;  %12922 = vmatprep.subr.bf16.mxu1 %v14589_v33  ;;  %v14630_v31 = vld [vmem:[#allocation3 + $0x338] sm:$0xff]   ;;  %v15700_v32 = vmov 45   ;;  %v174_v33 = vmul.f32 %v172_v22, %v15915_v5 }
 0x108   :  { %14419 = vset.pattern.permute.xlu0 %v15700_v32  ;;  %v14667_v32 = vld [vmem:[#allocation3 + $0x580] sm:$0xff]  }
 0x109   :  { %3052 = vperm.xlu0 %14419, %v15930_v50  }
 0x10a   :  { %12901 = vmatpush3.bf16.msra.mxu0 %v14590_v2  ;;  %12923 = vmatpush3.bf16.msra.mxu1 %v14591_v35  ;;  %v14631_v2 = vld [vmem:[#allocation3 + $0x3b8] sm:$0xff]   ;;  %v162_v35 = vmul.f32 %v160_v15, %v15915_v5 }
 0x10b   :  { %12902 = vmatprep.subr.bf16.mxu0 %v14592_v36  ;;  %12924 = vmatprep.subr.bf16.mxu1 %v14593_v37  ;;  %v14633_v36 = vld [vmem:[#allocation3 + $0x4c0] sm:$0xff]   ;;  %v1549_v37 = vpop.permute.xlu1 %1548  ;;  %v14661_v15 = vld [vmem:[#allocation3 + $0x4f8] sm:$0xff]  }
 0x10c   :  { %v1551_v40 = vmul.f32 %v1549_v37, %v15915_v5 }
 0x10d   :  { %14422 = vset.pattern.permute.xlu0 %v15702_v44  ;;  %v14677_v44 = vld [vmem:[#allocation3 + $0x5d8] sm:$0xff]  }
 0x10e   :  { %12903 = vmatpush3.bf16.msra.mxu0 %v14594_v38  ;;  %12925 = vmatpush3.bf16.msra.mxu1 %v14595_v39  ;;  %v14634_v38 = vld [vmem:[#allocation3 + $0x400] sm:$0xff]   ;;  %v1539_v39 = vmul.f32 %v1537_v27, %v15915_v5  ;;  %v1552_v51 = vpack.c.bf16 %v1551_v40, %v1551_v40  ;;  %v14639_v5 = vld [vmem:[#allocation3 + $0x488] sm:$0xff]   ;;  %v14673_v40 = vld [vmem:[#allocation3 + $0x5d0] sm:$0xff]  }
 0x10f   :  { %12904 = vmatprep.subr.bf16.mxu0 %v14596_v41  ;;  %12926 = vmatprep.subr.bf16.mxu1 %v14597_v42  ;;  %v15701_v41 = vmov 47   ;;  %v175_v42 = vpack.c.bf16 %v174_v33, %v174_v33  ;;  %v15706_v33 = vmov 50  }
 0x110   :  { %14421 = vset.pattern.permute.xlu1 %v15701_v41  ;;  %3058 = vperm.xlu0 %14422, %v15930_v50   ;;  %v14674_v41 = vld [vmem:[#allocation3 + $0x510] sm:$0xff]  }
 0x111   :  { %3064 = vperm.xlu1 %14421, %v15930_v50  }
 0x112   :  { %12905 = vmatpush3.bf16.msra.mxu0 %v14598_v43  ;;  %12927 = vmatpush3.bf16.msra.mxu1 %v14599_v46  ;;  %v14635_v43 = vld [vmem:[#allocation3 + $0x480] sm:$0xff]   ;;  %v163_v46 = vpack.c.bf16 %v162_v35, %v162_v35  ;;  %v14670_v35 = vld [vmem:[#allocation3 + $0x508] sm:$0xff]  }
 0x113   :  { %12934 = vmatprep.subr.bf16.mxu0 %v14600_v49  ;;  %12956 = vmatprep.subr.bf16.mxu1 %v14601_v52  ;;  %v1540_v49 = vpack.c.bf16 %v1539_v39, %v1539_v39  ;;  %v14640_v52 = vld [vmem:[#allocation3 + $0x450] sm:$0xff]  }
 0x114   :  { %v14672_v39 = vld [vmem:[#allocation3 + $0x550] sm:$0xff]  }
 0x115   :  { %1400 = vmatmul.mubr.bf16.vlgmr.msra.gmra.mrb[8].mxu0 %v139_v53  ;;  %1440 = vmatmul.mubr.bf16.vlgmr.msra.gmra.mrb[8].mxu1 %v151_v58  ;;  %v14645_v58 = vld [vmem:[#allocation3 + $0x4d8] sm:$0xff]   ;;  %v14649_v53 = vld [vmem:[#allocation3 + $0x4e0] sm:$0xff]  }
 0x116   :  { %12935 = vmatpush3.bf16.msra.mxu0 %v14602_v54  ;;  %12957 = vmatpush3.bf16.msra.mxu1 %v14603_v59  ;;  %v14641_v54 = vld [vmem:[#allocation3 + $0x4d0] sm:$0xff]   ;;  %v14646_v59 = vld [vmem:[#allocation3 + $0x418] sm:$0xff]  }
 0x117   :  { %12936 = vmatprep.subr.bf16.mxu0 %v14604_v61  ;;  %12958 = vmatprep.subr.bf16.mxu1 %v14605_v62  ;;  %v14648_v61 = vld [vmem:[#allocation3 + $0x460] sm:$0xff]  }
 0x118   :  { %1479 = vmatprep.mubr.bf16.mxu0 %v169_v0  ;;  %1519 = vmatprep.mubr.bf16.mxu1 %v181_v1  ;;  %v14650_v62 = vld [vmem:[#allocation3 + $0x420] sm:$0xff]   ;;  %v14652_v0 = vld [vmem:[#allocation3 + $0x468] sm:$0xff]  }
 0x119   :  { %v14653_v1 = vld [vmem:[#allocation3 + $0x4e8] sm:$0xff]  }
 0x11a   :  { %12937 = vmatpush3.bf16.msra.mxu0 %v14606_v63  ;;  %12959 = vmatpush3.bf16.msra.mxu1 %v14607_v3  ;;  %v14651_v63 = vld [vmem:[#allocation3 + $0x4a0] sm:$0xff]   ;;  %v1543_v3 = vpop.permute.xlu1 %1542 }
 0x11b   :  { %12938 = vmatprep.subr.bf16.mxu0 %v14608_v4  ;;  %12960 = vmatprep.subr.bf16.mxu1 %v14609_v6  ;;  %v14654_v4 = vld [vmem:[#allocation3 + $0x428] sm:$0xff]   ;;  %v15703_v6 = vmov 49  }
 0x11c   :  { %14423 = vset.pattern.permute.xlu1 %v15703_v6 }
 0x11d   :  { %4424 = vperm.xlu1 %14423, %v15930_v50  }
 0x11e   :  { %12939 = vmatpush3.bf16.msra.mxu0 %v14610_v7  ;;  %12961 = vmatpush3.bf16.msra.mxu1 %v14611_v8  ;;  %v14655_v7 = vld [vmem:[#allocation3 + $0x4a8] sm:$0xff]   ;;  %v14656_v8 = vld [vmem:[#allocation3 + $0x470] sm:$0xff]  }
 0x11f   :  { %12940 = vmatprep.subr.bf16.mxu0 %v14612_v9  ;;  %12962 = vmatprep.subr.bf16.mxu1 %v14613_v10  ;;  %v14657_v9 = vld [vmem:[#allocation3 + $0x4f0] sm:$0xff]   ;;  %v15960_v10 = vpop.permute.xlu1 %1554 }
 0x122   :  { %12941 = vmatpush3.bf16.msra.mxu0 %v14614_v11  ;;  %12963 = vmatpush3.bf16.msra.mxu1 %v14615_v12  ;;  %v14658_v11 = vld [vmem:[#allocation3 + $0x430] sm:$0xff]  }
 0x123   :  { %12942 = vmatprep.subr.bf16.mxu0 %v14616_v13  ;;  %12964 = vmatprep.subr.bf16.mxu1 %v14617_v14  ;;  %v14659_v12 = vld [vmem:[#allocation3 + $0x4b0] sm:$0xff]   ;;  %v1531_v13 = vpop.permute.xlu0 %1530  ;;  %v14660_v14 = vld [vmem:[#allocation3 + $0x478] sm:$0xff]   ;;  %v1573_v22 = vpop.permute.xlu1 %1572 }
 0x126   :  { %12943 = vmatpush3.bf16.msra.mxu0 %v14618_v16  ;;  %12965 = vmatpush3.bf16.msra.mxu1 %v14619_v17  ;;  %v14662_v16 = vld [vmem:[#allocation3 + $0x438] sm:$0xff]   ;;  %v15704_v17 = vmov 48  }
 0x127   :  { %12944 = vmatprep.subr.bf16.mxu0 %v14620_v18  ;;  %12966 = vmatprep.subr.bf16.mxu1 %v14621_v19  ;;  %v15965_v18 = vld [vmem:[%s16322_s1] sm:$0xff] }
 0x128   :  { %14424 = vset.pattern.permute.xlu1 %v15704_v17  ;;  %v1545_v19 = vmul.f32 %v15965_v18, %v1543_v3  ;;  %v1575_v28 = vmul.f32 %v15965_v18, %v1573_v22  ;;  %v14695_v3 = vld [vmem:[#allocation3 + $0x5b8] sm:$0xff]   ;;  %v15710_v17 = vmov 54  }
 0x129   :  { %4418 = vperm.xlu1 %14424, %v15930_v50   ;;  %v15975_v50 = vld [vmem:[%s16321_s0] sm:$0xff] }
 0x12a   :  { %12945 = vmatpush3.bf16.msra.mxu0 %v14622_v20  ;;  %12967 = vmatpush3.bf16.msra.mxu1 %v14623_v21  ;;  %v1533_v20 = vmul.f32 %v15965_v18, %v1531_v13  ;;  %v14663_v21 = vld [vmem:[#allocation3 + $0x4b8] sm:$0xff]   ;;  %v1576_v37 = vpack.c.bf16 %v1575_v28, %v1575_v28  ;;  %v14707_v28 = vld [vmem:[#allocation3 + $0x690] sm:$0xff]  }
 0x12b   :  { %12946 = vmatprep.subr.bf16.mxu0 %v14624_v23  ;;  %12968 = vmatprep.subr.bf16.mxu1 %v14625_v24  ;;  %v14664_v23 = vld [vmem:[#allocation3 + $0x540] sm:$0xff]  }
 0x12c   :  { %v14665_v24 = vld [vmem:[#allocation3 + $0x5c0] sm:$0xff]  }
 0x12d   :  { %14426 = vset.pattern.permute.xlu1 %v15706_v33  ;;  %v14712_v33 = vld [vmem:[#allocation3 + $0x660] sm:$0xff]  }
 0x12e   :  { %12947 = vmatpush3.bf16.msra.mxu0 %v14626_v25  ;;  %12969 = vmatpush3.bf16.msra.mxu1 %v14627_v26  ;;  %v1561_v25 = vpop.permute.xlu0 %1560  ;;  %v14666_v26 = vld [vmem:[#allocation3 + $0x500] sm:$0xff]  }
 0x12f   :  { %12948 = vmatprep.subr.bf16.mxu0 %v14628_v29  ;;  %12970 = vmatprep.subr.bf16.mxu1 %v14629_v30  ;;  %v1563_v27 = vmul.f32 %v15965_v18, %v1561_v25  ;;  %v15705_v29 = vmov 51   ;;  %v1546_v30 = vpack.c.bf16 %v1545_v19, %v1545_v19  ;;  %v14700_v19 = vld [vmem:[#allocation3 + $0x648] sm:$0xff]   ;;  %v14704_v25 = vld [vmem:[#allocation3 + $0x650] sm:$0xff]  }
 0x130   :  { %14425 = vset.pattern.permute.xlu0 %v15705_v29  ;;  %4430 = vperm.xlu1 %14426, %v15975_v50   ;;  %v14708_v29 = vld [vmem:[#allocation3 + $0x658] sm:$0xff]  }
 0x131   :  { %4436 = vperm.xlu0 %14425, %v15975_v50  }
 0x132   :  { %12949 = vmatpush3.bf16.msra.mxu0 %v14630_v31  ;;  %12971 = vmatpush3.bf16.msra.mxu1 %v14631_v2  ;;  %v1534_v31 = vpack.c.bf16 %v1533_v20, %v1533_v20  ;;  %v14668_v2 = vld [vmem:[#allocation3 + $0x548] sm:$0xff]  }
 0x133   :  { %12978 = vmatprep.subr.bf16.mxu0 %v14632_v34  ;;  %13000 = vmatprep.subr.bf16.mxu1 %v14633_v36  ;;  %v14669_v34 = vld [vmem:[#allocation3 + $0x5c8] sm:$0xff]   ;;  %v1564_v36 = vpack.c.bf16 %v1563_v27, %v1563_v27  ;;  %v14706_v27 = vld [vmem:[#allocation3 + $0x610] sm:$0xff]  }
 0x134   :  { %v14701_v20 = vld [vmem:[#allocation3 + $0x6c8] sm:$0xff]  }
 0x135   :  { %1480 = vmatmul.mubr.bf16.vlgmr.msra.gmra.mrb[12].mxu0 %v163_v46  ;;  %1520 = vmatmul.mubr.bf16.vlgmr.msra.gmra.mrb[12].mxu1 %v175_v42  ;;  %v14675_v42 = vld [vmem:[#allocation3 + $0x590] sm:$0xff]   ;;  %v14679_v46 = vld [vmem:[#allocation3 + $0x598] sm:$0xff]  }
 0x136   :  { %12979 = vmatpush3.bf16.msra.mxu0 %v14634_v38  ;;  %13001 = vmatpush3.bf16.msra.mxu1 %v14635_v43  ;;  %v14671_v38 = vld [vmem:[#allocation3 + $0x588] sm:$0xff]   ;;  %v14676_v43 = vld [vmem:[#allocation3 + $0x558] sm:$0xff]  }
 0x137   :  { %12980 = vmatprep.subr.bf16.mxu0 %v14636_v45  ;;  %13002 = vmatprep.subr.bf16.mxu1 %v14637_v47  ;;  %v14678_v45 = vld [vmem:[#allocation3 + $0x518] sm:$0xff]   ;;  %v14680_v47 = vld [vmem:[#allocation3 + $0x560] sm:$0xff]  }
 0x138   :  { %2683 = vmatprep.mubr.bf16.mxu0 %v1540_v49  ;;  %2723 = vmatprep.mubr.bf16.mxu1 %v1552_v51  ;;  %v14682_v49 = vld [vmem:[#allocation3 + $0x520] sm:$0xff]  }
 0x139   :  { %v14683_v51 = vld [vmem:[#allocation3 + $0x5a0] sm:$0xff]  }
 0x13a   :  { %12981 = vmatpush3.bf16.msra.mxu0 %v14638_v48  ;;  %13003 = vmatpush3.bf16.msra.mxu1 %v14639_v5  ;;  %v14681_v48 = vld [vmem:[#allocation3 + $0x5e0] sm:$0xff]   ;;  %v14684_v5 = vld [vmem:[#allocation3 + $0x568] sm:$0xff]  }
 0x13b   :  { %12982 = vmatprep.subr.bf16.mxu0 %v14640_v52  ;;  %13004 = vmatprep.subr.bf16.mxu1 %v14641_v54  ;;  %v14685_v52 = vld [vmem:[#allocation3 + $0x5e8] sm:$0xff]  }
 0x13c   :  { %v14686_v54 = vld [vmem:[#allocation3 + $0x528] sm:$0xff]  }
 0x13e   :  { %12983 = vmatpush3.bf16.msra.mxu0 %v14642_v55  ;;  %13005 = vmatpush3.bf16.msra.mxu1 %v14643_v56  ;;  %v15707_v55 = vmov 53   ;;  %v14687_v56 = vld [vmem:[#allocation3 + $0x5a8] sm:$0xff]  }
 0x13f   :  { %12984 = vmatprep.subr.bf16.mxu0 %v14644_v57  ;;  %13006 = vmatprep.subr.bf16.mxu1 %v14645_v58  ;;  %v14688_v57 = vld [vmem:[#allocation3 + $0x570] sm:$0xff]  }
 0x140   :  { %14427 = vset.pattern.permute.xlu1 %v15707_v55  ;;  %v14689_v58 = vld [vmem:[#allocation3 + $0x5f0] sm:$0xff]   ;;  %v14728_v55 = vld [vmem:[#allocation3 + $0x740] sm:$0xff]  }
 0x141   :  { %4448 = vperm.xlu1 %14427, %v15975_v50  }
 0x142   :  { %12985 = vmatpush3.bf16.msra.mxu0 %v14646_v59  ;;  %13007 = vmatpush3.bf16.msra.mxu1 %v14647_v60  ;;  %v14690_v59 = vld [vmem:[#allocation3 + $0x530] sm:$0xff]  }
 0x143   :  { %12986 = vmatprep.subr.bf16.mxu0 %v14648_v61  ;;  %13008 = vmatprep.subr.bf16.mxu1 %v14649_v53  ;;  %v14691_v60 = vld [vmem:[#allocation3 + $0x5b0] sm:$0xff]   ;;  %v1567_v61 = vpop.permute.xlu0 %1566  ;;  %v14692_v53 = vld [vmem:[#allocation3 + $0x578] sm:$0xff]  }
 0x146   :  { %12987 = vmatpush3.bf16.msra.mxu0 %v14650_v62  ;;  %13009 = vmatpush3.bf16.msra.mxu1 %v14651_v63  ;;  %v14693_v62 = vld [vmem:[#allocation3 + $0x5f8] sm:$0xff]  }
 0x147   :  { %12988 = vmatprep.subr.bf16.mxu0 %v14652_v0  ;;  %13010 = vmatprep.subr.bf16.mxu1 %v14653_v1  ;;  %v14694_v63 = vld [vmem:[#allocation3 + $0x538] sm:$0xff]   ;;  %v15708_v0 = vmov 55   ;;  %v1569_v1 = vmul.f32 %v15965_v18, %v1567_v61  ;;  %v1597_v6 = vpop.permute.xlu0 %1596 }
 0x148   :  { %14429 = vset.pattern.permute.xlu1 %v15708_v0  ;;  %v1599_v13 = vmul.f32 %v15965_v18, %v1597_v6  ;;  %v15714_v0 = vmov 58   ;;  %v14734_v6 = vld [vmem:[#allocation3 + $0x708] sm:$0xff]  }
 0x149   :  { %4460 = vperm.xlu1 %14429, %v15975_v50  }
 0x14a   :  { %12989 = vmatpush3.bf16.msra.mxu0 %v14654_v4  ;;  %13011 = vmatpush3.bf16.msra.mxu1 %v14655_v7  ;;  %v1585_v4 = vpop.permute.xlu1 %1584  ;;  %v14696_v7 = vld [vmem:[#allocation3 + $0x640] sm:$0xff]  }
 0x14b   :  { %12990 = vmatprep.subr.bf16.mxu0 %v14656_v8  ;;  %13012 = vmatprep.subr.bf16.mxu1 %v14657_v9  ;;  %v1557_v8 = vmul.f32 %v15965_v18, %v15960_v10  ;;  %v14697_v9 = vld [vmem:[#allocation3 + $0x6c0] sm:$0xff]  }
 0x14d   :  { %14430 = vset.pattern.permute.xlu1 %v15710_v17  ;;  %v1558_v10 = vpack.c.bf16 %v1557_v8, %v1557_v8  ;;  %v14742_v17 = vld [vmem:[#allocation3 + $0x718] sm:$0xff]  }
 0x14e   :  { %12991 = vmatpush3.bf16.msra.mxu0 %v14658_v11  ;;  %13013 = vmatpush3.bf16.msra.mxu1 %v14659_v12  ;;  %v14698_v11 = vld [vmem:[#allocation3 + $0x600] sm:$0xff]   ;;  %v1587_v12 = vmul.f32 %v15965_v18, %v1585_v4  ;;  %v14733_v4 = vld [vmem:[#allocation3 + $0x7c8] sm:$0xff]  }
 0x14f   :  { %12992 = vmatprep.subr.bf16.mxu0 %v14660_v14  ;;  %13014 = vmatprep.subr.bf16.mxu1 %v14661_v15  ;;  %v15709_v14 = vmov 52   ;;  %v1570_v15 = vpack.c.bf16 %v1569_v1, %v1569_v1  ;;  %v14732_v1 = vld [vmem:[#allocation3 + $0x748] sm:$0xff]  }
 0x150   :  { %14428 = vset.pattern.permute.xlu0 %v15709_v14  ;;  %v1588_v22 = vpack.c.bf16 %v1587_v12, %v1587_v12  ;;  %4454 = vperm.xlu1 %14430, %v15975_v50   ;;  %v14737_v12 = vld [vmem:[#allocation3 + $0x7d0] sm:$0xff]  }
 0x151   :  { %4442 = vperm.xlu0 %14428, %v15975_v50   ;;  %v14739_v14 = vld [vmem:[#allocation3 + $0x790] sm:$0xff]  }
 0x152   :  { %12993 = vmatpush3.bf16.msra.mxu0 %v14662_v16  ;;  %13015 = vmatpush3.bf16.msra.mxu1 %v14663_v21  ;;  %v14699_v16 = vld [vmem:[#allocation3 + $0x680] sm:$0xff]   ;;  %v14702_v21 = vld [vmem:[#allocation3 + $0x608] sm:$0xff]  }
 0x153   :  { %13022 = vmatprep.subr.bf16.mxu0 %v14664_v23  ;;  %13044 = vmatprep.subr.bf16.mxu1 %v14665_v24  ;;  %v1600_v23 = vpack.c.bf16 %v1599_v13, %v1599_v13  ;;  %v14703_v24 = vld [vmem:[#allocation3 + $0x688] sm:$0xff]   ;;  %v14738_v13 = vld [vmem:[#allocation3 + $0x710] sm:$0xff]  }
 0x155   :  { %2684 = vmatmul.mubr.bf16.vlgmr.msra.gmra.mrb[16].mxu0 %v1534_v31  ;;  %2724 = vmatmul.mubr.bf16.vlgmr.msra.gmra.mrb[16].mxu1 %v1546_v30  ;;  %v14709_v30 = vld [vmem:[#allocation3 + $0x6d8] sm:$0xff]  }
 0x156   :  { %13023 = vmatpush3.bf16.msra.mxu0 %v14666_v26  ;;  %13045 = vmatpush3.bf16.msra.mxu1 %v14667_v32  ;;  %v14705_v26 = vld [vmem:[#allocation3 + $0x6d0] sm:$0xff]   ;;  %v14710_v31 = vld [vmem:[#allocation3 + $0x618] sm:$0xff]  }
 0x157   :  { %13024 = vmatprep.subr.bf16.mxu0 %v14668_v2  ;;  %13046 = vmatprep.subr.bf16.mxu1 %v14669_v34  ;;  %v14711_v32 = vld [vmem:[#allocation3 + $0x698] sm:$0xff]   ;;  %v14713_v2 = vld [vmem:[#allocation3 + $0x6e0] sm:$0xff]   ;;  %v1579_v34 = vpop.permute.xlu1 %1578 }
 0x158   :  { %2763 = vmatprep.mubr.bf16.mxu0 %v1564_v36  ;;  %2803 = vmatprep.mubr.bf16.mxu1 %v1576_v37  ;;  %v14715_v36 = vld [vmem:[#allocation3 + $0x6a0] sm:$0xff]   ;;  %v14716_v37 = vld [vmem:[#allocation3 + $0x668] sm:$0xff]  }
 0x15a   :  { %13025 = vmatpush3.bf16.msra.mxu0 %v14670_v35  ;;  %13047 = vmatpush3.bf16.msra.mxu1 %v14671_v38  ;;  %v14714_v35 = vld [vmem:[#allocation3 + $0x620] sm:$0xff]   ;;  %v14717_v38 = vld [vmem:[#allocation3 + $0x6e8] sm:$0xff]  }
 0x15b   :  { %13026 = vmatprep.subr.bf16.mxu0 %v14672_v39  ;;  %13048 = vmatprep.subr.bf16.mxu1 %v14673_v40  ;;  %v14718_v39 = vld [vmem:[#allocation3 + $0x628] sm:$0xff]  }
 0x15c   :  { %v14719_v40 = vld [vmem:[#allocation3 + $0x6a8] sm:$0xff]  }
 0x15e   :  { %13027 = vmatpush3.bf16.msra.mxu0 %v14674_v41  ;;  %13049 = vmatpush3.bf16.msra.mxu1 %v14675_v42  ;;  %v1591_v41 = vpop.permute.xlu1 %1590  ;;  %v14720_v42 = vld [vmem:[#allocation3 + $0x670] sm:$0xff]  }
 0x15f   :  { %13028 = vmatprep.subr.bf16.mxu0 %v14676_v43  ;;  %13050 = vmatprep.subr.bf16.mxu1 %v14677_v44  ;;  %v14721_v43 = vld [vmem:[#allocation3 + $0x6f0] sm:$0xff]  }
 0x160   :  { %v14722_v44 = vld [vmem:[#allocation3 + $0x630] sm:$0xff]  }
 0x162   :  { %13029 = vmatpush3.bf16.msra.mxu0 %v14678_v45  ;;  %13051 = vmatpush3.bf16.msra.mxu1 %v14679_v46  ;;  %v14723_v45 = vld [vmem:[#allocation3 + $0x6b0] sm:$0xff]   ;;  %v1609_v46 = vpop.permute.xlu1 %1608 }
 0x163   :  { %13030 = vmatprep.subr.bf16.mxu0 %v14680_v47  ;;  %13052 = vmatprep.subr.bf16.mxu1 %v14681_v48  ;;  %v14724_v47 = vld [vmem:[#allocation3 + $0x678] sm:$0xff]  }
 0x164   :  { %v14725_v48 = vld [vmem:[#allocation3 + $0x6f8] sm:$0xff]  }
 0x166   :  { %13031 = vmatpush3.bf16.msra.mxu0 %v14682_v49  ;;  %13053 = vmatpush3.bf16.msra.mxu1 %v14683_v51  ;;  %v14726_v49 = vld [vmem:[#allocation3 + $0x638] sm:$0xff]   ;;  %v15711_v51 = vmov 56  }
 0x167   :  { %13032 = vmatprep.subr.bf16.mxu0 %v14684_v5  ;;  %13054 = vmatprep.subr.bf16.mxu1 %v14685_v52  ;;  %v15712_v5 = vmov 57   ;;  %v1593_v52 = vmul.f32 %v15965_v18, %v1591_v41 }
 0x168   :  { %14432 = vset.pattern.permute.xlu1 %v15711_v51  ;;  %14431 = vset.pattern.permute.xlu0 %v15712_v5  ;;  %v14759_v51 = vld [vmem:[#allocation3 + $0x7b8] sm:$0xff]  }
 0x169   :  { %4466 = vperm.xlu1 %14432, %v15975_v50   ;;  %4472 = vperm.xlu0 %14431, %v15975_v50  }
 0x16a   :  { %13033 = vmatpush3.bf16.msra.mxu0 %v14686_v54  ;;  %13055 = vmatpush3.bf16.msra.mxu1 %v14687_v56  ;;  %v14727_v54 = vld [vmem:[#allocation3 + $0x6b8] sm:$0xff]   ;;  %v1581_v56 = vmul.f32 %v15965_v18, %v1579_v34 }
 0x16b   :  { %13034 = vmatprep.subr.bf16.mxu0 %v14688_v57  ;;  %13056 = vmatprep.subr.bf16.mxu1 %v14689_v58  ;;  %v14729_v57 = vld [vmem:[#allocation3 + $0x7c0] sm:$0xff]   ;;  %v1621_v58 = vpop.permute.xlu1 %1620 }
 0x16c   :  { %v1623_v61 = vmul.f32 %v15965_v18, %v1621_v58 }
 0x16d   :  { %14434 = vset.pattern.permute.xlu0 %v15714_v0  ;;  %v14765_v0 = vld [vmem:[#allocation3 + $0x8c8] sm:$0xff]  }
 0x16e   :  { %13035 = vmatpush3.bf16.msra.mxu0 %v14690_v59  ;;  %13057 = vmatpush3.bf16.msra.mxu1 %v14691_v60  ;;  %v14730_v59 = vld [vmem:[#allocation3 + $0x700] sm:$0xff]   ;;  %v1611_v60 = vmul.f32 %v15965_v18, %v1609_v46  ;;  %v1624_v8 = vpack.c.bf16 %v1623_v61, %v1623_v61 }
 0x16f   :  { %13036 = vmatprep.subr.bf16.mxu0 %v14692_v53  ;;  %13058 = vmatprep.subr.bf16.mxu1 %v14693_v62  ;;  %v1594_v53 = vpack.c.bf16 %v1593_v52, %v1593_v52  ;;  %v14731_v62 = vld [vmem:[#allocation3 + $0x780] sm:$0xff]  }
 0x170   :  { %4478 = vperm.xlu0 %14434, %v15975_v50   ;;  %v14760_v52 = vld [vmem:[#allocation3 + $0x840] sm:$0xff]  }
 0x172   :  { %13037 = vmatpush3.bf16.msra.mxu0 %v14694_v63  ;;  %13059 = vmatpush3.bf16.msra.mxu1 %v14695_v3  ;;  %v15713_v63 = vmov 59   ;;  %v1582_v3 = vpack.c.bf16 %v1581_v56, %v1581_v56  ;;  %v14762_v56 = vld [vmem:[#allocation3 + $0x800] sm:$0xff]  }
 0x173   :  { %13066 = vmatprep.subr.bf16.mxu0 %v14696_v7  ;;  %13088 = vmatprep.subr.bf16.mxu1 %v14697_v9  ;;  %v1612_v7 = vpack.c.bf16 %v1611_v60, %v1611_v60  ;;  %v14735_v9 = vld [vmem:[#allocation3 + $0x788] sm:$0xff]   ;;  %v15717_v60 = vmov 63  }
 0x174   :  { %14433 = vset.pattern.permute.xlu1 %v15713_v63  ;;  %14437 = vset.pattern.permute.xlu0 %v15717_v60  ;;  %v14764_v63 = vld [vmem:[#allocation3 + $0x848] sm:$0xff]   ;;  %v14795_v60 = vld [vmem:[#allocation3 + $0x980] sm:$0xff]  }
 0x175   :  { %2764 = vmatmul.mubr.bf16.vlgmr.msra.gmra.mrb[20].mxu0 %v1558_v10  ;;  %2804 = vmatmul.mubr.bf16.vlgmr.msra.gmra.mrb[20].mxu1 %v1570_v15  ;;  %v14740_v15 = vld [vmem:[#allocation3 + $0x758] sm:$0xff]   ;;  %v14744_v10 = vld [vmem:[#allocation3 + $0x760] sm:$0xff]  }
 0x176   :  { %13067 = vmatpush3.bf16.msra.mxu0 %v14698_v11  ;;  %13089 = vmatpush3.bf16.msra.mxu1 %v14699_v16  ;;  %v14736_v11 = vld [vmem:[#allocation3 + $0x750] sm:$0xff]   ;;  %v14741_v16 = vld [vmem:[#allocation3 + $0x7d8] sm:$0xff]  }
 0x177   :  { %13068 = vmatprep.subr.bf16.mxu0 %v14700_v19  ;;  %13090 = vmatprep.subr.bf16.mxu1 %v14701_v20  ;;  %v14743_v19 = vld [vmem:[#allocation3 + $0x798] sm:$0xff]   ;;  %v14745_v20 = vld [vmem:[#allocation3 + $0x7e0] sm:$0xff]  }
 0x178   :  { %2843 = vmatprep.mubr.bf16.mxu0 %v1588_v22  ;;  %2883 = vmatprep.mubr.bf16.mxu1 %v1600_v23  ;;  %v14747_v22 = vld [vmem:[#allocation3 + $0x7a0] sm:$0xff]   ;;  %v14748_v23 = vld [vmem:[#allocation3 + $0x768] sm:$0xff]  }
 0x179   :  { %4484 = vperm.xlu1 %14433, %v15975_v50   ;;  %4508 = vperm.xlu0 %14437, %v15975_v50  }
 0x17a   :  { %13069 = vmatpush3.bf16.msra.mxu0 %v14702_v21  ;;  %13091 = vmatpush3.bf16.msra.mxu1 %v14703_v24  ;;  %v14746_v21 = vld [vmem:[#allocation3 + $0x720] sm:$0xff]   ;;  %v14749_v24 = vld [vmem:[#allocation3 + $0x7e8] sm:$0xff]  }
 0x17b   :  { %13070 = vmatprep.subr.bf16.mxu0 %v14704_v25  ;;  %13092 = vmatprep.subr.bf16.mxu1 %v14705_v26  ;;  %v1615_v25 = vpop.permute.xlu1 %1614  ;;  %v14750_v26 = vld [vmem:[#allocation3 + $0x728] sm:$0xff]  }
 0x17e   :  { %13071 = vmatpush3.bf16.msra.mxu0 %v14706_v27  ;;  %13093 = vmatpush3.bf16.msra.mxu1 %v14707_v28  ;;  %v15715_v27 = vmov 61   ;;  %v14751_v28 = vld [vmem:[#allocation3 + $0x7a8] sm:$0xff]  }
 0x17f   :  { %13072 = vmatprep.subr.bf16.mxu0 %v14708_v29  ;;  %13094 = vmatprep.subr.bf16.mxu1 %v14709_v30  ;;  %v14752_v29 = vld [vmem:[#allocation3 + $0x770] sm:$0xff]  }
 0x180   :  { %14435 = vset.pattern.permute.xlu1 %v15715_v27  ;;  %v14753_v30 = vld [vmem:[#allocation3 + $0x7f0] sm:$0xff]  }
 0x181   :  { %4496 = vperm.xlu1 %14435, %v15975_v50  }
 0x182   :  { %13073 = vmatpush3.bf16.msra.mxu0 %v14710_v31  ;;  %13095 = vmatpush3.bf16.msra.mxu1 %v14711_v32  ;;  %v1603_v31 = vpop.permute.xlu0 %1602  ;;  %v15997_v32 = vpop.permute.xlu1 %2974 }
 0x183   :  { %13074 = vmatprep.subr.bf16.mxu0 %v14712_v33  ;;  %13096 = vmatprep.subr.bf16.mxu1 %v14713_v2 }
 0x186   :  { %13075 = vmatpush3.bf16.msra.mxu0 %v14714_v35  ;;  %13097 = vmatpush3.bf16.msra.mxu1 %v14715_v36  ;;  %v14754_v36 = vld [vmem:[#allocation3 + $0x730] sm:$0xff]   ;;  %v2993_v5 = vpop.permute.xlu1 %2992 }
 0x187   :  { %13076 = vmatprep.subr.bf16.mxu0 %v14716_v37  ;;  %13098 = vmatprep.subr.bf16.mxu1 %v14717_v38  ;;  %v14755_v37 = vld [vmem:[#allocation3 + $0x7b0] sm:$0xff]   ;;  %v2995_v58 = vmul.f32 %v15965_v18, %v2993_v5  ;;  %v14792_v5 = vld [vmem:[#allocation3 + $0x940] sm:$0xff]  }
 0x18a   :  { %13077 = vmatpush3.bf16.msra.mxu0 %v14718_v39  ;;  %13099 = vmatpush3.bf16.msra.mxu1 %v14719_v40 }
 0x18b   :  { %13078 = vmatprep.subr.bf16.mxu0 %v14720_v42  ;;  %13100 = vmatprep.subr.bf16.mxu1 %v14721_v43 }
 0x18e   :  { %13079 = vmatpush3.bf16.msra.mxu0 %v14722_v44  ;;  %13101 = vmatpush3.bf16.msra.mxu1 %v14723_v45  ;;  %v14756_v44 = vld [vmem:[#allocation3 + $0x778] sm:$0xff]  }
 0x18f   :  { %13080 = vmatprep.subr.bf16.mxu0 %v14724_v47  ;;  %13102 = vmatprep.subr.bf16.mxu1 %v14725_v48  ;;  %v14757_v45 = vld [vmem:[#allocation3 + $0x7f8] sm:$0xff]   ;;  %v1617_v48 = vmul.f32 %v15965_v18, %v1615_v25  ;;  %v14784_v25 = vld [vmem:[#allocation3 + $0x870] sm:$0xff]  }
 0x190   :  { %v14758_v47 = vld [vmem:[#allocation3 + $0x738] sm:$0xff]  }
 0x191   :  { %v1618_v61 = vpack.c.bf16 %v1617_v48, %v1617_v48  ;;  %v3005_v48 = vpop.permute.xlu1 %3004 }
 0x192   :  { %13081 = vmatpush3.bf16.msra.mxu0 %v14726_v49  ;;  %13103 = vmatpush3.bf16.msra.mxu1 %v14727_v54  ;;  %v1605_v49 = vmul.f32 %v15965_v18, %v1603_v31  ;;  %v14761_v54 = vld [vmem:[#allocation3 + $0x8c0] sm:$0xff]   ;;  %v14787_v31 = vld [vmem:[#allocation3 + $0x8b0] sm:$0xff]  }
 0x193   :  { %13110 = vmatprep.subr.bf16.mxu0 %v14728_v55  ;;  %13132 = vmatprep.subr.bf16.mxu1 %v14729_v57  ;;  %v2981_v55 = vpop.permute.xlu0 %2980 }
 0x194   :  { %v2983_v57 = vmul.f32 %v15965_v18, %v2981_v55  ;;  %v2996_v18 = vpack.c.bf16 %v2995_v58, %v2995_v58  ;;  %v15721_v58 = vmov 64  }
 0x195   :  { %2844 = vmatmul.mubr.bf16.vlgmr.msra.gmra.mrb[24].mxu0 %v1582_v3  ;;  %2884 = vmatmul.mubr.bf16.vlgmr.msra.gmra.mrb[24].mxu1 %v1594_v53  ;;  %v1606_v53 = vpack.c.bf16 %v1605_v49, %v1605_v49 }
 0x196   :  { %13111 = vmatpush3.bf16.msra.mxu0 %v14730_v59  ;;  %13133 = vmatpush3.bf16.msra.mxu1 %v14731_v62  ;;  %v15716_v59 = vmov 60   ;;  %v14763_v62 = vld [vmem:[#allocation3 + $0x880] sm:$0xff]   ;;  %v2984_v3 = vpack.c.bf16 %v2983_v57, %v2983_v57  ;;  %v15720_v57 = vmov 67  }
 0x197   :  { %13112 = vmatprep.subr.bf16.mxu0 %v14732_v1  ;;  %13134 = vmatprep.subr.bf16.mxu1 %v14733_v4  ;;  %v14766_v1 = vld [vmem:[#allocation3 + $0x808] sm:$0xff]   ;;  %v2987_v27 = vpop.permute.xlu0 %2986 }
 0x198   :  { %2923 = vmatprep.mubr.bf16.mxu0 %v1612_v7  ;;  %2963 = vmatprep.mubr.bf16.mxu1 %v1624_v8  ;;  %v14767_v4 = vld [vmem:[#allocation3 + $0x888] sm:$0xff]   ;;  %v14769_v7 = vld [vmem:[#allocation3 + $0x8d0] sm:$0xff]  }
 0x199   :  { %14436 = vset.pattern.permute.xlu1 %v15716_v59  ;;  %v14770_v8 = vld [vmem:[#allocation3 + $0x810] sm:$0xff]   ;;  %14440 = vset.pattern.permute.xlu0 %v15721_v58  ;;  %v14828_v58 = vld [vmem:[#allocation3 + $0xa48] sm:$0xff]  }
 0x19a   :  { %13113 = vmatpush3.bf16.msra.mxu0 %v14734_v6  ;;  %13135 = vmatpush3.bf16.msra.mxu1 %v14735_v9  ;;  %v14768_v6 = vld [vmem:[#allocation3 + $0x850] sm:$0xff]   ;;  %v15718_v9 = vmov 62  }
 0x19b   :  { %13114 = vmatprep.subr.bf16.mxu0 %v14736_v11  ;;  %13136 = vmatprep.subr.bf16.mxu1 %v14737_v12  ;;  %v14772_v11 = vld [vmem:[#allocation3 + $0x858] sm:$0xff]   ;;  %v3017_v49 = vpop.permute.xlu0 %3016 }
 0x19c   :  { %4490 = vperm.xlu1 %14436, %v15975_v50   ;;  %v14771_v50 = vld [vmem:[#allocation3 + $0x890] sm:$0xff]   ;;  %v14773_v12 = vld [vmem:[#allocation3 + $0x8d8] sm:$0xff]  }
 0x19e   :  { %13115 = vmatpush3.bf16.msra.mxu0 %v14738_v13  ;;  %13137 = vmatpush3.bf16.msra.mxu1 %v14739_v14  ;;  %v14774_v13 = vld [vmem:[#allocation3 + $0x818] sm:$0xff]   ;;  %v16010_v14 = vld [vmem:[%s16321_s0] sm:$0xff] }
 0x19f   :  { %13116 = vmatprep.subr.bf16.mxu0 %v14740_v15  ;;  %13138 = vmatprep.subr.bf16.mxu1 %v14741_v16  ;;  %v14775_v15 = vld [vmem:[#allocation3 + $0x898] sm:$0xff]   ;;  %v14776_v16 = vld [vmem:[#allocation3 + $0x860] sm:$0xff]  }
 0x1a0   :  { %14438 = vset.pattern.permute.xlu1 %v15718_v9  ;;  %5862 = vperm.xlu0 %14440, %v16010_v14   ;;  %v14806_v9 = vld [vmem:[#allocation3 + $0x918] sm:$0xff]  }
 0x1a1   :  { %4502 = vperm.xlu1 %14438, %v16010_v14  }
 0x1a2   :  { %13117 = vmatpush3.bf16.msra.mxu0 %v14742_v17  ;;  %13139 = vmatpush3.bf16.msra.mxu1 %v14743_v19  ;;  %v14777_v17 = vld [vmem:[#allocation3 + $0x8e0] sm:$0xff]  }
 0x1a3   :  { %13118 = vmatprep.subr.bf16.mxu0 %v14744_v10  ;;  %13140 = vmatprep.subr.bf16.mxu1 %v14745_v20  ;;  %v14778_v19 = vld [vmem:[#allocation3 + $0x820] sm:$0xff]   ;;  %v14780_v20 = vld [vmem:[#allocation3 + $0x868] sm:$0xff]  }
 0x1a4   :  { %v14779_v10 = vld [vmem:[#allocation3 + $0x8a0] sm:$0xff]  }
 0x1a6   :  { %13119 = vmatpush3.bf16.msra.mxu0 %v14746_v21  ;;  %13141 = vmatpush3.bf16.msra.mxu1 %v14747_v22  ;;  %v14781_v21 = vld [vmem:[#allocation3 + $0x8e8] sm:$0xff]  }
 0x1a7   :  { %13120 = vmatprep.subr.bf16.mxu0 %v14748_v23  ;;  %13142 = vmatprep.subr.bf16.mxu1 %v14749_v24  ;;  %v14782_v22 = vld [vmem:[#allocation3 + $0x828] sm:$0xff]   ;;  %v15719_v23 = vmov 65  }
 0x1a8   :  { %v12818_v33 = vpop.f32.mrb[0].mxu0  ;;  %v12840_v2 = vpop.f32.mrb[0].mxu1  ;;  %14439 = vset.pattern.permute.xlu1 %v15719_v23  ;;  %v14783_v24 = vld [vmem:[#allocation3 + $0x8a8] sm:$0xff]   ;;  %v14816_v23 = vld [vmem:[#allocation3 + $0x970] sm:$0xff]  }
 0x1a9   :  { %v12819_v34 = vpop.f32.mrb[1].mxu0  ;;  %v12841_v35 = vpop.f32.mrb[1].mxu1  ;;  %5868 = vperm.xlu1 %14439, %v16010_v14  }
 0x1aa   :  { %v12820_v38 = vadd.f32 %v12819_v34, %v12818_v33  ;;  %v12842_v39 = vadd.f32 %v12841_v35, %v12840_v2  ;;  %13121 = vmatpush3.bf16.msra.mxu0 %v14750_v26  ;;  %13143 = vmatpush3.bf16.msra.mxu1 %v14751_v28  ;;  %v12843_v40 = vpop.f32.mrb[2].mxu1  ;;  %v12821_v41 = vpop.f32.mrb[2].mxu0  ;;  %v14785_v26 = vld [vmem:[#allocation3 + $0x8f0] sm:$0xff]  }
 0x1ab   :  { %v12844_v42 = vpop.f32.mrb[3].mxu1  ;;  %v12822_v43 = vpop.f32.mrb[3].mxu0  ;;  %13122 = vmatprep.subr.bf16.mxu0 %v14752_v29  ;;  %13144 = vmatprep.subr.bf16.mxu1 %v14753_v30  ;;  %v14786_v30 = vld [vmem:[#allocation3 + $0x830] sm:$0xff]   ;;  %v14788_v40 = vld [vmem:[#allocation3 + $0x878] sm:$0xff]  }
 0x1ac   :  { %v15999_v46 = vadd.f32 %v12842_v39, %v12820_v38  ;;  %v14789_v41 = vld [vmem:[#allocation3 + $0x8f8] sm:$0xff]  }
 0x1ad   :  { %v14790_v43 = vld [vmem:[#allocation3 + $0x838] sm:$0xff]   ;;  %14441 = vset.pattern.permute.xlu1 %v15720_v57  ;;  %v14827_v57 = vld [vmem:[#allocation3 + $0xa80] sm:$0xff]  }
 0x1ae   :  { %13123 = vmatpush3.bf16.msra.mxu0 %v14754_v36  ;;  %13145 = vmatpush3.bf16.msra.mxu1 %v14755_v37 }
 0x1af   :  { %13124 = vmatprep.subr.bf16.mxu0 %v14756_v44  ;;  %13146 = vmatprep.subr.bf16.mxu1 %v14757_v45  ;;  %v16018_v44 = vld [vmem:[%s16322_s1] sm:$0xff] }
 0x1b0   :  { %v2989_v45 = vmul.f32 %v16018_v44, %v2987_v27  ;;  %v3007_v55 = vmul.f32 %v16018_v44, %v3005_v48  ;;  %5880 = vperm.xlu1 %14441, %v16010_v14   ;;  %v14824_v48 = vld [vmem:[#allocation3 + $0xa40] sm:$0xff]  }
 0x1b2   :  { %13125 = vmatpush3.bf16.msra.mxu0 %v14758_v47  ;;  %13147 = vmatpush3.bf16.msra.mxu1 %v14759_v51  ;;  %v14791_v47 = vld [vmem:[#allocation3 + $0x8b8] sm:$0xff]   ;;  %v2990_v59 = vpack.c.bf16 %v2989_v45, %v2989_v45  ;;  %v15723_v45 = vmov 68  }
 0x1b3   :  { %13154 = vmatprep.subr.bf16.mxu0 %v14760_v52  ;;  %13176 = vmatprep.subr.bf16.mxu1 %v14761_v54  ;;  %v2977_v52 = vmul.f32 %v16018_v44, %v15997_v32  ;;  %v14794_v54 = vld [vmem:[#allocation3 + $0x900] sm:$0xff]   ;;  %v14796_v32 = vld [vmem:[#allocation3 + $0x948] sm:$0xff]  }
 0x1b5   :  { %2924 = vmatmul.mubr.bf16.vlgmr.msra.gmra.mrb[28].mxu0 %v1606_v53  ;;  %2964 = vmatmul.mubr.bf16.vlgmr.msra.gmra.mrb[28].mxu1 %v1618_v61  ;;  %v2978_v61 = vpack.c.bf16 %v2977_v52, %v2977_v52  ;;  %v14797_v53 = vld [vmem:[#allocation3 + $0x9c8] sm:$0xff]  }
 0x1b6   :  { %13155 = vmatpush3.bf16.msra.mxu0 %v14762_v56  ;;  %13177 = vmatpush3.bf16.msra.mxu1 %v14763_v62  ;;  %v3019_v56 = vmul.f32 %v16018_v44, %v3017_v49  ;;  %v14798_v62 = vld [vmem:[#allocation3 + $0x908] sm:$0xff]  }
 0x1b7   :  { %13156 = vmatprep.subr.bf16.mxu0 %v14764_v63  ;;  %13178 = vmatprep.subr.bf16.mxu1 %v14765_v0  ;;  %v3008_v63 = vpack.c.bf16 %v3007_v55, %v3007_v55  ;;  %v15724_v55 = vmov 69  }
 0x1b8   :  { %4127 = vmatprep.mubr.bf16.mxu0 %v2984_v3  ;;  %4167 = vmatprep.mubr.bf16.mxu1 %v2996_v18  ;;  %v3020_v0 = vpack.c.bf16 %v3019_v56, %v3019_v56  ;;  %v14800_v3 = vld [vmem:[#allocation3 + $0x950] sm:$0xff]  }
 0x1b9   :  { %v14801_v18 = vld [vmem:[#allocation3 + $0x9d0] sm:$0xff]   ;;  %14443 = vset.pattern.permute.xlu0 %v15724_v55  ;;  %v15729_v55 = vmov 75  }
 0x1ba   :  { %13157 = vmatpush3.bf16.msra.mxu0 %v14766_v1  ;;  %13179 = vmatpush3.bf16.msra.mxu1 %v14767_v4  ;;  %v14799_v1 = vld [vmem:[#allocation3 + $0x988] sm:$0xff]   ;;  %v14802_v4 = vld [vmem:[#allocation3 + $0x910] sm:$0xff]  }
 0x1bb   :  { %13158 = vmatprep.subr.bf16.mxu0 %v14768_v6  ;;  %13180 = vmatprep.subr.bf16.mxu1 %v14769_v7  ;;  %v14803_v6 = vld [vmem:[#allocation3 + $0x990] sm:$0xff]   ;;  %v15722_v7 = vmov 66  }
 0x1bc   :  { %14442 = vset.pattern.permute.xlu1 %v15722_v7  ;;  %5892 = vperm.xlu0 %14443, %v16010_v14   ;;  %v14837_v7 = vld [vmem:[#allocation3 + $0xad8] sm:$0xff]  }
 0x1bd   :  { %5874 = vperm.xlu1 %14442, %v16010_v14  }
 0x1be   :  { %13159 = vmatpush3.bf16.msra.mxu0 %v14770_v8  ;;  %13181 = vmatpush3.bf16.msra.mxu1 %v14771_v50  ;;  %v14804_v8 = vld [vmem:[#allocation3 + $0x958] sm:$0xff]  }
 0x1bf   :  { %13160 = vmatprep.subr.bf16.mxu0 %v14772_v11  ;;  %13182 = vmatprep.subr.bf16.mxu1 %v14773_v12  ;;  %v14805_v50 = vld [vmem:[#allocation3 + $0x9d8] sm:$0xff]   ;;  %v2999_v12 = vpop.permute.xlu1 %2998 }
 0x1c0   :  { %v14807_v11 = vld [vmem:[#allocation3 + $0x998] sm:$0xff]   ;;  %v3001_v49 = vmul.f32 %v16018_v44, %v2999_v12  ;;  %v14842_v12 = vld [vmem:[#allocation3 + $0xa20] sm:$0xff]  }
 0x1c1   :  { %14444 = vset.pattern.permute.xlu1 %v15723_v45 }
 0x1c2   :  { %13161 = vmatpush3.bf16.msra.mxu0 %v14774_v13  ;;  %13183 = vmatpush3.bf16.msra.mxu1 %v14775_v15  ;;  %v14808_v13 = vld [vmem:[#allocation3 + $0x960] sm:$0xff]  }
 0x1c3   :  { %13162 = vmatprep.subr.bf16.mxu0 %v14776_v16  ;;  %13184 = vmatprep.subr.bf16.mxu1 %v14777_v17  ;;  %v14809_v15 = vld [vmem:[#allocation3 + $0x9e0] sm:$0xff]  }
 0x1c4   :  { %v14810_v16 = vld [vmem:[#allocation3 + $0x920] sm:$0xff]   ;;  %5886 = vperm.xlu1 %14444, %v16010_v14  }
 0x1c5   :  { %v14811_v17 = vld [vmem:[#allocation3 + $0x9a0] sm:$0xff]  }
 0x1c6   :  { %13163 = vmatpush3.bf16.msra.mxu0 %v14778_v19  ;;  %13185 = vmatpush3.bf16.msra.mxu1 %v14779_v10  ;;  %v14812_v19 = vld [vmem:[#allocation3 + $0x968] sm:$0xff]  }
 0x1c7   :  { %13164 = vmatprep.subr.bf16.mxu0 %v14780_v20  ;;  %13186 = vmatprep.subr.bf16.mxu1 %v14781_v21  ;;  %v14813_v10 = vld [vmem:[#allocation3 + $0x9e8] sm:$0xff]   ;;  %v3011_v20 = vpop.permute.xlu1 %3010 }
 0x1c8   :  { %v12862_v28 = vpop.f32.mrb[4].mxu0  ;;  %v12884_v29 = vpop.f32.mrb[4].mxu1  ;;  %v14814_v21 = vld [vmem:[#allocation3 + $0x928] sm:$0xff]  }
 0x1c9   :  { %v12863_v33 = vpop.f32.mrb[5].mxu0  ;;  %v12885_v2 = vpop.f32.mrb[5].mxu1 }
 0x1ca   :  { %v12864_v34 = vadd.f32 %v12863_v33, %v12862_v28  ;;  %v12886_v35 = vadd.f32 %v12885_v2, %v12884_v29  ;;  %v12865_v36 = vpop.f32.mrb[6].mxu0  ;;  %v12887_v37 = vpop.f32.mrb[6].mxu1  ;;  %13165 = vmatpush3.bf16.msra.mxu0 %v14782_v22  ;;  %13187 = vmatpush3.bf16.msra.mxu1 %v14783_v24  ;;  %v14815_v22 = vld [vmem:[#allocation3 + $0x9a8] sm:$0xff]   ;;  %v14817_v24 = vld [vmem:[#allocation3 + $0x9f0] sm:$0xff]  }
 0x1cb   :  { %v12888_v38 = vpop.f32.mrb[7].mxu1  ;;  %v12866_v39 = vpop.f32.mrb[7].mxu0  ;;  %13166 = vmatprep.subr.bf16.mxu0 %v14784_v25  ;;  %13188 = vmatprep.subr.bf16.mxu1 %v14785_v26  ;;  %v14818_v28 = vld [vmem:[#allocation3 + $0x930] sm:$0xff]   ;;  %v14820_v36 = vld [vmem:[#allocation3 + $0x978] sm:$0xff]  }
 0x1cc   :  { %v1322_v42 = vadd.f32 %v12864_v34, %v15999_v46  ;;  %v14793_v46 = vld [vmem:[#allocation3 + $0x9c0] sm:$0xff]   ;;  %v3029_v25 = vpop.permute.xlu1 %3028  ;;  %v14819_v29 = vld [vmem:[#allocation3 + $0x9b0] sm:$0xff]   ;;  %v14821_v37 = vld [vmem:[#allocation3 + $0x9f8] sm:$0xff]  }
 0x1ce   :  { %v16021_v51 = vadd.f32 %v12886_v35, %v1322_v42  ;;  %13167 = vmatpush3.bf16.msra.mxu0 %v14786_v30  ;;  %13189 = vmatpush3.bf16.msra.mxu1 %v14787_v31  ;;  %v3013_v42 = vmul.f32 %v16018_v44, %v3011_v20  ;;  %v14847_v20 = vld [vmem:[#allocation3 + $0xaa8] sm:$0xff]  }
 0x1cf   :  { %13168 = vmatprep.subr.bf16.mxu0 %v14788_v40  ;;  %13190 = vmatprep.subr.bf16.mxu1 %v14789_v41  ;;  %v14822_v41 = vld [vmem:[#allocation3 + $0x938] sm:$0xff]  }
 0x1d0   :  { %v3041_v52 = vpop.permute.xlu1 %3040  ;;  %v3014_v56 = vpack.c.bf16 %v3013_v42, %v3013_v42 }
 0x1d2   :  { %13169 = vmatpush3.bf16.msra.mxu0 %v14790_v43  ;;  %13191 = vmatpush3.bf16.msra.mxu1 %v14791_v47  ;;  %v14823_v43 = vld [vmem:[#allocation3 + $0x9b8] sm:$0xff]  }
 0x1d3   :  { %13198 = vmatprep.subr.bf16.mxu0 %v14792_v5  ;;  %13220 = vmatprep.subr.bf16.mxu1 %v14793_v46  ;;  %v14825_v5 = vld [vmem:[#allocation3 + $0xac0] sm:$0xff]  }
 0x1d4   :  { %v14826_v46 = vld [vmem:[#allocation3 + $0xa00] sm:$0xff]  }
 0x1d5   :  { %4128 = vmatmul.mubr.bf16.vlgmr.msra.gmra.mrb[32].mxu0 %v2978_v61  ;;  %4168 = vmatmul.mubr.bf16.vlgmr.msra.gmra.mrb[32].mxu1 %v2990_v59  ;;  %v3002_v59 = vpack.c.bf16 %v3001_v49, %v3001_v49  ;;  %v14856_v49 = vld [vmem:[#allocation3 + $0xb40] sm:$0xff]  }
 0x1d6   :  { %13199 = vmatpush3.bf16.msra.mxu0 %v14794_v54  ;;  %13221 = vmatpush3.bf16.msra.mxu1 %v14795_v60  ;;  %v3043_v54 = vmul.f32 %v16018_v44, %v3041_v52  ;;  %v14829_v60 = vld [vmem:[#allocation3 + $0xac8] sm:$0xff]  }
 0x1d7   :  { %13200 = vmatprep.subr.bf16.mxu0 %v14796_v32  ;;  %13222 = vmatprep.subr.bf16.mxu1 %v14797_v53  ;;  %v14830_v32 = vld [vmem:[#allocation3 + $0xa08] sm:$0xff]  }
 0x1d8   :  { %4207 = vmatprep.mubr.bf16.mxu0 %v3008_v63  ;;  %4247 = vmatprep.mubr.bf16.mxu1 %v3020_v0  ;;  %v3044_v53 = vpack.c.bf16 %v3043_v54, %v3043_v54  ;;  %v14831_v63 = vld [vmem:[#allocation3 + $0xa88] sm:$0xff]   ;;  %v14832_v0 = vld [vmem:[#allocation3 + $0xa50] sm:$0xff]   ;;  %v15728_v54 = vmov 72  }
 0x1da   :  { %13201 = vmatpush3.bf16.msra.mxu0 %v14798_v62  ;;  %13223 = vmatpush3.bf16.msra.mxu1 %v14799_v1  ;;  %v15725_v62 = vmov 71   ;;  %v14833_v1 = vld [vmem:[#allocation3 + $0xad0] sm:$0xff]  }
 0x1db   :  { %13202 = vmatprep.subr.bf16.mxu0 %v14800_v3  ;;  %13224 = vmatprep.subr.bf16.mxu1 %v14801_v18  ;;  %v14834_v3 = vld [vmem:[#allocation3 + $0xa10] sm:$0xff]  }
 0x1dc   :  { %14445 = vset.pattern.permute.xlu1 %v15725_v62  ;;  %v14835_v18 = vld [vmem:[#allocation3 + $0xa90] sm:$0xff]   ;;  %v14863_v62 = vld [vmem:[#allocation3 + $0xb88] sm:$0xff]  }
 0x1dd   :  { %5904 = vperm.xlu1 %14445, %v16010_v14  }
 0x1de   :  { %13203 = vmatpush3.bf16.msra.mxu0 %v14802_v4  ;;  %13225 = vmatpush3.bf16.msra.mxu1 %v14803_v6  ;;  %v15726_v4 = vmov 70   ;;  %v14836_v6 = vld [vmem:[#allocation3 + $0xa58] sm:$0xff]  }
 0x1df   :  { %13204 = vmatprep.subr.bf16.mxu0 %v14804_v8  ;;  %13226 = vmatprep.subr.bf16.mxu1 %v14805_v50  ;;  %v14838_v8 = vld [vmem:[#allocation3 + $0xa18] sm:$0xff]  }
 0x1e0   :  { %14446 = vset.pattern.permute.xlu0 %v15726_v4  ;;  %v14839_v50 = vld [vmem:[#allocation3 + $0xa98] sm:$0xff]  }
 0x1e1   :  { %5898 = vperm.xlu0 %14446, %v16010_v14   ;;  %v14868_v4 = vld [vmem:[#allocation3 + $0xb58] sm:$0xff]  }
 0x1e2   :  { %13205 = vmatpush3.bf16.msra.mxu0 %v14806_v9  ;;  %13227 = vmatpush3.bf16.msra.mxu1 %v14807_v11  ;;  %v14840_v9 = vld [vmem:[#allocation3 + $0xa60] sm:$0xff]  }
 0x1e3   :  { %13206 = vmatprep.subr.bf16.mxu0 %v14808_v13  ;;  %13228 = vmatprep.subr.bf16.mxu1 %v14809_v15  ;;  %v14841_v11 = vld [vmem:[#allocation3 + $0xae0] sm:$0xff]   ;;  %v14844_v15 = vld [vmem:[#allocation3 + $0xa68] sm:$0xff]  }
 0x1e4   :  { %v14843_v13 = vld [vmem:[#allocation3 + $0xaa0] sm:$0xff]  }
 0x1e5   :  { %14449 = vset.pattern.permute.xlu0 %v15729_v55  ;;  %v14891_v55 = vld [vmem:[#allocation3 + $0xc80] sm:$0xff]  }
 0x1e6   :  { %13207 = vmatpush3.bf16.msra.mxu0 %v14810_v16  ;;  %13229 = vmatpush3.bf16.msra.mxu1 %v14811_v17  ;;  %v14845_v16 = vld [vmem:[#allocation3 + $0xae8] sm:$0xff]   ;;  %v3035_v17 = vpop.permute.xlu1 %3034 }
 0x1e7   :  { %13208 = vmatprep.subr.bf16.mxu0 %v14812_v19  ;;  %13230 = vmatprep.subr.bf16.mxu1 %v14813_v10  ;;  %v14846_v19 = vld [vmem:[#allocation3 + $0xa28] sm:$0xff]   ;;  %v15727_v10 = vmov 73  }
 0x1e8   :  { %v12906_v26 = vpop.f32.mrb[8].mxu0  ;;  %v12928_v27 = vpop.f32.mrb[8].mxu1  ;;  %14447 = vset.pattern.permute.xlu1 %v15727_v10  ;;  %5928 = vperm.xlu0 %14449, %v16010_v14   ;;  %v14880_v10 = vld [vmem:[#allocation3 + $0xb70] sm:$0xff]  }
 0x1e9   :  { %v12907_v30 = vpop.f32.mrb[9].mxu0  ;;  %v12929_v31 = vpop.f32.mrb[9].mxu1  ;;  %5916 = vperm.xlu1 %14447, %v16010_v14  }
 0x1ea   :  { %v12908_v33 = vadd.f32 %v12907_v30, %v12906_v26  ;;  %v12930_v2 = vadd.f32 %v12929_v31, %v12928_v27  ;;  %v12909_v34 = vpop.f32.mrb[10].mxu0  ;;  %v12931_v35 = vpop.f32.mrb[10].mxu1  ;;  %13209 = vmatpush3.bf16.msra.mxu0 %v14814_v21  ;;  %13231 = vmatpush3.bf16.msra.mxu1 %v14815_v22  ;;  %v14848_v21 = vld [vmem:[#allocation3 + $0xa70] sm:$0xff]  }
 0x1eb   :  { %v12910_v38 = vpop.f32.mrb[11].mxu0  ;;  %v12932_v39 = vpop.f32.mrb[11].mxu1  ;;  %13210 = vmatprep.subr.bf16.mxu0 %v14816_v23  ;;  %13232 = vmatprep.subr.bf16.mxu1 %v14817_v24  ;;  %v14849_v22 = vld [vmem:[#allocation3 + $0xaf0] sm:$0xff]  }
 0x1ec   :  { %v1402_v40 = vadd.f32 %v12908_v33, %v16021_v51  ;;  %v3031_v51 = vmul.f32 %v16018_v44, %v3029_v25  ;;  %v3023_v23 = vpop.permute.xlu0 %3022  ;;  %v16042_v24 = vpop.permute.xlu1 %3046  ;;  %v14851_v30 = vld [vmem:[#allocation3 + $0xab0] sm:$0xff]   ;;  %v14853_v38 = vld [vmem:[#allocation3 + $0xaf8] sm:$0xff]  }
 0x1ed   :  { %v3025_v42 = vmul.f32 %v16018_v44, %v3023_v23  ;;  %14448 = vset.pattern.permute.xlu1 %v15728_v54 }
 0x1ee   :  { %v16032_v47 = vadd.f32 %v12930_v2, %v1402_v40  ;;  %13211 = vmatpush3.bf16.msra.mxu0 %v14818_v28  ;;  %13233 = vmatpush3.bf16.msra.mxu1 %v14819_v29  ;;  %v3032_v61 = vpack.c.bf16 %v3031_v51, %v3031_v51  ;;  %v14850_v29 = vld [vmem:[#allocation3 + $0xa30] sm:$0xff]   ;;  %v14854_v40 = vld [vmem:[#allocation3 + $0xa38] sm:$0xff]  }
 0x1ef   :  { %13212 = vmatprep.subr.bf16.mxu0 %v14820_v36  ;;  %13234 = vmatprep.subr.bf16.mxu1 %v14821_v37  ;;  %v14852_v37 = vld [vmem:[#allocation3 + $0xa78] sm:$0xff]  }
 0x1f0   :  { %v3065_v45 = vpop.permute.xlu1 %3064  ;;  %v3053_v52 = vpop.permute.xlu0 %3052  ;;  %5910 = vperm.xlu1 %14448, %v16010_v14  }
 0x1f1   :  { %v3055_v51 = vmul.f32 %v16018_v44, %v3053_v52  ;;  %v14890_v52 = vld [vmem:[#allocation3 + $0xc00] sm:$0xff]  }
 0x1f2   :  { %13213 = vmatpush3.bf16.msra.mxu0 %v14822_v41  ;;  %13235 = vmatpush3.bf16.msra.mxu1 %v14823_v43  ;;  %v3037_v41 = vmul.f32 %v16018_v44, %v3035_v17  ;;  %v14855_v43 = vld [vmem:[#allocation3 + $0xab8] sm:$0xff]   ;;  %v15731_v17 = vmov 77  }
 0x1f3   :  { %13242 = vmatprep.subr.bf16.mxu0 %v14824_v48  ;;  %13264 = vmatprep.subr.bf16.mxu1 %v14825_v5  ;;  %v14857_v5 = vld [vmem:[#allocation3 + $0xbc0] sm:$0xff]  }
 0x1f5   :  { %4208 = vmatmul.mubr.bf16.vlgmr.msra.gmra.mrb[36].mxu0 %v3002_v59  ;;  %4248 = vmatmul.mubr.bf16.vlgmr.msra.gmra.mrb[36].mxu1 %v3014_v56  ;;  %v3038_v56 = vpack.c.bf16 %v3037_v41, %v3037_v41  ;;  %v14860_v59 = vld [vmem:[#allocation3 + $0xb48] sm:$0xff]   ;;  %v4425_v41 = vpop.permute.xlu1 %4424 }
 0x1f6   :  { %13243 = vmatpush3.bf16.msra.mxu0 %v14826_v46  ;;  %13265 = vmatpush3.bf16.msra.mxu1 %v14827_v57  ;;  %v14858_v46 = vld [vmem:[#allocation3 + $0xb00] sm:$0xff]   ;;  %v3026_v57 = vpack.c.bf16 %v3025_v42, %v3025_v42 }
 0x1f7   :  { %13244 = vmatprep.subr.bf16.mxu0 %v14828_v58  ;;  %13266 = vmatprep.subr.bf16.mxu1 %v14829_v60  ;;  %v14859_v58 = vld [vmem:[#allocation3 + $0xb80] sm:$0xff]   ;;  %v14861_v60 = vld [vmem:[#allocation3 + $0xbc8] sm:$0xff]  }
 0x1f8   :  { %4287 = vmatprep.mubr.bf16.mxu0 %v3032_v61  ;;  %4327 = vmatprep.mubr.bf16.mxu1 %v3044_v53  ;;  %v3056_v61 = vpack.c.bf16 %v3055_v51, %v3055_v51  ;;  %v15732_v51 = vmov 79  }
 0x1fa   :  { %13245 = vmatpush3.bf16.msra.mxu0 %v14830_v32  ;;  %13267 = vmatpush3.bf16.msra.mxu1 %v14831_v63  ;;  %v14862_v32 = vld [vmem:[#allocation3 + $0xb08] sm:$0xff]   ;;  %v14864_v63 = vld [vmem:[#allocation3 + $0xb50] sm:$0xff]  }
 0x1fb   :  { %13246 = vmatprep.subr.bf16.mxu0 %v14832_v0  ;;  %13268 = vmatprep.subr.bf16.mxu1 %v14833_v1  ;;  %v14865_v0 = vld [vmem:[#allocation3 + $0xbd0] sm:$0xff]  }
 0x1fc   :  { %v14866_v1 = vld [vmem:[#allocation3 + $0xb10] sm:$0xff]  }
 0x1fe   :  { %13247 = vmatpush3.bf16.msra.mxu0 %v14834_v3  ;;  %13269 = vmatpush3.bf16.msra.mxu1 %v14835_v18  ;;  %v14867_v3 = vld [vmem:[#allocation3 + $0xb90] sm:$0xff]   ;;  %v15730_v18 = vmov 74  }
 0x1ff   :  { %13248 = vmatprep.subr.bf16.mxu0 %v14836_v6  ;;  %13270 = vmatprep.subr.bf16.mxu1 %v14837_v7  ;;  %v14869_v6 = vld [vmem:[#allocation3 + $0xbd8] sm:$0xff]  }
 0x200   :  { %14450 = vset.pattern.permute.xlu1 %v15730_v18  ;;  %v14870_v7 = vld [vmem:[#allocation3 + $0xb18] sm:$0xff]  }
 0x201   :  { %5922 = vperm.xlu1 %14450, %v16010_v14   ;;  %v16057_v14 = vld [vmem:[%s16321_s0] sm:$0xff]  ;;  %v14902_v18 = vld [vmem:[#allocation3 + $0xc18] sm:$0xff]  }
 0x202   :  { %13249 = vmatpush3.bf16.msra.mxu0 %v14838_v8  ;;  %13271 = vmatpush3.bf16.msra.mxu1 %v14839_v50  ;;  %v14871_v8 = vld [vmem:[#allocation3 + $0xb98] sm:$0xff]   ;;  %v14872_v50 = vld [vmem:[#allocation3 + $0xb60] sm:$0xff]  }
 0x203   :  { %13250 = vmatprep.subr.bf16.mxu0 %v14840_v9  ;;  %13272 = vmatprep.subr.bf16.mxu1 %v14841_v11  ;;  %v14873_v9 = vld [vmem:[#allocation3 + $0xbe0] sm:$0xff]  }
 0x204   :  { %v14874_v11 = vld [vmem:[#allocation3 + $0xb20] sm:$0xff]  }
 0x205   :  { %14451 = vset.pattern.permute.xlu1 %v15731_v17  ;;  %v14912_v17 = vld [vmem:[#allocation3 + $0xc70] sm:$0xff]  }
 0x206   :  { %13251 = vmatpush3.bf16.msra.mxu0 %v14842_v12  ;;  %13273 = vmatpush3.bf16.msra.mxu1 %v14843_v13  ;;  %v14875_v12 = vld [vmem:[#allocation3 + $0xba0] sm:$0xff]   ;;  %v14876_v13 = vld [vmem:[#allocation3 + $0xb68] sm:$0xff]  }
 0x207   :  { %13252 = vmatprep.subr.bf16.mxu0 %v14844_v15  ;;  %13274 = vmatprep.subr.bf16.mxu1 %v14845_v16  ;;  %v14877_v15 = vld [vmem:[#allocation3 + $0xbe8] sm:$0xff]  }
 0x208   :  { %v12950_v25 = vpop.f32.mrb[12].mxu0  ;;  %v12972_v26 = vpop.f32.mrb[12].mxu1  ;;  %v14878_v16 = vld [vmem:[#allocation3 + $0xb28] sm:$0xff]   ;;  %5940 = vperm.xlu1 %14451, %v16057_v14  }
 0x209   :  { %v12951_v27 = vpop.f32.mrb[13].mxu0  ;;  %v12973_v28 = vpop.f32.mrb[13].mxu1 }
 0x20a   :  { %v12952_v31 = vadd.f32 %v12951_v27, %v12950_v25  ;;  %v12974_v33 = vadd.f32 %v12973_v28, %v12972_v26  ;;  %v12953_v2 = vpop.f32.mrb[14].mxu0  ;;  %v12975_v34 = vpop.f32.mrb[14].mxu1  ;;  %13253 = vmatpush3.bf16.msra.mxu0 %v14846_v19  ;;  %13275 = vmatpush3.bf16.msra.mxu1 %v14847_v20  ;;  %v14879_v19 = vld [vmem:[#allocation3 + $0xba8] sm:$0xff]   ;;  %v14881_v20 = vld [vmem:[#allocation3 + $0xbf0] sm:$0xff]  }
 0x20b   :  { %v12954_v35 = vpop.f32.mrb[15].mxu0  ;;  %v12976_v36 = vpop.f32.mrb[15].mxu1  ;;  %13254 = vmatprep.subr.bf16.mxu0 %v14848_v21  ;;  %13276 = vmatprep.subr.bf16.mxu1 %v14849_v22  ;;  %v14882_v25 = vld [vmem:[#allocation3 + $0xb30] sm:$0xff]  }
 0x20c   :  { %v1482_v39 = vadd.f32 %v12952_v31, %v16032_v47  ;;  %v3067_v47 = vmul.f32 %v16018_v44, %v3065_v45  ;;  %v3059_v21 = vpop.permute.xlu0 %3058  ;;  %v14883_v26 = vld [vmem:[#allocation3 + $0xbb0] sm:$0xff]   ;;  %v14884_v35 = vld [vmem:[#allocation3 + $0xb78] sm:$0xff]   ;;  %v16066_v45 = vld [vmem:[%s16322_s1] sm:$0xff]  ;;  %14453 = vset.pattern.permute.xlu1 %v15732_v51 }
 0x20d   :  { %v14885_v36 = vld [vmem:[#allocation3 + $0xbf8] sm:$0xff]   ;;  %5952 = vperm.xlu1 %14453, %v16057_v14  }
 0x20e   :  { %v16047_v48 = vadd.f32 %v12974_v33, %v1482_v39  ;;  %13255 = vmatpush3.bf16.msra.mxu0 %v14850_v29  ;;  %13277 = vmatpush3.bf16.msra.mxu1 %v14851_v30  ;;  %v3068_v53 = vpack.c.bf16 %v3067_v47, %v3067_v47  ;;  %v3061_v39 = vmul.f32 %v16018_v44, %v3059_v21  ;;  %v15733_v47 = vmov 76  }
 0x20f   :  { %13256 = vmatprep.subr.bf16.mxu0 %v14852_v37  ;;  %13278 = vmatprep.subr.bf16.mxu1 %v14853_v38  ;;  %v14886_v38 = vld [vmem:[#allocation3 + $0xb38] sm:$0xff]   ;;  %v4427_v44 = vmul.f32 %v16066_v45, %v4425_v41 }
 0x210   :  { %v4437_v42 = vpop.permute.xlu0 %4436  ;;  %14452 = vset.pattern.permute.xlu0 %v15733_v47  ;;  %v3062_v54 = vpack.c.bf16 %v3061_v39, %v3061_v39  ;;  %v14919_v39 = vld [vmem:[#allocation3 + $0xcb8] sm:$0xff]   ;;  %v14923_v47 = vld [vmem:[#allocation3 + $0xd80] sm:$0xff]  }
 0x211   :  { %5934 = vperm.xlu0 %14452, %v16057_v14  }
 0x212   :  { %13257 = vmatpush3.bf16.msra.mxu0 %v14854_v40  ;;  %13279 = vmatpush3.bf16.msra.mxu1 %v14855_v43  ;;  %v14887_v40 = vld [vmem:[#allocation3 + $0xbb8] sm:$0xff]   ;;  %v14888_v43 = vld [vmem:[#allocation3 + $0xc40] sm:$0xff]  }
 0x213   :  { %13286 = vmatprep.subr.bf16.mxu0 %v14856_v49  ;;  %13308 = vmatprep.subr.bf16.mxu1 %v14857_v5  ;;  %v3049_v49 = vmul.f32 %v16066_v45, %v16042_v24  ;;  %v14889_v5 = vld [vmem:[#allocation3 + $0xcc0] sm:$0xff]   ;;  %v14892_v24 = vld [vmem:[#allocation3 + $0xc48] sm:$0xff]  }
 0x215   :  { %4288 = vmatmul.mubr.bf16.vlgmr.msra.gmra.mrb[40].mxu0 %v3026_v57  ;;  %4328 = vmatmul.mubr.bf16.vlgmr.msra.gmra.mrb[40].mxu1 %v3038_v56  ;;  %v3050_v56 = vpack.c.bf16 %v3049_v49, %v3049_v49  ;;  %v14893_v57 = vld [vmem:[#allocation3 + $0xcc8] sm:$0xff]   ;;  %v14921_v49 = vld [vmem:[#allocation3 + $0xdc0] sm:$0xff]  }
 0x216   :  { %13287 = vmatpush3.bf16.msra.mxu0 %v14858_v46  ;;  %13309 = vmatpush3.bf16.msra.mxu1 %v14859_v58  ;;  %v4439_v46 = vmul.f32 %v16066_v45, %v4437_v42  ;;  %v14894_v58 = vld [vmem:[#allocation3 + $0xc08] sm:$0xff]   ;;  %v14920_v42 = vld [vmem:[#allocation3 + $0xd40] sm:$0xff]  }
 0x217   :  { %13288 = vmatprep.subr.bf16.mxu0 %v14860_v59  ;;  %13310 = vmatprep.subr.bf16.mxu1 %v14861_v60  ;;  %v4428_v59 = vpack.c.bf16 %v4427_v44, %v4427_v44 }
 0x218   :  { %4367 = vmatprep.mubr.bf16.mxu0 %v3056_v61  ;;  %4407 = vmatprep.mubr.bf16.mxu1 %v3068_v53  ;;  %v4440_v60 = vpack.c.bf16 %v4439_v46, %v4439_v46  ;;  %v14896_v61 = vld [vmem:[#allocation3 + $0xc50] sm:$0xff]   ;;  %v15736_v46 = vmov 81  }
 0x219   :  { %v14897_v53 = vld [vmem:[#allocation3 + $0xcd0] sm:$0xff]   ;;  %14455 = vset.pattern.permute.xlu0 %v15736_v46  ;;  %v15740_v46 = vmov 84  }
 0x21a   :  { %13289 = vmatpush3.bf16.msra.mxu0 %v14862_v32  ;;  %13311 = vmatpush3.bf16.msra.mxu1 %v14863_v62  ;;  %v14895_v32 = vld [vmem:[#allocation3 + $0xc88] sm:$0xff]   ;;  %v14898_v62 = vld [vmem:[#allocation3 + $0xc10] sm:$0xff]  }
 0x21b   :  { %13290 = vmatprep.subr.bf16.mxu0 %v14864_v63  ;;  %13312 = vmatprep.subr.bf16.mxu1 %v14865_v0  ;;  %v14899_v63 = vld [vmem:[#allocation3 + $0xc90] sm:$0xff]   ;;  %v15734_v0 = vmov 78  }
 0x21c   :  { %14454 = vset.pattern.permute.xlu1 %v15734_v0  ;;  %7312 = vperm.xlu0 %14455, %v16057_v14   ;;  %v14932_v0 = vld [vmem:[#allocation3 + $0xd58] sm:$0xff]  }
 0x21d   :  { %5946 = vperm.xlu1 %14454, %v16057_v14  }
 0x21e   :  { %13291 = vmatpush3.bf16.msra.mxu0 %v14866_v1  ;;  %13313 = vmatpush3.bf16.msra.mxu1 %v14867_v3  ;;  %v14900_v1 = vld [vmem:[#allocation3 + $0xc58] sm:$0xff]  }
 0x21f   :  { %13292 = vmatprep.subr.bf16.mxu0 %v14868_v4  ;;  %13314 = vmatprep.subr.bf16.mxu1 %v14869_v6  ;;  %v14901_v3 = vld [vmem:[#allocation3 + $0xcd8] sm:$0xff]   ;;  %v4419_v6 = vpop.permute.xlu1 %4418 }
 0x220   :  { %v14903_v4 = vld [vmem:[#allocation3 + $0xc98] sm:$0xff]  }
 0x222   :  { %13293 = vmatpush3.bf16.msra.mxu0 %v14870_v7  ;;  %13315 = vmatpush3.bf16.msra.mxu1 %v14871_v8  ;;  %v14904_v7 = vld [vmem:[#allocation3 + $0xc60] sm:$0xff]  }
 0x223   :  { %13294 = vmatprep.subr.bf16.mxu0 %v14872_v50  ;;  %13316 = vmatprep.subr.bf16.mxu1 %v14873_v9  ;;  %v14905_v8 = vld [vmem:[#allocation3 + $0xce0] sm:$0xff]  }
 0x224   :  { %v14906_v50 = vld [vmem:[#allocation3 + $0xc20] sm:$0xff]  }
 0x225   :  { %v14907_v9 = vld [vmem:[#allocation3 + $0xca0] sm:$0xff]  }
 0x226   :  { %13295 = vmatpush3.bf16.msra.mxu0 %v14874_v11  ;;  %13317 = vmatpush3.bf16.msra.mxu1 %v14875_v12  ;;  %v14908_v11 = vld [vmem:[#allocation3 + $0xc68] sm:$0xff]  }
 0x227   :  { %13296 = vmatprep.subr.bf16.mxu0 %v14876_v13  ;;  %13318 = vmatprep.subr.bf16.mxu1 %v14877_v15  ;;  %v14909_v12 = vld [vmem:[#allocation3 + $0xce8] sm:$0xff]   ;;  %v4431_v13 = vpop.permute.xlu1 %4430 }
 0x228   :  { %v12994_v22 = vpop.f32.mrb[16].mxu0  ;;  %v13016_v23 = vpop.f32.mrb[16].mxu1  ;;  %v14910_v15 = vld [vmem:[#allocation3 + $0xc28] sm:$0xff]  }
 0x229   :  { %v12995_v27 = vpop.f32.mrb[17].mxu0  ;;  %v13017_v28 = vpop.f32.mrb[17].mxu1 }
 0x22a   :  { %v12996_v29 = vadd.f32 %v12995_v27, %v12994_v22  ;;  %v13018_v30 = vadd.f32 %v13017_v28, %v13016_v23  ;;  %v12997_v31 = vpop.f32.mrb[18].mxu0  ;;  %v13019_v33 = vpop.f32.mrb[18].mxu1  ;;  %13297 = vmatpush3.bf16.msra.mxu0 %v14878_v16  ;;  %13319 = vmatpush3.bf16.msra.mxu1 %v14879_v19  ;;  %v14911_v16 = vld [vmem:[#allocation3 + $0xca8] sm:$0xff]   ;;  %v14913_v19 = vld [vmem:[#allocation3 + $0xcf0] sm:$0xff]  }
 0x22b   :  { %v12998_v2 = vpop.f32.mrb[19].mxu0  ;;  %v13020_v34 = vpop.f32.mrb[19].mxu1  ;;  %13298 = vmatprep.subr.bf16.mxu0 %v14880_v10  ;;  %13320 = vmatprep.subr.bf16.mxu1 %v14881_v20  ;;  %v14914_v22 = vld [vmem:[#allocation3 + $0xc30] sm:$0xff]   ;;  %v14916_v31 = vld [vmem:[#allocation3 + $0xc78] sm:$0xff]  }
 0x22c   :  { %v16060_v37 = vadd.f32 %v13018_v30, %v12996_v29  ;;  %v4449_v10 = vpop.permute.xlu1 %4448  ;;  %v14915_v23 = vld [vmem:[#allocation3 + $0xcb0] sm:$0xff]   ;;  %v14917_v33 = vld [vmem:[#allocation3 + $0xcf8] sm:$0xff]  }
 0x22e   :  { %13299 = vmatpush3.bf16.msra.mxu0 %v14882_v25  ;;  %13321 = vmatpush3.bf16.msra.mxu1 %v14883_v26 }
 0x22f   :  { %13300 = vmatprep.subr.bf16.mxu0 %v14884_v35  ;;  %13322 = vmatprep.subr.bf16.mxu1 %v14885_v36  ;;  %v14918_v36 = vld [vmem:[#allocation3 + $0xc38] sm:$0xff]  }
 0x232   :  { %13301 = vmatpush3.bf16.msra.mxu0 %v14886_v38  ;;  %13323 = vmatpush3.bf16.msra.mxu1 %v14887_v40  ;;  %v4433_v38 = vmul.f32 %v16066_v45, %v4431_v13  ;;  %v15735_v40 = vmov 80   ;;  %v15739_v13 = vmov 85  }
 0x233   :  { %13330 = vmatprep.subr.bf16.mxu0 %v14888_v43  ;;  %13352 = vmatprep.subr.bf16.mxu1 %v14889_v5  ;;  %v4421_v43 = vmul.f32 %v16066_v45, %v4419_v6  ;;  %v4461_v5 = vpop.permute.xlu1 %4460  ;;  %v14937_v6 = vld [vmem:[#allocation3 + $0xde0] sm:$0xff]  }
 0x234   :  { %14456 = vset.pattern.permute.xlu1 %v15735_v40  ;;  %v4463_v44 = vmul.f32 %v16066_v45, %v4461_v5  ;;  %v4434_v51 = vpack.c.bf16 %v4433_v38, %v4433_v38  ;;  %v14951_v40 = vld [vmem:[#allocation3 + $0xdb8] sm:$0xff]   ;;  %v14953_v5 = vld [vmem:[#allocation3 + $0xec0] sm:$0xff]  }
 0x235   :  { %4368 = vmatmul.mubr.bf16.vlgmr.msra.gmra.mrb[44].mxu0 %v3050_v56  ;;  %4408 = vmatmul.mubr.bf16.vlgmr.msra.gmra.mrb[44].mxu1 %v3062_v54  ;;  %v14924_v54 = vld [vmem:[#allocation3 + $0xd48] sm:$0xff]  }
 0x236   :  { %13331 = vmatpush3.bf16.msra.mxu0 %v14890_v52  ;;  %13353 = vmatpush3.bf16.msra.mxu1 %v14891_v55  ;;  %v14922_v52 = vld [vmem:[#allocation3 + $0xd00] sm:$0xff]   ;;  %v4422_v55 = vpack.c.bf16 %v4421_v43, %v4421_v43  ;;  %v14926_v56 = vld [vmem:[#allocation3 + $0xd08] sm:$0xff]  }
 0x237   :  { %13332 = vmatprep.subr.bf16.mxu0 %v14892_v24  ;;  %13354 = vmatprep.subr.bf16.mxu1 %v14893_v57  ;;  %v14925_v24 = vld [vmem:[#allocation3 + $0xdc8] sm:$0xff]  }
 0x238   :  { %5571 = vmatprep.mubr.bf16.mxu0 %v4428_v59  ;;  %5611 = vmatprep.mubr.bf16.mxu1 %v4440_v60  ;;  %v15737_v59 = vmov 83   ;;  %v14927_v60 = vld [vmem:[#allocation3 + $0xd88] sm:$0xff]  }
 0x239   :  { %7306 = vperm.xlu1 %14456, %v16057_v14  }
 0x23a   :  { %13333 = vmatpush3.bf16.msra.mxu0 %v14894_v58  ;;  %13355 = vmatpush3.bf16.msra.mxu1 %v14895_v32  ;;  %v4464_v58 = vpack.c.bf16 %v4463_v44, %v4463_v44  ;;  %v14928_v32 = vld [vmem:[#allocation3 + $0xd50] sm:$0xff]  }
 0x23b   :  { %13334 = vmatprep.subr.bf16.mxu0 %v14896_v61  ;;  %13356 = vmatprep.subr.bf16.mxu1 %v14897_v53  ;;  %v14929_v61 = vld [vmem:[#allocation3 + $0xdd0] sm:$0xff]  }
 0x23c   :  { %v14930_v53 = vld [vmem:[#allocation3 + $0xd10] sm:$0xff]  }
 0x23d   :  { %14457 = vset.pattern.permute.xlu1 %v15737_v59 }
 0x23e   :  { %13335 = vmatpush3.bf16.msra.mxu0 %v14898_v62  ;;  %13357 = vmatpush3.bf16.msra.mxu1 %v14899_v63  ;;  %v14931_v62 = vld [vmem:[#allocation3 + $0xd90] sm:$0xff]   ;;  %v15738_v63 = vmov 82  }
 0x23f   :  { %13336 = vmatprep.subr.bf16.mxu0 %v14900_v1  ;;  %13358 = vmatprep.subr.bf16.mxu1 %v14901_v3  ;;  %v14933_v1 = vld [vmem:[#allocation3 + $0xdd8] sm:$0xff]  }
 0x240   :  { %7324 = vperm.xlu1 %14457, %v16057_v14   ;;  %14458 = vset.pattern.permute.xlu0 %v15738_v63  ;;  %v14934_v3 = vld [vmem:[#allocation3 + $0xd18] sm:$0xff]   ;;  %v15742_v63 = vmov 86  }
 0x241   :  { %7318 = vperm.xlu0 %14458, %v16057_v14  }
 0x242   :  { %13337 = vmatpush3.bf16.msra.mxu0 %v14902_v18  ;;  %13359 = vmatpush3.bf16.msra.mxu1 %v14903_v4  ;;  %v14935_v18 = vld [vmem:[#allocation3 + $0xd98] sm:$0xff]   ;;  %v14936_v4 = vld [vmem:[#allocation3 + $0xd60] sm:$0xff]  }
 0x243   :  { %13338 = vmatprep.subr.bf16.mxu0 %v14904_v7  ;;  %13360 = vmatprep.subr.bf16.mxu1 %v14905_v8  ;;  %v14938_v7 = vld [vmem:[#allocation3 + $0xd20] sm:$0xff]  }
 0x244   :  { %v14939_v8 = vld [vmem:[#allocation3 + $0xda0] sm:$0xff]   ;;  %14459 = vset.pattern.permute.xlu1 %v15739_v13  ;;  %v14975_v13 = vld [vmem:[#allocation3 + $0xea8] sm:$0xff]  }
 0x245   :  { %7336 = vperm.xlu1 %14459, %v16057_v14  }
 0x246   :  { %13339 = vmatpush3.bf16.msra.mxu0 %v14906_v50  ;;  %13361 = vmatpush3.bf16.msra.mxu1 %v14907_v9  ;;  %v14940_v50 = vld [vmem:[#allocation3 + $0xd68] sm:$0xff]  }
 0x247   :  { %13340 = vmatprep.subr.bf16.mxu0 %v14908_v11  ;;  %13362 = vmatprep.subr.bf16.mxu1 %v14909_v12  ;;  %v14941_v9 = vld [vmem:[#allocation3 + $0xde8] sm:$0xff]   ;;  %v4455_v11 = vpop.permute.xlu1 %4454 }
 0x248   :  { %v13038_v20 = vpop.f32.mrb[20].mxu0  ;;  %v13060_v21 = vpop.f32.mrb[20].mxu1  ;;  %v14942_v12 = vld [vmem:[#allocation3 + $0xd28] sm:$0xff]   ;;  %v4457_v38 = vmul.f32 %v16066_v45, %v4455_v11 }
 0x249   :  { %v13039_v25 = vpop.f32.mrb[21].mxu0  ;;  %v13061_v26 = vpop.f32.mrb[21].mxu1  ;;  %14460 = vset.pattern.permute.xlu1 %v15740_v46  ;;  %v14974_v11 = vld [vmem:[#allocation3 + $0xe28] sm:$0xff]  }
 0x24a   :  { %v13040_v27 = vadd.f32 %v13039_v25, %v13038_v20  ;;  %v13062_v28 = vadd.f32 %v13061_v26, %v13060_v21  ;;  %v13041_v29 = vpop.f32.mrb[22].mxu0  ;;  %v13063_v30 = vpop.f32.mrb[22].mxu1  ;;  %13341 = vmatpush3.bf16.msra.mxu0 %v14910_v15  ;;  %13363 = vmatpush3.bf16.msra.mxu1 %v14911_v16  ;;  %v14943_v15 = vld [vmem:[#allocation3 + $0xda8] sm:$0xff]   ;;  %v14944_v16 = vld [vmem:[#allocation3 + $0xd70] sm:$0xff]  }
 0x24b   :  { %v13042_v2 = vpop.f32.mrb[23].mxu0  ;;  %v13064_v34 = vpop.f32.mrb[23].mxu1  ;;  %13342 = vmatprep.subr.bf16.mxu0 %v14912_v17  ;;  %13364 = vmatprep.subr.bf16.mxu1 %v14913_v19  ;;  %v14945_v17 = vld [vmem:[#allocation3 + $0xdf0] sm:$0xff]  }
 0x24c   :  { %v2766_v35 = vadd.f32 %v13040_v27, %v16060_v37  ;;  %v4451_v37 = vmul.f32 %v16066_v45, %v4449_v10  ;;  %v4443_v19 = vpop.permute.xlu0 %4442  ;;  %v16087_v10 = vpop.permute.xlu1 %4466  ;;  %v14946_v25 = vld [vmem:[#allocation3 + $0xd30] sm:$0xff]   ;;  %v14948_v2 = vld [vmem:[#allocation3 + $0xd78] sm:$0xff]   ;;  %7330 = vperm.xlu1 %14460, %v16057_v14  }
 0x24d   :  { %v14947_v26 = vld [vmem:[#allocation3 + $0xdb0] sm:$0xff]   ;;  %v14949_v34 = vld [vmem:[#allocation3 + $0xdf8] sm:$0xff]  }
 0x24e   :  { %v16077_v41 = vadd.f32 %v13062_v28, %v2766_v35  ;;  %13343 = vmatpush3.bf16.msra.mxu0 %v14914_v22  ;;  %13365 = vmatpush3.bf16.msra.mxu1 %v14915_v23  ;;  %v4452_v57 = vpack.c.bf16 %v4451_v37, %v4451_v37  ;;  %v14954_v37 = vld [vmem:[#allocation3 + $0xe00] sm:$0xff]  }
 0x24f   :  { %13344 = vmatprep.subr.bf16.mxu0 %v14916_v31  ;;  %13366 = vmatprep.subr.bf16.mxu1 %v14917_v33 }
 0x250   :  { %14462 = vset.pattern.permute.xlu1 %v15742_v63  ;;  %v14996_v63 = vld [vmem:[#allocation3 + $0xf58] sm:$0xff]  }
 0x251   :  { %7342 = vperm.xlu1 %14462, %v16057_v14  }
 0x252   :  { %13345 = vmatpush3.bf16.msra.mxu0 %v14918_v36  ;;  %13367 = vmatpush3.bf16.msra.mxu1 %v14919_v39  ;;  %v14950_v36 = vld [vmem:[#allocation3 + $0xd38] sm:$0xff]   ;;  %v4445_v39 = vmul.f32 %v16066_v45, %v4443_v19 }
 0x253   :  { %13374 = vmatprep.subr.bf16.mxu0 %v14920_v42  ;;  %13396 = vmatprep.subr.bf16.mxu1 %v14921_v49  ;;  %v4485_v42 = vpop.permute.xlu1 %4484  ;;  %v14952_v49 = vld [vmem:[#allocation3 + $0xe40] sm:$0xff]  }
 0x255   :  { %5572 = vmatmul.mubr.bf16.vlgmr.msra.gmra.mrb[48].mxu0 %v4422_v55  ;;  %5612 = vmatmul.mubr.bf16.vlgmr.msra.gmra.mrb[48].mxu1 %v4434_v51  ;;  %v15741_v51 = vmov 87   ;;  %v14955_v55 = vld [vmem:[#allocation3 + $0xe80] sm:$0xff]  }
 0x256   :  { %13375 = vmatpush3.bf16.msra.mxu0 %v14922_v52  ;;  %13397 = vmatpush3.bf16.msra.mxu1 %v14923_v47  ;;  %v4473_v52 = vpop.permute.xlu0 %4472  ;;  %v4458_v47 = vpack.c.bf16 %v4457_v38, %v4457_v38  ;;  %v14983_v38 = vld [vmem:[#allocation3 + $0xeb8] sm:$0xff]  }
 0x257   :  { %13376 = vmatprep.subr.bf16.mxu0 %v14924_v54  ;;  %13398 = vmatprep.subr.bf16.mxu1 %v14925_v24  ;;  %v4475_v44 = vmul.f32 %v16066_v45, %v4473_v52  ;;  %v4446_v54 = vpack.c.bf16 %v4445_v39, %v4445_v39  ;;  %v14956_v24 = vld [vmem:[#allocation3 + $0xe48] sm:$0xff]   ;;  %v4497_v39 = vpop.permute.xlu1 %4496  ;;  %v4469_v52 = vmul.f32 %v16066_v45, %v16087_v10  ;;  %v15745_v10 = vmov 88  }
 0x258   :  { %5651 = vmatprep.mubr.bf16.mxu0 %v4452_v57  ;;  %5691 = vmatprep.mubr.bf16.mxu1 %v4464_v58  ;;  %v14958_v57 = vld [vmem:[#allocation3 + $0xe08] sm:$0xff]  }
 0x259   :  { %14461 = vset.pattern.permute.xlu0 %v15741_v51  ;;  %v4476_v58 = vpack.c.bf16 %v4475_v44, %v4475_v44  ;;  %v15744_v51 = vmov 91  }
 0x25a   :  { %13377 = vmatpush3.bf16.msra.mxu0 %v14926_v56  ;;  %13399 = vmatpush3.bf16.msra.mxu1 %v14927_v60  ;;  %v14957_v56 = vld [vmem:[#allocation3 + $0xec8] sm:$0xff]  }
 0x25b   :  { %13378 = vmatprep.subr.bf16.mxu0 %v14928_v32  ;;  %13400 = vmatprep.subr.bf16.mxu1 %v14929_v61  ;;  %v14959_v60 = vld [vmem:[#allocation3 + $0xe88] sm:$0xff]   ;;  %v14960_v32 = vld [vmem:[#allocation3 + $0xe50] sm:$0xff]  }
 0x25c   :  { %7348 = vperm.xlu0 %14461, %v16057_v14   ;;  %v14961_v61 = vld [vmem:[#allocation3 + $0xed0] sm:$0xff]  }
 0x25e   :  { %13379 = vmatpush3.bf16.msra.mxu0 %v14930_v53  ;;  %13401 = vmatpush3.bf16.msra.mxu1 %v14931_v62  ;;  %v14962_v53 = vld [vmem:[#allocation3 + $0xe10] sm:$0xff]  }
 0x25f   :  { %13380 = vmatprep.subr.bf16.mxu0 %v14932_v0  ;;  %13402 = vmatprep.subr.bf16.mxu1 %v14933_v1  ;;  %v14963_v62 = vld [vmem:[#allocation3 + $0xe90] sm:$0xff]   ;;  %v14964_v0 = vld [vmem:[#allocation3 + $0xe58] sm:$0xff]  }
 0x260   :  { %v14965_v1 = vld [vmem:[#allocation3 + $0xed8] sm:$0xff]   ;;  %14464 = vset.pattern.permute.xlu0 %v15745_v10  ;;  %v15021_v10 = vld [vmem:[#allocation3 + $0x10c8] sm:$0xff]  }
 0x262   :  { %13381 = vmatpush3.bf16.msra.mxu0 %v14934_v3  ;;  %13403 = vmatpush3.bf16.msra.mxu1 %v14935_v18  ;;  %v14966_v3 = vld [vmem:[#allocation3 + $0xe18] sm:$0xff]  }
 0x263   :  { %13382 = vmatprep.subr.bf16.mxu0 %v14936_v4  ;;  %13404 = vmatprep.subr.bf16.mxu1 %v14937_v6  ;;  %v14967_v18 = vld [vmem:[#allocation3 + $0xe98] sm:$0xff]   ;;  %v14968_v4 = vld [vmem:[#allocation3 + $0xe60] sm:$0xff]  }
 0x264   :  { %v14969_v6 = vld [vmem:[#allocation3 + $0xee0] sm:$0xff]  }
 0x266   :  { %13383 = vmatpush3.bf16.msra.mxu0 %v14938_v7  ;;  %13405 = vmatpush3.bf16.msra.mxu1 %v14939_v8  ;;  %v14970_v7 = vld [vmem:[#allocation3 + $0xe20] sm:$0xff]  }
 0x267   :  { %13384 = vmatprep.subr.bf16.mxu0 %v14940_v50  ;;  %13406 = vmatprep.subr.bf16.mxu1 %v14941_v9  ;;  %v14971_v8 = vld [vmem:[#allocation3 + $0xea0] sm:$0xff]   ;;  %v14972_v50 = vld [vmem:[#allocation3 + $0xe68] sm:$0xff]  }
 0x268   :  { %v13082_v20 = vpop.f32.mrb[24].mxu0  ;;  %v13104_v21 = vpop.f32.mrb[24].mxu1  ;;  %v14973_v9 = vld [vmem:[#allocation3 + $0xee8] sm:$0xff]  }
 0x269   :  { %v13083_v22 = vpop.f32.mrb[25].mxu0  ;;  %v13105_v23 = vpop.f32.mrb[25].mxu1 }
 0x26a   :  { %v13084_v27 = vadd.f32 %v13083_v22, %v13082_v20  ;;  %v13106_v28 = vadd.f32 %v13105_v23, %v13104_v21  ;;  %v13085_v29 = vpop.f32.mrb[26].mxu0  ;;  %v13107_v30 = vpop.f32.mrb[26].mxu1  ;;  %13385 = vmatpush3.bf16.msra.mxu0 %v14942_v12  ;;  %13407 = vmatpush3.bf16.msra.mxu1 %v14943_v15  ;;  %v15743_v12 = vmov 89   ;;  %v14976_v15 = vld [vmem:[#allocation3 + $0xe70] sm:$0xff]   ;;  %v11768_v23 = vld [vmem:[#allocation5] ss:$0 sm:$0xff] }
 0x26b   :  { %v13086_v31 = vpop.f32.mrb[27].mxu0  ;;  %v13108_v33 = vpop.f32.mrb[27].mxu1  ;;  %13386 = vmatprep.subr.bf16.mxu0 %v14944_v16  ;;  %13408 = vmatprep.subr.bf16.mxu1 %v14945_v17  ;;  %v14977_v16 = vld [vmem:[#allocation3 + $0xef0] sm:$0xff]  }
 0x26c   :  { %v2846_v35 = vadd.f32 %v13084_v27, %v16077_v41  ;;  %v4487_v41 = vmul.f32 %v16066_v45, %v4485_v42  ;;  %14463 = vset.pattern.permute.xlu1 %v15743_v12  ;;  %v4479_v17 = vpop.permute.xlu0 %4478  ;;  %v14978_v21 = vld [vmem:[#allocation3 + $0xe30] sm:$0xff]   ;;  %v14980_v33 = vld [vmem:[#allocation3 + $0xe78] sm:$0xff]   ;;  %v1527_v42 = vadd.f32 %v11768_v23, %v16047_v48  ;;  %v15006_v12 = vld [vmem:[#allocation3 + $0xf28] sm:$0xff]  }
 0x26d   :  { %7360 = vperm.xlu1 %14463, %v16057_v14   ;;  %v14979_v22 = vld [vmem:[#allocation3 + $0xeb0] sm:$0xff]  }
 0x26e   :  { %v16092_v43 = vadd.f32 %v13106_v28, %v2846_v35  ;;  %13387 = vmatpush3.bf16.msra.mxu0 %v14946_v25  ;;  %13409 = vmatpush3.bf16.msra.mxu1 %v14947_v26  ;;  %v4488_v59 = vpack.c.bf16 %v4487_v41, %v4487_v41  ;;  %v14982_v35 = vld [vmem:[#allocation3 + $0xe38] sm:$0xff]   ;;  %v4499_v41 = vmul.f32 %v16066_v45, %v4497_v39  ;;  %v15747_v39 = vmov 92  }
 0x26f   :  { %13388 = vmatprep.subr.bf16.mxu0 %v14948_v2  ;;  %13410 = vmatprep.subr.bf16.mxu1 %v14949_v34  ;;  %v14981_v2 = vld [vmem:[#allocation3 + $0xef8] sm:$0xff]  }
 0x271   :  { %14465 = vset.pattern.permute.xlu1 %v15744_v51  ;;  %v15019_v51 = vld [vmem:[#allocation3 + $0x1080] sm:$0xff]  }
 0x272   :  { %13389 = vmatpush3.bf16.msra.mxu0 %v14950_v36  ;;  %13411 = vmatpush3.bf16.msra.mxu1 %v14951_v40  ;;  %v4481_v36 = vmul.f32 %v16066_v45, %v4479_v17  ;;  %v4509_v40 = vpop.permute.xlu0 %4508 }
 0x273   :  { %13418 = vmatprep.subr.bf16.mxu0 %v14952_v49  ;;  %13440 = vmatprep.subr.bf16.mxu1 %v14953_v5  ;;  %v14984_v5 = vld [vmem:[#allocation3 + $0xf40] sm:$0xff]   ;;  %v4511_v46 = vmul.f32 %v16066_v45, %v4509_v40  ;;  %v14989_v45 = vld [vmem:[#allocation3 + $0xfc8] sm:$0xff]  }
 0x274   :  { %v4482_v48 = vpack.c.bf16 %v4481_v36, %v4481_v36  ;;  %v15016_v40 = vld [vmem:[#allocation3 + $0x1040] sm:$0xff]  }
 0x275   :  { %5652 = vmatmul.mubr.bf16.vlgmr.msra.gmra.mrb[52].mxu0 %v4446_v54  ;;  %5692 = vmatmul.mubr.bf16.vlgmr.msra.gmra.mrb[52].mxu1 %v4458_v47  ;;  %v14987_v47 = vld [vmem:[#allocation3 + $0xf80] sm:$0xff]  }
 0x276   :  { %13419 = vmatpush3.bf16.msra.mxu0 %v14954_v37  ;;  %13441 = vmatpush3.bf16.msra.mxu1 %v14955_v55  ;;  %v14985_v37 = vld [vmem:[#allocation3 + $0xfc0] sm:$0xff]   ;;  %v14988_v55 = vld [vmem:[#allocation3 + $0xf48] sm:$0xff]  }
 0x277   :  { %13420 = vmatprep.subr.bf16.mxu0 %v14956_v24  ;;  %13442 = vmatprep.subr.bf16.mxu1 %v14957_v56  ;;  %v16112_v54 = vld [vmem:[%s16321_s0] sm:$0xff]  ;;  %v4470_v24 = vpack.c.bf16 %v4469_v52, %v4469_v52  ;;  %v14990_v56 = vld [vmem:[#allocation3 + $0xf08] sm:$0xff]  }
 0x278   :  { %5731 = vmatprep.mubr.bf16.mxu0 %v4476_v58  ;;  %5771 = vmatprep.mubr.bf16.mxu1 %v4488_v59  ;;  %v4512_v58 = vpack.c.bf16 %v4511_v46, %v4511_v46  ;;  %v14991_v59 = vld [vmem:[#allocation3 + $0xf88] sm:$0xff]   ;;  %v15018_v52 = vld [vmem:[#allocation3 + $0x1000] sm:$0xff]  }
 0x279   :  { %7372 = vperm.xlu1 %14465, %v16112_v54   ;;  %7354 = vperm.xlu0 %14464, %v16112_v54  }
 0x27a   :  { %13421 = vmatpush3.bf16.msra.mxu0 %v14958_v57  ;;  %13443 = vmatpush3.bf16.msra.mxu1 %v14959_v60  ;;  %v4500_v57 = vpack.c.bf16 %v4499_v41, %v4499_v41  ;;  %v14992_v60 = vld [vmem:[#allocation3 + $0xf50] sm:$0xff]   ;;  %v15748_v41 = vmov 93  }
 0x27b   :  { %13422 = vmatprep.subr.bf16.mxu0 %v14960_v32  ;;  %13444 = vmatprep.subr.bf16.mxu1 %v14961_v61  ;;  %v14993_v32 = vld [vmem:[#allocation3 + $0xfd0] sm:$0xff]  }
 0x27c   :  { %v14994_v61 = vld [vmem:[#allocation3 + $0xf10] sm:$0xff]  }
 0x27d   :  { %14467 = vset.pattern.permute.xlu0 %v15748_v41  ;;  %v15752_v41 = vmov 96  }
 0x27e   :  { %13423 = vmatpush3.bf16.msra.mxu0 %v14962_v53  ;;  %13445 = vmatpush3.bf16.msra.mxu1 %v14963_v62  ;;  %v14995_v53 = vld [vmem:[#allocation3 + $0xf90] sm:$0xff]   ;;  %v15746_v62 = vmov 90  }
 0x27f   :  { %13424 = vmatprep.subr.bf16.mxu0 %v14964_v0  ;;  %13446 = vmatprep.subr.bf16.mxu1 %v14965_v1  ;;  %v14997_v0 = vld [vmem:[#allocation3 + $0xfd8] sm:$0xff]  }
 0x280   :  { %14466 = vset.pattern.permute.xlu1 %v15746_v62  ;;  %v14998_v1 = vld [vmem:[#allocation3 + $0xf18] sm:$0xff]   ;;  %7384 = vperm.xlu0 %14467, %v16112_v54  }
 0x281   :  { %7366 = vperm.xlu1 %14466, %v16112_v54   ;;  %v15029_v62 = vld [vmem:[#allocation3 + $0x10d8] sm:$0xff]  }
 0x282   :  { %13425 = vmatpush3.bf16.msra.mxu0 %v14966_v3  ;;  %13447 = vmatpush3.bf16.msra.mxu1 %v14967_v18  ;;  %v14999_v3 = vld [vmem:[#allocation3 + $0xf98] sm:$0xff]   ;;  %v4491_v18 = vpop.permute.xlu1 %4490 }
 0x283   :  { %13426 = vmatprep.subr.bf16.mxu0 %v14968_v4  ;;  %13448 = vmatprep.subr.bf16.mxu1 %v14969_v6  ;;  %v15000_v4 = vld [vmem:[#allocation3 + $0xf60] sm:$0xff]  }
 0x284   :  { %v15001_v6 = vld [vmem:[#allocation3 + $0xfe0] sm:$0xff]  }
 0x285   :  { %14468 = vset.pattern.permute.xlu1 %v15747_v39  ;;  %v15047_v39 = vld [vmem:[#allocation3 + $0x10b8] sm:$0xff]  }
 0x286   :  { %13427 = vmatpush3.bf16.msra.mxu0 %v14970_v7  ;;  %13449 = vmatpush3.bf16.msra.mxu1 %v14971_v8  ;;  %v15002_v7 = vld [vmem:[#allocation3 + $0xf20] sm:$0xff]  }
 0x287   :  { %13428 = vmatprep.subr.bf16.mxu0 %v14972_v50  ;;  %13450 = vmatprep.subr.bf16.mxu1 %v14973_v9  ;;  %v15003_v8 = vld [vmem:[#allocation3 + $0xfa0] sm:$0xff]   ;;  %v15004_v50 = vld [vmem:[#allocation3 + $0xf68] sm:$0xff]  }
 0x288   :  { %v13126_v19 = vpop.f32.mrb[28].mxu0  ;;  %v13148_v20 = vpop.f32.mrb[28].mxu1  ;;  %v15005_v9 = vld [vmem:[#allocation3 + $0xfe8] sm:$0xff]   ;;  %7378 = vperm.xlu1 %14468, %v16112_v54  }
 0x289   :  { %v13127_v25 = vpop.f32.mrb[29].mxu0  ;;  %v13149_v26 = vpop.f32.mrb[29].mxu1 }
 0x28a   :  { %v13128_v27 = vadd.f32 %v13127_v25, %v13126_v19  ;;  %v13150_v28 = vadd.f32 %v13149_v26, %v13148_v20  ;;  %v13129_v29 = vpop.f32.mrb[30].mxu0  ;;  %v13151_v30 = vpop.f32.mrb[30].mxu1  ;;  %13429 = vmatpush3.bf16.msra.mxu0 %v14974_v11  ;;  %13451 = vmatpush3.bf16.msra.mxu1 %v14975_v13  ;;  %v15007_v13 = vld [vmem:[#allocation3 + $0xfa8] sm:$0xff]  }
 0x28b   :  { %v13130_v14 = vpop.f32.mrb[31].mxu0  ;;  %v13152_v31 = vpop.f32.mrb[31].mxu1  ;;  %13430 = vmatprep.subr.bf16.mxu0 %v14976_v15  ;;  %13452 = vmatprep.subr.bf16.mxu1 %v14977_v16  ;;  %v15008_v15 = vld [vmem:[#allocation3 + $0xf70] sm:$0xff]   ;;  %v15012_v30 = vld [vmem:[#allocation3 + $0xf78] sm:$0xff]  }
 0x28c   :  { %v2926_v34 = vadd.f32 %v13128_v27, %v16092_v43  ;;  %v14986_v43 = vld [vmem:[#allocation3 + $0xf00] sm:$0xff]   ;;  %v4503_v11 = vpop.permute.xlu1 %4502  ;;  %v15009_v16 = vld [vmem:[#allocation3 + $0xff0] sm:$0xff]   ;;  %v15013_v14 = vld [vmem:[#allocation3 + $0xff8] sm:$0xff]  }
 0x28e   :  { %v2966_v49 = vadd.f32 %v13150_v28, %v2926_v34  ;;  %13431 = vmatpush3.bf16.msra.mxu0 %v14978_v21  ;;  %13453 = vmatpush3.bf16.msra.mxu1 %v14979_v22  ;;  %v15010_v21 = vld [vmem:[#allocation3 + $0xf30] sm:$0xff]   ;;  %v15014_v34 = vld [vmem:[#allocation3 + $0xf38] sm:$0xff]  }
 0x28f   :  { %13432 = vmatprep.subr.bf16.mxu0 %v14980_v33  ;;  %13454 = vmatprep.subr.bf16.mxu1 %v14981_v2  ;;  %v15011_v22 = vld [vmem:[#allocation3 + $0xfb0] sm:$0xff]  }
 0x290   :  { %v16105_v44 = vadd.f32 %v2966_v49, %v1527_v42  ;;  %v5869_v17 = vpop.permute.xlu1 %5868  ;;  %v15017_v49 = vld [vmem:[#allocation3 + $0x10c0] sm:$0xff]  }
 0x292   :  { %13433 = vmatpush3.bf16.msra.mxu0 %v14982_v35  ;;  %13455 = vmatpush3.bf16.msra.mxu1 %v14983_v38  ;;  %v16122_v35 = vld [vmem:[%s16322_s1] sm:$0xff]  ;;  %v15015_v38 = vld [vmem:[#allocation3 + $0xfb8] sm:$0xff]  }
 0x293   :  { %13462 = vmatprep.subr.bf16.mxu0 %v14984_v5  ;;  %13484 = vmatprep.subr.bf16.mxu1 %v14985_v37  ;;  %v4505_v36 = vmul.f32 %v16122_v35, %v4503_v11  ;;  %v4493_v42 = vmul.f32 %v16122_v35, %v4491_v18  ;;  %v5871_v37 = vmul.f32 %v16122_v35, %v5869_v17  ;;  %v15034_v18 = vld [vmem:[#allocation3 + $0x1020] sm:$0xff]   ;;  %v15039_v11 = vld [vmem:[#allocation3 + $0x10a8] sm:$0xff]  }
 0x294   :  { %v5881_v5 = vpop.permute.xlu1 %5880 }
 0x295   :  { %5732 = vmatmul.mubr.bf16.vlgmr.msra.gmra.mrb[56].mxu0 %v4470_v24  ;;  %5772 = vmatmul.mubr.bf16.vlgmr.msra.gmra.mrb[56].mxu1 %v4482_v48  ;;  %v4506_v46 = vpack.c.bf16 %v4505_v36, %v4505_v36  ;;  %v15020_v48 = vld [vmem:[#allocation3 + $0x1048] sm:$0xff]   ;;  %v5872_v24 = vpack.c.bf16 %v5871_v37, %v5871_v37  ;;  %v15050_v37 = vld [vmem:[#allocation3 + $0x1100] sm:$0xff]  }
 0x296   :  { %13463 = vmatpush3.bf16.msra.mxu0 %v14986_v43  ;;  %13485 = vmatpush3.bf16.msra.mxu1 %v14987_v47  ;;  %v5883_v43 = vmul.f32 %v16122_v35, %v5881_v5  ;;  %v4494_v47 = vpack.c.bf16 %v4493_v42, %v4493_v42  ;;  %v15049_v5 = vld [vmem:[#allocation3 + $0x11c0] sm:$0xff]  }
 0x297   :  { %13464 = vmatprep.subr.bf16.mxu0 %v14988_v55  ;;  %13486 = vmatprep.subr.bf16.mxu1 %v14989_v45  ;;  %v15022_v55 = vld [vmem:[#allocation3 + $0x1008] sm:$0xff]  }
 0x298   :  { %5811 = vmatprep.mubr.bf16.mxu0 %v4500_v57  ;;  %5851 = vmatprep.mubr.bf16.mxu1 %v4512_v58  ;;  %v5884_v45 = vpack.c.bf16 %v5883_v43, %v5883_v43  ;;  %v15023_v57 = vld [vmem:[#allocation3 + $0x1088] sm:$0xff]   ;;  %v15024_v58 = vld [vmem:[#allocation3 + $0x1050] sm:$0xff]  }
 0x29a   :  { %13465 = vmatpush3.bf16.msra.mxu0 %v14990_v56  ;;  %13487 = vmatpush3.bf16.msra.mxu1 %v14991_v59  ;;  %v15749_v56 = vmov 95   ;;  %v15025_v59 = vld [vmem:[#allocation3 + $0x10d0] sm:$0xff]  }
 0x29b   :  { %13466 = vmatprep.subr.bf16.mxu0 %v14992_v60  ;;  %13488 = vmatprep.subr.bf16.mxu1 %v14993_v32  ;;  %v15026_v60 = vld [vmem:[#allocation3 + $0x1010] sm:$0xff]  }
 0x29c   :  { %14469 = vset.pattern.permute.xlu1 %v15749_v56  ;;  %v15027_v32 = vld [vmem:[#allocation3 + $0x1090] sm:$0xff]  }
 0x29d   :  { %7396 = vperm.xlu1 %14469, %v16112_v54  }
 0x29e   :  { %13467 = vmatpush3.bf16.msra.mxu0 %v14994_v61  ;;  %13489 = vmatpush3.bf16.msra.mxu1 %v14995_v53  ;;  %v15750_v61 = vmov 94   ;;  %v15028_v53 = vld [vmem:[#allocation3 + $0x1058] sm:$0xff]  }
 0x29f   :  { %13468 = vmatprep.subr.bf16.mxu0 %v14996_v63  ;;  %13490 = vmatprep.subr.bf16.mxu1 %v14997_v0  ;;  %v15030_v63 = vld [vmem:[#allocation3 + $0x1018] sm:$0xff]  }
 0x2a0   :  { %14470 = vset.pattern.permute.xlu0 %v15750_v61  ;;  %v15031_v0 = vld [vmem:[#allocation3 + $0x1098] sm:$0xff]   ;;  %v15754_v61 = vmov 98  }
 0x2a1   :  { %7390 = vperm.xlu0 %14470, %v16112_v54  }
 0x2a2   :  { %13469 = vmatpush3.bf16.msra.mxu0 %v14998_v1  ;;  %13491 = vmatpush3.bf16.msra.mxu1 %v14999_v3  ;;  %v15032_v1 = vld [vmem:[#allocation3 + $0x1060] sm:$0xff]  }
 0x2a3   :  { %13470 = vmatprep.subr.bf16.mxu0 %v15000_v4  ;;  %13492 = vmatprep.subr.bf16.mxu1 %v15001_v6  ;;  %v15033_v3 = vld [vmem:[#allocation3 + $0x10e0] sm:$0xff]   ;;  %v15036_v6 = vld [vmem:[#allocation3 + $0x1068] sm:$0xff]  }
 0x2a4   :  { %v15035_v4 = vld [vmem:[#allocation3 + $0x10a0] sm:$0xff]  }
 0x2a6   :  { %13471 = vmatpush3.bf16.msra.mxu0 %v15002_v7  ;;  %13493 = vmatpush3.bf16.msra.mxu1 %v15003_v8  ;;  %v15037_v7 = vld [vmem:[#allocation3 + $0x10e8] sm:$0xff]   ;;  %v5875_v8 = vpop.permute.xlu1 %5874 }
 0x2a7   :  { %13472 = vmatprep.subr.bf16.mxu0 %v15004_v50  ;;  %13494 = vmatprep.subr.bf16.mxu1 %v15005_v9  ;;  %v15038_v50 = vld [vmem:[#allocation3 + $0x1028] sm:$0xff]   ;;  %v15751_v9 = vmov 97   ;;  %v5877_v36 = vmul.f32 %v16122_v35, %v5875_v8 }
 0x2a8   :  { %v13170_v19 = vpop.f32.mrb[32].mxu0  ;;  %v13192_v20 = vpop.f32.mrb[32].mxu1  ;;  %14471 = vset.pattern.permute.xlu1 %v15751_v9  ;;  %v15070_v8 = vld [vmem:[#allocation3 + $0x1128] sm:$0xff]  }
 0x2a9   :  { %v13171_v23 = vpop.f32.mrb[33].mxu0  ;;  %v13193_v25 = vpop.f32.mrb[33].mxu1  ;;  %8756 = vperm.xlu1 %14471, %v16112_v54   ;;  %v15071_v9 = vld [vmem:[#allocation3 + $0x11a8] sm:$0xff]  }
 0x2aa   :  { %v13172_v26 = vadd.f32 %v13171_v23, %v13170_v19  ;;  %v13194_v27 = vadd.f32 %v13193_v25, %v13192_v20  ;;  %v13173_v28 = vpop.f32.mrb[34].mxu0  ;;  %v13195_v29 = vpop.f32.mrb[34].mxu1  ;;  %13473 = vmatpush3.bf16.msra.mxu0 %v15006_v12  ;;  %13495 = vmatpush3.bf16.msra.mxu1 %v15007_v13  ;;  %v15040_v12 = vld [vmem:[#allocation3 + $0x1070] sm:$0xff]  }
 0x2ab   :  { %v13174_v31 = vpop.f32.mrb[35].mxu0  ;;  %v13196_v33 = vpop.f32.mrb[35].mxu1  ;;  %13474 = vmatprep.subr.bf16.mxu0 %v15008_v15  ;;  %13496 = vmatprep.subr.bf16.mxu1 %v15009_v16  ;;  %v15041_v13 = vld [vmem:[#allocation3 + $0x10f0] sm:$0xff]  }
 0x2ac   :  { %v16117_v2 = vadd.f32 %v13194_v27, %v13172_v26  ;;  %v5863_v15 = vpop.permute.xlu0 %5862  ;;  %v16133_v16 = vpop.permute.xlu1 %5886  ;;  %v15043_v23 = vld [vmem:[#allocation3 + $0x10b0] sm:$0xff]   ;;  %v15045_v31 = vld [vmem:[#allocation3 + $0x10f8] sm:$0xff]  }
 0x2ad   :  { %14472 = vset.pattern.permute.xlu1 %v15752_v41  ;;  %v15757_v41 = vmov 100  }
 0x2ae   :  { %13475 = vmatpush3.bf16.msra.mxu0 %v15010_v21  ;;  %13497 = vmatpush3.bf16.msra.mxu1 %v15011_v22  ;;  %v15042_v22 = vld [vmem:[#allocation3 + $0x1030] sm:$0xff]  }
 0x2af   :  { %13476 = vmatprep.subr.bf16.mxu0 %v15012_v30  ;;  %13498 = vmatprep.subr.bf16.mxu1 %v15013_v14  ;;  %v15044_v14 = vld [vmem:[#allocation3 + $0x1078] sm:$0xff]  }
 0x2b0   :  { %8750 = vperm.xlu1 %14472, %v16112_v54  }
 0x2b2   :  { %13477 = vmatpush3.bf16.msra.mxu0 %v15014_v34  ;;  %13499 = vmatpush3.bf16.msra.mxu1 %v15015_v38  ;;  %v15046_v34 = vld [vmem:[#allocation3 + $0x1038] sm:$0xff]   ;;  %v5865_v38 = vmul.f32 %v16122_v35, %v5863_v15 }
 0x2b3   :  { %13506 = vmatprep.subr.bf16.mxu0 %v15016_v40  ;;  %13528 = vmatprep.subr.bf16.mxu1 %v15017_v49  ;;  %v5905_v40 = vpop.permute.xlu1 %5904  ;;  %v15048_v49 = vld [vmem:[#allocation3 + $0x1140] sm:$0xff]  }
 0x2b4   :  { %14474 = vset.pattern.permute.xlu1 %v15754_v61  ;;  %v15094_v61 = vld [vmem:[#allocation3 + $0x1218] sm:$0xff]  }
 0x2b5   :  { %5812 = vmatmul.mubr.bf16.vlgmr.msra.gmra.mrb[60].mxu0 %v4494_v47  ;;  %5852 = vmatmul.mubr.bf16.vlgmr.msra.gmra.mrb[60].mxu1 %v4506_v46  ;;  %v15753_v46 = vmov 99   ;;  %v15051_v47 = vld [vmem:[#allocation3 + $0x1180] sm:$0xff]  }
 0x2b6   :  { %13507 = vmatpush3.bf16.msra.mxu0 %v15018_v52  ;;  %13529 = vmatpush3.bf16.msra.mxu1 %v15019_v51  ;;  %v5893_v52 = vpop.permute.xlu0 %5892  ;;  %v5878_v51 = vpack.c.bf16 %v5877_v36, %v5877_v36  ;;  %v15079_v36 = vld [vmem:[#allocation3 + $0x11b8] sm:$0xff]  }
 0x2b7   :  { %13508 = vmatprep.subr.bf16.mxu0 %v15020_v48  ;;  %13530 = vmatprep.subr.bf16.mxu1 %v15021_v10  ;;  %v5895_v43 = vmul.f32 %v16122_v35, %v5893_v52  ;;  %v5866_v48 = vpack.c.bf16 %v5865_v38, %v5865_v38  ;;  %v15052_v10 = vld [vmem:[#allocation3 + $0x1148] sm:$0xff]   ;;  %v5917_v38 = vpop.permute.xlu1 %5916  ;;  %v15081_v52 = vld [vmem:[#allocation3 + $0x12c0] sm:$0xff]  }
 0x2b8   :  { %7015 = vmatprep.mubr.bf16.mxu0 %v5872_v24  ;;  %7055 = vmatprep.mubr.bf16.mxu1 %v5884_v45  ;;  %v15054_v24 = vld [vmem:[#allocation3 + $0x1108] sm:$0xff]  }
 0x2b9   :  { %14473 = vset.pattern.permute.xlu0 %v15753_v46  ;;  %v5896_v45 = vpack.c.bf16 %v5895_v43, %v5895_v43  ;;  %8762 = vperm.xlu1 %14474, %v16112_v54  }
 0x2ba   :  { %13509 = vmatpush3.bf16.msra.mxu0 %v15022_v55  ;;  %13531 = vmatpush3.bf16.msra.mxu1 %v15023_v57  ;;  %v15053_v55 = vld [vmem:[#allocation3 + $0x11c8] sm:$0xff]  }
 0x2bb   :  { %13510 = vmatprep.subr.bf16.mxu0 %v15024_v58  ;;  %13532 = vmatprep.subr.bf16.mxu1 %v15025_v59  ;;  %v15055_v57 = vld [vmem:[#allocation3 + $0x1188] sm:$0xff]   ;;  %v15056_v58 = vld [vmem:[#allocation3 + $0x1150] sm:$0xff]  }
 0x2bc   :  { %8768 = vperm.xlu0 %14473, %v16112_v54   ;;  %v15057_v59 = vld [vmem:[#allocation3 + $0x11d0] sm:$0xff]  }
 0x2be   :  { %13511 = vmatpush3.bf16.msra.mxu0 %v15026_v60  ;;  %13533 = vmatpush3.bf16.msra.mxu1 %v15027_v32  ;;  %v15058_v60 = vld [vmem:[#allocation3 + $0x1110] sm:$0xff]  }
 0x2bf   :  { %13512 = vmatprep.subr.bf16.mxu0 %v15028_v53  ;;  %13534 = vmatprep.subr.bf16.mxu1 %v15029_v62  ;;  %v15059_v32 = vld [vmem:[#allocation3 + $0x1190] sm:$0xff]   ;;  %v15060_v53 = vld [vmem:[#allocation3 + $0x1158] sm:$0xff]  }
 0x2c0   :  { %v15061_v62 = vld [vmem:[#allocation3 + $0x11d8] sm:$0xff]   ;;  %14476 = vset.pattern.permute.xlu0 %v15757_v41 }
 0x2c1   :  { %8774 = vperm.xlu0 %14476, %v16112_v54  }
 0x2c2   :  { %13513 = vmatpush3.bf16.msra.mxu0 %v15030_v63  ;;  %13535 = vmatpush3.bf16.msra.mxu1 %v15031_v0  ;;  %v15062_v63 = vld [vmem:[#allocation3 + $0x1118] sm:$0xff]  }
 0x2c3   :  { %13514 = vmatprep.subr.bf16.mxu0 %v15032_v1  ;;  %13536 = vmatprep.subr.bf16.mxu1 %v15033_v3  ;;  %v15063_v0 = vld [vmem:[#allocation3 + $0x1198] sm:$0xff]   ;;  %v15064_v1 = vld [vmem:[#allocation3 + $0x1160] sm:$0xff]  }
 0x2c4   :  { %v15065_v3 = vld [vmem:[#allocation3 + $0x11e0] sm:$0xff]  }
 0x2c6   :  { %13515 = vmatpush3.bf16.msra.mxu0 %v15034_v18  ;;  %13537 = vmatpush3.bf16.msra.mxu1 %v15035_v4  ;;  %v15066_v18 = vld [vmem:[#allocation3 + $0x1120] sm:$0xff]  }
 0x2c7   :  { %13516 = vmatprep.subr.bf16.mxu0 %v15036_v6  ;;  %13538 = vmatprep.subr.bf16.mxu1 %v15037_v7  ;;  %v15067_v4 = vld [vmem:[#allocation3 + $0x11a0] sm:$0xff]   ;;  %v15068_v6 = vld [vmem:[#allocation3 + $0x1168] sm:$0xff]  }
 0x2c8   :  { %v13214_v17 = vpop.f32.mrb[36].mxu0  ;;  %v13236_v19 = vpop.f32.mrb[36].mxu1  ;;  %v15069_v7 = vld [vmem:[#allocation3 + $0x11e8] sm:$0xff]  }
 0x2c9   :  { %v13215_v20 = vpop.f32.mrb[37].mxu0  ;;  %v13237_v21 = vpop.f32.mrb[37].mxu1 }
 0x2ca   :  { %v13216_v25 = vadd.f32 %v13215_v20, %v13214_v17  ;;  %v13238_v26 = vadd.f32 %v13237_v21, %v13236_v19  ;;  %v13217_v27 = vpop.f32.mrb[38].mxu0  ;;  %v13239_v28 = vpop.f32.mrb[38].mxu1  ;;  %13517 = vmatpush3.bf16.msra.mxu0 %v15038_v50  ;;  %13539 = vmatpush3.bf16.msra.mxu1 %v15039_v11  ;;  %v15755_v50 = vmov 101   ;;  %v15072_v11 = vld [vmem:[#allocation3 + $0x1170] sm:$0xff]  }
 0x2cb   :  { %v13218_v29 = vpop.f32.mrb[39].mxu0  ;;  %v13240_v30 = vpop.f32.mrb[39].mxu1  ;;  %13518 = vmatprep.subr.bf16.mxu0 %v15040_v12  ;;  %13540 = vmatprep.subr.bf16.mxu1 %v15041_v13  ;;  %v15073_v12 = vld [vmem:[#allocation3 + $0x11f0] sm:$0xff]  }
 0x2cc   :  { %v4210_v33 = vadd.f32 %v13216_v25, %v16117_v2  ;;  %v5907_v2 = vmul.f32 %v16122_v35, %v5905_v40  ;;  %14475 = vset.pattern.permute.xlu1 %v15755_v50  ;;  %v5899_v13 = vpop.permute.xlu0 %5898  ;;  %v15074_v19 = vld [vmem:[#allocation3 + $0x1130] sm:$0xff]   ;;  %v15076_v30 = vld [vmem:[#allocation3 + $0x1178] sm:$0xff]   ;;  %v15103_v50 = vld [vmem:[#allocation3 + $0x12a8] sm:$0xff]  }
 0x2cd   :  { %8780 = vperm.xlu1 %14475, %v16112_v54   ;;  %v15075_v20 = vld [vmem:[#allocation3 + $0x11b0] sm:$0xff]  }
 0x2ce   :  { %v16138_v42 = vadd.f32 %v13238_v26, %v4210_v33  ;;  %13519 = vmatpush3.bf16.msra.mxu0 %v15042_v22  ;;  %13541 = vmatpush3.bf16.msra.mxu1 %v15043_v23  ;;  %v5908_v56 = vpack.c.bf16 %v5907_v2, %v5907_v2  ;;  %v15078_v33 = vld [vmem:[#allocation3 + $0x1138] sm:$0xff]   ;;  %v15756_v2 = vmov 103  }
 0x2cf   :  { %13520 = vmatprep.subr.bf16.mxu0 %v15044_v14  ;;  %13542 = vmatprep.subr.bf16.mxu1 %v15045_v31  ;;  %v15077_v14 = vld [vmem:[#allocation3 + $0x11f8] sm:$0xff]  }
 0x2d1   :  { %14477 = vset.pattern.permute.xlu1 %v15756_v2 }
 0x2d2   :  { %13521 = vmatpush3.bf16.msra.mxu0 %v15046_v34  ;;  %13543 = vmatpush3.bf16.msra.mxu1 %v15047_v39  ;;  %v5901_v34 = vmul.f32 %v16122_v35, %v5899_v13  ;;  %v5929_v39 = vpop.permute.xlu0 %5928 }
 0x2d3   :  { %13550 = vmatprep.subr.bf16.mxu0 %v15048_v49  ;;  %13572 = vmatprep.subr.bf16.mxu1 %v15049_v5  ;;  %v15080_v49 = vld [vmem:[#allocation3 + $0x1240] sm:$0xff]   ;;  %v5889_v5 = vmul.f32 %v16122_v35, %v16133_v16  ;;  %v5931_v43 = vmul.f32 %v16122_v35, %v5929_v39  ;;  %v15084_v16 = vld [vmem:[#allocation3 + $0x1248] sm:$0xff]  }
 0x2d4   :  { %v5902_v46 = vpack.c.bf16 %v5901_v34, %v5901_v34  ;;  %8792 = vperm.xlu1 %14477, %v16112_v54   ;;  %v15090_v54 = vld [vmem:[#allocation3 + $0x1210] sm:$0xff]   ;;  %v15111_v34 = vld [vmem:[#allocation3 + $0x12b8] sm:$0xff]   ;;  %v15112_v39 = vld [vmem:[#allocation3 + $0x1340] sm:$0xff]  }
 0x2d5   :  { %7016 = vmatmul.mubr.bf16.vlgmr.msra.gmra.mrb[64].mxu0 %v5866_v48  ;;  %7056 = vmatmul.mubr.bf16.vlgmr.msra.gmra.mrb[64].mxu1 %v5878_v51  ;;  %v15083_v51 = vld [vmem:[#allocation3 + $0x1280] sm:$0xff]   ;;  %v5890_v48 = vpack.c.bf16 %v5889_v5, %v5889_v5 }
 0x2d6   :  { %13551 = vmatpush3.bf16.msra.mxu0 %v15050_v37  ;;  %13573 = vmatpush3.bf16.msra.mxu1 %v15051_v47  ;;  %v15082_v37 = vld [vmem:[#allocation3 + $0x1200] sm:$0xff]   ;;  %v15085_v47 = vld [vmem:[#allocation3 + $0x12c8] sm:$0xff]  }
 0x2d7   :  { %13552 = vmatprep.subr.bf16.mxu0 %v15052_v10  ;;  %13574 = vmatprep.subr.bf16.mxu1 %v15053_v55  ;;  %v15086_v10 = vld [vmem:[#allocation3 + $0x1208] sm:$0xff]   ;;  %v15113_v5 = vld [vmem:[#allocation3 + $0x13c0] sm:$0xff]  }
 0x2d8   :  { %7095 = vmatprep.mubr.bf16.mxu0 %v5896_v45  ;;  %7135 = vmatprep.mubr.bf16.mxu1 %v5908_v56  ;;  %v15087_v45 = vld [vmem:[#allocation3 + $0x1288] sm:$0xff]   ;;  %v15088_v56 = vld [vmem:[#allocation3 + $0x1250] sm:$0xff]  }
 0x2da   :  { %13553 = vmatpush3.bf16.msra.mxu0 %v15054_v24  ;;  %13575 = vmatpush3.bf16.msra.mxu1 %v15055_v57  ;;  %v5932_v24 = vpack.c.bf16 %v5931_v43, %v5931_v43  ;;  %v15089_v57 = vld [vmem:[#allocation3 + $0x12d0] sm:$0xff]  }
 0x2db   :  { %13554 = vmatprep.subr.bf16.mxu0 %v15056_v58  ;;  %13576 = vmatprep.subr.bf16.mxu1 %v15057_v59  ;;  %v15091_v58 = vld [vmem:[#allocation3 + $0x1290] sm:$0xff]   ;;  %v15758_v59 = vmov 102  }
 0x2dc   :  { %14478 = vset.pattern.permute.xlu1 %v15758_v59  ;;  %v15124_v59 = vld [vmem:[#allocation3 + $0x1358] sm:$0xff]  }
 0x2de   :  { %13555 = vmatpush3.bf16.msra.mxu0 %v15058_v60  ;;  %13577 = vmatpush3.bf16.msra.mxu1 %v15059_v32  ;;  %v15092_v60 = vld [vmem:[#allocation3 + $0x1258] sm:$0xff]  }
 0x2df   :  { %13556 = vmatprep.subr.bf16.mxu0 %v15060_v53  ;;  %13578 = vmatprep.subr.bf16.mxu1 %v15061_v62  ;;  %v15093_v32 = vld [vmem:[#allocation3 + $0x12d8] sm:$0xff]   ;;  %v16159_v53 = vld [vmem:[%s16321_s0] sm:$0xff] }
 0x2e0   :  { %8786 = vperm.xlu1 %14478, %v16159_v53   ;;  %v15095_v62 = vld [vmem:[#allocation3 + $0x1298] sm:$0xff]  }
 0x2e2   :  { %13557 = vmatpush3.bf16.msra.mxu0 %v15062_v63  ;;  %13579 = vmatpush3.bf16.msra.mxu1 %v15063_v0  ;;  %v5911_v63 = vpop.permute.xlu1 %5910  ;;  %v15096_v0 = vld [vmem:[#allocation3 + $0x1260] sm:$0xff]  }
 0x2e3   :  { %13558 = vmatprep.subr.bf16.mxu0 %v15064_v1  ;;  %13580 = vmatprep.subr.bf16.mxu1 %v15065_v3  ;;  %v15097_v1 = vld [vmem:[#allocation3 + $0x12e0] sm:$0xff]  }
 0x2e4   :  { %v15098_v3 = vld [vmem:[#allocation3 + $0x1220] sm:$0xff]  }
 0x2e6   :  { %13559 = vmatpush3.bf16.msra.mxu0 %v15066_v18  ;;  %13581 = vmatpush3.bf16.msra.mxu1 %v15067_v4  ;;  %v15099_v18 = vld [vmem:[#allocation3 + $0x12a0] sm:$0xff]   ;;  %v15100_v4 = vld [vmem:[#allocation3 + $0x1268] sm:$0xff]  }
 0x2e7   :  { %13560 = vmatprep.subr.bf16.mxu0 %v15068_v6  ;;  %13582 = vmatprep.subr.bf16.mxu1 %v15069_v7  ;;  %v15101_v6 = vld [vmem:[#allocation3 + $0x12e8] sm:$0xff]   ;;  %v5923_v7 = vpop.permute.xlu1 %5922 }
 0x2e8   :  { %v13258_v15 = vpop.f32.mrb[40].mxu0  ;;  %v13280_v17 = vpop.f32.mrb[40].mxu1 }
 0x2e9   :  { %v13259_v21 = vpop.f32.mrb[41].mxu0  ;;  %v13281_v22 = vpop.f32.mrb[41].mxu1 }
 0x2ea   :  { %v13260_v23 = vadd.f32 %v13259_v21, %v13258_v15  ;;  %v13282_v25 = vadd.f32 %v13281_v22, %v13280_v17  ;;  %v13261_v26 = vpop.f32.mrb[42].mxu0  ;;  %v13283_v27 = vpop.f32.mrb[42].mxu1  ;;  %13561 = vmatpush3.bf16.msra.mxu0 %v15070_v8  ;;  %13583 = vmatpush3.bf16.msra.mxu1 %v15071_v9  ;;  %v15102_v8 = vld [vmem:[#allocation3 + $0x1228] sm:$0xff]   ;;  %v15104_v9 = vld [vmem:[#allocation3 + $0x1270] sm:$0xff]  }
 0x2eb   :  { %v13262_v28 = vpop.f32.mrb[43].mxu0  ;;  %v13284_v29 = vpop.f32.mrb[43].mxu1  ;;  %13562 = vmatprep.subr.bf16.mxu0 %v15072_v11  ;;  %13584 = vmatprep.subr.bf16.mxu1 %v15073_v12  ;;  %v15105_v11 = vld [vmem:[#allocation3 + $0x12f0] sm:$0xff]   ;;  %v15108_v27 = vld [vmem:[#allocation3 + $0x1278] sm:$0xff]  }
 0x2ec   :  { %v4290_v31 = vadd.f32 %v13260_v23, %v16138_v42  ;;  %v5919_v42 = vmul.f32 %v16122_v35, %v5917_v38  ;;  %v5941_v12 = vpop.permute.xlu1 %5940  ;;  %v15106_v17 = vld [vmem:[#allocation3 + $0x1230] sm:$0xff]   ;;  %v15109_v28 = vld [vmem:[#allocation3 + $0x12f8] sm:$0xff]  }
 0x2ee   :  { %v16148_v40 = vadd.f32 %v13282_v25, %v4290_v31  ;;  %13563 = vmatpush3.bf16.msra.mxu0 %v15074_v19  ;;  %13585 = vmatpush3.bf16.msra.mxu1 %v15075_v20  ;;  %v5920_v55 = vpack.c.bf16 %v5919_v42, %v5919_v42  ;;  %v15107_v19 = vld [vmem:[#allocation3 + $0x12b0] sm:$0xff]   ;;  %v15110_v31 = vld [vmem:[#allocation3 + $0x1238] sm:$0xff]   ;;  %v16171_v42 = vld [vmem:[%s16322_s1] sm:$0xff] }
 0x2ef   :  { %13564 = vmatprep.subr.bf16.mxu0 %v15076_v30  ;;  %13586 = vmatprep.subr.bf16.mxu1 %v15077_v14  ;;  %v5943_v43 = vmul.f32 %v16171_v42, %v5941_v12 }
 0x2f2   :  { %13565 = vmatpush3.bf16.msra.mxu0 %v15078_v33  ;;  %13587 = vmatpush3.bf16.msra.mxu1 %v15079_v36  ;;  %v5925_v33 = vmul.f32 %v16122_v35, %v5923_v7  ;;  %v15759_v36 = vmov 104   ;;  %v15763_v7 = vmov 109  }
 0x2f3   :  { %13594 = vmatprep.subr.bf16.mxu0 %v15080_v49  ;;  %13616 = vmatprep.subr.bf16.mxu1 %v15081_v52  ;;  %v5913_v49 = vmul.f32 %v16122_v35, %v5911_v63  ;;  %v5953_v52 = vpop.permute.xlu1 %5952  ;;  %v15760_v35 = vmov 105   ;;  %v15129_v63 = vld [vmem:[#allocation3 + $0x13e0] sm:$0xff]  }
 0x2f4   :  { %14480 = vset.pattern.permute.xlu1 %v15759_v36  ;;  %v5955_v2 = vmul.f32 %v16171_v42, %v5953_v52  ;;  %14479 = vset.pattern.permute.xlu0 %v15760_v35  ;;  %v5926_v41 = vpack.c.bf16 %v5925_v33, %v5925_v33  ;;  %v15143_v36 = vld [vmem:[#allocation3 + $0x13b8] sm:$0xff]   ;;  %v15146_v52 = vld [vmem:[#allocation3 + $0x1400] sm:$0xff]   ;;  %v15765_v35 = vmov 111  }
 0x2f5   :  { %7096 = vmatmul.mubr.bf16.vlgmr.msra.gmra.mrb[68].mxu0 %v5890_v48  ;;  %7136 = vmatmul.mubr.bf16.vlgmr.msra.gmra.mrb[68].mxu1 %v5902_v46  ;;  %v15115_v46 = vld [vmem:[#allocation3 + $0x1380] sm:$0xff]   ;;  %v15118_v48 = vld [vmem:[#allocation3 + $0x1308] sm:$0xff]  }
 0x2f6   :  { %13595 = vmatpush3.bf16.msra.mxu0 %v15082_v37  ;;  %13617 = vmatpush3.bf16.msra.mxu1 %v15083_v51  ;;  %v5914_v51 = vpack.c.bf16 %v5913_v49, %v5913_v49  ;;  %v15145_v49 = vld [vmem:[#allocation3 + $0x14c0] sm:$0xff]  }
 0x2f7   :  { %13596 = vmatprep.subr.bf16.mxu0 %v15084_v16  ;;  %13618 = vmatprep.subr.bf16.mxu1 %v15085_v47  ;;  %v15117_v16 = vld [vmem:[#allocation3 + $0x13c8] sm:$0xff]   ;;  %v5944_v47 = vpack.c.bf16 %v5943_v43, %v5943_v43 }
 0x2f8   :  { %7175 = vmatprep.mubr.bf16.mxu0 %v5920_v55  ;;  %7215 = vmatprep.mubr.bf16.mxu1 %v5932_v24  ;;  %v15761_v55 = vmov 107   ;;  %v15119_v24 = vld [vmem:[#allocation3 + $0x1388] sm:$0xff]  }
 0x2f9   :  { %8798 = vperm.xlu1 %14480, %v16159_v53   ;;  %8804 = vperm.xlu0 %14479, %v16159_v53  }
 0x2fa   :  { %13597 = vmatpush3.bf16.msra.mxu0 %v15086_v10  ;;  %13619 = vmatpush3.bf16.msra.mxu1 %v15087_v45  ;;  %v5956_v10 = vpack.c.bf16 %v5955_v2, %v5955_v2  ;;  %v15120_v45 = vld [vmem:[#allocation3 + $0x1350] sm:$0xff]   ;;  %v15764_v2 = vmov 108  }
 0x2fb   :  { %13598 = vmatprep.subr.bf16.mxu0 %v15088_v56  ;;  %13620 = vmatprep.subr.bf16.mxu1 %v15089_v57  ;;  %v15121_v56 = vld [vmem:[#allocation3 + $0x13d0] sm:$0xff]  }
 0x2fc   :  { %v15122_v57 = vld [vmem:[#allocation3 + $0x1310] sm:$0xff]  }
 0x2fd   :  { %14481 = vset.pattern.permute.xlu1 %v15761_v55  ;;  %v15151_v55 = vld [vmem:[#allocation3 + $0x1488] sm:$0xff]  }
 0x2fe   :  { %13599 = vmatpush3.bf16.msra.mxu0 %v15090_v54  ;;  %13621 = vmatpush3.bf16.msra.mxu1 %v15091_v58  ;;  %v15123_v54 = vld [vmem:[#allocation3 + $0x1390] sm:$0xff]   ;;  %v15762_v58 = vmov 106  }
 0x2ff   :  { %13600 = vmatprep.subr.bf16.mxu0 %v15092_v60  ;;  %13622 = vmatprep.subr.bf16.mxu1 %v15093_v32  ;;  %v15125_v60 = vld [vmem:[#allocation3 + $0x13d8] sm:$0xff]  }
 0x300   :  { %8816 = vperm.xlu1 %14481, %v16159_v53   ;;  %14482 = vset.pattern.permute.xlu0 %v15762_v58  ;;  %v15126_v32 = vld [vmem:[#allocation3 + $0x1318] sm:$0xff]  }
 0x301   :  { %8810 = vperm.xlu0 %14482, %v16159_v53   ;;  %v15156_v58 = vld [vmem:[#allocation3 + $0x1458] sm:$0xff]  }
 0x302   :  { %13601 = vmatpush3.bf16.msra.mxu0 %v15094_v61  ;;  %13623 = vmatpush3.bf16.msra.mxu1 %v15095_v62  ;;  %v15127_v61 = vld [vmem:[#allocation3 + $0x1398] sm:$0xff]   ;;  %v15128_v62 = vld [vmem:[#allocation3 + $0x1360] sm:$0xff]  }
 0x303   :  { %13602 = vmatprep.subr.bf16.mxu0 %v15096_v0  ;;  %13624 = vmatprep.subr.bf16.mxu1 %v15097_v1  ;;  %v15130_v0 = vld [vmem:[#allocation3 + $0x1320] sm:$0xff]  }
 0x304   :  { %v15131_v1 = vld [vmem:[#allocation3 + $0x13a0] sm:$0xff]   ;;  %14483 = vset.pattern.permute.xlu1 %v15763_v7  ;;  %v15168_v7 = vld [vmem:[#allocation3 + $0x1470] sm:$0xff]  }
 0x305   :  { %8828 = vperm.xlu1 %14483, %v16159_v53   ;;  %14485 = vset.pattern.permute.xlu0 %v15765_v35 }
 0x306   :  { %13603 = vmatpush3.bf16.msra.mxu0 %v15098_v3  ;;  %13625 = vmatpush3.bf16.msra.mxu1 %v15099_v18  ;;  %v15132_v3 = vld [vmem:[#allocation3 + $0x1368] sm:$0xff]  }
 0x307   :  { %13604 = vmatprep.subr.bf16.mxu0 %v15100_v4  ;;  %13626 = vmatprep.subr.bf16.mxu1 %v15101_v6  ;;  %v15133_v18 = vld [vmem:[#allocation3 + $0x13e8] sm:$0xff]   ;;  %v5947_v4 = vpop.permute.xlu1 %5946 }
 0x308   :  { %v13302_v13 = vpop.f32.mrb[44].mxu0  ;;  %v13324_v15 = vpop.f32.mrb[44].mxu1  ;;  %v15134_v6 = vld [vmem:[#allocation3 + $0x1328] sm:$0xff]   ;;  %v5949_v33 = vmul.f32 %v16171_v42, %v5947_v4  ;;  %8840 = vperm.xlu0 %14485, %v16159_v53   ;;  %v15767_v4 = vmov 113  }
 0x309   :  { %v13303_v20 = vpop.f32.mrb[45].mxu0  ;;  %v13325_v21 = vpop.f32.mrb[45].mxu1  ;;  %14484 = vset.pattern.permute.xlu1 %v15764_v2  ;;  %v15769_v2 = vmov 112  }
 0x30a   :  { %v13304_v22 = vadd.f32 %v13303_v20, %v13302_v13  ;;  %v13326_v23 = vadd.f32 %v13325_v21, %v13324_v15  ;;  %v13305_v25 = vpop.f32.mrb[46].mxu0  ;;  %v13327_v26 = vpop.f32.mrb[46].mxu1  ;;  %13605 = vmatpush3.bf16.msra.mxu0 %v15102_v8  ;;  %13627 = vmatpush3.bf16.msra.mxu1 %v15103_v50  ;;  %v15135_v8 = vld [vmem:[#allocation3 + $0x13a8] sm:$0xff]   ;;  %v15136_v50 = vld [vmem:[#allocation3 + $0x1370] sm:$0xff]  }
 0x30b   :  { %v13306_v29 = vpop.f32.mrb[47].mxu0  ;;  %v13328_v30 = vpop.f32.mrb[47].mxu1  ;;  %13606 = vmatprep.subr.bf16.mxu0 %v15104_v9  ;;  %13628 = vmatprep.subr.bf16.mxu1 %v15105_v11  ;;  %v15137_v9 = vld [vmem:[#allocation3 + $0x13f0] sm:$0xff]  }
 0x30c   :  { %v4370_v14 = vadd.f32 %v13304_v22, %v16148_v40  ;;  %v15114_v40 = vld [vmem:[#allocation3 + $0x1300] sm:$0xff]   ;;  %v5935_v11 = vpop.permute.xlu0 %5934  ;;  %v16180_v12 = vpop.permute.xlu1 %7306  ;;  %v15138_v20 = vld [vmem:[#allocation3 + $0x1330] sm:$0xff]   ;;  %v15140_v29 = vld [vmem:[#allocation3 + $0x1378] sm:$0xff]   ;;  %8822 = vperm.xlu1 %14484, %v16159_v53   ;;  %14488 = vset.pattern.permute.xlu0 %v15769_v2 }
 0x30d   :  { %v15139_v21 = vld [vmem:[#allocation3 + $0x13b0] sm:$0xff]   ;;  %v15141_v30 = vld [vmem:[#allocation3 + $0x13f8] sm:$0xff]   ;;  %10194 = vperm.xlu0 %14488, %v16159_v53   ;;  %v15211_v2 = vld [vmem:[#allocation3 + $0x1680] sm:$0xff]  }
 0x30e   :  { %v4410_v38 = vadd.f32 %v13326_v23, %v4370_v14  ;;  %13607 = vmatpush3.bf16.msra.mxu0 %v15106_v17  ;;  %13629 = vmatpush3.bf16.msra.mxu1 %v15107_v19 }
 0x30f   :  { %13608 = vmatprep.subr.bf16.mxu0 %v15108_v27  ;;  %13630 = vmatprep.subr.bf16.mxu1 %v15109_v28 }
 0x310   :  { %v16166_v37 = vadd.f32 %v4410_v38, %v16105_v44  ;;  %v15116_v44 = vld [vmem:[#allocation3 + $0x1348] sm:$0xff]   ;;  %v7325_v38 = vpop.permute.xlu1 %7324 }
 0x311   :  { %v7327_v43 = vmul.f32 %v16171_v42, %v7325_v38 }
 0x312   :  { %13609 = vmatpush3.bf16.msra.mxu0 %v15110_v31  ;;  %13631 = vmatpush3.bf16.msra.mxu1 %v15111_v34  ;;  %v15142_v31 = vld [vmem:[#allocation3 + $0x1338] sm:$0xff]   ;;  %v5937_v34 = vmul.f32 %v16171_v42, %v5935_v11 }
 0x313   :  { %13638 = vmatprep.subr.bf16.mxu0 %v15112_v39  ;;  %13660 = vmatprep.subr.bf16.mxu1 %v15113_v5  ;;  %v15144_v39 = vld [vmem:[#allocation3 + $0x1440] sm:$0xff]   ;;  %v7313_v5 = vpop.permute.xlu0 %7312 }
 0x315   :  { %7176 = vmatmul.mubr.bf16.vlgmr.msra.gmra.mrb[72].mxu0 %v5914_v51  ;;  %7216 = vmatmul.mubr.bf16.vlgmr.msra.gmra.mrb[72].mxu1 %v5926_v41  ;;  %v5950_v41 = vpack.c.bf16 %v5949_v33, %v5949_v33  ;;  %v15148_v51 = vld [vmem:[#allocation3 + $0x1448] sm:$0xff]   ;;  %v15175_v33 = vld [vmem:[#allocation3 + $0x14b8] sm:$0xff]  }
 0x316   :  { %13639 = vmatpush3.bf16.msra.mxu0 %v15114_v40  ;;  %13661 = vmatpush3.bf16.msra.mxu1 %v15115_v46  ;;  %v7315_v40 = vmul.f32 %v16171_v42, %v7313_v5  ;;  %v5938_v46 = vpack.c.bf16 %v5937_v34, %v5937_v34  ;;  %v7337_v34 = vpop.permute.xlu1 %7336  ;;  %v15177_v5 = vld [vmem:[#allocation3 + $0x15c0] sm:$0xff]  }
 0x317   :  { %13640 = vmatprep.subr.bf16.mxu0 %v15116_v44  ;;  %13662 = vmatprep.subr.bf16.mxu1 %v15117_v16  ;;  %v15147_v44 = vld [vmem:[#allocation3 + $0x1480] sm:$0xff]   ;;  %v15149_v16 = vld [vmem:[#allocation3 + $0x14c8] sm:$0xff]  }
 0x318   :  { %7255 = vmatprep.mubr.bf16.mxu0 %v5944_v47  ;;  %7295 = vmatprep.mubr.bf16.mxu1 %v5956_v10  ;;  %v7316_v47 = vpack.c.bf16 %v7315_v40, %v7315_v40  ;;  %v7328_v10 = vpack.c.bf16 %v7327_v43, %v7327_v43  ;;  %v15768_v43 = vmov 115  }
 0x31a   :  { %13641 = vmatpush3.bf16.msra.mxu0 %v15118_v48  ;;  %13663 = vmatpush3.bf16.msra.mxu1 %v15119_v24  ;;  %v15150_v48 = vld [vmem:[#allocation3 + $0x1408] sm:$0xff]   ;;  %v15152_v24 = vld [vmem:[#allocation3 + $0x1450] sm:$0xff]  }
 0x31b   :  { %13642 = vmatprep.subr.bf16.mxu0 %v15120_v45  ;;  %13664 = vmatprep.subr.bf16.mxu1 %v15121_v56  ;;  %v15153_v45 = vld [vmem:[#allocation3 + $0x14d0] sm:$0xff]  }
 0x31c   :  { %v15154_v56 = vld [vmem:[#allocation3 + $0x1410] sm:$0xff]  }
 0x31e   :  { %13643 = vmatpush3.bf16.msra.mxu0 %v15122_v57  ;;  %13665 = vmatpush3.bf16.msra.mxu1 %v15123_v54  ;;  %v15155_v57 = vld [vmem:[#allocation3 + $0x1490] sm:$0xff]   ;;  %v15766_v54 = vmov 110  }
 0x31f   :  { %13644 = vmatprep.subr.bf16.mxu0 %v15124_v59  ;;  %13666 = vmatprep.subr.bf16.mxu1 %v15125_v60  ;;  %v15157_v59 = vld [vmem:[#allocation3 + $0x14d8] sm:$0xff]  }
 0x320   :  { %14486 = vset.pattern.permute.xlu1 %v15766_v54  ;;  %v15158_v60 = vld [vmem:[#allocation3 + $0x1418] sm:$0xff]  }
 0x321   :  { %8834 = vperm.xlu1 %14486, %v16159_v53   ;;  %v15189_v54 = vld [vmem:[#allocation3 + $0x15d8] sm:$0xff]  }
 0x322   :  { %13645 = vmatpush3.bf16.msra.mxu0 %v15126_v32  ;;  %13667 = vmatpush3.bf16.msra.mxu1 %v15127_v61  ;;  %v15159_v32 = vld [vmem:[#allocation3 + $0x1498] sm:$0xff]   ;;  %v15160_v61 = vld [vmem:[#allocation3 + $0x1460] sm:$0xff]  }
 0x323   :  { %13646 = vmatprep.subr.bf16.mxu0 %v15128_v62  ;;  %13668 = vmatprep.subr.bf16.mxu1 %v15129_v63  ;;  %v15161_v62 = vld [vmem:[#allocation3 + $0x14e0] sm:$0xff]  }
 0x324   :  { %v15162_v63 = vld [vmem:[#allocation3 + $0x1420] sm:$0xff]  }
 0x325   :  { %14487 = vset.pattern.permute.xlu1 %v15767_v4  ;;  %v15199_v4 = vld [vmem:[#allocation3 + $0x15a8] sm:$0xff]  }
 0x326   :  { %13647 = vmatpush3.bf16.msra.mxu0 %v15130_v0  ;;  %13669 = vmatpush3.bf16.msra.mxu1 %v15131_v1  ;;  %v15163_v0 = vld [vmem:[#allocation3 + $0x14a0] sm:$0xff]   ;;  %v15164_v1 = vld [vmem:[#allocation3 + $0x1468] sm:$0xff]  }
 0x327   :  { %13648 = vmatprep.subr.bf16.mxu0 %v15132_v3  ;;  %13670 = vmatprep.subr.bf16.mxu1 %v15133_v18  ;;  %v15165_v3 = vld [vmem:[#allocation3 + $0x14e8] sm:$0xff]  }
 0x328   :  { %v13346_v13 = vpop.f32.mrb[48].mxu0  ;;  %v13368_v15 = vpop.f32.mrb[48].mxu1  ;;  %v15166_v18 = vld [vmem:[#allocation3 + $0x1428] sm:$0xff]   ;;  %10200 = vperm.xlu1 %14487, %v16159_v53  }
 0x329   :  { %v13347_v17 = vpop.f32.mrb[49].mxu0  ;;  %v13369_v19 = vpop.f32.mrb[49].mxu1 }
 0x32a   :  { %v13348_v22 = vadd.f32 %v13347_v17, %v13346_v13  ;;  %v13370_v23 = vadd.f32 %v13369_v19, %v13368_v15  ;;  %v13349_v25 = vpop.f32.mrb[50].mxu0  ;;  %v13371_v26 = vpop.f32.mrb[50].mxu1  ;;  %13649 = vmatpush3.bf16.msra.mxu0 %v15134_v6  ;;  %13671 = vmatpush3.bf16.msra.mxu1 %v15135_v8  ;;  %v15167_v6 = vld [vmem:[#allocation3 + $0x14a8] sm:$0xff]   ;;  %v15169_v8 = vld [vmem:[#allocation3 + $0x14f0] sm:$0xff]  }
 0x32b   :  { %v13350_v27 = vpop.f32.mrb[51].mxu0  ;;  %v13372_v28 = vpop.f32.mrb[51].mxu1  ;;  %13650 = vmatprep.subr.bf16.mxu0 %v15136_v50  ;;  %13672 = vmatprep.subr.bf16.mxu1 %v15137_v9  ;;  %v15170_v13 = vld [vmem:[#allocation3 + $0x1430] sm:$0xff]  }
 0x32c   :  { %v16182_v14 = vadd.f32 %v13370_v23, %v13348_v22  ;;  %v7319_v50 = vpop.permute.xlu0 %7318  ;;  %v15171_v15 = vld [vmem:[#allocation3 + $0x14b0] sm:$0xff]   ;;  %v15172_v27 = vld [vmem:[#allocation3 + $0x1478] sm:$0xff]   ;;  %14489 = vset.pattern.permute.xlu1 %v15768_v43 }
 0x32d   :  { %v15173_v28 = vld [vmem:[#allocation3 + $0x14f8] sm:$0xff]   ;;  %10212 = vperm.xlu1 %14489, %v16159_v53  }
 0x32e   :  { %13651 = vmatpush3.bf16.msra.mxu0 %v15138_v20  ;;  %13673 = vmatpush3.bf16.msra.mxu1 %v15139_v21 }
 0x32f   :  { %13652 = vmatprep.subr.bf16.mxu0 %v15140_v29  ;;  %13674 = vmatprep.subr.bf16.mxu1 %v15141_v30  ;;  %v15174_v30 = vld [vmem:[#allocation3 + $0x1438] sm:$0xff]  }
 0x332   :  { %13653 = vmatpush3.bf16.msra.mxu0 %v15142_v31  ;;  %13675 = vmatpush3.bf16.msra.mxu1 %v15143_v36  ;;  %v7321_v31 = vmul.f32 %v16171_v42, %v7319_v50  ;;  %v7349_v36 = vpop.permute.xlu0 %7348 }
 0x333   :  { %13682 = vmatprep.subr.bf16.mxu0 %v15144_v39  ;;  %13704 = vmatprep.subr.bf16.mxu1 %v15145_v49  ;;  %v15176_v39 = vld [vmem:[#allocation3 + $0x1540] sm:$0xff]   ;;  %v7309_v49 = vmul.f32 %v16171_v42, %v16180_v12  ;;  %v7351_v40 = vmul.f32 %v16171_v42, %v7349_v36  ;;  %v15180_v12 = vld [vmem:[#allocation3 + $0x1548] sm:$0xff]  }
 0x334   :  { %v7322_v35 = vpack.c.bf16 %v7321_v31, %v7321_v31  ;;  %v15771_v31 = vmov 116  }
 0x335   :  { %7256 = vmatmul.mubr.bf16.vlgmr.msra.gmra.mrb[76].mxu0 %v5938_v46  ;;  %7296 = vmatmul.mubr.bf16.vlgmr.msra.gmra.mrb[76].mxu1 %v5950_v41  ;;  %v15179_v41 = vld [vmem:[#allocation3 + $0x1580] sm:$0xff]   ;;  %v7310_v46 = vpack.c.bf16 %v7309_v49, %v7309_v49 }
 0x336   :  { %13683 = vmatpush3.bf16.msra.mxu0 %v15146_v52  ;;  %13705 = vmatpush3.bf16.msra.mxu1 %v15147_v44  ;;  %v15178_v52 = vld [vmem:[#allocation3 + $0x1500] sm:$0xff]   ;;  %v15181_v44 = vld [vmem:[#allocation3 + $0x15c8] sm:$0xff]  }
 0x337   :  { %13684 = vmatprep.subr.bf16.mxu0 %v15148_v51  ;;  %13706 = vmatprep.subr.bf16.mxu1 %v15149_v16  ;;  %v15182_v51 = vld [vmem:[#allocation3 + $0x1508] sm:$0xff]  }
 0x338   :  { %8459 = vmatprep.mubr.bf16.mxu0 %v7316_v47  ;;  %8499 = vmatprep.mubr.bf16.mxu1 %v7328_v10  ;;  %v15183_v47 = vld [vmem:[#allocation3 + $0x1588] sm:$0xff]   ;;  %v15184_v10 = vld [vmem:[#allocation3 + $0x1550] sm:$0xff]  }
 0x33a   :  { %13685 = vmatpush3.bf16.msra.mxu0 %v15150_v48  ;;  %13707 = vmatpush3.bf16.msra.mxu1 %v15151_v55  ;;  %v7352_v48 = vpack.c.bf16 %v7351_v40, %v7351_v40  ;;  %v15185_v55 = vld [vmem:[#allocation3 + $0x15d0] sm:$0xff]   ;;  %v15772_v40 = vmov 117  }
 0x33b   :  { %13686 = vmatprep.subr.bf16.mxu0 %v15152_v24  ;;  %13708 = vmatprep.subr.bf16.mxu1 %v15153_v45  ;;  %v15186_v24 = vld [vmem:[#allocation3 + $0x1510] sm:$0xff]  }
 0x33c   :  { %v15187_v45 = vld [vmem:[#allocation3 + $0x1590] sm:$0xff]   ;;  %14491 = vset.pattern.permute.xlu0 %v15772_v40 }
 0x33e   :  { %13687 = vmatpush3.bf16.msra.mxu0 %v15154_v56  ;;  %13709 = vmatpush3.bf16.msra.mxu1 %v15155_v57  ;;  %v15770_v56 = vmov 114   ;;  %v15188_v57 = vld [vmem:[#allocation3 + $0x1558] sm:$0xff]  }
 0x33f   :  { %13688 = vmatprep.subr.bf16.mxu0 %v15156_v58  ;;  %13710 = vmatprep.subr.bf16.mxu1 %v15157_v59  ;;  %v15190_v58 = vld [vmem:[#allocation3 + $0x1518] sm:$0xff]  }
 0x340   :  { %14490 = vset.pattern.permute.xlu1 %v15770_v56  ;;  %v15191_v59 = vld [vmem:[#allocation3 + $0x1598] sm:$0xff]  }
 0x341   :  { %10206 = vperm.xlu1 %14490, %v16159_v53   ;;  %v15200_v53 = vld [vmem:[#allocation3 + $0x1570] sm:$0xff]   ;;  %v15221_v56 = vld [vmem:[#allocation3 + $0x16d8] sm:$0xff]  }
 0x342   :  { %13689 = vmatpush3.bf16.msra.mxu0 %v15158_v60  ;;  %13711 = vmatpush3.bf16.msra.mxu1 %v15159_v32  ;;  %v7331_v60 = vpop.permute.xlu1 %7330  ;;  %v15192_v32 = vld [vmem:[#allocation3 + $0x1560] sm:$0xff]  }
 0x343   :  { %13690 = vmatprep.subr.bf16.mxu0 %v15160_v61  ;;  %13712 = vmatprep.subr.bf16.mxu1 %v15161_v62  ;;  %v15193_v61 = vld [vmem:[#allocation3 + $0x15e0] sm:$0xff]   ;;  %v7333_v36 = vmul.f32 %v16171_v42, %v7331_v60 }
 0x344   :  { %v15194_v62 = vld [vmem:[#allocation3 + $0x1520] sm:$0xff]  }
 0x345   :  { %14492 = vset.pattern.permute.xlu1 %v15771_v31  ;;  %v15226_v60 = vld [vmem:[#allocation3 + $0x1620] sm:$0xff]   ;;  %v15239_v31 = vld [vmem:[#allocation3 + $0x16b8] sm:$0xff]  }
 0x346   :  { %13691 = vmatpush3.bf16.msra.mxu0 %v15162_v63  ;;  %13713 = vmatpush3.bf16.msra.mxu1 %v15163_v0  ;;  %v15195_v63 = vld [vmem:[#allocation3 + $0x15a0] sm:$0xff]   ;;  %v15196_v0 = vld [vmem:[#allocation3 + $0x1568] sm:$0xff]  }
 0x347   :  { %13692 = vmatprep.subr.bf16.mxu0 %v15164_v1  ;;  %13714 = vmatprep.subr.bf16.mxu1 %v15165_v3  ;;  %v15197_v1 = vld [vmem:[#allocation3 + $0x15e8] sm:$0xff]   ;;  %v7343_v3 = vpop.permute.xlu1 %7342 }
 0x348   :  { %v13390_v9 = vpop.f32.mrb[52].mxu0  ;;  %v13412_v11 = vpop.f32.mrb[52].mxu1 }
 0x349   :  { %v13391_v17 = vpop.f32.mrb[53].mxu0  ;;  %v13413_v19 = vpop.f32.mrb[53].mxu1 }
 0x34a   :  { %v13392_v20 = vadd.f32 %v13391_v17, %v13390_v9  ;;  %v13414_v21 = vadd.f32 %v13413_v19, %v13412_v11  ;;  %v13393_v22 = vpop.f32.mrb[54].mxu0  ;;  %v13415_v23 = vpop.f32.mrb[54].mxu1  ;;  %13693 = vmatpush3.bf16.msra.mxu0 %v15166_v18  ;;  %13715 = vmatpush3.bf16.msra.mxu1 %v15167_v6  ;;  %v15198_v18 = vld [vmem:[#allocation3 + $0x1528] sm:$0xff]   ;;  %v15201_v6 = vld [vmem:[#allocation3 + $0x15f0] sm:$0xff]  }
 0x34b   :  { %v13394_v25 = vpop.f32.mrb[55].mxu0  ;;  %v13416_v26 = vpop.f32.mrb[55].mxu1  ;;  %13694 = vmatprep.subr.bf16.mxu0 %v15168_v7  ;;  %13716 = vmatprep.subr.bf16.mxu1 %v15169_v8  ;;  %v15202_v9 = vld [vmem:[#allocation3 + $0x1530] sm:$0xff]   ;;  %v15204_v22 = vld [vmem:[#allocation3 + $0x1578] sm:$0xff]  }
 0x34c   :  { %v5654_v29 = vadd.f32 %v13392_v20, %v16182_v14  ;;  %v7339_v14 = vmul.f32 %v16171_v42, %v7337_v34  ;;  %v7361_v7 = vpop.permute.xlu1 %7360  ;;  %v15203_v11 = vld [vmem:[#allocation3 + $0x15b0] sm:$0xff]   ;;  %v15205_v23 = vld [vmem:[#allocation3 + $0x15f8] sm:$0xff]   ;;  %v15208_v34 = vld [vmem:[#allocation3 + $0x1640] sm:$0xff]  }
 0x34e   :  { %v16194_v38 = vadd.f32 %v13414_v21, %v5654_v29  ;;  %13695 = vmatpush3.bf16.msra.mxu0 %v15170_v13  ;;  %13717 = vmatpush3.bf16.msra.mxu1 %v15171_v15  ;;  %v7340_v16 = vpack.c.bf16 %v7339_v14, %v7339_v14  ;;  %v7345_v29 = vmul.f32 %v16171_v42, %v7343_v3  ;;  %v16213_v14 = vld [vmem:[%s16321_s0] sm:$0xff]  ;;  %v15231_v3 = vld [vmem:[#allocation3 + $0x16a8] sm:$0xff]  }
 0x34f   :  { %13696 = vmatprep.subr.bf16.mxu0 %v15172_v27  ;;  %13718 = vmatprep.subr.bf16.mxu1 %v15173_v28  ;;  %v15206_v28 = vld [vmem:[#allocation3 + $0x1538] sm:$0xff]  }
 0x350   :  { %v7373_v49 = vpop.permute.xlu1 %7372  ;;  %10218 = vperm.xlu1 %14492, %v16213_v14   ;;  %v7346_v43 = vpack.c.bf16 %v7345_v29, %v7345_v29  ;;  %10224 = vperm.xlu0 %14491, %v16213_v14  }
 0x352   :  { %13697 = vmatpush3.bf16.msra.mxu0 %v15174_v30  ;;  %13719 = vmatpush3.bf16.msra.mxu1 %v15175_v33  ;;  %v15207_v30 = vld [vmem:[#allocation3 + $0x15b8] sm:$0xff]  }
 0x353   :  { %13726 = vmatprep.subr.bf16.mxu0 %v15176_v39  ;;  %13748 = vmatprep.subr.bf16.mxu1 %v15177_v5  ;;  %v15209_v39 = vld [vmem:[#allocation3 + $0x16c0] sm:$0xff]  }
 0x354   :  { %v15210_v5 = vld [vmem:[#allocation3 + $0x1600] sm:$0xff]  }
 0x355   :  { %8460 = vmatmul.mubr.bf16.vlgmr.msra.gmra.mrb[80].mxu0 %v7310_v46  ;;  %8500 = vmatmul.mubr.bf16.vlgmr.msra.gmra.mrb[80].mxu1 %v7322_v35  ;;  %v15212_v35 = vld [vmem:[#allocation3 + $0x1648] sm:$0xff]  }
 0x356   :  { %13727 = vmatpush3.bf16.msra.mxu0 %v15178_v52  ;;  %13749 = vmatpush3.bf16.msra.mxu1 %v15179_v41  ;;  %v7375_v52 = vmul.f32 %v16171_v42, %v7373_v49  ;;  %v7334_v41 = vpack.c.bf16 %v7333_v36, %v7333_v36  ;;  %v15241_v49 = vld [vmem:[#allocation3 + $0x17c0] sm:$0xff]  }
 0x357   :  { %13728 = vmatprep.subr.bf16.mxu0 %v15180_v12  ;;  %13750 = vmatprep.subr.bf16.mxu1 %v15181_v44  ;;  %v15214_v12 = vld [vmem:[#allocation3 + $0x1608] sm:$0xff]  }
 0x358   :  { %8539 = vmatprep.mubr.bf16.mxu0 %v7340_v16  ;;  %8579 = vmatprep.mubr.bf16.mxu1 %v7352_v48  ;;  %v7376_v44 = vpack.c.bf16 %v7375_v52, %v7375_v52  ;;  %v15215_v16 = vld [vmem:[#allocation3 + $0x1688] sm:$0xff]   ;;  %v15216_v48 = vld [vmem:[#allocation3 + $0x1650] sm:$0xff]  }
 0x35a   :  { %13729 = vmatpush3.bf16.msra.mxu0 %v15182_v51  ;;  %13751 = vmatpush3.bf16.msra.mxu1 %v15183_v47  ;;  %v15773_v51 = vmov 119   ;;  %v15217_v47 = vld [vmem:[#allocation3 + $0x16d0] sm:$0xff]  }
 0x35b   :  { %13730 = vmatprep.subr.bf16.mxu0 %v15184_v10  ;;  %13752 = vmatprep.subr.bf16.mxu1 %v15185_v55  ;;  %v15218_v10 = vld [vmem:[#allocation3 + $0x1610] sm:$0xff]  }
 0x35c   :  { %14493 = vset.pattern.permute.xlu1 %v15773_v51  ;;  %v15219_v55 = vld [vmem:[#allocation3 + $0x1690] sm:$0xff]  }
 0x35d   :  { %10236 = vperm.xlu1 %14493, %v16213_v14  }
 0x35e   :  { %13731 = vmatpush3.bf16.msra.mxu0 %v15186_v24  ;;  %13753 = vmatpush3.bf16.msra.mxu1 %v15187_v45  ;;  %v15774_v24 = vmov 118   ;;  %v15220_v45 = vld [vmem:[#allocation3 + $0x1658] sm:$0xff]  }
 0x35f   :  { %13732 = vmatprep.subr.bf16.mxu0 %v15188_v57  ;;  %13754 = vmatprep.subr.bf16.mxu1 %v15189_v54  ;;  %v15222_v57 = vld [vmem:[#allocation3 + $0x1618] sm:$0xff]  }
 0x360   :  { %14494 = vset.pattern.permute.xlu0 %v15774_v24  ;;  %v15223_v54 = vld [vmem:[#allocation3 + $0x1698] sm:$0xff]   ;;  %v15778_v24 = vmov 122  }
 0x361   :  { %10230 = vperm.xlu0 %14494, %v16213_v14  }
 0x362   :  { %13733 = vmatpush3.bf16.msra.mxu0 %v15190_v58  ;;  %13755 = vmatpush3.bf16.msra.mxu1 %v15191_v59  ;;  %v15224_v58 = vld [vmem:[#allocation3 + $0x1660] sm:$0xff]  }
 0x363   :  { %13734 = vmatprep.subr.bf16.mxu0 %v15192_v32  ;;  %13756 = vmatprep.subr.bf16.mxu1 %v15193_v61  ;;  %v15225_v59 = vld [vmem:[#allocation3 + $0x16e0] sm:$0xff]   ;;  %v15228_v61 = vld [vmem:[#allocation3 + $0x1668] sm:$0xff]  }
 0x364   :  { %v15227_v32 = vld [vmem:[#allocation3 + $0x16a0] sm:$0xff]  }
 0x366   :  { %13735 = vmatpush3.bf16.msra.mxu0 %v15194_v62  ;;  %13757 = vmatpush3.bf16.msra.mxu1 %v15195_v63  ;;  %v15229_v62 = vld [vmem:[#allocation3 + $0x16e8] sm:$0xff]   ;;  %v7367_v63 = vpop.permute.xlu1 %7366 }
 0x367   :  { %13736 = vmatprep.subr.bf16.mxu0 %v15196_v0  ;;  %13758 = vmatprep.subr.bf16.mxu1 %v15197_v1  ;;  %v15230_v0 = vld [vmem:[#allocation3 + $0x1628] sm:$0xff]   ;;  %v15775_v1 = vmov 121  }
 0x368   :  { %v13434_v8 = vpop.f32.mrb[56].mxu0  ;;  %v13456_v50 = vpop.f32.mrb[56].mxu1  ;;  %14495 = vset.pattern.permute.xlu1 %v15775_v1  ;;  %v15263_v1 = vld [vmem:[#allocation3 + $0x17a8] sm:$0xff]  }
 0x369   :  { %v13435_v13 = vpop.f32.mrb[57].mxu0  ;;  %v13457_v15 = vpop.f32.mrb[57].mxu1  ;;  %10248 = vperm.xlu1 %14495, %v16213_v14  }
 0x36a   :  { %v13436_v17 = vadd.f32 %v13435_v13, %v13434_v8  ;;  %v13458_v19 = vadd.f32 %v13457_v15, %v13456_v50  ;;  %v13437_v20 = vpop.f32.mrb[58].mxu0  ;;  %v13459_v21 = vpop.f32.mrb[58].mxu1  ;;  %13737 = vmatpush3.bf16.msra.mxu0 %v15198_v18  ;;  %13759 = vmatpush3.bf16.msra.mxu1 %v15199_v4  ;;  %v15232_v18 = vld [vmem:[#allocation3 + $0x1670] sm:$0xff]  }
 0x36b   :  { %v13438_v25 = vpop.f32.mrb[59].mxu0  ;;  %v13460_v26 = vpop.f32.mrb[59].mxu1  ;;  %13738 = vmatprep.subr.bf16.mxu0 %v15200_v53  ;;  %13760 = vmatprep.subr.bf16.mxu1 %v15201_v6  ;;  %v15233_v4 = vld [vmem:[#allocation3 + $0x16f0] sm:$0xff]  }
 0x36c   :  { %v5734_v27 = vadd.f32 %v13436_v17, %v16194_v38  ;;  %v7363_v38 = vmul.f32 %v16171_v42, %v7361_v7  ;;  %v15213_v42 = vld [vmem:[#allocation3 + $0x16c8] sm:$0xff]   ;;  %v7355_v53 = vpop.permute.xlu0 %7354  ;;  %v16220_v6 = vpop.permute.xlu1 %7378  ;;  %v15235_v13 = vld [vmem:[#allocation3 + $0x16b0] sm:$0xff]   ;;  %v15237_v25 = vld [vmem:[#allocation3 + $0x16f8] sm:$0xff]  }
 0x36e   :  { %v16205_v33 = vadd.f32 %v13458_v19, %v5734_v27  ;;  %13739 = vmatpush3.bf16.msra.mxu0 %v15202_v9  ;;  %13761 = vmatpush3.bf16.msra.mxu1 %v15203_v11  ;;  %v7364_v46 = vpack.c.bf16 %v7363_v38, %v7363_v38  ;;  %v15234_v11 = vld [vmem:[#allocation3 + $0x1630] sm:$0xff]   ;;  %v15238_v27 = vld [vmem:[#allocation3 + $0x1638] sm:$0xff]   ;;  %v15242_v38 = vld [vmem:[#allocation3 + $0x1700] sm:$0xff]  }
 0x36f   :  { %13740 = vmatprep.subr.bf16.mxu0 %v15204_v22  ;;  %13762 = vmatprep.subr.bf16.mxu1 %v15205_v23  ;;  %v15236_v23 = vld [vmem:[#allocation3 + $0x1678] sm:$0xff]  }
 0x372   :  { %13741 = vmatpush3.bf16.msra.mxu0 %v15206_v28  ;;  %13763 = vmatpush3.bf16.msra.mxu1 %v15207_v30  ;;  %v16226_v28 = vld [vmem:[%s16322_s1] sm:$0xff] }
 0x373   :  { %13770 = vmatprep.subr.bf16.mxu0 %v15208_v34  ;;  %13792 = vmatprep.subr.bf16.mxu1 %v15209_v39  ;;  %v7369_v29 = vmul.f32 %v16226_v28, %v7367_v63  ;;  %v7357_v30 = vmul.f32 %v16226_v28, %v7355_v53  ;;  %v7397_v34 = vpop.permute.xlu1 %7396  ;;  %v15240_v39 = vld [vmem:[#allocation3 + $0x1740] sm:$0xff]   ;;  %v15262_v63 = vld [vmem:[#allocation3 + $0x1728] sm:$0xff]  }
 0x374   :  { %v7399_v40 = vmul.f32 %v16226_v28, %v7397_v34  ;;  %v15272_v34 = vld [vmem:[#allocation3 + $0x1840] sm:$0xff]  }
 0x375   :  { %8540 = vmatmul.mubr.bf16.vlgmr.msra.gmra.mrb[84].mxu0 %v7334_v41  ;;  %8580 = vmatmul.mubr.bf16.vlgmr.msra.gmra.mrb[84].mxu1 %v7346_v43  ;;  %v15776_v43 = vmov 120   ;;  %v7358_v41 = vpack.c.bf16 %v7357_v30, %v7357_v30 }
 0x376   :  { %13771 = vmatpush3.bf16.msra.mxu0 %v15210_v5  ;;  %13793 = vmatpush3.bf16.msra.mxu1 %v15211_v2  ;;  %v15777_v2 = vmov 123   ;;  %v7400_v51 = vpack.c.bf16 %v7399_v40, %v7399_v40  ;;  %v15781_v40 = vmov 124  }
 0x377   :  { %13772 = vmatprep.subr.bf16.mxu0 %v15212_v35  ;;  %13794 = vmatprep.subr.bf16.mxu1 %v15213_v42  ;;  %v7370_v35 = vpack.c.bf16 %v7369_v29, %v7369_v29  ;;  %v15243_v42 = vld [vmem:[#allocation3 + $0x1780] sm:$0xff]   ;;  %v15271_v29 = vld [vmem:[#allocation3 + $0x17b8] sm:$0xff]   ;;  %v8757_v30 = vpop.permute.xlu1 %8756 }
 0x378   :  { %8619 = vmatprep.mubr.bf16.mxu0 %v7364_v46  ;;  %8659 = vmatprep.mubr.bf16.mxu1 %v7376_v44  ;;  %v15246_v46 = vld [vmem:[#allocation3 + $0x1708] sm:$0xff]  }
 0x379   :  { %14496 = vset.pattern.permute.xlu1 %v15776_v43  ;;  %14497 = vset.pattern.permute.xlu0 %v15777_v2  ;;  %v15275_v2 = vld [vmem:[#allocation3 + $0x1880] sm:$0xff]  }
 0x37a   :  { %13773 = vmatpush3.bf16.msra.mxu0 %v15214_v12  ;;  %13795 = vmatpush3.bf16.msra.mxu1 %v15215_v16  ;;  %v15245_v12 = vld [vmem:[#allocation3 + $0x17c8] sm:$0xff]  }
 0x37b   :  { %13774 = vmatprep.subr.bf16.mxu0 %v15216_v48  ;;  %13796 = vmatprep.subr.bf16.mxu1 %v15217_v47  ;;  %v15247_v16 = vld [vmem:[#allocation3 + $0x1788] sm:$0xff]   ;;  %v15248_v48 = vld [vmem:[#allocation3 + $0x1750] sm:$0xff]  }
 0x37c   :  { %10242 = vperm.xlu1 %14496, %v16213_v14   ;;  %10260 = vperm.xlu0 %14497, %v16213_v14   ;;  %v15249_v47 = vld [vmem:[#allocation3 + $0x17d0] sm:$0xff]  }
 0x37e   :  { %13775 = vmatpush3.bf16.msra.mxu0 %v15218_v10  ;;  %13797 = vmatpush3.bf16.msra.mxu1 %v15219_v55  ;;  %v15250_v10 = vld [vmem:[#allocation3 + $0x1710] sm:$0xff]  }
 0x37f   :  { %13776 = vmatprep.subr.bf16.mxu0 %v15220_v45  ;;  %13798 = vmatprep.subr.bf16.mxu1 %v15221_v56  ;;  %v15251_v55 = vld [vmem:[#allocation3 + $0x1790] sm:$0xff]   ;;  %v15252_v45 = vld [vmem:[#allocation3 + $0x1758] sm:$0xff]  }
 0x380   :  { %14498 = vset.pattern.permute.xlu1 %v15778_v24  ;;  %v15253_v56 = vld [vmem:[#allocation3 + $0x17d8] sm:$0xff]   ;;  %14500 = vset.pattern.permute.xlu0 %v15781_v40  ;;  %v15309_v40 = vld [vmem:[#allocation3 + $0x19c8] sm:$0xff]  }
 0x381   :  { %10254 = vperm.xlu1 %14498, %v16213_v14   ;;  %10266 = vperm.xlu0 %14500, %v16213_v14   ;;  %v15286_v24 = vld [vmem:[#allocation3 + $0x1818] sm:$0xff]  }
 0x382   :  { %13777 = vmatpush3.bf16.msra.mxu0 %v15222_v57  ;;  %13799 = vmatpush3.bf16.msra.mxu1 %v15223_v54  ;;  %v15254_v57 = vld [vmem:[#allocation3 + $0x1718] sm:$0xff]  }
 0x383   :  { %13778 = vmatprep.subr.bf16.mxu0 %v15224_v58  ;;  %13800 = vmatprep.subr.bf16.mxu1 %v15225_v59  ;;  %v15255_v54 = vld [vmem:[#allocation3 + $0x1798] sm:$0xff]   ;;  %v15256_v58 = vld [vmem:[#allocation3 + $0x1760] sm:$0xff]  }
 0x384   :  { %v15257_v59 = vld [vmem:[#allocation3 + $0x17e0] sm:$0xff]  }
 0x386   :  { %13779 = vmatpush3.bf16.msra.mxu0 %v15226_v60  ;;  %13801 = vmatpush3.bf16.msra.mxu1 %v15227_v32  ;;  %v15258_v60 = vld [vmem:[#allocation3 + $0x1720] sm:$0xff]  }
 0x387   :  { %13780 = vmatprep.subr.bf16.mxu0 %v15228_v61  ;;  %13802 = vmatprep.subr.bf16.mxu1 %v15229_v62  ;;  %v15259_v32 = vld [vmem:[#allocation3 + $0x17a0] sm:$0xff]   ;;  %v15260_v61 = vld [vmem:[#allocation3 + $0x1768] sm:$0xff]  }
 0x388   :  { %v13478_v7 = vpop.f32.mrb[60].mxu0  ;;  %v13500_v8 = vpop.f32.mrb[60].mxu1  ;;  %v15261_v62 = vld [vmem:[#allocation3 + $0x17e8] sm:$0xff]  }
 0x389   :  { %v13479_v50 = vpop.f32.mrb[61].mxu0  ;;  %v13501_v9 = vpop.f32.mrb[61].mxu1 }
 0x38a   :  { %v13480_v15 = vadd.f32 %v13479_v50, %v13478_v7  ;;  %v13502_v17 = vadd.f32 %v13501_v9, %v13500_v8  ;;  %v13481_v19 = vpop.f32.mrb[62].mxu0  ;;  %v13503_v20 = vpop.f32.mrb[62].mxu1  ;;  %13781 = vmatpush3.bf16.msra.mxu0 %v15230_v0  ;;  %13803 = vmatpush3.bf16.msra.mxu1 %v15231_v3  ;;  %v15779_v0 = vmov 125   ;;  %v15264_v3 = vld [vmem:[#allocation3 + $0x1770] sm:$0xff]  }
 0x38b   :  { %v13482_v21 = vpop.f32.mrb[63].mxu0  ;;  %v13504_v22 = vpop.f32.mrb[63].mxu1  ;;  %13782 = vmatprep.subr.bf16.mxu0 %v15232_v18  ;;  %13804 = vmatprep.subr.bf16.mxu1 %v15233_v4  ;;  %v15265_v18 = vld [vmem:[#allocation3 + $0x17f0] sm:$0xff]  }
 0x38c   :  { %v5814_v26 = vadd.f32 %v13480_v15, %v16205_v33  ;;  %v7385_v33 = vpop.permute.xlu0 %7384  ;;  %14499 = vset.pattern.permute.xlu1 %v15779_v0  ;;  %v15266_v8 = vld [vmem:[#allocation3 + $0x1730] sm:$0xff]   ;;  %v15268_v22 = vld [vmem:[#allocation3 + $0x1778] sm:$0xff]  }
 0x38d   :  { %v7387_v52 = vmul.f32 %v16226_v28, %v7385_v33  ;;  %10272 = vperm.xlu1 %14499, %v16213_v14   ;;  %v15267_v50 = vld [vmem:[#allocation3 + $0x17b0] sm:$0xff]   ;;  %v8759_v33 = vmul.f32 %v16226_v28, %v8757_v30 }
 0x38e   :  { %v5854_v36 = vadd.f32 %v13502_v17, %v5814_v26  ;;  %13783 = vmatpush3.bf16.msra.mxu0 %v15234_v11  ;;  %13805 = vmatpush3.bf16.msra.mxu1 %v15235_v13  ;;  %v15270_v26 = vld [vmem:[#allocation3 + $0x1738] sm:$0xff]   ;;  %v15297_v0 = vld [vmem:[#allocation3 + $0x18f0] sm:$0xff]  }
 0x38f   :  { %13784 = vmatprep.subr.bf16.mxu0 %v15236_v23  ;;  %13806 = vmatprep.subr.bf16.mxu1 %v15237_v25  ;;  %v7388_v44 = vpack.c.bf16 %v7387_v52, %v7387_v52  ;;  %v15269_v23 = vld [vmem:[#allocation3 + $0x17f8] sm:$0xff]   ;;  %v15780_v52 = vmov 127  }
 0x390   :  { %v16231_v5 = vadd.f32 %v5854_v36, %v16166_v37  ;;  %v15244_v37 = vld [vmem:[#allocation3 + $0x1748] sm:$0xff]   ;;  %v7391_v4 = vpop.permute.xlu0 %7390  ;;  %v7381_v36 = vmul.f32 %v16226_v28, %v16220_v6  ;;  %14503 = vset.pattern.permute.xlu0 %v15780_v52 }
 0x391   :  { %14501 = vset.pattern.permute.xlu1 %v15780_v52  ;;  %v15276_v6 = vld [vmem:[#allocation3 + $0x1848] sm:$0xff]  }
 0x392   :  { %13785 = vmatpush3.bf16.msra.mxu0 %v15238_v27  ;;  %13807 = vmatpush3.bf16.msra.mxu1 %v15239_v31  ;;  %v7393_v27 = vmul.f32 %v16226_v28, %v7391_v4  ;;  %v15298_v4 = vld [vmem:[#allocation3 + $0x1830] sm:$0xff]  }
 0x393   :  { %13814 = vmatprep.subr.bf16.mxu0 %v15240_v39  ;;  %13836 = vmatprep.subr.bf16.mxu1 %v15241_v49  ;;  %v15273_v39 = vld [vmem:[#allocation3 + $0x18c0] sm:$0xff]  }
 0x394   :  { %v8769_v31 = vpop.permute.xlu0 %8768  ;;  %v15274_v49 = vld [vmem:[#allocation3 + $0x1800] sm:$0xff]   ;;  %v7394_v43 = vpack.c.bf16 %v7393_v27, %v7393_v27  ;;  %10284 = vperm.xlu1 %14501, %v16213_v14  }
 0x395   :  { %8620 = vmatmul.mubr.bf16.vlgmr.msra.gmra.mrb[88].mxu0 %v7358_v41  ;;  %8660 = vmatmul.mubr.bf16.vlgmr.msra.gmra.mrb[88].mxu1 %v7370_v35  ;;  %v7382_v35 = vpack.c.bf16 %v7381_v36, %v7381_v36  ;;  %v15277_v41 = vld [vmem:[#allocation3 + $0x18c8] sm:$0xff]   ;;  %v15306_v36 = vld [vmem:[#allocation3 + $0x1900] sm:$0xff]  }
 0x396   :  { %13815 = vmatpush3.bf16.msra.mxu0 %v15242_v38  ;;  %13837 = vmatpush3.bf16.msra.mxu1 %v15243_v42  ;;  %v8771_v38 = vmul.f32 %v16226_v28, %v8769_v31  ;;  %v15278_v42 = vld [vmem:[#allocation3 + $0x1808] sm:$0xff]   ;;  %v15305_v31 = vld [vmem:[#allocation3 + $0x19c0] sm:$0xff]  }
 0x397   :  { %13816 = vmatprep.subr.bf16.mxu0 %v15244_v37  ;;  %13838 = vmatprep.subr.bf16.mxu1 %v15245_v12  ;;  %v8760_v37 = vpack.c.bf16 %v8759_v33, %v8759_v33  ;;  %v15307_v33 = vld [vmem:[#allocation3 + $0x1980] sm:$0xff]  }
 0x398   :  { %8699 = vmatprep.mubr.bf16.mxu0 %v7388_v44  ;;  %8739 = vmatprep.mubr.bf16.mxu1 %v7400_v51  ;;  %v8772_v12 = vpack.c.bf16 %v8771_v38, %v8771_v38  ;;  %v15280_v44 = vld [vmem:[#allocation3 + $0x1850] sm:$0xff]   ;;  %v15308_v38 = vld [vmem:[#allocation3 + $0x1948] sm:$0xff]  }
 0x399   :  { %v15281_v51 = vld [vmem:[#allocation3 + $0x18d0] sm:$0xff]  }
 0x39a   :  { %13817 = vmatpush3.bf16.msra.mxu0 %v15246_v46  ;;  %13839 = vmatpush3.bf16.msra.mxu1 %v15247_v16  ;;  %v15279_v46 = vld [vmem:[#allocation3 + $0x1888] sm:$0xff]   ;;  %v15282_v16 = vld [vmem:[#allocation3 + $0x1810] sm:$0xff]  }
 0x39b   :  { %13818 = vmatprep.subr.bf16.mxu0 %v15248_v48  ;;  %13840 = vmatprep.subr.bf16.mxu1 %v15249_v47  ;;  %v15283_v48 = vld [vmem:[#allocation3 + $0x1890] sm:$0xff]   ;;  %v15782_v47 = vmov 126  }
 0x39c   :  { %14502 = vset.pattern.permute.xlu1 %v15782_v47  ;;  %v15321_v47 = vld [vmem:[#allocation3 + $0x19e0] sm:$0xff]  }
 0x39d   :  { %10278 = vperm.xlu1 %14502, %v16213_v14   ;;  %v15296_v14 = vld [vmem:[#allocation3 + $0x1870] sm:$0xff]  }
 0x39e   :  { %13819 = vmatpush3.bf16.msra.mxu0 %v15250_v10  ;;  %13841 = vmatpush3.bf16.msra.mxu1 %v15251_v55  ;;  %v15284_v10 = vld [vmem:[#allocation3 + $0x1858] sm:$0xff]  }
 0x39f   :  { %13820 = vmatprep.subr.bf16.mxu0 %v15252_v45  ;;  %13842 = vmatprep.subr.bf16.mxu1 %v15253_v56  ;;  %v15285_v55 = vld [vmem:[#allocation3 + $0x18d8] sm:$0xff]   ;;  %v8751_v56 = vpop.permute.xlu1 %8750 }
 0x3a0   :  { %v15287_v45 = vld [vmem:[#allocation3 + $0x1898] sm:$0xff]   ;;  %v8753_v30 = vmul.f32 %v16226_v28, %v8751_v56 }
 0x3a2   :  { %13821 = vmatpush3.bf16.msra.mxu0 %v15254_v57  ;;  %13843 = vmatpush3.bf16.msra.mxu1 %v15255_v54  ;;  %v15288_v57 = vld [vmem:[#allocation3 + $0x1860] sm:$0xff]   ;;  %v8754_v52 = vpack.c.bf16 %v8753_v30, %v8753_v30 }
 0x3a3   :  { %13822 = vmatprep.subr.bf16.mxu0 %v15256_v58  ;;  %13844 = vmatprep.subr.bf16.mxu1 %v15257_v59  ;;  %v15289_v54 = vld [vmem:[#allocation3 + $0x18e0] sm:$0xff]  }
 0x3a4   :  { %v15290_v58 = vld [vmem:[#allocation3 + $0x1820] sm:$0xff]  }
 0x3a5   :  { %v15291_v59 = vld [vmem:[#allocation3 + $0x18a0] sm:$0xff]  }
 0x3a6   :  { %13823 = vmatpush3.bf16.msra.mxu0 %v15258_v60  ;;  %13845 = vmatpush3.bf16.msra.mxu1 %v15259_v32  ;;  %v15292_v60 = vld [vmem:[#allocation3 + $0x1868] sm:$0xff]  }
 0x3a7   :  { %13824 = vmatprep.subr.bf16.mxu0 %v15260_v61  ;;  %13846 = vmatprep.subr.bf16.mxu1 %v15261_v62  ;;  %v15293_v32 = vld [vmem:[#allocation3 + $0x18e8] sm:$0xff]   ;;  %v8763_v61 = vpop.permute.xlu1 %8762 }
 0x3a8   :  { %v13522_v53 = vpop.f32.mrb[64].mxu0  ;;  %v13544_v7 = vpop.f32.mrb[64].mxu1  ;;  %v15294_v62 = vld [vmem:[#allocation3 + $0x1828] sm:$0xff]  }
 0x3a9   :  { %v13523_v9 = vpop.f32.mrb[65].mxu0  ;;  %v13545_v11 = vpop.f32.mrb[65].mxu1 }
 0x3aa   :  { %v13524_v13 = vadd.f32 %v13523_v9, %v13522_v53  ;;  %v13546_v15 = vadd.f32 %v13545_v11, %v13544_v7  ;;  %v13525_v17 = vpop.f32.mrb[66].mxu0  ;;  %v13547_v19 = vpop.f32.mrb[66].mxu1  ;;  %13825 = vmatpush3.bf16.msra.mxu0 %v15262_v63  ;;  %13847 = vmatpush3.bf16.msra.mxu1 %v15263_v1  ;;  %v15295_v63 = vld [vmem:[#allocation3 + $0x18a8] sm:$0xff]   ;;  %v15299_v53 = vld [vmem:[#allocation3 + $0x18b0] sm:$0xff]  }
 0x3ab   :  { %v13526_v20 = vpop.f32.mrb[67].mxu0  ;;  %v13548_v21 = vpop.f32.mrb[67].mxu1  ;;  %13826 = vmatprep.subr.bf16.mxu0 %v15264_v3  ;;  %13848 = vmatprep.subr.bf16.mxu1 %v15265_v18  ;;  %v15301_v17 = vld [vmem:[#allocation3 + $0x18f8] sm:$0xff]  }
 0x3ac   :  { %v16239_v25 = vadd.f32 %v13546_v15, %v13524_v13  ;;  %v8781_v1 = vpop.permute.xlu1 %8780  ;;  %v15300_v15 = vld [vmem:[#allocation3 + $0x1878] sm:$0xff]  }
 0x3ae   :  { %13827 = vmatpush3.bf16.msra.mxu0 %v15266_v8  ;;  %13849 = vmatpush3.bf16.msra.mxu1 %v15267_v50 }
 0x3af   :  { %13828 = vmatprep.subr.bf16.mxu0 %v15268_v22  ;;  %13850 = vmatprep.subr.bf16.mxu1 %v15269_v23  ;;  %v15302_v22 = vld [vmem:[#allocation3 + $0x1838] sm:$0xff]   ;;  %v8765_v23 = vmul.f32 %v16226_v28, %v8763_v61 }
 0x3b2   :  { %13829 = vmatpush3.bf16.msra.mxu0 %v15270_v26  ;;  %13851 = vmatpush3.bf16.msra.mxu1 %v15271_v29  ;;  %v15303_v26 = vld [vmem:[#allocation3 + $0x18b8] sm:$0xff]   ;;  %v15304_v29 = vld [vmem:[#allocation3 + $0x1940] sm:$0xff]  }
 0x3b3   :  { %13858 = vmatprep.subr.bf16.mxu0 %v15272_v34  ;;  %13880 = vmatprep.subr.bf16.mxu1 %v15273_v39  ;;  %v8793_v34 = vpop.permute.xlu1 %8792  ;;  %v8783_v39 = vmul.f32 %v16226_v28, %v8781_v1  ;;  %v15331_v1 = vld [vmem:[#allocation3 + $0x19b0] sm:$0xff]  }
 0x3b5   :  { %8700 = vmatmul.mubr.bf16.vlgmr.msra.gmra.mrb[92].mxu0 %v7382_v35  ;;  %8740 = vmatmul.mubr.bf16.vlgmr.msra.gmra.mrb[92].mxu1 %v7394_v43  ;;  %v15310_v43 = vld [vmem:[#allocation3 + $0x1908] sm:$0xff]  }
 0x3b6   :  { %13859 = vmatpush3.bf16.msra.mxu0 %v15274_v49  ;;  %13881 = vmatpush3.bf16.msra.mxu1 %v15275_v2  ;;  %v8766_v49 = vpack.c.bf16 %v8765_v23, %v8765_v23  ;;  %v8784_v2 = vpack.c.bf16 %v8783_v39, %v8783_v39  ;;  %v15311_v35 = vld [vmem:[#allocation3 + $0x1988] sm:$0xff]   ;;  %v15337_v23 = vld [vmem:[#allocation3 + $0x1ac0] sm:$0xff]  }
 0x3b7   :  { %13860 = vmatprep.subr.bf16.mxu0 %v15276_v6  ;;  %13882 = vmatprep.subr.bf16.mxu1 %v15277_v41  ;;  %v15312_v41 = vld [vmem:[#allocation3 + $0x1950] sm:$0xff]   ;;  %v8787_v56 = vpop.permute.xlu1 %8786  ;;  %v15340_v39 = vld [vmem:[#allocation3 + $0x1a48] sm:$0xff]  }
 0x3b8   :  { %9903 = vmatprep.mubr.bf16.mxu0 %v8760_v37  ;;  %9943 = vmatprep.mubr.bf16.mxu1 %v8772_v12  ;;  %v15314_v37 = vld [vmem:[#allocation3 + $0x1910] sm:$0xff]  }
 0x3b9   :  { %v15315_v12 = vld [vmem:[#allocation3 + $0x1990] sm:$0xff]  }
 0x3ba   :  { %13861 = vmatpush3.bf16.msra.mxu0 %v15278_v42  ;;  %13883 = vmatpush3.bf16.msra.mxu1 %v15279_v46  ;;  %v15313_v42 = vld [vmem:[#allocation3 + $0x19d0] sm:$0xff]   ;;  %v15316_v46 = vld [vmem:[#allocation3 + $0x1958] sm:$0xff]  }
 0x3bb   :  { %13862 = vmatprep.subr.bf16.mxu0 %v15280_v44  ;;  %13884 = vmatprep.subr.bf16.mxu1 %v15281_v51  ;;  %v15317_v44 = vld [vmem:[#allocation3 + $0x19d8] sm:$0xff]  }
 0x3bc   :  { %v15318_v51 = vld [vmem:[#allocation3 + $0x1918] sm:$0xff]  }
 0x3be   :  { %13863 = vmatpush3.bf16.msra.mxu0 %v15282_v16  ;;  %13885 = vmatpush3.bf16.msra.mxu1 %v15283_v48  ;;  %v15319_v16 = vld [vmem:[#allocation3 + $0x1998] sm:$0xff]   ;;  %v15320_v48 = vld [vmem:[#allocation3 + $0x1960] sm:$0xff]  }
 0x3bf   :  { %13864 = vmatprep.subr.bf16.mxu0 %v15284_v10  ;;  %13886 = vmatprep.subr.bf16.mxu1 %v15285_v55  ;;  %v15322_v10 = vld [vmem:[#allocation3 + $0x1920] sm:$0xff]  }
 0x3c0   :  { %v15323_v55 = vld [vmem:[#allocation3 + $0x19a0] sm:$0xff]  }
 0x3c2   :  { %13865 = vmatpush3.bf16.msra.mxu0 %v15286_v24  ;;  %13887 = vmatpush3.bf16.msra.mxu1 %v15287_v45  ;;  %v15324_v24 = vld [vmem:[#allocation3 + $0x1968] sm:$0xff]  }
 0x3c3   :  { %13866 = vmatprep.subr.bf16.mxu0 %v15288_v57  ;;  %13888 = vmatprep.subr.bf16.mxu1 %v15289_v54  ;;  %v15325_v45 = vld [vmem:[#allocation3 + $0x19e8] sm:$0xff]  }
 0x3c4   :  { %v15326_v57 = vld [vmem:[#allocation3 + $0x1928] sm:$0xff]  }
 0x3c5   :  { %v15327_v54 = vld [vmem:[#allocation3 + $0x19a8] sm:$0xff]  }
 0x3c6   :  { %13867 = vmatpush3.bf16.msra.mxu0 %v15290_v58  ;;  %13889 = vmatpush3.bf16.msra.mxu1 %v15291_v59  ;;  %v15328_v58 = vld [vmem:[#allocation3 + $0x1970] sm:$0xff]  }
 0x3c7   :  { %13868 = vmatprep.subr.bf16.mxu0 %v15292_v60  ;;  %13890 = vmatprep.subr.bf16.mxu1 %v15293_v32  ;;  %v15329_v59 = vld [vmem:[#allocation3 + $0x19f0] sm:$0xff]   ;;  %v8775_v60 = vpop.permute.xlu0 %8774  ;;  %v16256_v32 = vpop.permute.xlu1 %8798 }
 0x3c8   :  { %v13566_v3 = vpop.f32.mrb[68].mxu0  ;;  %v13588_v18 = vpop.f32.mrb[68].mxu1 }
 0x3c9   :  { %v13567_v7 = vpop.f32.mrb[69].mxu0  ;;  %v13589_v8 = vpop.f32.mrb[69].mxu1 }
 0x3ca   :  { %v13568_v50 = vadd.f32 %v13567_v7, %v13566_v3  ;;  %v13590_v9 = vadd.f32 %v13589_v8, %v13588_v18  ;;  %v13569_v11 = vpop.f32.mrb[70].mxu0  ;;  %v13591_v13 = vpop.f32.mrb[70].mxu1  ;;  %13869 = vmatpush3.bf16.msra.mxu0 %v15294_v62  ;;  %13891 = vmatpush3.bf16.msra.mxu1 %v15295_v63 }
 0x3cb   :  { %v13570_v19 = vpop.f32.mrb[71].mxu0  ;;  %v13592_v20 = vpop.f32.mrb[71].mxu1  ;;  %13870 = vmatprep.subr.bf16.mxu0 %v15296_v14  ;;  %13892 = vmatprep.subr.bf16.mxu1 %v15297_v0  ;;  %v15330_v0 = vld [vmem:[#allocation3 + $0x1930] sm:$0xff]   ;;  %v15334_v13 = vld [vmem:[#allocation3 + $0x1938] sm:$0xff]  }
 0x3cc   :  { %v7098_v21 = vadd.f32 %v13568_v50, %v16239_v25  ;;  %v8795_v25 = vmul.f32 %v16226_v28, %v8793_v34  ;;  %v15332_v50 = vld [vmem:[#allocation3 + $0x1978] sm:$0xff]   ;;  %v8817_v20 = vpop.permute.xlu1 %8816 }
 0x3cd   :  { %v15335_v19 = vld [vmem:[#allocation3 + $0x19b8] sm:$0xff]  }
 0x3ce   :  { %v16251_v27 = vadd.f32 %v13590_v9, %v7098_v21  ;;  %13871 = vmatpush3.bf16.msra.mxu0 %v15298_v4  ;;  %13893 = vmatpush3.bf16.msra.mxu1 %v15299_v53  ;;  %v8796_v6 = vpack.c.bf16 %v8795_v25, %v8795_v25  ;;  %v15333_v9 = vld [vmem:[#allocation3 + $0x19f8] sm:$0xff]   ;;  %v15341_v25 = vld [vmem:[#allocation3 + $0x1ac8] sm:$0xff]  }
 0x3cf   :  { %13872 = vmatprep.subr.bf16.mxu0 %v15300_v15  ;;  %13894 = vmatprep.subr.bf16.mxu1 %v15301_v17  ;;  %v8789_v15 = vmul.f32 %v16226_v28, %v8787_v56  ;;  %v8777_v17 = vmul.f32 %v16226_v28, %v8775_v60 }
 0x3d1   :  { %v8778_v34 = vpack.c.bf16 %v8777_v17, %v8777_v17  ;;  %v15369_v17 = vld [vmem:[#allocation3 + $0x1bc0] sm:$0xff]  }
 0x3d2   :  { %13873 = vmatpush3.bf16.msra.mxu0 %v15302_v22  ;;  %13895 = vmatpush3.bf16.msra.mxu1 %v15303_v26  ;;  %v15336_v22 = vld [vmem:[#allocation3 + $0x1a40] sm:$0xff]   ;;  %v8805_v26 = vpop.permute.xlu0 %8804 }
 0x3d3   :  { %13902 = vmatprep.subr.bf16.mxu0 %v15304_v29  ;;  %13924 = vmatprep.subr.bf16.mxu1 %v15305_v31  ;;  %v15338_v29 = vld [vmem:[#allocation3 + $0x1a00] sm:$0xff]   ;;  %v8807_v30 = vmul.f32 %v16226_v28, %v8805_v26  ;;  %v8790_v31 = vpack.c.bf16 %v8789_v15, %v8789_v15 }
 0x3d4   :  { %v15371_v26 = vld [vmem:[#allocation3 + $0x1b80] sm:$0xff]  }
 0x3d5   :  { %9904 = vmatmul.mubr.bf16.vlgmr.msra.gmra.mrb[96].mxu0 %v8754_v52  ;;  %9944 = vmatmul.mubr.bf16.vlgmr.msra.gmra.mrb[96].mxu1 %v8766_v49  ;;  %v15342_v49 = vld [vmem:[#allocation3 + $0x1a08] sm:$0xff]  }
 0x3d6   :  { %13903 = vmatpush3.bf16.msra.mxu0 %v15306_v36  ;;  %13925 = vmatpush3.bf16.msra.mxu1 %v15307_v33  ;;  %v15339_v36 = vld [vmem:[#allocation3 + $0x1a80] sm:$0xff]   ;;  %v8808_v33 = vpack.c.bf16 %v8807_v30, %v8807_v30  ;;  %v15343_v52 = vld [vmem:[#allocation3 + $0x1a88] sm:$0xff]  }
 0x3d7   :  { %13904 = vmatprep.subr.bf16.mxu0 %v15308_v38  ;;  %13926 = vmatprep.subr.bf16.mxu1 %v15309_v40  ;;  %v15344_v40 = vld [vmem:[#allocation3 + $0x1a50] sm:$0xff]  }
 0x3d8   :  { %9983 = vmatprep.mubr.bf16.mxu0 %v8784_v2  ;;  %10023 = vmatprep.mubr.bf16.mxu1 %v8796_v6  ;;  %v15347_v2 = vld [vmem:[#allocation3 + $0x1a90] sm:$0xff]   ;;  %v15348_v6 = vld [vmem:[#allocation3 + $0x1a58] sm:$0xff]  }
 0x3da   :  { %13905 = vmatpush3.bf16.msra.mxu0 %v15310_v43  ;;  %13927 = vmatpush3.bf16.msra.mxu1 %v15311_v35  ;;  %v15346_v43 = vld [vmem:[#allocation3 + $0x1a10] sm:$0xff]   ;;  %v15349_v35 = vld [vmem:[#allocation3 + $0x1ad8] sm:$0xff]  }
 0x3db   :  { %13906 = vmatprep.subr.bf16.mxu0 %v15312_v41  ;;  %13928 = vmatprep.subr.bf16.mxu1 %v15313_v42  ;;  %v15350_v41 = vld [vmem:[#allocation3 + $0x1a18] sm:$0xff]  }
 0x3dc   :  { %v15351_v42 = vld [vmem:[#allocation3 + $0x1a98] sm:$0xff]  }
 0x3de   :  { %13907 = vmatpush3.bf16.msra.mxu0 %v15314_v37  ;;  %13929 = vmatpush3.bf16.msra.mxu1 %v15315_v12  ;;  %v15352_v37 = vld [vmem:[#allocation3 + $0x1a60] sm:$0xff]  }
 0x3df   :  { %13908 = vmatprep.subr.bf16.mxu0 %v15316_v46  ;;  %13930 = vmatprep.subr.bf16.mxu1 %v15317_v44  ;;  %v15353_v12 = vld [vmem:[#allocation3 + $0x1ae0] sm:$0xff]  }
 0x3e0   :  { %v15354_v46 = vld [vmem:[#allocation3 + $0x1a20] sm:$0xff]  }
 0x3e1   :  { %v15355_v44 = vld [vmem:[#allocation3 + $0x1aa0] sm:$0xff]  }
 0x3e2   :  { %13909 = vmatpush3.bf16.msra.mxu0 %v15318_v51  ;;  %13931 = vmatpush3.bf16.msra.mxu1 %v15319_v16  ;;  %v15356_v51 = vld [vmem:[#allocation3 + $0x1a68] sm:$0xff]  }
 0x3e3   :  { %13910 = vmatprep.subr.bf16.mxu0 %v15320_v48  ;;  %13932 = vmatprep.subr.bf16.mxu1 %v15321_v47  ;;  %v15357_v16 = vld [vmem:[#allocation3 + $0x1ae8] sm:$0xff]  }
 0x3e4   :  { %v15358_v48 = vld [vmem:[#allocation3 + $0x1a28] sm:$0xff]  }
 0x3e5   :  { %v15359_v47 = vld [vmem:[#allocation3 + $0x1aa8] sm:$0xff]  }
 0x3e6   :  { %13911 = vmatpush3.bf16.msra.mxu0 %v15322_v10  ;;  %13933 = vmatpush3.bf16.msra.mxu1 %v15323_v55  ;;  %v15360_v10 = vld [vmem:[#allocation3 + $0x1a70] sm:$0xff]  }
 0x3e7   :  { %13912 = vmatprep.subr.bf16.mxu0 %v15324_v24  ;;  %13934 = vmatprep.subr.bf16.mxu1 %v15325_v45  ;;  %v15361_v55 = vld [vmem:[#allocation3 + $0x1af0] sm:$0xff]   ;;  %v8811_v24 = vpop.permute.xlu0 %8810 }
 0x3e8   :  { %v13610_v61 = vpop.f32.mrb[72].mxu0  ;;  %v13632_v62 = vpop.f32.mrb[72].mxu1 }
 0x3e9   :  { %v13611_v63 = vpop.f32.mrb[73].mxu0  ;;  %v13633_v14 = vpop.f32.mrb[73].mxu1 }
 0x3ea   :  { %v13612_v3 = vadd.f32 %v13611_v63, %v13610_v61  ;;  %v13634_v18 = vadd.f32 %v13633_v14, %v13632_v62  ;;  %v13613_v4 = vpop.f32.mrb[74].mxu0  ;;  %v13635_v53 = vpop.f32.mrb[74].mxu1  ;;  %13913 = vmatpush3.bf16.msra.mxu0 %v15326_v57  ;;  %13935 = vmatpush3.bf16.msra.mxu1 %v15327_v54  ;;  %v15362_v57 = vld [vmem:[#allocation3 + $0x1a30] sm:$0xff]  }
 0x3eb   :  { %v13614_v7 = vpop.f32.mrb[75].mxu0  ;;  %v13636_v8 = vpop.f32.mrb[75].mxu1  ;;  %13914 = vmatprep.subr.bf16.mxu0 %v15328_v58  ;;  %13936 = vmatprep.subr.bf16.mxu1 %v15329_v59  ;;  %v15363_v54 = vld [vmem:[#allocation3 + $0x1ab0] sm:$0xff]   ;;  %v15366_v4 = vld [vmem:[#allocation3 + $0x1a38] sm:$0xff]   ;;  %v16269_v53 = vld [vmem:[%s16322_s1] sm:$0xff] }
 0x3ec   :  { %v7178_v11 = vadd.f32 %v13612_v3, %v16251_v27  ;;  %v8819_v27 = vmul.f32 %v16226_v28, %v8817_v20  ;;  %v15345_v28 = vld [vmem:[#allocation3 + $0x1ad0] sm:$0xff]   ;;  %v15365_v3 = vld [vmem:[#allocation3 + $0x1af8] sm:$0xff]   ;;  %v8813_v7 = vmul.f32 %v16269_v53, %v8811_v24  ;;  %v8801_v15 = vmul.f32 %v16269_v53, %v16256_v32  ;;  %v15370_v20 = vld [vmem:[#allocation3 + $0x1b00] sm:$0xff]  }
 0x3ed   :  { %v15367_v8 = vld [vmem:[#allocation3 + $0x1ab8] sm:$0xff]   ;;  %v15373_v32 = vld [vmem:[#allocation3 + $0x1bc8] sm:$0xff]  }
 0x3ee   :  { %v16261_v21 = vadd.f32 %v13634_v18, %v7178_v11  ;;  %13915 = vmatpush3.bf16.msra.mxu0 %v15330_v0  ;;  %13937 = vmatpush3.bf16.msra.mxu1 %v15331_v1  ;;  %v8820_v38 = vpack.c.bf16 %v8819_v27, %v8819_v27  ;;  %v15364_v1 = vld [vmem:[#allocation3 + $0x1a78] sm:$0xff]   ;;  %v8802_v30 = vpack.c.bf16 %v8801_v15, %v8801_v15  ;;  %v15374_v27 = vld [vmem:[#allocation3 + $0x1b08] sm:$0xff]  }
 0x3ef   :  { %13916 = vmatprep.subr.bf16.mxu0 %v15332_v50  ;;  %13938 = vmatprep.subr.bf16.mxu1 %v15333_v9  ;;  %v8829_v50 = vpop.permute.xlu1 %8828  ;;  %v8841_v9 = vpop.permute.xlu0 %8840  ;;  %v15404_v15 = vld [vmem:[#allocation3 + $0x1c48] sm:$0xff]  }
 0x3f2   :  { %13917 = vmatpush3.bf16.msra.mxu0 %v15334_v13  ;;  %13939 = vmatpush3.bf16.msra.mxu1 %v15335_v19  ;;  %v15368_v13 = vld [vmem:[#allocation3 + $0x1b40] sm:$0xff]  }
 0x3f3   :  { %13946 = vmatprep.subr.bf16.mxu0 %v15336_v22  ;;  %13968 = vmatprep.subr.bf16.mxu1 %v15337_v23  ;;  %v8843_v22 = vmul.f32 %v16269_v53, %v8841_v9  ;;  %v8814_v23 = vpack.c.bf16 %v8813_v7, %v8813_v7 }
 0x3f5   :  { %9984 = vmatmul.mubr.bf16.vlgmr.msra.gmra.mrb[100].mxu0 %v8778_v34  ;;  %10024 = vmatmul.mubr.bf16.vlgmr.msra.gmra.mrb[100].mxu1 %v8790_v31  ;;  %v8844_v34 = vpack.c.bf16 %v8843_v22, %v8843_v22 }
 0x3f6   :  { %13947 = vmatpush3.bf16.msra.mxu0 %v15338_v29  ;;  %13969 = vmatpush3.bf16.msra.mxu1 %v15339_v36  ;;  %v15372_v29 = vld [vmem:[#allocation3 + $0x1b48] sm:$0xff]   ;;  %v15376_v36 = vld [vmem:[#allocation3 + $0x1b50] sm:$0xff]  }
 0x3f7   :  { %13948 = vmatprep.subr.bf16.mxu0 %v15340_v39  ;;  %13970 = vmatprep.subr.bf16.mxu1 %v15341_v25  ;;  %v15377_v39 = vld [vmem:[#allocation3 + $0x1bd0] sm:$0xff]  }
 0x3f8   :  { %10063 = vmatprep.mubr.bf16.mxu0 %v8808_v33  ;;  %10103 = vmatprep.mubr.bf16.mxu1 %v8820_v38  ;;  %v15378_v25 = vld [vmem:[#allocation3 + $0x1b10] sm:$0xff]   ;;  %v15380_v33 = vld [vmem:[#allocation3 + $0x1b58] sm:$0xff]  }
 0x3f9   :  { %v15381_v38 = vld [vmem:[#allocation3 + $0x1bd8] sm:$0xff]  }
 0x3fa   :  { %13949 = vmatpush3.bf16.msra.mxu0 %v15342_v49  ;;  %13971 = vmatpush3.bf16.msra.mxu1 %v15343_v52  ;;  %v15379_v49 = vld [vmem:[#allocation3 + $0x1b90] sm:$0xff]   ;;  %v15382_v52 = vld [vmem:[#allocation3 + $0x1b18] sm:$0xff]  }
 0x3fb   :  { %13950 = vmatprep.subr.bf16.mxu0 %v15344_v40  ;;  %13972 = vmatprep.subr.bf16.mxu1 %v15345_v28  ;;  %v15383_v40 = vld [vmem:[#allocation3 + $0x1b98] sm:$0xff]   ;;  %v8823_v28 = vpop.permute.xlu1 %8822 }
 0x3fe   :  { %13951 = vmatpush3.bf16.msra.mxu0 %v15346_v43  ;;  %13973 = vmatpush3.bf16.msra.mxu1 %v15347_v2  ;;  %v15384_v43 = vld [vmem:[#allocation3 + $0x1b60] sm:$0xff]  }
 0x3ff   :  { %13952 = vmatprep.subr.bf16.mxu0 %v15348_v6  ;;  %13974 = vmatprep.subr.bf16.mxu1 %v15349_v35  ;;  %v15385_v2 = vld [vmem:[#allocation3 + $0x1be0] sm:$0xff]  }
 0x400   :  { %v15386_v6 = vld [vmem:[#allocation3 + $0x1b20] sm:$0xff]  }
 0x401   :  { %v15387_v35 = vld [vmem:[#allocation3 + $0x1ba0] sm:$0xff]  }
 0x402   :  { %13953 = vmatpush3.bf16.msra.mxu0 %v15350_v41  ;;  %13975 = vmatpush3.bf16.msra.mxu1 %v15351_v42  ;;  %v15388_v41 = vld [vmem:[#allocation3 + $0x1b68] sm:$0xff]  }
 0x403   :  { %13954 = vmatprep.subr.bf16.mxu0 %v15352_v37  ;;  %13976 = vmatprep.subr.bf16.mxu1 %v15353_v12  ;;  %v15389_v42 = vld [vmem:[#allocation3 + $0x1be8] sm:$0xff]   ;;  %v8835_v37 = vpop.permute.xlu1 %8834 }
 0x404   :  { %v15390_v12 = vld [vmem:[#allocation3 + $0x1b28] sm:$0xff]  }
 0x406   :  { %13955 = vmatpush3.bf16.msra.mxu0 %v15354_v46  ;;  %13977 = vmatpush3.bf16.msra.mxu1 %v15355_v44  ;;  %v15391_v46 = vld [vmem:[#allocation3 + $0x1ba8] sm:$0xff]   ;;  %v15392_v44 = vld [vmem:[#allocation3 + $0x1b70] sm:$0xff]  }
 0x407   :  { %13956 = vmatprep.subr.bf16.mxu0 %v15356_v51  ;;  %13978 = vmatprep.subr.bf16.mxu1 %v15357_v16  ;;  %v15393_v51 = vld [vmem:[#allocation3 + $0x1bf0] sm:$0xff]   ;;  %v10201_v16 = vpop.permute.xlu1 %10200 }
 0x408   :  { %v13654_v45 = vpop.f32.mrb[76].mxu0  ;;  %v13676_v56 = vpop.f32.mrb[76].mxu1 }
 0x409   :  { %v13655_v58 = vpop.f32.mrb[77].mxu0  ;;  %v13677_v59 = vpop.f32.mrb[77].mxu1 }
 0x40a   :  { %v13656_v60 = vadd.f32 %v13655_v58, %v13654_v45  ;;  %v13678_v61 = vadd.f32 %v13677_v59, %v13676_v56  ;;  %v13657_v62 = vpop.f32.mrb[78].mxu0  ;;  %v13679_v63 = vpop.f32.mrb[78].mxu1  ;;  %13957 = vmatpush3.bf16.msra.mxu0 %v15358_v48  ;;  %13979 = vmatpush3.bf16.msra.mxu1 %v15359_v47  ;;  %v15396_v59 = vld [vmem:[#allocation3 + $0x1b78] sm:$0xff]  }
 0x40b   :  { %v13658_v14 = vpop.f32.mrb[79].mxu0  ;;  %v13680_v0 = vpop.f32.mrb[79].mxu1  ;;  %13958 = vmatprep.subr.bf16.mxu0 %v15360_v10  ;;  %13980 = vmatprep.subr.bf16.mxu1 %v15361_v55  ;;  %v15394_v10 = vld [vmem:[#allocation3 + $0x1b30] sm:$0xff]  }
 0x40c   :  { %v7258_v18 = vadd.f32 %v13656_v60, %v16261_v21  ;;  %v8831_v21 = vmul.f32 %v16269_v53, %v8829_v50  ;;  %v15395_v55 = vld [vmem:[#allocation3 + $0x1bb0] sm:$0xff]   ;;  %v15397_v60 = vld [vmem:[#allocation3 + $0x1bf8] sm:$0xff]   ;;  %v8837_v0 = vmul.f32 %v16269_v53, %v8835_v37  ;;  %v10213_v7 = vpop.permute.xlu1 %10212  ;;  %v10203_v50 = vmul.f32 %v16269_v53, %v10201_v16 }
 0x40d   :  { %v15398_v14 = vld [vmem:[#allocation3 + $0x1b38] sm:$0xff]   ;;  %v10215_v9 = vmul.f32 %v16269_v53, %v10213_v7 }
 0x40e   :  { %v7298_v11 = vadd.f32 %v13678_v61, %v7258_v18  ;;  %13959 = vmatpush3.bf16.msra.mxu0 %v15362_v57  ;;  %13981 = vmatpush3.bf16.msra.mxu1 %v15363_v54  ;;  %v8832_v31 = vpack.c.bf16 %v8831_v21, %v8831_v21  ;;  %v8825_v18 = vmul.f32 %v16269_v53, %v8823_v28  ;;  %v15406_v21 = vld [vmem:[#allocation3 + $0x1c08] sm:$0xff]  }
 0x40f   :  { %13960 = vmatprep.subr.bf16.mxu0 %v15364_v1  ;;  %13982 = vmatprep.subr.bf16.mxu1 %v15365_v3  ;;  %v15399_v1 = vld [vmem:[#allocation3 + $0x1bb8] sm:$0xff]   ;;  %v15400_v3 = vld [vmem:[#allocation3 + $0x1c40] sm:$0xff]   ;;  %v10204_v22 = vpack.c.bf16 %v10203_v50, %v10203_v50  ;;  %v15422_v28 = vld [vmem:[#allocation3 + $0x1c28] sm:$0xff]  }
 0x410   :  { %v16275_v19 = vadd.f32 %v7298_v11, %v16231_v5  ;;  %v15375_v5 = vld [vmem:[#allocation3 + $0x1b88] sm:$0xff]   ;;  %v8838_v11 = vpack.c.bf16 %v8837_v0, %v8837_v0  ;;  %v15433_v0 = vld [vmem:[#allocation3 + $0x1dc0] sm:$0xff]  }
 0x411   :  { %v15436_v50 = vld [vmem:[#allocation3 + $0x1d48] sm:$0xff]  }
 0x412   :  { %13961 = vmatpush3.bf16.msra.mxu0 %v15366_v4  ;;  %13983 = vmatpush3.bf16.msra.mxu1 %v15367_v8  ;;  %v15401_v4 = vld [vmem:[#allocation3 + $0x1cc0] sm:$0xff]  }
 0x413   :  { %13990 = vmatprep.subr.bf16.mxu0 %v15368_v13  ;;  %14012 = vmatprep.subr.bf16.mxu1 %v15369_v17  ;;  %v15402_v8 = vld [vmem:[#allocation3 + $0x1c00] sm:$0xff]   ;;  %v8826_v17 = vpack.c.bf16 %v8825_v18, %v8825_v18 }
 0x414   :  { %v15403_v13 = vld [vmem:[#allocation3 + $0x1c80] sm:$0xff]  }
 0x415   :  { %10064 = vmatmul.mubr.bf16.vlgmr.msra.gmra.mrb[104].mxu0 %v8802_v30  ;;  %10104 = vmatmul.mubr.bf16.vlgmr.msra.gmra.mrb[104].mxu1 %v8814_v23  ;;  %v10216_v23 = vpack.c.bf16 %v10215_v9, %v10215_v9  ;;  %v15409_v30 = vld [vmem:[#allocation3 + $0x1cd0] sm:$0xff]   ;;  %v15437_v9 = vld [vmem:[#allocation3 + $0x1dc8] sm:$0xff]  }
 0x416   :  { %13991 = vmatpush3.bf16.msra.mxu0 %v15370_v20  ;;  %14013 = vmatpush3.bf16.msra.mxu1 %v15371_v26  ;;  %v15405_v20 = vld [vmem:[#allocation3 + $0x1cc8] sm:$0xff]  }
 0x417   :  { %13992 = vmatprep.subr.bf16.mxu0 %v15372_v29  ;;  %14014 = vmatprep.subr.bf16.mxu1 %v15373_v32  ;;  %v15407_v26 = vld [vmem:[#allocation3 + $0x1c88] sm:$0xff]   ;;  %v15408_v29 = vld [vmem:[#allocation3 + $0x1c50] sm:$0xff]  }
 0x418   :  { %10143 = vmatprep.mubr.bf16.mxu0 %v8832_v31  ;;  %10183 = vmatprep.mubr.bf16.mxu1 %v8844_v34  ;;  %v15410_v32 = vld [vmem:[#allocation3 + $0x1c10] sm:$0xff]   ;;  %v15412_v31 = vld [vmem:[#allocation3 + $0x1c58] sm:$0xff]  }
 0x419   :  { %v15413_v34 = vld [vmem:[#allocation3 + $0x1cd8] sm:$0xff]  }
 0x41a   :  { %13993 = vmatpush3.bf16.msra.mxu0 %v15374_v27  ;;  %14015 = vmatpush3.bf16.msra.mxu1 %v15375_v5  ;;  %v15411_v27 = vld [vmem:[#allocation3 + $0x1c90] sm:$0xff]   ;;  %v15414_v5 = vld [vmem:[#allocation3 + $0x1c18] sm:$0xff]  }
 0x41b   :  { %13994 = vmatprep.subr.bf16.mxu0 %v15376_v36  ;;  %14016 = vmatprep.subr.bf16.mxu1 %v15377_v39  ;;  %v15415_v36 = vld [vmem:[#allocation3 + $0x1c98] sm:$0xff]   ;;  %v15416_v39 = vld [vmem:[#allocation3 + $0x1c60] sm:$0xff]  }
 0x41e   :  { %13995 = vmatpush3.bf16.msra.mxu0 %v15378_v25  ;;  %14017 = vmatpush3.bf16.msra.mxu1 %v15379_v49  ;;  %v15417_v25 = vld [vmem:[#allocation3 + $0x1ce0] sm:$0xff]  }
 0x41f   :  { %13996 = vmatprep.subr.bf16.mxu0 %v15380_v33  ;;  %14018 = vmatprep.subr.bf16.mxu1 %v15381_v38  ;;  %v15418_v49 = vld [vmem:[#allocation3 + $0x1c20] sm:$0xff]   ;;  %v15420_v38 = vld [vmem:[#allocation3 + $0x1c68] sm:$0xff]  }
 0x420   :  { %v15419_v33 = vld [vmem:[#allocation3 + $0x1ca0] sm:$0xff]  }
 0x422   :  { %13997 = vmatpush3.bf16.msra.mxu0 %v15382_v52  ;;  %14019 = vmatpush3.bf16.msra.mxu1 %v15383_v40  ;;  %v15421_v52 = vld [vmem:[#allocation3 + $0x1ce8] sm:$0xff]   ;;  %v10207_v40 = vpop.permute.xlu1 %10206 }
 0x423   :  { %13998 = vmatprep.subr.bf16.mxu0 %v15384_v43  ;;  %14020 = vmatprep.subr.bf16.mxu1 %v15385_v2  ;;  %v15423_v43 = vld [vmem:[#allocation3 + $0x1ca8] sm:$0xff]   ;;  %v15424_v2 = vld [vmem:[#allocation3 + $0x1c70] sm:$0xff]  }
 0x426   :  { %13999 = vmatpush3.bf16.msra.mxu0 %v15386_v6  ;;  %14021 = vmatpush3.bf16.msra.mxu1 %v15387_v35  ;;  %v15425_v6 = vld [vmem:[#allocation3 + $0x1cf0] sm:$0xff]   ;;  %v10195_v35 = vpop.permute.xlu0 %10194 }
 0x427   :  { %14000 = vmatprep.subr.bf16.mxu0 %v15388_v41  ;;  %14022 = vmatprep.subr.bf16.mxu1 %v15389_v42  ;;  %v16285_v41 = vpop.permute.xlu1 %10218 }
 0x428   :  { %v13698_v48 = vpop.f32.mrb[80].mxu0  ;;  %v13720_v47 = vpop.f32.mrb[80].mxu1 }
 0x429   :  { %v13699_v24 = vpop.f32.mrb[81].mxu0  ;;  %v13721_v45 = vpop.f32.mrb[81].mxu1 }
 0x42a   :  { %v13700_v56 = vadd.f32 %v13699_v24, %v13698_v48  ;;  %v13722_v57 = vadd.f32 %v13721_v45, %v13720_v47  ;;  %v13701_v54 = vpop.f32.mrb[82].mxu0  ;;  %v13723_v58 = vpop.f32.mrb[82].mxu1  ;;  %14001 = vmatpush3.bf16.msra.mxu0 %v15390_v12  ;;  %14023 = vmatpush3.bf16.msra.mxu1 %v15391_v46  ;;  %v15428_v45 = vld [vmem:[#allocation3 + $0x1c78] sm:$0xff]  }
 0x42b   :  { %v13702_v61 = vpop.f32.mrb[83].mxu0  ;;  %v13724_v62 = vpop.f32.mrb[83].mxu1  ;;  %14002 = vmatprep.subr.bf16.mxu0 %v15392_v44  ;;  %14024 = vmatprep.subr.bf16.mxu1 %v15393_v51  ;;  %v15426_v44 = vld [vmem:[#allocation3 + $0x1c30] sm:$0xff]   ;;  %v15430_v54 = vld [vmem:[#allocation3 + $0x1c38] sm:$0xff]   ;;  %v10209_v58 = vmul.f32 %v16269_v53, %v10207_v40 }
 0x42c   :  { %v16279_v63 = vadd.f32 %v13722_v57, %v13700_v56  ;;  %v15427_v51 = vld [vmem:[#allocation3 + $0x1cb0] sm:$0xff]   ;;  %v15429_v56 = vld [vmem:[#allocation3 + $0x1cf8] sm:$0xff]   ;;  %v10237_v61 = vpop.permute.xlu1 %10236 }
 0x42e   :  { %14003 = vmatpush3.bf16.msra.mxu0 %v15394_v10  ;;  %14025 = vmatpush3.bf16.msra.mxu1 %v15395_v55 }
 0x42f   :  { %14004 = vmatprep.subr.bf16.mxu0 %v15396_v59  ;;  %14026 = vmatprep.subr.bf16.mxu1 %v15397_v60  ;;  %v10197_v59 = vmul.f32 %v16269_v53, %v10195_v35  ;;  %v15431_v60 = vld [vmem:[#allocation3 + $0x1cb8] sm:$0xff]  }
 0x431   :  { %v10198_v7 = vpack.c.bf16 %v10197_v59, %v10197_v59  ;;  %v15465_v59 = vld [vmem:[#allocation3 + $0x1ec0] sm:$0xff]  }
 0x432   :  { %14005 = vmatpush3.bf16.msra.mxu0 %v15398_v14  ;;  %14027 = vmatpush3.bf16.msra.mxu1 %v15399_v1  ;;  %v15432_v14 = vld [vmem:[#allocation3 + $0x1d40] sm:$0xff]   ;;  %v10225_v1 = vpop.permute.xlu0 %10224 }
 0x433   :  { %14034 = vmatprep.subr.bf16.mxu0 %v15400_v3  ;;  %14056 = vmatprep.subr.bf16.mxu1 %v15401_v4  ;;  %v15434_v3 = vld [vmem:[#allocation3 + $0x1d00] sm:$0xff]   ;;  %v10227_v18 = vmul.f32 %v16269_v53, %v10225_v1  ;;  %v10210_v4 = vpack.c.bf16 %v10209_v58, %v10209_v58 }
 0x434   :  { %v15464_v58 = vld [vmem:[#allocation3 + $0x1e40] sm:$0xff]  }
 0x435   :  { %10144 = vmatmul.mubr.bf16.vlgmr.msra.gmra.mrb[108].mxu0 %v8826_v17  ;;  %10184 = vmatmul.mubr.bf16.vlgmr.msra.gmra.mrb[108].mxu1 %v8838_v11  ;;  %v15438_v11 = vld [vmem:[#allocation3 + $0x1d08] sm:$0xff]  }
 0x436   :  { %14035 = vmatpush3.bf16.msra.mxu0 %v15402_v8  ;;  %14057 = vmatpush3.bf16.msra.mxu1 %v15403_v13  ;;  %v15435_v8 = vld [vmem:[#allocation3 + $0x1d80] sm:$0xff]   ;;  %v10228_v13 = vpack.c.bf16 %v10227_v18, %v10227_v18  ;;  %v15439_v17 = vld [vmem:[#allocation3 + $0x1d88] sm:$0xff]  }
 0x437   :  { %14036 = vmatprep.subr.bf16.mxu0 %v15404_v15  ;;  %14058 = vmatprep.subr.bf16.mxu1 %v15405_v20  ;;  %v15440_v20 = vld [vmem:[#allocation3 + $0x1d50] sm:$0xff]   ;;  %v15469_v18 = vld [vmem:[#allocation3 + $0x1ec8] sm:$0xff]  }
 0x438   :  { %11347 = vmatprep.mubr.bf16.mxu0 %v10204_v22  ;;  %11387 = vmatprep.mubr.bf16.mxu1 %v10216_v23  ;;  %v15442_v22 = vld [vmem:[#allocation3 + $0x1d10] sm:$0xff]  }
 0x439   :  { %v15443_v23 = vld [vmem:[#allocation3 + $0x1d90] sm:$0xff]  }
 0x43a   :  { %14037 = vmatpush3.bf16.msra.mxu0 %v15406_v21  ;;  %14059 = vmatpush3.bf16.msra.mxu1 %v15407_v26  ;;  %v15441_v21 = vld [vmem:[#allocation3 + $0x1dd0] sm:$0xff]   ;;  %v15444_v26 = vld [vmem:[#allocation3 + $0x1d58] sm:$0xff]  }
 0x43b   :  { %14038 = vmatprep.subr.bf16.mxu0 %v15408_v29  ;;  %14060 = vmatprep.subr.bf16.mxu1 %v15409_v30  ;;  %v15445_v29 = vld [vmem:[#allocation3 + $0x1dd8] sm:$0xff]  }
 0x43c   :  { %v15446_v30 = vld [vmem:[#allocation3 + $0x1d18] sm:$0xff]  }
 0x43e   :  { %14039 = vmatpush3.bf16.msra.mxu0 %v15410_v32  ;;  %14061 = vmatpush3.bf16.msra.mxu1 %v15411_v27  ;;  %v15447_v32 = vld [vmem:[#allocation3 + $0x1d98] sm:$0xff]   ;;  %v15448_v27 = vld [vmem:[#allocation3 + $0x1d60] sm:$0xff]  }
 0x43f   :  { %14040 = vmatprep.subr.bf16.mxu0 %v15412_v31  ;;  %14062 = vmatprep.subr.bf16.mxu1 %v15413_v34  ;;  %v15449_v31 = vld [vmem:[#allocation3 + $0x1de0] sm:$0xff]  }
 0x440   :  { %v15450_v34 = vld [vmem:[#allocation3 + $0x1d20] sm:$0xff]  }
 0x442   :  { %14041 = vmatpush3.bf16.msra.mxu0 %v15414_v5  ;;  %14063 = vmatpush3.bf16.msra.mxu1 %v15415_v36  ;;  %v15451_v5 = vld [vmem:[#allocation3 + $0x1da0] sm:$0xff]   ;;  %v15452_v36 = vld [vmem:[#allocation3 + $0x1d68] sm:$0xff]  }
 0x443   :  { %14042 = vmatprep.subr.bf16.mxu0 %v15416_v39  ;;  %14064 = vmatprep.subr.bf16.mxu1 %v15417_v25  ;;  %v15453_v39 = vld [vmem:[#allocation3 + $0x1de8] sm:$0xff]  }
 0x444   :  { %v15454_v25 = vld [vmem:[#allocation3 + $0x1d28] sm:$0xff]  }
 0x446   :  { %14043 = vmatpush3.bf16.msra.mxu0 %v15418_v49  ;;  %14065 = vmatpush3.bf16.msra.mxu1 %v15419_v33  ;;  %v15455_v49 = vld [vmem:[#allocation3 + $0x1da8] sm:$0xff]   ;;  %v15456_v33 = vld [vmem:[#allocation3 + $0x1d70] sm:$0xff]  }
 0x447   :  { %14044 = vmatprep.subr.bf16.mxu0 %v15420_v38  ;;  %14066 = vmatprep.subr.bf16.mxu1 %v15421_v52  ;;  %v15457_v38 = vld [vmem:[#allocation3 + $0x1df0] sm:$0xff]   ;;  %v10231_v52 = vpop.permute.xlu0 %10230 }
 0x448   :  { %v13742_v42 = vpop.f32.mrb[84].mxu0  ;;  %v13764_v37 = vpop.f32.mrb[84].mxu1 }
 0x449   :  { %v13743_v12 = vpop.f32.mrb[85].mxu0  ;;  %v13765_v46 = vpop.f32.mrb[85].mxu1 }
 0x44a   :  { %v13744_v16 = vadd.f32 %v13743_v12, %v13742_v42  ;;  %v13766_v48 = vadd.f32 %v13765_v46, %v13764_v37  ;;  %v13745_v47 = vpop.f32.mrb[86].mxu0  ;;  %v13767_v10 = vpop.f32.mrb[86].mxu1  ;;  %14045 = vmatpush3.bf16.msra.mxu0 %v15422_v28  ;;  %14067 = vmatpush3.bf16.msra.mxu1 %v15423_v43  ;;  %v15458_v12 = vld [vmem:[#allocation3 + $0x1d30] sm:$0xff]  }
 0x44b   :  { %v13746_v55 = vpop.f32.mrb[87].mxu0  ;;  %v13768_v24 = vpop.f32.mrb[87].mxu1  ;;  %14046 = vmatprep.subr.bf16.mxu0 %v15424_v2  ;;  %14068 = vmatprep.subr.bf16.mxu1 %v15425_v6  ;;  %v15459_v46 = vld [vmem:[#allocation3 + $0x1db0] sm:$0xff]   ;;  %v10233_v10 = vmul.f32 %v16269_v53, %v10231_v52 }
 0x44c   :  { %v8542_v57 = vadd.f32 %v13744_v16, %v16279_v63  ;;  %v10239_v63 = vmul.f32 %v16269_v53, %v10237_v61  ;;  %v15460_v16 = vld [vmem:[#allocation3 + $0x1d78] sm:$0xff]   ;;  %v10249_v55 = vpop.permute.xlu1 %10248  ;;  %v10261_v24 = vpop.permute.xlu0 %10260 }
 0x44d   :  { %v10263_v61 = vmul.f32 %v16269_v53, %v10261_v24  ;;  %v15497_v24 = vld [vmem:[#allocation3 + $0x1fc0] sm:$0xff]  }
 0x44e   :  { %v16290_v62 = vadd.f32 %v13766_v48, %v8542_v57  ;;  %14047 = vmatpush3.bf16.msra.mxu0 %v15426_v44  ;;  %14069 = vmatpush3.bf16.msra.mxu1 %v15427_v51  ;;  %v10240_v15 = vpack.c.bf16 %v10239_v63, %v10239_v63  ;;  %v15461_v48 = vld [vmem:[#allocation3 + $0x1df8] sm:$0xff]  }
 0x44f   :  { %14048 = vmatprep.subr.bf16.mxu0 %v15428_v45  ;;  %14070 = vmatprep.subr.bf16.mxu1 %v15429_v56  ;;  %v15462_v56 = vld [vmem:[#allocation3 + $0x1d38] sm:$0xff]  }
 0x450   :  { %v15463_v57 = vld [vmem:[#allocation3 + $0x1db8] sm:$0xff]  }
 0x452   :  { %14049 = vmatpush3.bf16.msra.mxu0 %v15430_v54  ;;  %14071 = vmatpush3.bf16.msra.mxu1 %v15431_v60  ;;  %v10221_v54 = vmul.f32 %v16269_v53, %v16285_v41  ;;  %v10251_v60 = vmul.f32 %v16269_v53, %v10249_v55  ;;  %v10264_v41 = vpack.c.bf16 %v10263_v61, %v10263_v61  ;;  %v15472_v53 = vld [vmem:[#allocation3 + $0x1e50] sm:$0xff]   ;;  %v15496_v55 = vld [vmem:[#allocation3 + $0x1f40] sm:$0xff]   ;;  %v15500_v61 = vld [vmem:[#allocation3 + $0x1f48] sm:$0xff]  }
 0x453   :  { %14078 = vmatprep.subr.bf16.mxu0 %v15432_v14  ;;  %14100 = vmatprep.subr.bf16.mxu1 %v15433_v0  ;;  %v15466_v14 = vld [vmem:[#allocation3 + $0x1e00] sm:$0xff]  }
 0x454   :  { %v15467_v0 = vld [vmem:[#allocation3 + $0x1e80] sm:$0xff]   ;;  %v10222_v1 = vpack.c.bf16 %v10221_v54, %v10221_v54  ;;  %v10252_v63 = vpack.c.bf16 %v10251_v60, %v10251_v60 }
 0x455   :  { %11348 = vmatmul.mubr.bf16.vlgmr.msra.gmra.mrb[112].mxu0 %v10198_v7  ;;  %11388 = vmatmul.mubr.bf16.vlgmr.msra.gmra.mrb[112].mxu1 %v10210_v4  ;;  %v15470_v4 = vld [vmem:[#allocation3 + $0x1e08] sm:$0xff]  }
 0x456   :  { %14079 = vmatpush3.bf16.msra.mxu0 %v15434_v3  ;;  %14101 = vmatpush3.bf16.msra.mxu1 %v15435_v8  ;;  %v15468_v3 = vld [vmem:[#allocation3 + $0x1e48] sm:$0xff]   ;;  %v15473_v8 = vld [vmem:[#allocation3 + $0x1ed0] sm:$0xff]  }
 0x457   :  { %14080 = vmatprep.subr.bf16.mxu0 %v15436_v50  ;;  %14102 = vmatprep.subr.bf16.mxu1 %v15437_v9  ;;  %v15471_v7 = vld [vmem:[#allocation3 + $0x1e88] sm:$0xff]   ;;  %v15474_v50 = vld [vmem:[#allocation3 + $0x1e10] sm:$0xff]  }
 0x458   :  { %11427 = vmatprep.mubr.bf16.mxu0 %v10228_v13  ;;  %11467 = vmatprep.mubr.bf16.mxu1 %v10240_v15  ;;  %v15475_v9 = vld [vmem:[#allocation3 + $0x1e90] sm:$0xff]   ;;  %v15477_v13 = vld [vmem:[#allocation3 + $0x1ed8] sm:$0xff]   ;;  %v10243_v15 = vpop.permute.xlu1 %10242 }
 0x45a   :  { %14081 = vmatpush3.bf16.msra.mxu0 %v15438_v11  ;;  %14103 = vmatpush3.bf16.msra.mxu1 %v15439_v17  ;;  %v15476_v11 = vld [vmem:[#allocation3 + $0x1e58] sm:$0xff]  }
 0x45b   :  { %14082 = vmatprep.subr.bf16.mxu0 %v15440_v20  ;;  %14104 = vmatprep.subr.bf16.mxu1 %v15441_v21  ;;  %v15478_v17 = vld [vmem:[#allocation3 + $0x1e18] sm:$0xff]   ;;  %v15480_v21 = vld [vmem:[#allocation3 + $0x1e60] sm:$0xff]  }
 0x45c   :  { %v15479_v20 = vld [vmem:[#allocation3 + $0x1e98] sm:$0xff]  }
 0x45e   :  { %14083 = vmatpush3.bf16.msra.mxu0 %v15442_v22  ;;  %14105 = vmatpush3.bf16.msra.mxu1 %v15443_v23  ;;  %v15481_v22 = vld [vmem:[#allocation3 + $0x1ee0] sm:$0xff]  }
 0x45f   :  { %14084 = vmatprep.subr.bf16.mxu0 %v15444_v26  ;;  %14106 = vmatprep.subr.bf16.mxu1 %v15445_v29  ;;  %v15482_v23 = vld [vmem:[#allocation3 + $0x1e20] sm:$0xff]   ;;  %v15484_v29 = vld [vmem:[#allocation3 + $0x1e68] sm:$0xff]  }
 0x460   :  { %v15483_v26 = vld [vmem:[#allocation3 + $0x1ea0] sm:$0xff]  }
 0x462   :  { %14085 = vmatpush3.bf16.msra.mxu0 %v15446_v30  ;;  %14107 = vmatpush3.bf16.msra.mxu1 %v15447_v32  ;;  %v15485_v30 = vld [vmem:[#allocation3 + $0x1ee8] sm:$0xff]   ;;  %v10255_v32 = vpop.permute.xlu1 %10254 }
 0x463   :  { %14086 = vmatprep.subr.bf16.mxu0 %v15448_v27  ;;  %14108 = vmatprep.subr.bf16.mxu1 %v15449_v31  ;;  %v15486_v27 = vld [vmem:[#allocation3 + $0x1e28] sm:$0xff]  }
 0x464   :  { %v15487_v31 = vld [vmem:[#allocation3 + $0x1ea8] sm:$0xff]  }
 0x466   :  { %14087 = vmatpush3.bf16.msra.mxu0 %v15450_v34  ;;  %14109 = vmatpush3.bf16.msra.mxu1 %v15451_v5  ;;  %v15488_v34 = vld [vmem:[#allocation3 + $0x1e70] sm:$0xff]  }
 0x467   :  { %14088 = vmatprep.subr.bf16.mxu0 %v15452_v36  ;;  %14110 = vmatprep.subr.bf16.mxu1 %v15453_v39  ;;  %v15489_v5 = vld [vmem:[#allocation3 + $0x1ef0] sm:$0xff]   ;;  %v10273_v36 = vpop.permute.xlu1 %10272 }
 0x468   :  { %v13786_v40 = vpop.f32.mrb[88].mxu0  ;;  %v13808_v28 = vpop.f32.mrb[88].mxu1 }
 0x469   :  { %v13787_v43 = vpop.f32.mrb[89].mxu0  ;;  %v13809_v2 = vpop.f32.mrb[89].mxu1 }
 0x46a   :  { %v13788_v6 = vadd.f32 %v13787_v43, %v13786_v40  ;;  %v13810_v35 = vadd.f32 %v13809_v2, %v13808_v28  ;;  %v13789_v42 = vpop.f32.mrb[90].mxu0  ;;  %v13811_v37 = vpop.f32.mrb[90].mxu1  ;;  %14089 = vmatpush3.bf16.msra.mxu0 %v15454_v25  ;;  %14111 = vmatpush3.bf16.msra.mxu1 %v15455_v49  ;;  %v15490_v43 = vld [vmem:[#allocation3 + $0x1e30] sm:$0xff]  }
 0x46b   :  { %v13790_v44 = vpop.f32.mrb[91].mxu0  ;;  %v13812_v51 = vpop.f32.mrb[91].mxu1  ;;  %14090 = vmatprep.subr.bf16.mxu0 %v15456_v33  ;;  %14112 = vmatprep.subr.bf16.mxu1 %v15457_v38  ;;  %v15491_v2 = vld [vmem:[#allocation3 + $0x1eb0] sm:$0xff]   ;;  %v15492_v42 = vld [vmem:[#allocation3 + $0x1e78] sm:$0xff]  }
 0x46c   :  { %v8622_v47 = vadd.f32 %v13788_v6, %v16290_v62  ;;  %v10234_v62 = vpack.c.bf16 %v10233_v10, %v10233_v10  ;;  %v15493_v37 = vld [vmem:[#allocation3 + $0x1ef8] sm:$0xff]   ;;  %v10285_v51 = vpop.permute.xlu1 %10284 }
 0x46e   :  { %v16296_v45 = vadd.f32 %v13810_v35, %v8622_v47  ;;  %14091 = vmatpush3.bf16.msra.mxu0 %v15458_v12  ;;  %14113 = vmatpush3.bf16.msra.mxu1 %v15459_v46  ;;  %v16306_v46 = vld [vmem:[%s16322_s1] sm:$0xff]  ;;  %v15495_v47 = vld [vmem:[#allocation3 + $0x1eb8] sm:$0xff]  }
 0x46f   :  { %14092 = vmatprep.subr.bf16.mxu0 %v15460_v16  ;;  %14114 = vmatprep.subr.bf16.mxu1 %v15461_v48  ;;  %v10257_v44 = vmul.f32 %v16306_v46, %v10255_v32  ;;  %v15494_v48 = vld [vmem:[#allocation3 + $0x1e38] sm:$0xff]   ;;  %v10245_v10 = vmul.f32 %v16306_v46, %v10243_v15  ;;  %v15516_v15 = vld [vmem:[#allocation3 + $0x1f68] sm:$0xff]  }
 0x471   :  { %v10258_v54 = vpack.c.bf16 %v10257_v44, %v10257_v44  ;;  %v10246_v60 = vpack.c.bf16 %v10245_v10, %v10245_v10 }
 0x472   :  { %14093 = vmatpush3.bf16.msra.mxu0 %v15462_v56  ;;  %14115 = vmatpush3.bf16.msra.mxu1 %v15463_v57  ;;  %v10275_v56 = vmul.f32 %v16306_v46, %v10273_v36  ;;  %v10287_v57 = vmul.f32 %v16306_v46, %v10285_v51 }
 0x473   :  { %14122 = vmatprep.subr.bf16.mxu0 %v15464_v58  ;;  %14144 = vmatprep.subr.bf16.mxu1 %v15465_v59  ;;  %v15498_v58 = vld [vmem:[#allocation3 + $0x1f00] sm:$0xff]  }
 0x474   :  { %v15499_v59 = vld [vmem:[#allocation3 + $0x1f80] sm:$0xff]  }
 0x475   :  { %11428 = vmatmul.mubr.bf16.vlgmr.msra.gmra.mrb[116].mxu0 %v10222_v1  ;;  %11468 = vmatmul.mubr.bf16.vlgmr.msra.gmra.mrb[116].mxu1 %v10234_v62  ;;  %v15501_v62 = vld [vmem:[#allocation3 + $0x1fc8] sm:$0xff]  }
 0x476   :  { %14123 = vmatpush3.bf16.msra.mxu0 %v15466_v14  ;;  %14145 = vmatpush3.bf16.msra.mxu1 %v15467_v0  ;;  %v10276_v14 = vpack.c.bf16 %v10275_v56, %v10275_v56  ;;  %v10288_v0 = vpack.c.bf16 %v10287_v57, %v10287_v57  ;;  %v15503_v1 = vld [vmem:[#allocation3 + $0x1f88] sm:$0xff]  }
 0x477   :  { %14124 = vmatprep.subr.bf16.mxu0 %v15468_v3  ;;  %14146 = vmatprep.subr.bf16.mxu1 %v15469_v18  ;;  %v15504_v3 = vld [vmem:[#allocation3 + $0x1f50] sm:$0xff]  }
 0x478   :  { %11507 = vmatprep.mubr.bf16.mxu0 %v10252_v63  ;;  %11547 = vmatprep.mubr.bf16.mxu1 %v10264_v41  ;;  %v15505_v18 = vld [vmem:[#allocation3 + $0x1fd0] sm:$0xff]  }
 0x479   :  { %v15506_v63 = vld [vmem:[#allocation3 + $0x1f10] sm:$0xff]  }
 0x47a   :  { %14125 = vmatpush3.bf16.msra.mxu0 %v15470_v4  ;;  %14147 = vmatpush3.bf16.msra.mxu1 %v15471_v7  ;;  %v15507_v41 = vld [vmem:[#allocation3 + $0x1f90] sm:$0xff]   ;;  %v15508_v4 = vld [vmem:[#allocation3 + $0x1f58] sm:$0xff]  }
 0x47b   :  { %14126 = vmatprep.subr.bf16.mxu0 %v15472_v53  ;;  %14148 = vmatprep.subr.bf16.mxu1 %v15473_v8  ;;  %v15509_v7 = vld [vmem:[#allocation3 + $0x1fd8] sm:$0xff]  }
 0x47c   :  { %v15510_v53 = vld [vmem:[#allocation3 + $0x1f18] sm:$0xff]  }
 0x47d   :  { %v15511_v8 = vld [vmem:[#allocation3 + $0x1f98] sm:$0xff]  }
 0x47e   :  { %14127 = vmatpush3.bf16.msra.mxu0 %v15474_v50  ;;  %14149 = vmatpush3.bf16.msra.mxu1 %v15475_v9  ;;  %v15512_v50 = vld [vmem:[#allocation3 + $0x1f60] sm:$0xff]  }
 0x47f   :  { %14128 = vmatprep.subr.bf16.mxu0 %v15476_v11  ;;  %14150 = vmatprep.subr.bf16.mxu1 %v15477_v13  ;;  %v15513_v9 = vld [vmem:[#allocation3 + $0x1fe0] sm:$0xff]  }
 0x480   :  { %v15514_v11 = vld [vmem:[#allocation3 + $0x1f20] sm:$0xff]  }
 0x481   :  { %v15515_v13 = vld [vmem:[#allocation3 + $0x1fa0] sm:$0xff]  }
 0x482   :  { %14129 = vmatpush3.bf16.msra.mxu0 %v15478_v17  ;;  %14151 = vmatpush3.bf16.msra.mxu1 %v15479_v20  ;;  %v15517_v17 = vld [vmem:[#allocation3 + $0x1fe8] sm:$0xff]  }
 0x483   :  { %14130 = vmatprep.subr.bf16.mxu0 %v15480_v21  ;;  %14152 = vmatprep.subr.bf16.mxu1 %v15481_v22  ;;  %v15518_v20 = vld [vmem:[#allocation3 + $0x1f28] sm:$0xff]   ;;  %v15520_v22 = vld [vmem:[#allocation3 + $0x1f70] sm:$0xff]  }
 0x484   :  { %v15519_v21 = vld [vmem:[#allocation3 + $0x1fa8] sm:$0xff]  }
 0x486   :  { %14131 = vmatpush3.bf16.msra.mxu0 %v15482_v23  ;;  %14153 = vmatpush3.bf16.msra.mxu1 %v15483_v26  ;;  %v15521_v23 = vld [vmem:[#allocation3 + $0x1ff0] sm:$0xff]   ;;  %v10279_v26 = vpop.permute.xlu1 %10278 }
 0x487   :  { %14132 = vmatprep.subr.bf16.mxu0 %v15484_v29  ;;  %14154 = vmatprep.subr.bf16.mxu1 %v15485_v30  ;;  %v10267_v29 = vpop.permute.xlu0 %10266 }
 0x488   :  { %v13830_v39 = vpop.f32.mrb[92].mxu0  ;;  %v13852_v25 = vpop.f32.mrb[92].mxu1 }
 0x489   :  { %v13831_v49 = vpop.f32.mrb[93].mxu0  ;;  %v13853_v33 = vpop.f32.mrb[93].mxu1 }
 0x48a   :  { %v13832_v38 = vadd.f32 %v13831_v49, %v13830_v39  ;;  %v13854_v52 = vadd.f32 %v13853_v33, %v13852_v25  ;;  %v13833_v40 = vpop.f32.mrb[94].mxu0  ;;  %v13855_v28 = vpop.f32.mrb[94].mxu1  ;;  %14133 = vmatpush3.bf16.msra.mxu0 %v15486_v27  ;;  %14155 = vmatpush3.bf16.msra.mxu1 %v15487_v31  ;;  %v15522_v25 = vld [vmem:[#allocation3 + $0x1f30] sm:$0xff]  }
 0x48b   :  { %v13834_v6 = vpop.f32.mrb[95].mxu0  ;;  %v13856_v35 = vpop.f32.mrb[95].mxu1  ;;  %14134 = vmatprep.subr.bf16.mxu0 %v15488_v34  ;;  %14156 = vmatprep.subr.bf16.mxu1 %v15489_v5  ;;  %v15523_v49 = vld [vmem:[#allocation3 + $0x1fb0] sm:$0xff]   ;;  %v15525_v40 = vld [vmem:[#allocation3 + $0x1ff8] sm:$0xff]  }
 0x48c   :  { %v8702_v12 = vadd.f32 %v13832_v38, %v16296_v45  ;;  %v15526_v6 = vld [vmem:[#allocation3 + $0x1f38] sm:$0xff]  }
 0x48d   :  { %v15527_v35 = vld [vmem:[#allocation3 + $0x1fb8] sm:$0xff]  }
 0x48e   :  { %v8742_v16 = vadd.f32 %v13854_v52, %v8702_v12  ;;  %14135 = vmatpush3.bf16.msra.mxu0 %v15490_v43  ;;  %14157 = vmatpush3.bf16.msra.mxu1 %v15491_v2  ;;  %v15524_v52 = vld [vmem:[#allocation3 + $0x1f78] sm:$0xff]   ;;  %v10281_v43 = vmul.f32 %v16306_v46, %v10279_v26  ;;  %v10269_v2 = vmul.f32 %v16306_v46, %v10267_v29 }
 0x48f   :  { %14136 = vmatprep.subr.bf16.mxu0 %v15492_v42  ;;  %14158 = vmatprep.subr.bf16.mxu1 %v15493_v37 }
 0x490   :  { %v16311_v45 = vadd.f32 %v8742_v16, %v16275_v19  ;;  %v15502_v19 = vld [vmem:[#allocation3 + $0x1f08] sm:$0xff]   ;;  %v10282_v42 = vpack.c.bf16 %v10281_v43, %v10281_v43  ;;  %v10270_v37 = vpack.c.bf16 %v10269_v2, %v10269_v2 }
 0x492   :  { %14137 = vmatpush3.bf16.msra.mxu0 %v15494_v48  ;;  %14159 = vmatpush3.bf16.msra.mxu1 %v15495_v47 }
 0x493   :  { %14166 = vmatprep.subr.bf16.mxu0 %v15496_v55  ;;  %14188 = vmatprep.subr.bf16.mxu1 %v15497_v24 }
 0x495   :  { %11508 = vmatmul.mubr.bf16.vlgmr.msra.gmra.mrb[120].mxu0 %v10246_v60  ;;  %11548 = vmatmul.mubr.bf16.vlgmr.msra.gmra.mrb[120].mxu1 %v10258_v54 }
 0x496   :  { %14167 = vmatpush3.bf16.msra.mxu0 %v15498_v58  ;;  %14189 = vmatpush3.bf16.msra.mxu1 %v15499_v59 }
 0x497   :  { %14168 = vmatprep.subr.bf16.mxu0 %v15500_v61  ;;  %14190 = vmatprep.subr.bf16.mxu1 %v15501_v62 }
 0x498   :  { %11587 = vmatprep.mubr.bf16.mxu0 %v10276_v14  ;;  %11627 = vmatprep.mubr.bf16.mxu1 %v10288_v0 }
 0x49a   :  { %14169 = vmatpush3.bf16.msra.mxu0 %v15502_v19  ;;  %14191 = vmatpush3.bf16.msra.mxu1 %v15503_v1 }
 0x49b   :  { %14170 = vmatprep.subr.bf16.mxu0 %v15504_v3  ;;  %14192 = vmatprep.subr.bf16.mxu1 %v15505_v18 }
 0x49e   :  { %14171 = vmatpush3.bf16.msra.mxu0 %v15506_v63  ;;  %14193 = vmatpush3.bf16.msra.mxu1 %v15507_v41  ;;  %v15528_v63 = vld [vmem:[#allocation7] sm:$0xff]   ;;  %v15783_v41 = vmov 0.0  }
 0x49f   :  { %14172 = vmatprep.subr.bf16.mxu0 %v15508_v4  ;;  %14194 = vmatprep.subr.bf16.mxu1 %v15509_v7  ;;  %v15529_v4 = vld [vmem:[#allocation7 + $0x8] sm:$0xff]   ;;  %v15530_v7 = vld [vmem:[#allocation7 + $0x10] sm:$0xff]  }
 0x4a2   :  { %14173 = vmatpush3.bf16.msra.mxu0 %v15510_v53  ;;  %14195 = vmatpush3.bf16.msra.mxu1 %v15511_v8  ;;  %v15531_v53 = vld [vmem:[#allocation7 + $0x18] sm:$0xff]   ;;  %v15532_v8 = vld [vmem:[#allocation7 + $0x20] sm:$0xff]  }
 0x4a3   :  { %14174 = vmatprep.subr.bf16.mxu0 %v15512_v50  ;;  %14196 = vmatprep.subr.bf16.mxu1 %v15513_v9 }
 0x4a6   :  { %14175 = vmatpush3.bf16.msra.mxu0 %v15514_v11  ;;  %14197 = vmatpush3.bf16.msra.mxu1 %v15515_v13 }
 0x4a7   :  { %14176 = vmatprep.subr.bf16.mxu0 %v15516_v15  ;;  %14198 = vmatprep.subr.bf16.mxu1 %v15517_v17  ;;  %v15533_v15 = vld [vmem:[#allocation7 + $0x28] sm:$0xff]  }
 0x4a8   :  { %v13874_v30 = vpop.f32.mrb[96].mxu0  ;;  %v13896_v32 = vpop.f32.mrb[96].mxu1 }
 0x4a9   :  { %v13875_v27 = vpop.f32.mrb[97].mxu0  ;;  %v13897_v31 = vpop.f32.mrb[97].mxu1 }
 0x4aa   :  { %v13876_v34 = vadd.f32 %v13875_v27, %v13874_v30  ;;  %v13898_v5 = vadd.f32 %v13897_v31, %v13896_v32  ;;  %v13877_v36 = vpop.f32.mrb[98].mxu0  ;;  %v13899_v39 = vpop.f32.mrb[98].mxu1  ;;  %14177 = vmatpush3.bf16.msra.mxu0 %v15518_v20  ;;  %14199 = vmatpush3.bf16.msra.mxu1 %v15519_v21  ;;  %v15534_v30 = vld [vmem:[#allocation7 + $0x30] sm:$0xff]   ;;  %v15535_v31 = vld [vmem:[#allocation7 + $0x38] sm:$0xff]  }
 0x4ab   :  { %v13878_v33 = vpop.f32.mrb[99].mxu0  ;;  %v13900_v38 = vpop.f32.mrb[99].mxu1  ;;  %14178 = vmatprep.subr.bf16.mxu0 %v15520_v22  ;;  %14200 = vmatprep.subr.bf16.mxu1 %v15521_v23 }
 0x4ac   :  { %v9946_v28 = vadd.f32 %v13898_v5, %v13876_v34 }
 0x4ae   :  { %14179 = vmatpush3.bf16.msra.mxu0 %v15522_v25  ;;  %14201 = vmatpush3.bf16.msra.mxu1 %v15523_v49 }
 0x4af   :  { %14180 = vmatprep.subr.bf16.mxu0 %v15524_v52  ;;  %14202 = vmatprep.subr.bf16.mxu1 %v15525_v40 }
 0x4b2   :  { %14181 = vmatpush3.bf16.msra.mxu0 %v15526_v6  ;;  %14203 = vmatpush3.bf16.msra.mxu1 %v15527_v35 }
 0x4b3   :  { %14219 = vmatprep.subr.bf16.mxu0 %v15783_v41 }
 0x4b5   :  { %11588 = vmatmul.mubr.bf16.vlgmr.msra.gmra.mrb[124].mxu0 %v10270_v37  ;;  %11628 = vmatmul.mubr.bf16.vlgmr.msra.gmra.mrb[124].mxu1 %v10282_v42 }
 0x4b6   :  { %14220 = vmatpush3.bf16.msra.mxu0 %v15528_v63  ;;  %14235 = vmatprep.mubr.msk.bf16.mxu0 %vm15784_vm0, %v15783_v41 }
 0x4b7   :  { %14221 = vmatprep.subr.bf16.mxu0 %v15783_v41 }
 0x4ba   :  { %14222 = vmatpush3.bf16.msra.mxu0 %v15529_v4 }
 0x4bb   :  { %14223 = vmatprep.subr.bf16.mxu0 %v15783_v41 }
 0x4be   :  { %14224 = vmatpush3.bf16.msra.mxu0 %v15530_v7 }
 0x4bf   :  { %14225 = vmatprep.subr.bf16.mxu0 %v15783_v41 }
 0x4c2   :  { %14226 = vmatpush3.bf16.msra.mxu0 %v15531_v53 }
 0x4c3   :  { %14227 = vmatprep.subr.bf16.mxu0 %v15783_v41 }
 0x4c6   :  { %14228 = vmatpush3.bf16.msra.mxu0 %v15532_v8 }
 0x4c7   :  { %14229 = vmatprep.subr.bf16.mxu0 %v15783_v41 }
 0x4c8   :  { %v13918_v12 = vpop.f32.mrb[100].mxu0  ;;  %v13940_v44 = vpop.f32.mrb[100].mxu1 }
 0x4c9   :  { %v13919_v51 = vpop.f32.mrb[101].mxu0  ;;  %v13941_v16 = vpop.f32.mrb[101].mxu1 }
 0x4ca   :  { %v13920_v48 = vadd.f32 %v13919_v51, %v13918_v12  ;;  %v13942_v47 = vadd.f32 %v13941_v16, %v13940_v44  ;;  %v13921_v10 = vpop.f32.mrb[102].mxu0  ;;  %v13943_v46 = vpop.f32.mrb[102].mxu1  ;;  %14230 = vmatpush3.bf16.msra.mxu0 %v15533_v15 }
 0x4cb   :  { %v13922_v55 = vpop.f32.mrb[103].mxu0  ;;  %v13944_v24 = vpop.f32.mrb[103].mxu1  ;;  %14231 = vmatprep.subr.bf16.mxu0 %v15783_v41 }
 0x4cc   :  { %v9986_v56 = vadd.f32 %v13920_v48, %v9946_v28 }
 0x4ce   :  { %v10026_v57 = vadd.f32 %v13942_v47, %v9986_v56  ;;  %14232 = vmatpush3.bf16.msra.mxu0 %v15534_v30 }
 0x4cf   :  { %14233 = vmatprep.subr.bf16.mxu0 %v15783_v41 }
 0x4d2   :  { %14234 = vmatpush3.bf16.msra.mxu0 %v15535_v31 }
 0x4e8   :  { %v13962_v54 = vpop.f32.mrb[104].mxu0  ;;  %v13984_v58 = vpop.f32.mrb[104].mxu1 }
 0x4e9   :  { %v13963_v59 = vpop.f32.mrb[105].mxu0  ;;  %v13985_v60 = vpop.f32.mrb[105].mxu1 }
 0x4ea   :  { %v13964_v61 = vadd.f32 %v13963_v59, %v13962_v54  ;;  %v13986_v62 = vadd.f32 %v13985_v60, %v13984_v58  ;;  %v13965_v14 = vpop.f32.mrb[106].mxu0  ;;  %v13987_v0 = vpop.f32.mrb[106].mxu1 }
 0x4eb   :  { %v13966_v19 = vpop.f32.mrb[107].mxu0  ;;  %v13988_v1 = vpop.f32.mrb[107].mxu1 }
 0x4ec   :  { %v10066_v3 = vadd.f32 %v13964_v61, %v10026_v57 }
 0x4ee   :  { %v10106_v18 = vadd.f32 %v13986_v62, %v10066_v3 }
 0x508   :  { %v14006_v50 = vpop.f32.mrb[108].mxu0  ;;  %v14028_v9 = vpop.f32.mrb[108].mxu1 }
 0x509   :  { %v14007_v11 = vpop.f32.mrb[109].mxu0  ;;  %v14029_v13 = vpop.f32.mrb[109].mxu1 }
 0x50a   :  { %v14008_v17 = vadd.f32 %v14007_v11, %v14006_v50  ;;  %v14030_v20 = vadd.f32 %v14029_v13, %v14028_v9  ;;  %v14009_v21 = vpop.f32.mrb[110].mxu0  ;;  %v14031_v22 = vpop.f32.mrb[110].mxu1  ;;  %v12793_v11 = vld [vmem:[#allocation8] ss:$0 sm:$0xff] }
 0x50b   :  { %v14010_v23 = vpop.f32.mrb[111].mxu0  ;;  %v14032_v26 = vpop.f32.mrb[111].mxu1 }
 0x50c   :  { %v10146_v29 = vadd.f32 %v14008_v17, %v10106_v18 }
 0x50e   :  { %v10186_v32 = vadd.f32 %v14030_v20, %v10146_v29 }
 0x510   :  { %v10191_v27 = vadd.f32 %v10186_v32, %v16311_v45 }
 0x528   :  { %v14050_v34 = vpop.f32.mrb[112].mxu0  ;;  %v14072_v5 = vpop.f32.mrb[112].mxu1 }
 0x529   :  { %v14051_v36 = vpop.f32.mrb[113].mxu0  ;;  %v14073_v39 = vpop.f32.mrb[113].mxu1 }
 0x52a   :  { %v14052_v25 = vadd.f32 %v14051_v36, %v14050_v34  ;;  %v14074_v49 = vadd.f32 %v14073_v39, %v14072_v5  ;;  %v14053_v33 = vpop.f32.mrb[114].mxu0  ;;  %v14075_v38 = vpop.f32.mrb[114].mxu1 }
 0x52b   :  { %v14054_v52 = vpop.f32.mrb[115].mxu0  ;;  %v14076_v40 = vpop.f32.mrb[115].mxu1 }
 0x52c   :  { %v11390_v28 = vadd.f32 %v14074_v49, %v14052_v25 }
 0x548   :  { %v14094_v43 = vpop.f32.mrb[116].mxu0  ;;  %v14116_v2 = vpop.f32.mrb[116].mxu1 }
 0x549   :  { %v14095_v6 = vpop.f32.mrb[117].mxu0  ;;  %v14117_v45 = vpop.f32.mrb[117].mxu1 }
 0x54a   :  { %v14096_v35 = vadd.f32 %v14095_v6, %v14094_v43  ;;  %v14118_v42 = vadd.f32 %v14117_v45, %v14116_v2  ;;  %v14097_v37 = vpop.f32.mrb[118].mxu0  ;;  %v14119_v12 = vpop.f32.mrb[118].mxu1 }
 0x54b   :  { %v14098_v44 = vpop.f32.mrb[119].mxu0  ;;  %v14120_v51 = vpop.f32.mrb[119].mxu1 }
 0x54c   :  { %v11430_v16 = vadd.f32 %v14096_v35, %v11390_v28 }
 0x54e   :  { %v11470_v48 = vadd.f32 %v14118_v42, %v11430_v16 }
 0x568   :  { %v14138_v47 = vpop.f32.mrb[120].mxu0  ;;  %v14160_v10 = vpop.f32.mrb[120].mxu1 }
 0x569   :  { %v14139_v46 = vpop.f32.mrb[121].mxu0  ;;  %v14161_v55 = vpop.f32.mrb[121].mxu1 }
 0x56a   :  { %v14140_v24 = vadd.f32 %v14139_v46, %v14138_v47  ;;  %v14162_v56 = vadd.f32 %v14161_v55, %v14160_v10  ;;  %v14141_v57 = vpop.f32.mrb[122].mxu0  ;;  %v14163_v54 = vpop.f32.mrb[122].mxu1 }
 0x56b   :  { %v14142_v58 = vpop.f32.mrb[123].mxu0  ;;  %v14164_v59 = vpop.f32.mrb[123].mxu1 }
 0x56c   :  { %v11510_v60 = vadd.f32 %v14140_v24, %v11470_v48 }
 0x56e   :  { %v11550_v61 = vadd.f32 %v14162_v56, %v11510_v60 }
 0x588   :  { %v14182_v62 = vpop.f32.mrb[124].mxu0  ;;  %v14204_v14 = vpop.f32.mrb[124].mxu1 }
 0x589   :  { %v14183_v0 = vpop.f32.mrb[125].mxu0  ;;  %v14205_v19 = vpop.f32.mrb[125].mxu1 }
 0x58a   :  { %v14184_v1 = vadd.f32 %v14183_v0, %v14182_v62  ;;  %v14206_v3 = vadd.f32 %v14205_v19, %v14204_v14  ;;  %v14185_v18 = vpop.f32.mrb[126].mxu0  ;;  %v14207_v63 = vpop.f32.mrb[126].mxu1 }
 0x58b   :  { %v14186_v41 = vpop.f32.mrb[127].mxu0  ;;  %v14208_v4 = vpop.f32.mrb[127].mxu1 }
 0x58c   :  { %v11590_v7 = vadd.f32 %v14184_v1, %v11550_v61 }
 0x58e   :  { %v11630_v53 = vadd.f32 %v14206_v3, %v11590_v7 }
 0x590   :  { %v11635_v8 = vadd.f32 %v11630_v53, %v10191_v27 }
 0x592   :  { %v11638_v50 = vmax.f32 %v11635_v8, 0.0 }
 0x594   :  { %v11639_v9 = vpack.c.bf16 %v11638_v50, %v11638_v50 }
 0x596   :  { %14236 = vmatmul.mubr.bf16.vlgmr.msra.gmra.mrb[128].mxu0 %v11639_v9 }
 0x669   :  { %v11745_v13 = vpop.f32.mrb[128].mxu0 }
 0x66a   :  { %v11746_v15 = vadd.f32 %v12793_v11, %v11745_v13  ;;  %v14237_v17 = vpop.f32.mrb[129].mxu0 }
 0x66b   :  { %v11748_v20 = vpop.f32.mrb[130].mxu0 }
 0x66c   :  { %11751 = vmax.xlane.f32.xlu0 %v11746_v15  ;;  %v14238_v21 = vpop.f32.mrb[131].mxu0 }
 0x6f9   :  { %v11752_v22 = vpop.xlane.xlu0 %11751 }
 0x6fa   :  { %v11753_v23 = vsub.f32 %v11746_v15, %v11752_v22 }
 0x6fc   :  { %v11754_v26 = vmul.f32 1.442695, %v11753_v23 }
 0x6fe   :  { %15536 = vpow2.f32 %v11754_v26 }
 0x708   :  { %v15537_v29 = vpop.eup %15536 }
 0x709   :  { %11756 = vadd.xlane.f32.xlu1 %v15537_v29 }
 0x796   :  { %v11757_v30 = vpop.xlane.xlu1 %11756 }
 0x797   :  { %15538 = vrcp.f32 %v11757_v30 }
 0x7a1   :  { %v15539_v32 = vpop.eup %15538 }
 0x7a2   :  { %v11759_v27 = vmul.f32 %v15539_v32, %v15537_v29 }
 0x7a4   :  { %11760 = vst [vmem:[%s16327_s6] sm:$0xff] %v11759_v27 }
 0x7a5   :  { %11765 = vsyncpa [#allocation4], 1 }
 0x7a6   :  { %11766 = vsyncpa [#allocation6], 1 }
 0x7a7   :  { %11767 = vsyncpa [#allocation9], 1 }

</bundles_post_ra>
